<compile_context>
chip_gen: v7x
topology: tpu7x:2x2x1
jax: 0.10.0
libtpu: 0.0.40
codegen_flags: <defaults>
</compile_context>

<pallas_src>
import jax
import jax.numpy as jnp
from jax.experimental import pallas as pl
from jax.experimental.pallas import tpu as pltpu

EPS = 1e-5  # torch.nn.BatchNorm1d default


# ---------------------------------------------------------------------------
# Fused kernel: whole generator, grid over w4 column tiles.
# ---------------------------------------------------------------------------
def fused_generator_kernel(x_ref,
                           w1_ref, g1_ref, be1_ref,
                           w2_ref, g2_ref, be2_ref,
                           w3_ref, g3_ref, be3_ref,
                           w4_ref, b4_ref,
                           o_ref):
    inv_b = 1.0 / x_ref.shape[0]

    def bn_relu(y, g, be):
        # one-pass batch stats (biased variance, matches BatchNorm1d training)
        mean = jnp.sum(y, axis=0, keepdims=True) * inv_b
        mean_sq = jnp.sum(y * y, axis=0, keepdims=True) * inv_b
        var = jnp.maximum(mean_sq - mean * mean, 0.0)   # guard f32 cancellation
        s = g * jax.lax.rsqrt(var + EPS)                # fused scale
        return jnp.maximum(y * s + (be - mean * s), 0.0)

    def mm(a, w_ref):
        # bf16 x bf16 MXU matmul, f32 accumulation
        return jnp.dot(a.astype(jnp.bfloat16), w_ref[...],
                       preferred_element_type=jnp.float32)

    # layers 1..3 (weights VMEM-resident; linear biases dropped — BN cancels)
    h = bn_relu(mm(x_ref[...], w1_ref), g1_ref[...], be1_ref[...])
    h = bn_relu(mm(h, w2_ref), g2_ref[...], be2_ref[...])
    h = bn_relu(mm(h, w3_ref), g3_ref[...], be3_ref[...])

    # layer 4: only this weight is streamed per grid step (contiguous slab)
    y = jnp.dot(h.astype(jnp.bfloat16), w4_ref[...],
                preferred_element_type=jnp.float32)
    o_ref[...] = jnp.tanh(y + b4_ref[...])


# ---------------------------------------------------------------------------
# Wrapper
# ---------------------------------------------------------------------------
def generator_pallas(p, x):
    B, K = x.shape
    H1 = p["w1"].shape[1]               # 256
    H2 = p["w2"].shape[1]               # 512
    H3 = p["w3"].shape[1]               # 2048
    n_tiles, _, tn4 = p["w4t"].shape    # (4, 2048, 1024)
    N4 = n_tiles * tn4                  # 4096
    assert B % 8 == 0, "batch must be a multiple of 8 (f32 sublane tile)"

    # constant-block residents: DMA'd once, single-buffered (never change)
    def const(shape):
        return pl.BlockSpec(shape, lambda j: (0, 0),
                            pipeline_mode=pl.Buffered(1))

    # advisory cost: tiny FLOPs, dominated by bf16 weight streaming
    weight_bytes = 2 * (K * H1 + H1 * H2 + H2 * H3 + H3 * N4)
    io_bytes = 4 * (B * K + B * N4 + 2 * (H1 + H2 + H3) + N4)
    flops = 2 * B * (K * H1 + H1 * H2 + H2 * H3 + H3 * N4)
    cost = pl.CostEstimate(flops=flops,
                           transcendentals=B * N4 + 3 * (H1 + H2 + H3),
                           bytes_accessed=weight_bytes + io_bytes)

    out = pl.pallas_call(
        fused_generator_kernel,
        out_shape=jax.ShapeDtypeStruct((B, N4), jnp.float32),
        grid_spec=pltpu.PrefetchScalarGridSpec(
            num_scalar_prefetch=0,
            grid=(n_tiles,),
            in_specs=[
                const((B, K)),                                      # x
                const((K, H1)), const((1, H1)), const((1, H1)),     # w1,g1,be1
                const((H1, H2)), const((1, H2)), const((1, H2)),    # w2,g2,be2
                const((H2, H3)), const((1, H3)), const((1, H3)),    # w3,g3,be3
                pl.BlockSpec((None, H3, tn4), lambda j: (j, 0, 0)),  # w4 slab
                pl.BlockSpec((1, tn4), lambda j: (0, j)),            # b4 tile
            ],
            out_specs=pl.BlockSpec((B, tn4), lambda j: (0, j)),
        ),
        compiler_params=pltpu.CompilerParams(
            dimension_semantics=("parallel",),
            vmem_limit_bytes=32 * 1024 * 1024,
        ),
        cost_estimate=cost,
    )(x,
      p["w1"], p["g1"], p["be1"],
      p["w2"], p["g2"], p["be2"],
      p["w3"], p["g3"], p["be3"],
      p["w4t"], p["b4"])

    return out.reshape(-1, 1, 64, 64)   # NCHW, same as PyTorch


# ---------------------------------------------------------------------------
# One-time parameter preparation: bf16 weight cast + contiguous w4 slabs.
# ---------------------------------------------------------------------------
def prepare_params(params, *, tn4=1024):
    H3, N4 = params["w4"].shape
    assert N4 % tn4 == 0
    bf = lambda a: a.astype(jnp.bfloat16)
    row = lambda v: v.reshape(1, -1).astype(jnp.float32)
    # slab j == w4[:, j*tn4:(j+1)*tn4], stored contiguously
    w4t = bf(params["w4"]).reshape(H3, N4 // tn4, tn4).transpose(1, 0, 2)
    return {
        "w1": bf(params["w1"]), "g1": row(params["g1"]), "be1": row(params["be1"]),
        "w2": bf(params["w2"]), "g2": row(params["g2"]), "be2": row(params["be2"]),
        "w3": bf(params["w3"]), "g3": row(params["g3"]), "be3": row(params["be3"]),
        "w4t": w4t, "b4": row(params["b4"]),
    }


# ---------------------------------------------------------------------------
# Parameter construction (deterministic; weights stored (in, out); BatchNorm
# affine init gamma=1, beta=0).  b1..b3 are kept only for the reference.
# ---------------------------------------------------------------------------
def init_linear(key, fan_in, fan_out):
    kw, kb = jax.random.split(key)
    bound = 1.0 / (fan_in ** 0.5)
    w = jax.random.uniform(kw, (fan_in, fan_out), jnp.float32, -bound, bound)
    b = jax.random.uniform(kb, (fan_out,), jnp.float32, -bound, bound)
    return w, b


def init_bn(n):
    return jnp.ones((n,), jnp.float32), jnp.zeros((n,), jnp.float32)


def make_params(key):
    k1, k2, k3, k4 = jax.random.split(key, 4)
    p = {}
    p["w1"], p["b1"] = init_linear(k1, 32, 256)
    p["w2"], p["b2"] = init_linear(k2, 256, 512)
    p["w3"], p["b3"] = init_linear(k3, 512, 2048)
    p["w4"], p["b4"] = init_linear(k4, 2048, 4096)
    p["g1"], p["be1"] = init_bn(256)
    p["g2"], p["be2"] = init_bn(512)
    p["g3"], p["be3"] = init_bn(2048)
    return p


@jax.jit
def generator_forward(prepared_params, x):
    return generator_pallas(prepared_params, x)


# Pure-JAX f32 reference (mirrors the PyTorch forward exactly, including the
# biases before BatchNorm — which training-mode BN cancels).
def reference_forward(params, x):
    def bn(y, g, b):
        m = jnp.mean(y, axis=0, keepdims=True)
        v = jnp.mean((y - m) ** 2, axis=0, keepdims=True)
        return (y - m) / jnp.sqrt(v + EPS) * g + b

    h = jnp.maximum(bn(x @ params["w1"] + params["b1"],
                       params["g1"], params["be1"]), 0.0)
    h = jnp.maximum(bn(h @ params["w2"] + params["b2"],
                       params["g2"], params["be2"]), 0.0)
    h = jnp.maximum(bn(h @ params["w3"] + params["b3"],
                       params["g3"], params["be3"]), 0.0)
    h = jnp.tanh(h @ params["w4"] + params["b4"])
    return h.reshape(-1, 1, 64, 64)


if __name__ == "__main__":
    key = jax.random.PRNGKey(0)
    kp, kx = jax.random.split(key)
    params = make_params(kp)
    prepared = prepare_params(params, tn4=1024)

    B = 8                               # small batch (multiple of 8)
    x = jax.random.normal(kx, (B, 32), jnp.float32)

    out = generator_forward(prepared, x)
    out = jax.block_until_ready(out)

    assert out.shape == (B, 1, 64, 64), out.shape

    ref = reference_forward(params, x)
    err = float(jnp.max(jnp.abs(out - ref)))
    # Tolerance loosened vs the f32-only kernel: weights are streamed in bf16
    # (tanh output stays bounded; BN stats shift slightly).
    assert err < 6e-2, f"mismatch vs f32 reference: {err}"

    print("KERNEL_OK")
</pallas_src>

<mosaic_0001>
module attributes {stable_mosaic.version = 11 : i64} {
  func.func @fused_generator_kernel(%arg0: i32, %arg1: memref<8x32xf32, #tpu.memory_space<vmem>>, %arg2: memref<32x256xbf16, #tpu.memory_space<vmem>>, %arg3: memref<1x256xf32, #tpu.memory_space<vmem>>, %arg4: memref<1x256xf32, #tpu.memory_space<vmem>>, %arg5: memref<256x512xbf16, #tpu.memory_space<vmem>>, %arg6: memref<1x512xf32, #tpu.memory_space<vmem>>, %arg7: memref<1x512xf32, #tpu.memory_space<vmem>>, %arg8: memref<512x2048xbf16, #tpu.memory_space<vmem>>, %arg9: memref<1x2048xf32, #tpu.memory_space<vmem>>, %arg10: memref<1x2048xf32, #tpu.memory_space<vmem>>, %arg11: memref<1x2048x1024xbf16, #tpu.memory_space<vmem>>, %arg12: memref<1x1024xf32, #tpu.memory_space<vmem>>, %arg13: memref<8x1024xf32, #tpu.memory_space<vmem>>) attributes {dimension_semantics = [#tpu.dimension_semantics<parallel>], iteration_bounds = array<i64: 4>, scalar_prefetch = 0 : i64, scratch_operands = 0 : i64, tpu.core_type = #tpu.core_type<tc>, window_params = [{pipeline_mode = #tpu.pipeline_mode<synchronous>, transform_indices = @transform_0, window_bounds = array<i64: 8, 32>}, {pipeline_mode = #tpu.pipeline_mode<synchronous>, transform_indices = @transform_1, window_bounds = array<i64: 32, 256>}, {pipeline_mode = #tpu.pipeline_mode<synchronous>, transform_indices = @transform_2, window_bounds = array<i64: 1, 256>}, {pipeline_mode = #tpu.pipeline_mode<synchronous>, transform_indices = @transform_3, window_bounds = array<i64: 1, 256>}, {pipeline_mode = #tpu.pipeline_mode<synchronous>, transform_indices = @transform_4, window_bounds = array<i64: 256, 512>}, {pipeline_mode = #tpu.pipeline_mode<synchronous>, transform_indices = @transform_5, window_bounds = array<i64: 1, 512>}, {pipeline_mode = #tpu.pipeline_mode<synchronous>, transform_indices = @transform_6, window_bounds = array<i64: 1, 512>}, {pipeline_mode = #tpu.pipeline_mode<synchronous>, transform_indices = @transform_7, window_bounds = array<i64: 512, 2048>}, {pipeline_mode = #tpu.pipeline_mode<synchronous>, transform_indices = @transform_8, window_bounds = array<i64: 1, 2048>}, {pipeline_mode = #tpu.pipeline_mode<synchronous>, transform_indices = @transform_9, window_bounds = array<i64: 1, 2048>}, {transform_indices = @transform_10, window_bounds = array<i64: 1, 2048, 1024>}, {transform_indices = @transform_11, window_bounds = array<i64: 1, 1024>}, {transform_indices = @transform_12, window_bounds = array<i64: 8, 1024>}]} {
    %c0 = arith.constant 0 : index
    %c0_0 = arith.constant 0 : index
    %0 = vector.load %arg1[%c0, %c0_0] : memref<8x32xf32, #tpu.memory_space<vmem>>, vector<8x32xf32>
    %1 = arith.truncf %0 : vector<8x32xf32> to vector<8x32xbf16>
    %c0_1 = arith.constant 0 : index
    %c0_2 = arith.constant 0 : index
    %2 = vector.load %arg2[%c0_1, %c0_2] : memref<32x256xbf16, #tpu.memory_space<vmem>>, vector<32x256xbf16>
    %cst = arith.constant dense<0.000000e+00> : vector<8x256xf32>
    %3 = tpu.matmul %1, %2, %cst {dimension_numbers = #tpu.dot_dimension_numbers<[1], [0], [0], [1], [0, 0, 1, 1], [], []>} : vector<8x32xbf16>, vector<32x256xbf16>, vector<8x256xf32> -> vector<8x256xf32>
    %c0_3 = arith.constant 0 : index
    %c0_4 = arith.constant 0 : index
    %4 = vector.load %arg3[%c0_3, %c0_4] : memref<1x256xf32, #tpu.memory_space<vmem>>, vector<1x256xf32>
    %c0_5 = arith.constant 0 : index
    %c0_6 = arith.constant 0 : index
    %5 = vector.load %arg4[%c0_5, %c0_6] : memref<1x256xf32, #tpu.memory_space<vmem>>, vector<1x256xf32>
    %cst_7 = arith.constant dense<0.000000e+00> : vector<256xf32>
    %6 = vector.multi_reduction <add>, %3, %cst_7 [0] : vector<8x256xf32> to vector<256xf32>
    %7 = vector.shape_cast %6 : vector<256xf32> to vector<1x256xf32>
    %cst_8 = arith.constant 1.250000e-01 : f32
    %8 = vector.broadcast %cst_8 : f32 to vector<1x256xf32>
    %9 = arith.mulf %7, %8 : vector<1x256xf32>
    %10 = arith.mulf %3, %3 : vector<8x256xf32>
    %cst_9 = arith.constant dense<0.000000e+00> : vector<256xf32>
    %11 = vector.multi_reduction <add>, %10, %cst_9 [0] : vector<8x256xf32> to vector<256xf32>
    %12 = vector.shape_cast %11 : vector<256xf32> to vector<1x256xf32>
    %cst_10 = arith.constant 1.250000e-01 : f32
    %13 = vector.broadcast %cst_10 : f32 to vector<1x256xf32>
    %14 = arith.mulf %12, %13 : vector<1x256xf32>
    %15 = arith.mulf %9, %9 : vector<1x256xf32>
    %16 = arith.subf %14, %15 : vector<1x256xf32>
    %cst_11 = arith.constant 0.000000e+00 : f32
    %17 = vector.broadcast %cst_11 : f32 to vector<1x256xf32>
    %18 = arith.maximumf %16, %17 : vector<1x256xf32>
    %cst_12 = arith.constant 9.99999974E-6 : f32
    %19 = vector.broadcast %cst_12 : f32 to vector<1x256xf32>
    %20 = arith.addf %18, %19 : vector<1x256xf32>
    %21 = math.rsqrt %20 : vector<1x256xf32>
    %22 = arith.mulf %4, %21 : vector<1x256xf32>
    %23 = vector.broadcast %22 : vector<1x256xf32> to vector<8x256xf32>
    %24 = arith.mulf %3, %23 : vector<8x256xf32>
    %25 = arith.mulf %9, %22 : vector<1x256xf32>
    %26 = arith.subf %5, %25 : vector<1x256xf32>
    %27 = vector.broadcast %26 : vector<1x256xf32> to vector<8x256xf32>
    %28 = arith.addf %24, %27 : vector<8x256xf32>
    %cst_13 = arith.constant 0.000000e+00 : f32
    %29 = vector.broadcast %cst_13 : f32 to vector<8x256xf32>
    %30 = arith.maximumf %28, %29 : vector<8x256xf32>
    %31 = arith.truncf %30 : vector<8x256xf32> to vector<8x256xbf16>
    %c0_14 = arith.constant 0 : index
    %c0_15 = arith.constant 0 : index
    %32 = vector.load %arg5[%c0_14, %c0_15] : memref<256x512xbf16, #tpu.memory_space<vmem>>, vector<256x512xbf16>
    %cst_16 = arith.constant dense<0.000000e+00> : vector<8x512xf32>
    %33 = tpu.matmul %31, %32, %cst_16 {dimension_numbers = #tpu.dot_dimension_numbers<[1], [0], [0], [1], [0, 0, 1, 1], [], []>} : vector<8x256xbf16>, vector<256x512xbf16>, vector<8x512xf32> -> vector<8x512xf32>
    %c0_17 = arith.constant 0 : index
    %c0_18 = arith.constant 0 : index
    %34 = vector.load %arg6[%c0_17, %c0_18] : memref<1x512xf32, #tpu.memory_space<vmem>>, vector<1x512xf32>
    %c0_19 = arith.constant 0 : index
    %c0_20 = arith.constant 0 : index
    %35 = vector.load %arg7[%c0_19, %c0_20] : memref<1x512xf32, #tpu.memory_space<vmem>>, vector<1x512xf32>
    %cst_21 = arith.constant dense<0.000000e+00> : vector<512xf32>
    %36 = vector.multi_reduction <add>, %33, %cst_21 [0] : vector<8x512xf32> to vector<512xf32>
    %37 = vector.shape_cast %36 : vector<512xf32> to vector<1x512xf32>
    %cst_22 = arith.constant 1.250000e-01 : f32
    %38 = vector.broadcast %cst_22 : f32 to vector<1x512xf32>
    %39 = arith.mulf %37, %38 : vector<1x512xf32>
    %40 = arith.mulf %33, %33 : vector<8x512xf32>
    %cst_23 = arith.constant dense<0.000000e+00> : vector<512xf32>
    %41 = vector.multi_reduction <add>, %40, %cst_23 [0] : vector<8x512xf32> to vector<512xf32>
    %42 = vector.shape_cast %41 : vector<512xf32> to vector<1x512xf32>
    %cst_24 = arith.constant 1.250000e-01 : f32
    %43 = vector.broadcast %cst_24 : f32 to vector<1x512xf32>
    %44 = arith.mulf %42, %43 : vector<1x512xf32>
    %45 = arith.mulf %39, %39 : vector<1x512xf32>
    %46 = arith.subf %44, %45 : vector<1x512xf32>
    %cst_25 = arith.constant 0.000000e+00 : f32
    %47 = vector.broadcast %cst_25 : f32 to vector<1x512xf32>
    %48 = arith.maximumf %46, %47 : vector<1x512xf32>
    %cst_26 = arith.constant 9.99999974E-6 : f32
    %49 = vector.broadcast %cst_26 : f32 to vector<1x512xf32>
    %50 = arith.addf %48, %49 : vector<1x512xf32>
    %51 = math.rsqrt %50 : vector<1x512xf32>
    %52 = arith.mulf %34, %51 : vector<1x512xf32>
    %53 = vector.broadcast %52 : vector<1x512xf32> to vector<8x512xf32>
    %54 = arith.mulf %33, %53 : vector<8x512xf32>
    %55 = arith.mulf %39, %52 : vector<1x512xf32>
    %56 = arith.subf %35, %55 : vector<1x512xf32>
    %57 = vector.broadcast %56 : vector<1x512xf32> to vector<8x512xf32>
    %58 = arith.addf %54, %57 : vector<8x512xf32>
    %cst_27 = arith.constant 0.000000e+00 : f32
    %59 = vector.broadcast %cst_27 : f32 to vector<8x512xf32>
    %60 = arith.maximumf %58, %59 : vector<8x512xf32>
    %61 = arith.truncf %60 : vector<8x512xf32> to vector<8x512xbf16>
    %c0_28 = arith.constant 0 : index
    %c0_29 = arith.constant 0 : index
    %62 = vector.load %arg8[%c0_28, %c0_29] : memref<512x2048xbf16, #tpu.memory_space<vmem>>, vector<512x2048xbf16>
    %cst_30 = arith.constant dense<0.000000e+00> : vector<8x2048xf32>
    %63 = tpu.matmul %61, %62, %cst_30 {dimension_numbers = #tpu.dot_dimension_numbers<[1], [0], [0], [1], [0, 0, 1, 1], [], []>} : vector<8x512xbf16>, vector<512x2048xbf16>, vector<8x2048xf32> -> vector<8x2048xf32>
    %c0_31 = arith.constant 0 : index
    %c0_32 = arith.constant 0 : index
    %64 = vector.load %arg9[%c0_31, %c0_32] : memref<1x2048xf32, #tpu.memory_space<vmem>>, vector<1x2048xf32>
    %c0_33 = arith.constant 0 : index
    %c0_34 = arith.constant 0 : index
    %65 = vector.load %arg10[%c0_33, %c0_34] : memref<1x2048xf32, #tpu.memory_space<vmem>>, vector<1x2048xf32>
    %cst_35 = arith.constant dense<0.000000e+00> : vector<2048xf32>
    %66 = vector.multi_reduction <add>, %63, %cst_35 [0] : vector<8x2048xf32> to vector<2048xf32>
    %67 = vector.shape_cast %66 : vector<2048xf32> to vector<1x2048xf32>
    %cst_36 = arith.constant 1.250000e-01 : f32
    %68 = vector.broadcast %cst_36 : f32 to vector<1x2048xf32>
    %69 = arith.mulf %67, %68 : vector<1x2048xf32>
    %70 = arith.mulf %63, %63 : vector<8x2048xf32>
    %cst_37 = arith.constant dense<0.000000e+00> : vector<2048xf32>
    %71 = vector.multi_reduction <add>, %70, %cst_37 [0] : vector<8x2048xf32> to vector<2048xf32>
    %72 = vector.shape_cast %71 : vector<2048xf32> to vector<1x2048xf32>
    %cst_38 = arith.constant 1.250000e-01 : f32
    %73 = vector.broadcast %cst_38 : f32 to vector<1x2048xf32>
    %74 = arith.mulf %72, %73 : vector<1x2048xf32>
    %75 = arith.mulf %69, %69 : vector<1x2048xf32>
    %76 = arith.subf %74, %75 : vector<1x2048xf32>
    %cst_39 = arith.constant 0.000000e+00 : f32
    %77 = vector.broadcast %cst_39 : f32 to vector<1x2048xf32>
    %78 = arith.maximumf %76, %77 : vector<1x2048xf32>
    %cst_40 = arith.constant 9.99999974E-6 : f32
    %79 = vector.broadcast %cst_40 : f32 to vector<1x2048xf32>
    %80 = arith.addf %78, %79 : vector<1x2048xf32>
    %81 = math.rsqrt %80 : vector<1x2048xf32>
    %82 = arith.mulf %64, %81 : vector<1x2048xf32>
    %83 = vector.broadcast %82 : vector<1x2048xf32> to vector<8x2048xf32>
    %84 = arith.mulf %63, %83 : vector<8x2048xf32>
    %85 = arith.mulf %69, %82 : vector<1x2048xf32>
    %86 = arith.subf %65, %85 : vector<1x2048xf32>
    %87 = vector.broadcast %86 : vector<1x2048xf32> to vector<8x2048xf32>
    %88 = arith.addf %84, %87 : vector<8x2048xf32>
    %cst_41 = arith.constant 0.000000e+00 : f32
    %89 = vector.broadcast %cst_41 : f32 to vector<8x2048xf32>
    %90 = arith.maximumf %88, %89 : vector<8x2048xf32>
    %91 = arith.truncf %90 : vector<8x2048xf32> to vector<8x2048xbf16>
    %c0_42 = arith.constant 0 : index
    %c0_43 = arith.constant 0 : index
    %c0_44 = arith.constant 0 : index
    %92 = vector.load %arg11[%c0_42, %c0_43, %c0_44] : memref<1x2048x1024xbf16, #tpu.memory_space<vmem>>, vector<1x2048x1024xbf16>
    %93 = vector.shape_cast %92 : vector<1x2048x1024xbf16> to vector<2048x1024xbf16>
    %cst_45 = arith.constant dense<0.000000e+00> : vector<8x1024xf32>
    %94 = tpu.matmul %91, %93, %cst_45 {dimension_numbers = #tpu.dot_dimension_numbers<[1], [0], [0], [1], [0, 0, 1, 1], [], []>} : vector<8x2048xbf16>, vector<2048x1024xbf16>, vector<8x1024xf32> -> vector<8x1024xf32>
    %c0_46 = arith.constant 0 : index
    %c0_47 = arith.constant 0 : index
    %95 = vector.load %arg12[%c0_46, %c0_47] : memref<1x1024xf32, #tpu.memory_space<vmem>>, vector<1x1024xf32>
    %96 = vector.broadcast %95 : vector<1x1024xf32> to vector<8x1024xf32>
    %97 = arith.addf %94, %96 : vector<8x1024xf32>
    %98 = math.tanh %97 : vector<8x1024xf32>
    %c0_48 = arith.constant 0 : index
    %c0_49 = arith.constant 0 : index
    %99 = vector.load %arg13[%c0_48, %c0_49] : memref<8x1024xf32, #tpu.memory_space<vmem>>, vector<8x1024xf32>
    tpu.vector_store %arg13[%c0_48, %c0_49], %98 {strides = array<i32>} : memref<8x1024xf32, #tpu.memory_space<vmem>>, vector<8x1024xf32>,
    return
  }
  func.func @transform_0(%arg0: i32) -> (i32, i32) {
    %c0_i32 = arith.constant 0 : i32
    %c0_i32_0 = arith.constant 0 : i32
    %c0_i32_1 = arith.constant 0 : i32
    return %c0_i32, %c0_i32_0 : i32, i32
  }
  func.func @transform_1(%arg0: i32) -> (i32, i32) {
    %c0_i32 = arith.constant 0 : i32
    %c0_i32_0 = arith.constant 0 : i32
    %c0_i32_1 = arith.constant 0 : i32
    return %c0_i32, %c0_i32_0 : i32, i32
  }
  func.func @transform_2(%arg0: i32) -> (i32, i32) {
    %c0_i32 = arith.constant 0 : i32
    %c0_i32_0 = arith.constant 0 : i32
    %c0_i32_1 = arith.constant 0 : i32
    return %c0_i32, %c0_i32_0 : i32, i32
  }
  func.func @transform_3(%arg0: i32) -> (i32, i32) {
    %c0_i32 = arith.constant 0 : i32
    %c0_i32_0 = arith.constant 0 : i32
    %c0_i32_1 = arith.constant 0 : i32
    return %c0_i32, %c0_i32_0 : i32, i32
  }
  func.func @transform_4(%arg0: i32) -> (i32, i32) {
    %c0_i32 = arith.constant 0 : i32
    %c0_i32_0 = arith.constant 0 : i32
    %c0_i32_1 = arith.constant 0 : i32
    return %c0_i32, %c0_i32_0 : i32, i32
  }
  func.func @transform_5(%arg0: i32) -> (i32, i32) {
    %c0_i32 = arith.constant 0 : i32
    %c0_i32_0 = arith.constant 0 : i32
    %c0_i32_1 = arith.constant 0 : i32
    return %c0_i32, %c0_i32_0 : i32, i32
  }
  func.func @transform_6(%arg0: i32) -> (i32, i32) {
    %c0_i32 = arith.constant 0 : i32
    %c0_i32_0 = arith.constant 0 : i32
    %c0_i32_1 = arith.constant 0 : i32
    return %c0_i32, %c0_i32_0 : i32, i32
  }
  func.func @transform_7(%arg0: i32) -> (i32, i32) {
    %c0_i32 = arith.constant 0 : i32
    %c0_i32_0 = arith.constant 0 : i32
    %c0_i32_1 = arith.constant 0 : i32
    return %c0_i32, %c0_i32_0 : i32, i32
  }
  func.func @transform_8(%arg0: i32) -> (i32, i32) {
    %c0_i32 = arith.constant 0 : i32
    %c0_i32_0 = arith.constant 0 : i32
    %c0_i32_1 = arith.constant 0 : i32
    return %c0_i32, %c0_i32_0 : i32, i32
  }
  func.func @transform_9(%arg0: i32) -> (i32, i32) {
    %c0_i32 = arith.constant 0 : i32
    %c0_i32_0 = arith.constant 0 : i32
    %c0_i32_1 = arith.constant 0 : i32
    return %c0_i32, %c0_i32_0 : i32, i32
  }
  func.func @transform_10(%arg0: i32) -> (i32, i32, i32) {
    %c0_i32 = arith.constant 0 : i32
    %c0_i32_0 = arith.constant 0 : i32
    %c0_i32_1 = arith.constant 0 : i32
    return %arg0, %c0_i32, %c0_i32_0 : i32, i32, i32
  }
  func.func @transform_11(%arg0: i32) -> (i32, i32) {
    %c0_i32 = arith.constant 0 : i32
    %c0_i32_0 = arith.constant 0 : i32
    return %c0_i32, %arg0 : i32, i32
  }
  func.func @transform_12(%arg0: i32) -> (i32, i32) {
    %c0_i32 = arith.constant 0 : i32
    %c0_i32_0 = arith.constant 0 : i32
    return %c0_i32, %arg0 : i32, i32
  }
}

</mosaic_0001>

<bundles_post_ra>
// kernel: generator_forward.1
= control target key start
LH: loop header
LB: loop body
LE: loop exit
PB: predicated region body
PF: predicated region fallthrough
CT: control target
= control target key end

     0   :  { %s18934_s0 = inlined_call_operand.hbm [shape: f32[8,32], index: 0, kind: input, shape index: {}]   ;;  %s18935_s1 = inlined_call_operand.hbm [shape: bf16[32,256], index: 1, kind: input, shape index: {}]   ;;  %s18936_s2 = inlined_call_operand.hbm [shape: f32[1,256], index: 2, kind: input, shape index: {}]   ;;  %s18937_s3 = inlined_call_operand.hbm [shape: f32[1,256], index: 3, kind: input, shape index: {}]   ;;  %s18938_s4 = inlined_call_operand.hbm [shape: bf16[256,512], index: 4, kind: input, shape index: {}]   ;;  %s18939_s5 = inlined_call_operand.hbm [shape: f32[1,512], index: 5, kind: input, shape index: {}]   ;;  %s18940_s6 = inlined_call_operand.hbm [shape: f32[1,512], index: 6, kind: input, shape index: {}]   ;;  %s18941_s7 = inlined_call_operand.hbm [shape: bf16[512,2048], index: 7, kind: input, shape index: {}]   ;;  %s18942_s8 = inlined_call_operand.hbm [shape: f32[1,2048], index: 8, kind: input, shape index: {}]   ;;  %s18943_s9 = inlined_call_operand.hbm [shape: f32[1,2048], index: 9, kind: input, shape index: {}]   ;;  %s18944_s10 = inlined_call_operand.hbm [shape: bf16[4,2048,1024], index: 10, kind: input, shape index: {}]   ;;  %s18945_s11 = inlined_call_operand.hbm [shape: f32[1,4096], index: 11, kind: input, shape index: {}]   ;;  %s18946_s12 = inlined_call_operand.vmem [shape: f32[8,4096], index: 12, kind: output, shape index: {}]  }
   0x1   :  { %18983 = sst [smem:[#allocation42_spill]] %s18934_s0 }
   0x2   :  { %18984 = sst [smem:[#allocation43_spill]] %s18935_s1 }
   0x3   :  { %18985 = sst [smem:[#allocation44_spill]] %s18937_s3 }
   0x4   :  { %18986 = sst [smem:[#allocation45_spill]] %s18939_s5 }
   0x5   :  { %18987 = sst [smem:[#allocation46_spill]] %s18941_s7 }
   0x6   :  { %18988 = sst [smem:[#allocation47_spill]] %s18944_s10 }
   0x7   :  { %18989 = sst [smem:[#allocation48_spill]] %s18946_s12 }
   0x8   :  { %17 = vsyncpa [#allocation3], 0 }
   0x9   :  { %18 = vsyncpa [#allocation5], 0 }
   0xa   :  { %19 = vsyncpa [#allocation8], 0 }
   0xb   :  { %20 = vsyncpa [#allocation11], 0 }
   0xc   :  { %21 = vsyncpa [#allocation14], 0 }
   0xd   :  { %22 = vsyncpa [#allocation17], 0  ;;  %s16283_s21 = smov 0   ;;  %s16285_s22 = smov 0  }
   0xe   :  { %s16287_s23 = smov 0   ;;  %s16289_s24 = smov 0  }
   0xf LB: > { %s16196_s25 = smov [#allocation2]   ;;  %s16304_s27 = sadd.s32 4294967295, %s16194_s24   ;;  %s16194_s24 = sphi %s16289_s24, %s19119_s24   ;;  %s16190_s23 = sphi %s16287_s23, %s19118_s23   ;;  %s16186_s22 = sphi %s16285_s22, %s19117_s22   ;;  %s16182_s21 = sphi %s16283_s21, %s19116_s21  }
  0x10   : > { %s334_s26 = sshll.u32 %s16196_s25, 4  ;;  %p13684_p0 = scmp.ge.s32.totalorder %s16194_s24, 1  ;;  %s335_s26 = int_to_ptr.vmem [resolvable:$true] %s334_s26 }
  0x11   : > { %p18947_p1 = scmp.eq.s32.totalorder %s16304_s27, 0  ;;  %p321_p2 = scmp.lt.s32.totalorder %s16194_s24, 5 }
  0x12   : > { %s16197_s29 = smov [#allocation4]   ;;  %s16198_s14 = smov [#allocation7]  }
  0x13   : > { %p16309_p3 = pnand %p13684_p0, %p321_p2  ;;  %s344_s30 = sshll.u32 %s16197_s29, 4  ;;  %s16315_s30 = int_to_ptr.vmem [resolvable:$true] %s344_s30 }
  0x14   : > { %s369_s15 = sshll.u32 %s16198_s14, 4  ;;  %s18993_s0 = sld [smem:[#allocation42_spill]]  ;;  %s16323_s15 = int_to_ptr.vmem [resolvable:$true] %s369_s15 }
  0x15   : > { %s18990_s28 = scalar_select %p16309_p3, 1, 0 }
  0x16   : > { %p15522_p4 = pneg %p16309_p3 }
  0x17   : > { %18991 = sst [smem:[#allocation27_spill]] %s18990_s28 }
  0x18   : > { %p16319_p5 = pnand %p15522_p4, %p18947_p1 }
  0x1a   : > { %s18992_s13 = scalar_select %p16319_p5, 1, 0 }
  0x1b   : > { %s15796_s18 = scalar_lea.hbm %s18993_s0, 128  ;;  %p16333_p7 = pneg %p16319_p5 }
  0x1c   : > { %p15797_p6 = scmp.ne.s32.totalorder %s18993_s0, %s15796_s18  ;;  %p15803_p10 = scmp.lt.u32.totalorder %s15796_s18, %s18993_s0 }
  0x1e   : > { %p15799_p8 = pnand %p16333_p7, %p15797_p6 }
  0x20   : > { %p15800_p9 = pneg %p15799_p8 }
  0x22   : > { %p15805_p11 = pnand %p15803_p10, %p15800_p9 }
  0x24   : > { %15808 = shalt.err (!%p15805_p11)
}
  0x25   : > { %s15809_s16 = scalar_lea.vmem %s335_s26, 128  ;;  %p15817_p2 = scmp.lt.s32.totalorder %s335_s26, %s335_s26 }
  0x26   : > { %p15810_p12 = scmp.ne.s32.totalorder %s335_s26, %s15809_s16  ;;  %p15818_p4 = scmp.lt.s32.totalorder %s15809_s16, %s15809_s16 }
  0x28   : > { %p15812_p13 = pnand %p15810_p12, %p16333_p7  ;;  %p15819_p1 = por %p15818_p4, %p15817_p2 }
  0x2a   : > { %p15813_p0 = pneg %p15812_p13 }
  0x2c   : > { %p15820_p3 = pnand %p15819_p1, %p15813_p0 }
  0x2e   : > { %15823 = shalt.err (!%p15820_p3)
}
  0x2f   : > { %15525 = dma.hbm_to_vmem [thread:$0]  (!%p16319_p5), %s18993_s0, 128, %s335_s26, [#allocation3]  }
  0x30   : > { %s18995_s1 = sld [smem:[#allocation43_spill]] }
  0x36   : > { %s15824_s29 = scalar_lea.hbm %s18995_s1, 512 }
  0x37   : > { %p15825_p6 = scmp.ne.s32.totalorder %s18995_s1, %s15824_s29  ;;  %p15831_p1 = scmp.lt.u32.totalorder %s15824_s29, %s18995_s1 }
  0x39   : > { %p15827_p8 = pnand %p15825_p6, %p16333_p7 }
  0x3b   : > { %p15828_p9 = pneg %p15827_p8 }
  0x3d   : > { %p15833_p3 = pnand %p15831_p1, %p15828_p9 }
  0x3f   : > { %15836 = shalt.err (!%p15833_p3)
}
  0x40   : > { %s15837_s26 = scalar_lea.vmem %s16315_s30, 512  ;;  %p15845_p13 = scmp.lt.s32.totalorder %s16315_s30, %s16315_s30 }
  0x41   : > { %p15838_p10 = scmp.ne.s32.totalorder %s16315_s30, %s15837_s26  ;;  %p15846_p0 = scmp.lt.s32.totalorder %s15837_s26, %s15837_s26 }
  0x43   : > { %p15840_p11 = pnand %p15838_p10, %p16333_p7  ;;  %p15847_p2 = por %p15846_p0, %p15845_p13 }
  0x45   : > { %p15841_p12 = pneg %p15840_p11 }
  0x47   : > { %p15848_p4 = pnand %p15847_p2, %p15841_p12 }
  0x49   : > { %15851 = shalt.err (!%p15848_p4)
}
  0x4a   : > { %s16199_s12 = smov 128   ;;  %s16200_s28 = smov 8  }
  0x4b   : > { %15528 = dma.hbm_to_vmem [thread:$0]  (!%p16319_p5), %s18995_s1, 512, %s16315_s30, [#allocation5], %s16199_s12, %s16199_s12, %s16200_s28  }
  0x4c   : > { %s18996_s3 = sld [smem:[#allocation44_spill]] }
  0x52   : > { %s15852_s29 = scalar_lea.hbm %s18996_s3, 32 }
  0x53   : > { %p15853_p6 = scmp.ne.s32.totalorder %s18996_s3, %s15852_s29  ;;  %p15859_p1 = scmp.lt.u32.totalorder %s15852_s29, %s18996_s3 }
  0x55   : > { %p15855_p8 = pnand %p15853_p6, %p16333_p7 }
  0x57   : > { %p15856_p9 = pneg %p15855_p8 }
  0x59   : > { %p15861_p3 = pnand %p15859_p1, %p15856_p9 }
  0x5b   : > { %15864 = shalt.err (!%p15861_p3)
}
  0x5c   : > { %s15865_s30 = scalar_lea.vmem %s16323_s15, 32  ;;  %p15873_p13 = scmp.lt.s32.totalorder %s16323_s15, %s16323_s15 }
  0x5d   : > { %p15866_p10 = scmp.ne.s32.totalorder %s16323_s15, %s15865_s30  ;;  %p15874_p0 = scmp.lt.s32.totalorder %s15865_s30, %s15865_s30 }
  0x5f   : > { %p15868_p11 = pnand %p15866_p10, %p16333_p7  ;;  %p15875_p2 = por %p15874_p0, %p15873_p13 }
  0x61   : > { %p15869_p12 = pneg %p15868_p11 }
  0x63   : > { %p15876_p4 = pnand %p15875_p2, %p15869_p12 }
  0x65   : > { %15879 = shalt.err (!%p15876_p4)
}
  0x66   : > { %15534 = dma.hbm_to_vmem [thread:$0]  (!%p16319_p5), %s18996_s3, 32, %s16323_s15, [#allocation8]  }
  0x67   : > { %s16201_s28 = smov [#allocation10]   ;;  %s16202_s19 = smov [#allocation13]  }
  0x68   : > { %s393_s17 = sshll.u32 %s16201_s28, 4  ;;  %s414_s18 = sshll.u32 %s16202_s19, 4  ;;  %s394_s17 = int_to_ptr.vmem [resolvable:$true] %s393_s17  ;;  %s415_s18 = int_to_ptr.vmem [resolvable:$true] %s414_s18 }
  0x69   : > { %s18997_s5 = sld [smem:[#allocation45_spill]] }
  0x6f   : > { %s15880_s14 = scalar_lea.hbm %s18997_s5, 64 }
  0x70   : > { %p15881_p6 = scmp.ne.s32.totalorder %s18997_s5, %s15880_s14  ;;  %p15887_p1 = scmp.lt.u32.totalorder %s15880_s14, %s18997_s5 }
  0x72   : > { %p15883_p8 = pnand %p15881_p6, %p16333_p7 }
  0x74   : > { %p15884_p9 = pneg %p15883_p8 }
  0x76   : > { %p15889_p3 = pnand %p15887_p1, %p15884_p9 }
  0x78   : > { %15892 = shalt.err (!%p15889_p3)
}
  0x79   : > { %s15893_s15 = scalar_lea.vmem %s394_s17, 64  ;;  %p15901_p13 = scmp.lt.s32.totalorder %s394_s17, %s394_s17 }
  0x7a   : > { %p15894_p10 = scmp.ne.s32.totalorder %s394_s17, %s15893_s15  ;;  %p15902_p0 = scmp.lt.s32.totalorder %s15893_s15, %s15893_s15 }
  0x7c   : > { %p15896_p11 = pnand %p15894_p10, %p16333_p7  ;;  %p15903_p2 = por %p15902_p0, %p15901_p13 }
  0x7e   : > { %p15897_p12 = pneg %p15896_p11 }
  0x80   : > { %p15904_p4 = pnand %p15903_p2, %p15897_p12 }
  0x82   : > { %15907 = shalt.err (!%p15904_p4)
}
  0x83   : > { %15540 = dma.hbm_to_vmem [thread:$0]  (!%p16319_p5), %s18997_s5, 64, %s394_s17, [#allocation11]  }
  0x84   : > { %s18998_s7 = sld [smem:[#allocation46_spill]] }
  0x8a   : > { %s15908_s29 = scalar_lea.hbm %s18998_s7, 65536 }
  0x8b   : > { %p15909_p6 = scmp.ne.s32.totalorder %s18998_s7, %s15908_s29  ;;  %p15915_p1 = scmp.lt.u32.totalorder %s15908_s29, %s18998_s7 }
  0x8d   : > { %p15911_p8 = pnand %p15909_p6, %p16333_p7 }
  0x8f   : > { %p15912_p9 = pneg %p15911_p8 }
  0x91   : > { %p15917_p3 = pnand %p15915_p1, %p15912_p9 }
  0x93   : > { %15920 = shalt.err (!%p15917_p3)
}
  0x94   : > { %s15921_s0 = scalar_lea.vmem %s415_s18, 65536  ;;  %p15929_p13 = scmp.lt.s32.totalorder %s415_s18, %s415_s18 }
  0x95   : > { %p15922_p10 = scmp.ne.s32.totalorder %s415_s18, %s15921_s0  ;;  %p15930_p0 = scmp.lt.s32.totalorder %s15921_s0, %s15921_s0 }
  0x97   : > { %p15924_p11 = pnand %p15922_p10, %p16333_p7  ;;  %p15931_p2 = por %p15930_p0, %p15929_p13 }
  0x99   : > { %p15925_p12 = pneg %p15924_p11 }
  0x9b   : > { %p15932_p4 = pnand %p15931_p2, %p15925_p12 }
  0x9d   : > { %15935 = shalt.err (!%p15932_p4)
}
  0x9e   : > { %s16203_s17 = smov 1024   ;;  %s16204_s15 = smov 64  }
  0x9f   : > { %15546 = dma.hbm_to_vmem [thread:$0]  (!%p16319_p5), %s18998_s7, 65536, %s415_s18, [#allocation14], %s16203_s17, %s16203_s17, %s16204_s15  }
  0xa0   : > { %s16432_s19 = sadd.s32 1, %s16194_s24   ;;  %s245_s29 = sadd.s32 1, %s16190_s23 }
  0xa1   : > { %s242_s20 = ssub.s32 %s16194_s24, %s16432_s19  ;;  %p252_p8 = scmp.ne.s32.totalorder %s16190_s23, %s16186_s22 }
  0xa2   : > { %p243_p6 = scmp.eq.s32.totalorder %s242_s20, 0  ;;  %p253_p9 = scmp.eq.s32.totalorder %s16194_s24, 0 }
  0xa3   : > { %p258_p1 = scmp.ne.s32.totalorder %s16186_s22, %s16182_s21  ;;  %p18999_p10 = scmp.eq.s32.totalorder %s16304_s27, 0 }
  0xa4   : > { %s16443_s14 = scalar_select %p243_p6, %s16190_s23, %s245_s29  }
  0xa5   : > { %p254_p3 = por %p253_p9, %p252_p8  ;;  %p16447_p11 = por %p18999_p10, %p258_p1 }
  0xa6   : > { %p15570_p12 = scmp.lt.s32.totalorder %s16194_s24, 4  ;;  %s450_s26 = sand.u32 1, %s16194_s24  }
  0xa7   : > { %s19000_s16 = scalar_select %p16447_p11, 1, 0 }
  0xa8   : > { %s18950_s18 = sand.u32 1, %s16190_s23   ;;  %s15324_s0 = sshll.u32 %s16194_s24, 17 }
  0xa9   : > { %s13696_s30 = sshll.u32 %s18950_s18, 13  ;;  %s19001_s10 = sld [smem:[#allocation47_spill]] }
  0xaa   : > { %s454_s21 = scalar_lea.vmem [#allocation18], %s13696_s30  ;;  %p16462_p13 = pnand %p15570_p12, %p254_p3 }
  0xab   : > { %s461_s28 = sshll.u32 %s454_s21, 4  ;;  %s16468_s29 = scalar_lea.sflag [#allocation3], %s450_s26  ;;  %s16466_s28 = int_to_ptr.vmem [resolvable:$true] %s461_s28 }
  0xac   : > { %s19002_s20 = scalar_select %p16462_p13, 1, 0 }
  0xad   : > { %p18954_p2 = pneg %p16462_p13 }
  0xaf   : > { %s16460_s12 = scalar_lea.hbm %s19001_s10, %s15324_s0  ;;  %s15941_s17 = scalar_lea.hbm %s19001_s10, 524288 }
  0xb0   : > { %s15936_s18 = scalar_lea.hbm %s16460_s12, 131072  ;;  %p15942_p8 = scmp.lt.u32.totalorder %s16460_s12, %s19001_s10 }
  0xb1   : > { %p15937_p0 = scmp.ne.s32.totalorder %s16460_s12, %s15936_s18  ;;  %p15943_p9 = scmp.lt.u32.totalorder %s15941_s17, %s15936_s18 }
  0xb2   : > { %p15945_p3 = scmp.lt.u32.totalorder %s15936_s18, %s16460_s12 }
  0xb3   : > { %p15939_p4 = pnand %p18954_p2, %p15937_p0  ;;  %p15944_p1 = por %p15943_p9, %p15942_p8 }
  0xb5   : > { %p15940_p6 = pneg %p15939_p4  ;;  %p15946_p10 = por %p15945_p3, %p15944_p1 }
  0xb7   : > { %p15947_p12 = pnand %p15946_p10, %p15940_p6 }
  0xb9   : > { %15950 = shalt.err (!%p15947_p12)
}
  0xba   : > { %s15951_s26 = scalar_lea.vmem %s16466_s28, 131072  ;;  %s16205_s30 = smov [#allocation18]  }
  0xbb   : > { %p15952_p0 = scmp.ne.s32.totalorder %s16466_s28, %s15951_s26  ;;  %s15956_s0 = sshll.u32 %s16205_s30, 4  ;;  %s15957_s0 = int_to_ptr.vmem [resolvable:$false] %s15956_s0 }
  0xbc   : > { %s15958_s15 = scalar_lea.vmem %s15957_s0, 262144  ;;  %p15959_p5 = scmp.lt.s32.totalorder %s16466_s28, %s15957_s0 }
  0xbd   : > { %p15954_p4 = pnand %p15952_p0, %p18954_p2  ;;  %p15960_p8 = scmp.lt.s32.totalorder %s15958_s15, %s15951_s26 }
  0xbf   : > { %p15955_p11 = pneg %p15954_p4  ;;  %p15961_p9 = por %p15960_p8, %p15959_p5 }
  0xc1   : > { %p15962_p1 = pnand %p15961_p9, %p15955_p11 }
  0xc3   : > { %15965 = shalt.err (!%p15962_p1)
}
  0xc4   : > { %s16206_s18 = smov 512   ;;  %s16207_s17 = smov 32  }
  0xc5   : > { %15556 = dma.hbm_to_vmem [thread:$0]  (!%p16462_p13), %s16460_s12, 131072, %s16466_s28, %s16468_s29, %s16206_s18, %s16206_s18, %s16207_s17  }
  0xc6   : > { %s16208_s21 = smov [#allocation6]   ;;  %s16209_s3 = smov [#allocation9]  }
  0xc7   : > { %s358_s1 = sshll.u32 %s16208_s21, 4  ;;  %s379_s30 = sshll.u32 %s16209_s3, 4  ;;  %s359_s1 = int_to_ptr.vmem [resolvable:$true] %s358_s1  ;;  %s16496_s30 = int_to_ptr.vmem [resolvable:$true] %s379_s30 }
  0xc8   : > { %s15966_s15 = scalar_lea.hbm %s18936_s2, 32 }
  0xc9   : > { %p15967_p5 = scmp.ne.s32.totalorder %s18936_s2, %s15966_s15  ;;  %p15973_p3 = scmp.lt.u32.totalorder %s15966_s15, %s18936_s2 }
  0xcb   : > { %p15969_p11 = pnand %p15967_p5, %p16333_p7 }
  0xcd   : > { %p15970_p6 = pneg %p15969_p11 }
  0xcf   : > { %p15975_p10 = pnand %p15973_p3, %p15970_p6 }
  0xd1   : > { %15978 = shalt.err (!%p15975_p10)
}
  0xd2   : > { %s15979_s3 = scalar_lea.vmem %s359_s1, 32  ;;  %p15987_p8 = scmp.lt.s32.totalorder %s359_s1, %s359_s1 }
  0xd3   : > { %p15980_p12 = scmp.ne.s32.totalorder %s359_s1, %s15979_s3  ;;  %p15988_p9 = scmp.lt.s32.totalorder %s15979_s3, %s15979_s3 }
  0xd5   : > { %p15982_p0 = pnand %p15980_p12, %p16333_p7  ;;  %p15989_p1 = por %p15988_p9, %p15987_p8 }
  0xd7   : > { %p15983_p4 = pneg %p15982_p0 }
  0xd9   : > { %p15990_p2 = pnand %p15989_p1, %p15983_p4 }
  0xdb   : > { %15993 = shalt.err (!%p15990_p2)
}
  0xdc   : > { %p19003_p5 = scmp.ne.s32.totalorder %s18992_s13, 0  ;;  %s15994_s18 = scalar_lea.hbm %s18938_s4, 8192 }
  0xdd   : > { %p15995_p11 = scmp.ne.s32.totalorder %s18938_s4, %s15994_s18  ;;  %p16001_p2 = scmp.lt.u32.totalorder %s15994_s18, %s18938_s4 }
  0xde   : > { %15531 = dma.hbm_to_vmem [thread:$0]  (!%p19003_p5), %s18936_s2, 32, %s359_s1, [#allocation5]  }
  0xdf   : > { %p15997_p6 = pnand %p15995_p11, %p16333_p7 }
  0xe1   : > { %p15998_p3 = pneg %p15997_p6 }
  0xe3   : > { %p16003_p10 = pnand %p16001_p2, %p15998_p3 }
  0xe5   : > { %16006 = shalt.err (!%p16003_p10)
}
  0xe6   : > { %s16007_s1 = scalar_lea.vmem %s16496_s30, 8192  ;;  %p16015_p8 = scmp.lt.s32.totalorder %s16496_s30, %s16496_s30 }
  0xe7   : > { %p16008_p12 = scmp.ne.s32.totalorder %s16496_s30, %s16007_s1  ;;  %p16016_p9 = scmp.lt.s32.totalorder %s16007_s1, %s16007_s1 }
  0xe9   : > { %p16010_p0 = pnand %p16008_p12, %p16333_p7  ;;  %p16017_p1 = por %p16016_p9, %p16015_p8 }
  0xeb   : > { %p16011_p4 = pneg %p16010_p0 }
  0xed   : > { %p16018_p11 = pnand %p16017_p1, %p16011_p4 }
  0xef   : > { %16021 = shalt.err (!%p16018_p11)
}
  0xf0   : > { %s16210_s15 = smov 256   ;;  %s16211_s12 = smov 16  }
  0xf1   : > { %15537 = dma.hbm_to_vmem [thread:$0]  (!%p19003_p5), %s18938_s4, 8192, %s16496_s30, [#allocation8], %s16210_s15, %s16210_s15, %s16211_s12  }
  0xf2   : > { %s16212_s7 = smov [#allocation12]   ;;  %s16213_s28 = smov [#allocation15]  }
  0xf3   : > { %s404_s10 = sshll.u32 %s16212_s7, 4  ;;  %s428_s18 = sshll.u32 %s16213_s28, 4  ;;  %s405_s10 = int_to_ptr.vmem [resolvable:$true] %s404_s10  ;;  %s16539_s18 = int_to_ptr.vmem [resolvable:$true] %s428_s18 }
  0xf4   : > { %s16022_s26 = scalar_lea.hbm %s18940_s6, 64 }
  0xf5   : > { %p16023_p6 = scmp.ne.s32.totalorder %s18940_s6, %s16022_s26  ;;  %p16029_p10 = scmp.lt.u32.totalorder %s16022_s26, %s18940_s6 }
  0xf7   : > { %p16025_p3 = pnand %p16023_p6, %p16333_p7 }
  0xf9   : > { %p16026_p2 = pneg %p16025_p3 }
  0xfb   : > { %p16031_p12 = pnand %p16029_p10, %p16026_p2 }
  0xfd   : > { %16034 = shalt.err (!%p16031_p12)
}
  0xfe   : > { %s16035_s15 = scalar_lea.vmem %s405_s10, 64  ;;  %p16043_p9 = scmp.lt.s32.totalorder %s405_s10, %s405_s10 }
  0xff   : > { %p16036_p0 = scmp.ne.s32.totalorder %s405_s10, %s16035_s15  ;;  %p16044_p1 = scmp.lt.s32.totalorder %s16035_s15, %s16035_s15 }
 0x101   : > { %p16038_p4 = pnand %p16036_p0, %p16333_p7  ;;  %p16045_p11 = por %p16044_p1, %p16043_p9 }
 0x103   : > { %p16039_p8 = pneg %p16038_p4 }
 0x105   : > { %p16046_p13 = pnand %p16045_p11, %p16039_p8 }
 0x107   : > { %16049 = shalt.err (!%p16046_p13)
}
 0x108   : > { %15543 = dma.hbm_to_vmem [thread:$0]  (!%p19003_p5), %s18940_s6, 64, %s405_s10, [#allocation11]  }
 0x109   : > { %s16050_s17 = scalar_lea.hbm %s18942_s8, 256 }
 0x10a   : > { %p16051_p6 = scmp.ne.s32.totalorder %s18942_s8, %s16050_s17  ;;  %p16057_p13 = scmp.lt.u32.totalorder %s16050_s17, %s18942_s8 }
 0x10c   : > { %p16053_p3 = pnand %p16051_p6, %p16333_p7 }
 0x10e   : > { %p16054_p2 = pneg %p16053_p3 }
 0x110   : > { %p16059_p10 = pnand %p16057_p13, %p16054_p2 }
 0x112   : > { %16062 = shalt.err (!%p16059_p10)
}
 0x113   : > { %s16063_s10 = scalar_lea.vmem %s16539_s18, 256  ;;  %p16071_p8 = scmp.lt.s32.totalorder %s16539_s18, %s16539_s18 }
 0x114   : > { %p16064_p12 = scmp.ne.s32.totalorder %s16539_s18, %s16063_s10  ;;  %p16072_p9 = scmp.lt.s32.totalorder %s16063_s10, %s16063_s10 }
 0x116   : > { %p16066_p0 = pnand %p16064_p12, %p16333_p7  ;;  %p16073_p1 = por %p16072_p9, %p16071_p8 }
 0x118   : > { %p16067_p4 = pneg %p16066_p0 }
 0x11a   : > { %p16074_p11 = pnand %p16073_p1, %p16067_p4 }
 0x11c   : > { %16077 = shalt.err (!%p16074_p11)
}
 0x11d   : > { %15549 = dma.hbm_to_vmem [thread:$0]  (!%p19003_p5), %s18942_s8, 256, %s16539_s18, [#allocation14]  }
 0x11e   : > { %s19004_s15 = sand.u32 1, %s16190_s23   ;;  %s16214_s5 = smov [#allocation16]  }
 0x11f   : > { %s13699_s12 = sshll.u32 %s19004_s15, 3  ;;  %s439_s7 = sshll.u32 %s16214_s5, 4  ;;  %s440_s7 = int_to_ptr.vmem [resolvable:$true] %s439_s7 }
 0x120   : > { %s15325_s28 = sshll.u32 %s16194_s24, 7  ;;  %s16078_s26 = scalar_lea.hbm %s18943_s9, 256 }
 0x121   : > { %p16079_p6 = scmp.ne.s32.totalorder %s18943_s9, %s16078_s26  ;;  %p16085_p13 = scmp.lt.u32.totalorder %s16078_s26, %s18943_s9 }
 0x123   : > { %p16081_p3 = pnand %p16079_p6, %p16333_p7 }
 0x125   : > { %p16082_p2 = pneg %p16081_p3 }
 0x127   : > { %p16087_p10 = pnand %p16085_p13, %p16082_p2 }
 0x129   : > { %16090 = shalt.err (!%p16087_p10)
}
 0x12a   : > { %s16091_s18 = scalar_lea.vmem %s440_s7, 256  ;;  %p16099_p8 = scmp.lt.s32.totalorder %s440_s7, %s440_s7 }
 0x12b   : > { %p16092_p12 = scmp.ne.s32.totalorder %s440_s7, %s16091_s18  ;;  %p16100_p9 = scmp.lt.s32.totalorder %s16091_s18, %s16091_s18 }
 0x12d   : > { %p16094_p0 = pnand %p16092_p12, %p16333_p7  ;;  %p16101_p1 = por %p16100_p9, %p16099_p8 }
 0x12f   : > { %p16095_p4 = pneg %p16094_p0 }
 0x131   : > { %p16102_p11 = pnand %p16101_p1, %p16095_p4 }
 0x133   : > { %16105 = shalt.err (!%p16102_p11)
}
 0x134   : > { %15552 = dma.hbm_to_vmem [thread:$0]  (!%p19003_p5), %s18943_s9, 256, %s440_s7, [#allocation17]  }
 0x135   : > { %s16606_s17 = scalar_lea.hbm %s18945_s11, %s15325_s28  ;;  %s475_s25 = scalar_lea.vmem [#allocation19], %s13699_s12 }
 0x136   : > { %s483_s21 = sshll.u32 %s475_s25, 4  ;;  %s16106_s26 = scalar_lea.hbm %s16606_s17, 128  ;;  %s484_s21 = int_to_ptr.vmem [resolvable:$true] %s483_s21 }
 0x137   : > { %p16107_p7 = scmp.ne.s32.totalorder %s16606_s17, %s16106_s26  ;;  %p19005_p6 = scmp.ne.s32.totalorder %s19002_s20, 0 }
 0x138   : > { %s16111_s0 = scalar_lea.hbm %s18945_s11, 512  ;;  %p16112_p5 = scmp.lt.u32.totalorder %s16606_s17, %s18945_s11 }
 0x139   : > { %p19006_p3 = pneg %p19005_p6  ;;  %p16113_p10 = scmp.lt.u32.totalorder %s16111_s0, %s16106_s26 }
 0x13a   : > { %p16115_p0 = scmp.lt.u32.totalorder %s16106_s26, %s16606_s17 }
 0x13b   : > { %p16109_p2 = pnand %p16107_p7, %p19006_p3  ;;  %p16114_p12 = por %p16113_p10, %p16112_p5 }
 0x13d   : > { %p16110_p13 = pneg %p16109_p2  ;;  %p16116_p4 = por %p16115_p0, %p16114_p12 }
 0x13f   : > { %p16117_p8 = pnand %p16116_p4, %p16110_p13 }
 0x141   : > { %16120 = shalt.err (!%p16117_p8)
}
 0x142   : > { %s16121_s12 = scalar_lea.vmem %s484_s21, 128  ;;  %p19007_p1 = pmov %p19006_p3 }
 0x143   : > { %p16122_p9 = scmp.ne.s32.totalorder %s484_s21, %s16121_s12  ;;  %s16215_s10 = smov [#allocation19]  }
 0x144   : > { %s16126_s3 = sshll.u32 %s16215_s10, 4  ;;  %s16127_s3 = int_to_ptr.vmem [resolvable:$false] %s16126_s3 }
 0x145   : > { %p16124_p11 = pnand %p16122_p9, %p19007_p1  ;;  %s16128_s18 = scalar_lea.vmem %s16127_s3, 256 }
 0x146   : > { %p16129_p3 = scmp.lt.s32.totalorder %s484_s21, %s16127_s3  ;;  %p16130_p2 = scmp.lt.s32.totalorder %s16128_s18, %s16121_s12 }
 0x147   : > { %p16125_p7 = pneg %p16124_p11 }
 0x148   : > { %p16131_p5 = por %p16130_p2, %p16129_p3 }
 0x14a   : > { %p16132_p10 = pnand %p16131_p5, %p16125_p7 }
 0x14c   : > { %16135 = shalt.err (!%p16132_p10)
}
 0x14d   : > { %15559 = dma.hbm_to_vmem [thread:$0]  (!%p19005_p6), %s16606_s17, 128, %s484_s21, %s16468_s29  }
 0x14e   : > { %s19008_s24 = sld [smem:[#allocation27_spill]] }
 0x154   : > { %p19009_p13 = scmp.ne.s32.totalorder %s19008_s24, 0 }
 0x156   : > { %492 = sbr.rel (%p19009_p13) target bundleno = 2650 (0xa5a), region = 68 }
 0x15d   : > { %p19010_p12 = scmp.eq.s32.totalorder %s16304_s27, 0 }
 0x15f   : > { %16153 = dma.done.wait (%p19010_p12), [#allocation3], 128   ;;  %p19011_p0 = pmov %p19010_p12 }
 0x161   : > { %16155 = vsyncadd (%p19011_p0), [#allocation3], 4294967168  ;;  %p19012_p4 = pmov %p19011_p0 }
 0x162   : > { %p19013_p8 = pmov %p19011_p0 }
 0x163   : > { %16157 = dma.done.wait (%p19012_p4), [#allocation5], 544  }
 0x164   : > { %16159 = vsyncadd (%p19013_p8), [#allocation5], 4294966752  ;;  %p19014_p9 = pmov %p19011_p0 }
 0x165   : > { %p19015_p6 = pmov %p19011_p0 }
 0x166   : > { %16161 = dma.done.wait (%p19014_p9), [#allocation8], 8224  }
 0x167   : > { %16163 = vsyncadd (%p19015_p6), [#allocation8], 4294959072  ;;  %p19016_p1 = pmov %p19011_p0 }
 0x168   : > { %p19017_p11 = pmov %p19011_p0 }
 0x169   : > { %16165 = dma.done.wait (%p19016_p1), [#allocation11], 128  }
 0x16a   : > { %16167 = vsyncadd (%p19017_p11), [#allocation11], 4294967168  ;;  %p19018_p7 = pmov %p19011_p0 }
 0x16b   : > { %p19019_p3 = pmov %p19011_p0 }
 0x16c   : > { %16169 = dma.done.wait (%p19018_p7), [#allocation14], 65792  }
 0x16d   : > { %16171 = vsyncadd (%p19019_p3), [#allocation14], 4294901504  ;;  %p19020_p2 = pmov %p19011_p0 }
 0x16e   : > { %p19021_p5 = pmov %p19011_p0 }
 0x16f   : > { %16173 = dma.done.wait (%p19020_p2), [#allocation17], 256  }
 0x170   : > { %16175 = vsyncadd (%p19021_p5), [#allocation17], 4294967040  ;;  %s534_s20 = sand.u32 1, %s16304_s27   ;;  %s536_s29 = sand.u32 1, %s16186_s22  }
 0x171   : > { %s13713_s30 = sshll.u32 %s536_s29, 13  ;;  %s535_s15 = scalar_lea.sflag [#allocation3], %s534_s20 }
 0x172   : > { %s16658_s5 = scalar_lea.vmem [#allocation18], %s13713_s30  ;;  %p19022_p10 = scmp.ne.s32.totalorder %s19000_s16, 0 }
 0x174   : > { %16177 = dma.done.wait (%p19022_p10), %s535_s15, 131200  }
 0x175   : > { %16179 = vsyncadd (%p19022_p10), %s535_s15, 4294836096  ;;  %v16216_v0 = vmov 0   ;;  %v15633_v1 = vld [vmem:[#allocation4 + $0x4] ss:$8 sps:$4 sm:$0xff]   ;;  %v15635_v2 = vld [vmem:[#allocation4] ss:$8 sps:$4 sm:$0xff]  }
 0x176   : > { %663 = vmatprep.mubr.bf16.mxu0 %v16216_v0  ;;  %631 = vmatprep.subr.bf16.mxu0 %v15633_v1  ;;  %v15636_v3 = vld [vmem:[#allocation4 + $0x14] ss:$8 sps:$4 sm:$0xff]   ;;  %v15638_v4 = vld [vmem:[#allocation4 + $0x10] ss:$8 sps:$4 sm:$0xff]   ;;  %vm627_vm0 = vcmask 261120   ;;  %s18559_s16 = sshll.u32 %s536_s29, 3 }
 0x177   : > { %v601_v5 = vld [vmem:[#allocation2] sm:$0xff]  ;;  %632 = vmatpush1.bf16.msra.mxu0 %v15635_v2  ;;  %v15643_v8 = vld [vmem:[#allocation9 + $0xc] ss:$16 sps:$4 sm:$0xff]   ;;  %v15644_v10 = vld [vmem:[#allocation9] ss:$16 sps:$4 sm:$0xff]   ;;  %s547_s17 = scalar_lea.vmem [#allocation19], %s18559_s16 }
 0x178   : > { %633 = vmatprep.subr.bf16.mxu0 %v15636_v3  ;;  %v602_v6 = vpack.c.bf16 %v601_v5, %v601_v5  ;;  %v15639_v7 = vld [vmem:[#allocation9 + $0x4] ss:$16 sps:$4 sm:$0xff]   ;;  %v15641_v9 = vld [vmem:[#allocation9 + $0x8] ss:$16 sps:$4 sm:$0xff]   ;;  %v15649_v12 = vld [vmem:[#allocation9 + $0x2c] ss:$16 sps:$4 sm:$0xff]  }
 0x179   : > { %1168 = vmatprep.subr.bf16.mxu1 %v15639_v7  ;;  %v15645_v11 = vld [vmem:[#allocation9 + $0x24] ss:$16 sps:$4 sm:$0xff]   ;;  %v15647_v13 = vld [vmem:[#allocation9 + $0x28] ss:$16 sps:$4 sm:$0xff]   ;;  %v15650_v14 = vld [vmem:[#allocation9 + $0x20] ss:$16 sps:$4 sm:$0xff]  }
 0x17a   : > { %1169 = vmatpush1.bf16.msra.mxu1 %v15644_v10  ;;  %v15651_v15 = vld [vmem:[#allocation9 + $0x44] ss:$16 sps:$4 sm:$0xff]   ;;  %v15655_v16 = vld [vmem:[#allocation9 + $0x4c] ss:$16 sps:$4 sm:$0xff]   ;;  %v15653_v17 = vld [vmem:[#allocation9 + $0x48] ss:$16 sps:$4 sm:$0xff]  }
 0x17b   : > { %634 = vmatpush1.bf16.msra.mxu0 %v15638_v4  ;;  %1170 = vmatprep.subr.bf16.mxu1 %v15645_v11  ;;  %v15656_v18 = vld [vmem:[#allocation9 + $0x40] ss:$16 sps:$4 sm:$0xff]   ;;  %v15657_v19 = vld [vmem:[#allocation9 + $0x64] ss:$16 sps:$4 sm:$0xff]   ;;  %v15661_v20 = vld [vmem:[#allocation9 + $0x6c] ss:$16 sps:$4 sm:$0xff]  }
 0x17c   : > { %1209 = vmatprep.subr.bf16.mxu0 %v15643_v8  ;;  %v15659_v21 = vld [vmem:[#allocation9 + $0x68] ss:$16 sps:$4 sm:$0xff]   ;;  %v15662_v22 = vld [vmem:[#allocation9 + $0x60] ss:$16 sps:$4 sm:$0xff]   ;;  %v15663_v23 = vld [vmem:[#allocation9 + $0x84] ss:$16 sps:$4 sm:$0xff]  }
 0x17d   : > { %v15667_v24 = vld [vmem:[#allocation9 + $0x8c] ss:$16 sps:$4 sm:$0xff]   ;;  %v15665_v25 = vld [vmem:[#allocation9 + $0x88] ss:$16 sps:$4 sm:$0xff]   ;;  %v15668_v26 = vld [vmem:[#allocation9 + $0x80] ss:$16 sps:$4 sm:$0xff]  }
 0x17e   : > { %13721 = vmatmul.mubr.msk.bf16.vlgmr.msra.gmra.mrb[0].mxu0 %vm627_vm0, %v602_v6  ;;  %1171 = vmatpush1.bf16.msra.mxu1 %v15650_v14  ;;  %v15669_v27 = vld [vmem:[#allocation9 + $0xa4] ss:$16 sps:$4 sm:$0xff]   ;;  %v15673_v28 = vld [vmem:[#allocation9 + $0xac] ss:$16 sps:$4 sm:$0xff]   ;;  %v15671_v29 = vld [vmem:[#allocation9 + $0xa8] ss:$16 sps:$4 sm:$0xff]  }
 0x17f   : > { %1210 = vmatpush1.bf16.msra.mxu0 %v15641_v9  ;;  %1172 = vmatprep.subr.bf16.mxu1 %v15651_v15  ;;  %v15674_v30 = vld [vmem:[#allocation9 + $0xa0] ss:$16 sps:$4 sm:$0xff]   ;;  %v15675_v31 = vld [vmem:[#allocation9 + $0xc4] ss:$16 sps:$4 sm:$0xff]   ;;  %v15679_v32 = vld [vmem:[#allocation9 + $0xcc] ss:$16 sps:$4 sm:$0xff]  }
 0x180   : > { %1211 = vmatprep.subr.bf16.mxu0 %v15649_v12  ;;  %v15677_v33 = vld [vmem:[#allocation9 + $0xc8] ss:$16 sps:$4 sm:$0xff]   ;;  %v15680_v34 = vld [vmem:[#allocation9 + $0xc0] ss:$16 sps:$4 sm:$0xff]   ;;  %v15681_v35 = vld [vmem:[#allocation9 + $0xe4] ss:$16 sps:$4 sm:$0xff]  }
 0x181   : > { %v15685_v36 = vld [vmem:[#allocation9 + $0xec] ss:$16 sps:$4 sm:$0xff]   ;;  %v15683_v37 = vld [vmem:[#allocation9 + $0xe8] ss:$16 sps:$4 sm:$0xff]   ;;  %v15686_v38 = vld [vmem:[#allocation9 + $0xe0] ss:$16 sps:$4 sm:$0xff]  }
 0x182   : > { %1173 = vmatpush1.bf16.msra.mxu1 %v15656_v18  ;;  %v15687_v39 = vld [vmem:[#allocation9 + $0x104] ss:$16 sps:$4 sm:$0xff]   ;;  %v15691_v40 = vld [vmem:[#allocation9 + $0x10c] ss:$16 sps:$4 sm:$0xff]   ;;  %v15689_v41 = vld [vmem:[#allocation9 + $0x108] ss:$16 sps:$4 sm:$0xff]  }
 0x183   : > { %1212 = vmatpush1.bf16.msra.mxu0 %v15647_v13  ;;  %1174 = vmatprep.subr.bf16.mxu1 %v15657_v19  ;;  %v15692_v42 = vld [vmem:[#allocation9 + $0x100] ss:$16 sps:$4 sm:$0xff]   ;;  %v15693_v43 = vld [vmem:[#allocation9 + $0x124] ss:$16 sps:$4 sm:$0xff]   ;;  %v15697_v44 = vld [vmem:[#allocation9 + $0x12c] ss:$16 sps:$4 sm:$0xff]  }
 0x184   : > { %1213 = vmatprep.subr.bf16.mxu0 %v15655_v16  ;;  %v15695_v45 = vld [vmem:[#allocation9 + $0x128] ss:$16 sps:$4 sm:$0xff]   ;;  %v15698_v46 = vld [vmem:[#allocation9 + $0x120] ss:$16 sps:$4 sm:$0xff]   ;;  %v15699_v47 = vld [vmem:[#allocation9 + $0x144] ss:$16 sps:$4 sm:$0xff]  }
 0x185   : > { %v15703_v48 = vld [vmem:[#allocation9 + $0x14c] ss:$16 sps:$4 sm:$0xff]   ;;  %v15701_v49 = vld [vmem:[#allocation9 + $0x148] ss:$16 sps:$4 sm:$0xff]   ;;  %v15704_v50 = vld [vmem:[#allocation9 + $0x140] ss:$16 sps:$4 sm:$0xff]  }
 0x186   : > { %1175 = vmatpush1.bf16.msra.mxu1 %v15662_v22  ;;  %v15705_v51 = vld [vmem:[#allocation9 + $0x164] ss:$16 sps:$4 sm:$0xff]   ;;  %v15709_v52 = vld [vmem:[#allocation9 + $0x16c] ss:$16 sps:$4 sm:$0xff]   ;;  %v15707_v53 = vld [vmem:[#allocation9 + $0x168] ss:$16 sps:$4 sm:$0xff]  }
 0x187   : > { %1214 = vmatpush1.bf16.msra.mxu0 %v15653_v17  ;;  %1176 = vmatprep.subr.bf16.mxu1 %v15663_v23  ;;  %v15710_v54 = vld [vmem:[#allocation9 + $0x160] ss:$16 sps:$4 sm:$0xff]   ;;  %v15711_v55 = vld [vmem:[#allocation9 + $0x184] ss:$16 sps:$4 sm:$0xff]   ;;  %v15715_v56 = vld [vmem:[#allocation9 + $0x18c] ss:$16 sps:$4 sm:$0xff]  }
 0x188   : > { %1215 = vmatprep.subr.bf16.mxu0 %v15661_v20  ;;  %v15713_v57 = vld [vmem:[#allocation9 + $0x188] ss:$16 sps:$4 sm:$0xff]   ;;  %v15716_v58 = vld [vmem:[#allocation9 + $0x180] ss:$16 sps:$4 sm:$0xff]   ;;  %v15717_v59 = vld [vmem:[#allocation9 + $0x1a4] ss:$16 sps:$4 sm:$0xff]  }
 0x189   : > { %v15721_v60 = vld [vmem:[#allocation9 + $0x1ac] ss:$16 sps:$4 sm:$0xff]   ;;  %v15719_v61 = vld [vmem:[#allocation9 + $0x1a8] ss:$16 sps:$4 sm:$0xff]   ;;  %v15722_v62 = vld [vmem:[#allocation9 + $0x1a0] ss:$16 sps:$4 sm:$0xff]  }
 0x18a   : > { %1177 = vmatpush1.bf16.msra.mxu1 %v15668_v26  ;;  %v15723_v63 = vld [vmem:[#allocation9 + $0x1c4] ss:$16 sps:$4 sm:$0xff]   ;;  %v15727_v0 = vld [vmem:[#allocation9 + $0x1cc] ss:$16 sps:$4 sm:$0xff]   ;;  %v15725_v1 = vld [vmem:[#allocation9 + $0x1c8] ss:$16 sps:$4 sm:$0xff]  }
 0x18b   : > { %1216 = vmatpush1.bf16.msra.mxu0 %v15659_v21  ;;  %1178 = vmatprep.subr.bf16.mxu1 %v15669_v27  ;;  %v15728_v2 = vld [vmem:[#allocation9 + $0x1c0] ss:$16 sps:$4 sm:$0xff]   ;;  %v15729_v3 = vld [vmem:[#allocation9 + $0x1e4] ss:$16 sps:$4 sm:$0xff]   ;;  %v15733_v4 = vld [vmem:[#allocation9 + $0x1ec] ss:$16 sps:$4 sm:$0xff]  }
 0x18c   : > { %1217 = vmatprep.subr.bf16.mxu0 %v15667_v24  ;;  %v15731_v5 = vld [vmem:[#allocation9 + $0x1e8] ss:$16 sps:$4 sm:$0xff]   ;;  %v15734_v6 = vld [vmem:[#allocation9 + $0x1e0] ss:$16 sps:$4 sm:$0xff]   ;;  %s13715_s25 = sshll.u32 %s16304_s27, 3  ;;  %s19115_s7 = sld [smem:[#allocation48_spill]] }
 0x18d   : > { %p18580_p13 = scmp.lt.s32.totalorder %s13715_s25, 31 }
 0x18e   : > { %1179 = vmatpush1.bf16.msra.mxu1 %v15674_v30 }
 0x18f   : > { %1218 = vmatpush1.bf16.msra.mxu0 %v15665_v25  ;;  %1180 = vmatprep.subr.bf16.mxu1 %v15675_v31  ;;  %s19121_s25 = smov (!%p18580_p13, %s13715_s25), 31 }
 0x190   : > { %1219 = vmatprep.subr.bf16.mxu0 %v15673_v28  ;;  %s13716_s27 = sshll.u32 %s19121_s25, 3 }
 0x192   : > { %1181 = vmatpush1.bf16.msra.mxu1 %v15680_v34  ;;  %s18607_s0 = scalar_lea.vmem %s19115_s7, %s13716_s27 }
 0x193   : > { %1220 = vmatpush1.bf16.msra.mxu0 %v15671_v29  ;;  %1182 = vmatprep.subr.bf16.mxu1 %v15681_v35 }
 0x194   : > { %1221 = vmatprep.subr.bf16.mxu0 %v15679_v32 }
 0x196   : > { %1183 = vmatpush1.bf16.msra.mxu1 %v15686_v38 }
 0x197   : > { %1222 = vmatpush1.bf16.msra.mxu0 %v15677_v33  ;;  %1184 = vmatprep.subr.bf16.mxu1 %v15687_v39 }
 0x198   : > { %1223 = vmatprep.subr.bf16.mxu0 %v15685_v36 }
 0x19a   : > { %1185 = vmatpush1.bf16.msra.mxu1 %v15692_v42 }
 0x19b   : > { %1224 = vmatpush1.bf16.msra.mxu0 %v15683_v37  ;;  %1186 = vmatprep.subr.bf16.mxu1 %v15693_v43 }
 0x19c   : > { %1225 = vmatprep.subr.bf16.mxu0 %v15691_v40 }
 0x19e   : > { %1187 = vmatpush1.bf16.msra.mxu1 %v15698_v46 }
 0x19f   : > { %1226 = vmatpush1.bf16.msra.mxu0 %v15689_v41  ;;  %1188 = vmatprep.subr.bf16.mxu1 %v15699_v47 }
 0x1a0   : > { %1227 = vmatprep.subr.bf16.mxu0 %v15697_v44 }
 0x1a2   : > { %1189 = vmatpush1.bf16.msra.mxu1 %v15704_v50 }
 0x1a3   : > { %1228 = vmatpush1.bf16.msra.mxu0 %v15695_v45  ;;  %1190 = vmatprep.subr.bf16.mxu1 %v15705_v51  ;;  %v720_v51 = vlaneseq }
 0x1a4   : > { %1229 = vmatprep.subr.bf16.mxu0 %v15703_v48 }
 0x1a6   : > { %1191 = vmatpush1.bf16.msra.mxu1 %v15710_v54 }
 0x1a7   : > { %1230 = vmatpush1.bf16.msra.mxu0 %v15701_v49  ;;  %1192 = vmatprep.subr.bf16.mxu1 %v15711_v55  ;;  %v16217_v49 = vmov 1966171168  }
 0x1a8   : > { %1231 = vmatprep.subr.bf16.mxu0 %v15709_v52  ;;  %v718_v50 = vunpack.c.l.s4 %v16217_v49 }
 0x1aa   : > { %1193 = vmatpush1.bf16.msra.mxu1 %v15716_v58  ;;  %v719_v52 = vunpack.c.0.s8 %v718_v50 }
 0x1ab   : > { %1232 = vmatpush1.bf16.msra.mxu0 %v15707_v53  ;;  %1194 = vmatprep.subr.bf16.mxu1 %v15717_v59  ;;  %v16670_v53 = vshrl.u32 %v720_v51, 7  ;;  %v672_v59 = vld [vmem:[#allocation6] sm:$0x3]  ;;  %v1518_v51 = vld [vmem:[#allocation13 + $0x200] sm:$0xff] }
 0x1ac   : > { %1233 = vmatprep.subr.bf16.mxu0 %v15715_v56 }
 0x1ad   : > { %v16673_v55 = vsub.s32 %v719_v52, %v16670_v53  ;;  %v1526_v52 = vld [vmem:[#allocation13 + $0x240] sm:$0xff] }
 0x1ae   : > { %1195 = vmatpush1.bf16.msra.mxu1 %v15722_v62  ;;  %v16681_v62 = vsub.s32 1, %v16670_v53 }
 0x1af   : > { %1234 = vmatpush1.bf16.msra.mxu0 %v15713_v57  ;;  %1196 = vmatprep.subr.bf16.mxu1 %v15723_v63 }
 0x1b0   : > { %1235 = vmatprep.subr.bf16.mxu0 %v15721_v60 }
 0x1b2   : > { %1197 = vmatpush1.bf16.msra.mxu1 %v15728_v2 }
 0x1b3   : > { %1236 = vmatpush1.bf16.msra.mxu0 %v15719_v61  ;;  %1198 = vmatprep.subr.bf16.mxu1 %v15729_v3  ;;  %v16678_v61 = vsub.s32 0, %v16670_v53 }
 0x1b4   : > { %1237 = vmatprep.subr.bf16.mxu0 %v15727_v0 }
 0x1b6   : > { %1199 = vmatpush1.bf16.msra.mxu1 %v15734_v6 }
 0x1b7   : > { %1238 = vmatpush1.bf16.msra.mxu0 %v15725_v1 }
 0x1b8   : > { %1239 = vmatprep.subr.bf16.mxu0 %v15733_v4 }
 0x1bb   : > { %1240 = vmatpush1.bf16.msra.mxu0 %v15731_v5 }
 0x251   : > { %v16664_v7 = vpop.f32.mrb[0].mxu0 }
 0x252   : > { %v674_v8 = vrot.slane %v16664_v7, 4  ;;  %v688_v9 = vmul.f32 %v16664_v7, %v16664_v7  ;;  %v667_v10 = vpop.f32.mrb[1].mxu0 }
 0x253   : > { %v680_v11 = vrot.slane %v667_v10, 4  ;;  %v689_v12 = vmul.f32 %v667_v10, %v667_v10  ;;  %v669_v13 = vpop.f32.mrb[2].mxu0 }
 0x254   : > { %v675_v14 = vadd.f32 %v674_v8, %v16664_v7  ;;  %v690_v15 = vrot.slane %v688_v9, 4  ;;  %v670_v16 = vpop.f32.mrb[3].mxu0 }
 0x255   : > { %v681_v17 = vadd.f32 %v680_v11, %v667_v10  ;;  %v696_v18 = vrot.slane %v689_v12, 4 }
 0x256   : > { %v676_v19 = vrot.slane %v675_v14, 2  ;;  %v691_v20 = vadd.f32 %v690_v15, %v688_v9  ;;  %v673_v9 = vld [vmem:[#allocation7] sm:$0x3] }
 0x257   : > { %v682_v21 = vrot.slane %v681_v17, 2  ;;  %v697_v22 = vadd.f32 %v696_v18, %v689_v12 }
 0x258   : > { %v677_v23 = vadd.f32 %v676_v19, %v675_v14  ;;  %v692_v24 = vrot.slane %v691_v20, 2 }
 0x259   : > { %v683_v25 = vadd.f32 %v682_v21, %v681_v17  ;;  %v698_v26 = vrot.slane %v697_v22, 2  ;;  %v1455_v21 = vld [vmem:[#allocation13 + $0x8] sm:$0xff] }
 0x25a   : > { %v678_v27 = vrot.slane %v677_v23, 1  ;;  %v693_v28 = vadd.f32 %v692_v24, %v691_v20  ;;  %v1462_v20 = vld [vmem:[#allocation13 + $0x40] sm:$0xff] }
 0x25b   : > { %v684_v29 = vrot.slane %v683_v25, 1  ;;  %v699_v30 = vadd.f32 %v698_v26, %v697_v22 }
 0x25c   : > { %v679_v31 = vadd.f32 %v678_v27, %v677_v23  ;;  %v694_v32 = vrot.slane %v693_v28, 1  ;;  %v1463_v23 = vld [vmem:[#allocation13 + $0x48] sm:$0xff]  ;;  %v1470_v27 = vld [vmem:[#allocation13 + $0x80] sm:$0xff] }
 0x25d   : > { %v685_v33 = vadd.f32 %v684_v29, %v683_v25  ;;  %v700_v34 = vrot.slane %v699_v30, 1  ;;  %v13788_v25 = vcombine.low %v1455_v21, %v1463_v23  ;;  %v13789_v26 = vcombine.high %v1455_v21, %v1463_v23  ;;  %v1471_v29 = vld [vmem:[#allocation13 + $0x88] sm:$0xff]  ;;  %v1582_v23 = vld [vmem:[#allocation13 + $0x400] sm:$0xff] }
 0x25e   : > { %v686_v35 = vmul.f32 0.125, %v679_v31  ;;  %v695_v36 = vadd.f32 %v694_v32, %v693_v28  ;;  %v1478_v28 = vld [vmem:[#allocation13 + $0xc0] sm:$0xff]  ;;  %v1479_v31 = vld [vmem:[#allocation13 + $0xc8] sm:$0xff] }
 0x25f   : > { %v687_v37 = vmul.f32 0.125, %v685_v33  ;;  %v701_v38 = vadd.f32 %v700_v34, %v699_v30  ;;  %4608 = vmatprep.subr.bf16.mxu0 %v13789_v26  ;;  %v13803_v30 = vcombine.high %v1470_v27, %v1478_v28  ;;  %v13802_v32 = vcombine.low %v1470_v27, %v1478_v28  ;;  %v1591_v27 = vld [vmem:[#allocation13 + $0x448] sm:$0xff] }
 0x260   : > { %v702_v39 = vmul.f32 0.125, %v695_v36  ;;  %v704_v40 = vmul.f32 %v686_v35, %v686_v35  ;;  %v13804_v33 = vcombine.low %v1471_v29, %v1479_v31  ;;  %v13805_v34 = vcombine.high %v1471_v29, %v1479_v31  ;;  %v1494_v36 = vld [vmem:[#allocation13 + $0x140] sm:$0xff] }
 0x261   : > { %v703_v41 = vmul.f32 0.125, %v701_v38  ;;  %v705_v42 = vmul.f32 %v687_v37, %v687_v37  ;;  %v1598_v31 = vld [vmem:[#allocation13 + $0x480] sm:$0xff] }
 0x262   : > { %v706_v43 = vsub.f32 %v702_v39, %v704_v40  ;;  %v1495_v39 = vld [vmem:[#allocation13 + $0x148] sm:$0xff] }
 0x263   : > { %v707_v44 = vsub.f32 %v703_v41, %v705_v42 }
 0x264   : > { %v708_v45 = vmax.f32 %v706_v43, 0.0  ;;  %v1502_v43 = vld [vmem:[#allocation13 + $0x180] sm:$0xff] }
 0x265   : > { %v709_v46 = vmax.f32 %v707_v44, 0.0  ;;  %v1510_v44 = vld [vmem:[#allocation13 + $0x1c0] sm:$0xff] }
 0x266   : > { %v710_v47 = vadd.f32 1e-05, %v708_v45  ;;  %v1503_v45 = vld [vmem:[#allocation13 + $0x188] sm:$0xff] }
 0x267   : > { %v711_v48 = vadd.f32 1e-05, %v709_v46  ;;  %v13835_v46 = vcombine.high %v1502_v43, %v1510_v44 }
 0x268   : > { %15735 = vrsqrt.f32 %v710_v47  ;;  %v1511_v47 = vld [vmem:[#allocation13 + $0x1c8] sm:$0xff] }
 0x269   : > { %15737 = vrsqrt.f32 %v711_v48  ;;  %v13834_v48 = vcombine.low %v1502_v43, %v1510_v44  ;;  %v13836_v49 = vcombine.low %v1503_v45, %v1511_v47  ;;  %v13837_v50 = vcombine.high %v1503_v45, %v1511_v47  ;;  %v1623_v43 = vld [vmem:[#allocation13 + $0x548] sm:$0xff]  ;;  %v1630_v47 = vld [vmem:[#allocation13 + $0x580] sm:$0xff] }
 0x272   : > { %v15736_v54 = vpop.eup %15735 }
 0x273   : > { %v15738_v56 = vpop.eup %15737 }
 0x274   : > { %v716_v57 = vcombine.low %v15736_v54, %v15738_v56  ;;  %v1519_v54 = vld [vmem:[#allocation13 + $0x208] sm:$0xff]  ;;  %v13851_v56 = vcombine.high %v1518_v51, %v1526_v52 }
 0x276   : > { %v723_v58 = vrot.slane %v716_v57, %v16673_v55  ;;  %v1527_v57 = vld [vmem:[#allocation13 + $0x248] sm:$0xff] }
 0x278   : > { %v730_v60 = vrot.slane %v723_v58, %v16673_v55  ;;  %v13850_v58 = vcombine.low %v1518_v51, %v1526_v52  ;;  %v1639_v51 = vld [vmem:[#allocation13 + $0x5c8] sm:$0xff] }
 0x27a   : > { %v732_v63 = vmul.f32 %v730_v60, %v672_v59  ;;  %v13852_v59 = vcombine.low %v1519_v54, %v1527_v57  ;;  %v13853_v60 = vcombine.high %v1519_v54, %v1527_v57  ;;  %v1646_v57 = vld [vmem:[#allocation13 + $0x600] sm:$0xff] }
 0x27c   : > { %v737_v0 = vrot.slane %v732_v63, %v16678_v61  ;;  %v741_v1 = vrot.slane %v732_v63, %v16681_v62  ;;  %v1534_v63 = vld [vmem:[#allocation13 + $0x280] sm:$0xff] }
 0x27e   : > { %v745_v2 = vmul.f32 %v741_v1, %v667_v10  ;;  %v746_v3 = vmul.f32 %v737_v0, %v686_v35  ;;  %v747_v4 = vmul.f32 %v741_v1, %v687_v37  ;;  %v744_v5 = vmul.f32 %v737_v0, %v16664_v7  ;;  %v1454_v7 = vld [vmem:[#allocation13] sm:$0xff]  ;;  %v1487_v37 = vld [vmem:[#allocation13 + $0x108] sm:$0xff] }
 0x27f   : > { %v13787_v22 = vcombine.high %v1454_v7, %v1462_v20  ;;  %v13786_v24 = vcombine.low %v1454_v7, %v1462_v20  ;;  %v1486_v35 = vld [vmem:[#allocation13 + $0x100] sm:$0xff]  ;;  %v13820_v41 = vcombine.low %v1487_v37, %v1495_v39  ;;  %v13821_v42 = vcombine.high %v1487_v37, %v1495_v39  ;;  %v1535_v1 = vld [vmem:[#allocation13 + $0x288] sm:$0xff] }
 0x280   : > { %v750_v6 = vcombine.low %v746_v3, %v747_v4  ;;  %v13819_v38 = vcombine.high %v1486_v35, %v1494_v36  ;;  %v13818_v40 = vcombine.low %v1486_v35, %v1494_v36  ;;  %v1542_v0 = vld [vmem:[#allocation13 + $0x2c0] sm:$0xff]  ;;  %v1543_v3 = vld [vmem:[#allocation13 + $0x2c8] sm:$0xff] }
 0x281   : > { %4526 = vmatprep.subr.bf16.mxu1 %v13787_v22  ;;  %v13866_v4 = vcombine.low %v1534_v63, %v1542_v0  ;;  %v1575_v7 = vld [vmem:[#allocation13 + $0x3c8] sm:$0xff]  ;;  %v1614_v39 = vld [vmem:[#allocation13 + $0x500] sm:$0xff] }
 0x282   : > { %v757_v8 = vrot.slane %v750_v6, %v16673_v55  ;;  %v13869_v6 = vcombine.high %v1535_v1, %v1543_v3  ;;  %v1607_v35 = vld [vmem:[#allocation13 + $0x4c8] sm:$0xff] }
 0x284   : > { %v764_v11 = vrot.slane %v757_v8, %v16673_v55  ;;  %v1550_v8 = vld [vmem:[#allocation13 + $0x300] sm:$0xff] }
 0x286   : > { %v766_v12 = vsub.f32 %v673_v9, %v764_v11  ;;  %v1558_v9 = vld [vmem:[#allocation13 + $0x340] sm:$0xff]  ;;  %v1551_v11 = vld [vmem:[#allocation13 + $0x308] sm:$0xff] }
 0x288   : > { %v775_v13 = vrot.slane %v766_v12, %v16681_v62  ;;  %v771_v14 = vrot.slane %v766_v12, %v16678_v61  ;;  %v13883_v12 = vcombine.high %v1550_v8, %v1558_v9 }
 0x28a   : > { %v779_v15 = vadd.f32 %v775_v13, %v745_v2  ;;  %v778_v16 = vadd.f32 %v771_v14, %v744_v5  ;;  %v13867_v2 = vcombine.high %v1534_v63, %v1542_v0  ;;  %v13868_v5 = vcombine.low %v1535_v1, %v1543_v3  ;;  %v1559_v13 = vld [vmem:[#allocation13 + $0x348] sm:$0xff]  ;;  %v1662_v3 = vld [vmem:[#allocation13 + $0x680] sm:$0xff] }
 0x28b   : > { %v13882_v14 = vcombine.low %v1550_v8, %v1558_v9  ;;  %v1655_v63 = vld [vmem:[#allocation13 + $0x648] sm:$0xff] }
 0x28c   : > { %v781_v17 = vmax.f32 %v779_v15, 0.0  ;;  %v780_v18 = vmax.f32 %v778_v16, 0.0  ;;  %v13884_v15 = vcombine.low %v1551_v11, %v1559_v13  ;;  %v13885_v16 = vcombine.high %v1551_v11, %v1559_v13  ;;  %v1671_v8 = vld [vmem:[#allocation13 + $0x6c8] sm:$0xff]  ;;  %v1678_v13 = vld [vmem:[#allocation13 + $0x700] sm:$0xff] }
 0x28e   : > { %v783_v10 = vpack.c.bf16 %v781_v17, %v781_v17  ;;  %v782_v19 = vpack.c.bf16 %v780_v18, %v780_v18  ;;  %v1566_v17 = vld [vmem:[#allocation13 + $0x380] sm:$0xff] }
 0x28f   : > { %v1574_v18 = vld [vmem:[#allocation13 + $0x3c0] sm:$0xff] }
 0x290   : > { %1200 = vmatprep.mubr.bf16.mxu1 %v783_v10  ;;  %1241 = vmatprep.mubr.bf16.mxu0 %v783_v10  ;;  %v1567_v10 = vld [vmem:[#allocation13 + $0x388] sm:$0xff]  ;;  %v13898_v20 = vcombine.low %v1566_v17, %v1574_v18 }
 0x291   : > { %1201 = vmatmul.mubr.bf16.vlgmr.msra.gmra.mrb[0].mxu1 %v782_v19  ;;  %1242 = vmatmul.mubr.bf16.vlgmr.msra.gmra.mrb[4].mxu0 %v782_v19  ;;  %v13899_v19 = vcombine.high %v1566_v17, %v1574_v18  ;;  %v13900_v21 = vcombine.low %v1567_v10, %v1575_v7  ;;  %v13901_v22 = vcombine.high %v1567_v10, %v1575_v7  ;;  %v1687_v17 = vld [vmem:[#allocation13 + $0x748] sm:$0xff]  ;;  %v1694_v7 = vld [vmem:[#allocation13 + $0x780] sm:$0xff] }
 0x292   : > { %4527 = vmatpush1.bf16.msra.mxu1 %v13786_v24  ;;  %4609 = vmatpush1.bf16.msra.mxu0 %v13788_v25  ;;  %v1590_v24 = vld [vmem:[#allocation13 + $0x440] sm:$0xff]  ;;  %v1583_v25 = vld [vmem:[#allocation13 + $0x408] sm:$0xff] }
 0x293   : > { %4528 = vmatprep.subr.bf16.mxu1 %v13803_v30  ;;  %4610 = vmatprep.subr.bf16.mxu0 %v13805_v34  ;;  %v13915_v26 = vcombine.high %v1582_v23, %v1590_v24  ;;  %v13914_v28 = vcombine.low %v1582_v23, %v1590_v24  ;;  %v13916_v29 = vcombine.low %v1583_v25, %v1591_v27  ;;  %v1703_v23 = vld [vmem:[#allocation13 + $0x7c8] sm:$0xff] }
 0x294   : > { %v13917_v30 = vcombine.high %v1583_v25, %v1591_v27  ;;  %v16690_v27 = vld [vmem:[#allocation13 + $0x800] sm:$0xff] }
 0x296   : > { %4529 = vmatpush1.bf16.msra.mxu1 %v13802_v32  ;;  %4611 = vmatpush1.bf16.msra.mxu0 %v13804_v33  ;;  %v1606_v32 = vld [vmem:[#allocation13 + $0x4c0] sm:$0xff]  ;;  %v1599_v33 = vld [vmem:[#allocation13 + $0x488] sm:$0xff] }
 0x297   : > { %4530 = vmatprep.subr.bf16.mxu1 %v13819_v38  ;;  %4612 = vmatprep.subr.bf16.mxu0 %v13821_v42  ;;  %v13931_v34 = vcombine.high %v1598_v31, %v1606_v32  ;;  %v13930_v36 = vcombine.low %v1598_v31, %v1606_v32  ;;  %v13932_v37 = vcombine.low %v1599_v33, %v1607_v35  ;;  %v16698_v31 = vld [vmem:[#allocation13 + $0x848] sm:$0xff] }
 0x298   : > { %v13933_v38 = vcombine.high %v1599_v33, %v1607_v35 }
 0x29a   : > { %4531 = vmatpush1.bf16.msra.mxu1 %v13818_v40  ;;  %4613 = vmatpush1.bf16.msra.mxu0 %v13820_v41  ;;  %v1622_v40 = vld [vmem:[#allocation13 + $0x540] sm:$0xff]  ;;  %v1615_v41 = vld [vmem:[#allocation13 + $0x508] sm:$0xff] }
 0x29b   : > { %4532 = vmatprep.subr.bf16.mxu1 %v13835_v46  ;;  %4614 = vmatprep.subr.bf16.mxu0 %v13837_v50  ;;  %v13947_v42 = vcombine.high %v1614_v39, %v1622_v40  ;;  %v13946_v44 = vcombine.low %v1614_v39, %v1622_v40  ;;  %v13948_v45 = vcombine.low %v1615_v41, %v1623_v43 }
 0x29c   : > { %v13949_v46 = vcombine.high %v1615_v41, %v1623_v43 }
 0x29e   : > { %4533 = vmatpush1.bf16.msra.mxu1 %v13834_v48  ;;  %4615 = vmatpush1.bf16.msra.mxu0 %v13836_v49  ;;  %v1638_v48 = vld [vmem:[#allocation13 + $0x5c0] sm:$0xff]  ;;  %v1631_v49 = vld [vmem:[#allocation13 + $0x588] sm:$0xff] }
 0x29f   : > { %4534 = vmatprep.subr.bf16.mxu1 %v13851_v56  ;;  %4616 = vmatprep.subr.bf16.mxu0 %v13853_v60  ;;  %v13963_v50 = vcombine.high %v1630_v47, %v1638_v48  ;;  %v13962_v52 = vcombine.low %v1630_v47, %v1638_v48  ;;  %v13964_v54 = vcombine.low %v1631_v49, %v1639_v51 }
 0x2a0   : > { %v13965_v56 = vcombine.high %v1631_v49, %v1639_v51 }
 0x2a2   : > { %4535 = vmatpush1.bf16.msra.mxu1 %v13850_v58  ;;  %4617 = vmatpush1.bf16.msra.mxu0 %v13852_v59  ;;  %v1654_v58 = vld [vmem:[#allocation13 + $0x640] sm:$0xff]  ;;  %v1647_v59 = vld [vmem:[#allocation13 + $0x608] sm:$0xff] }
 0x2a3   : > { %4536 = vmatprep.subr.bf16.mxu1 %v13867_v2  ;;  %4618 = vmatprep.subr.bf16.mxu0 %v13869_v6  ;;  %v13979_v60 = vcombine.high %v1646_v57, %v1654_v58  ;;  %v13978_v0 = vcombine.low %v1646_v57, %v1654_v58  ;;  %v13980_v1 = vcombine.low %v1647_v59, %v1655_v63 }
 0x2a4   : > { %v13981_v2 = vcombine.high %v1647_v59, %v1655_v63 }
 0x2a6   : > { %4537 = vmatpush1.bf16.msra.mxu1 %v13866_v4  ;;  %4619 = vmatpush1.bf16.msra.mxu0 %v13868_v5  ;;  %v1670_v4 = vld [vmem:[#allocation13 + $0x6c0] sm:$0xff]  ;;  %v1663_v5 = vld [vmem:[#allocation13 + $0x688] sm:$0xff] }
 0x2a7   : > { %4538 = vmatprep.subr.bf16.mxu1 %v13883_v12  ;;  %4620 = vmatprep.subr.bf16.mxu0 %v13885_v16  ;;  %v13995_v6 = vcombine.high %v1662_v3, %v1670_v4  ;;  %v13994_v9 = vcombine.low %v1662_v3, %v1670_v4  ;;  %v13996_v11 = vcombine.low %v1663_v5, %v1671_v8 }
 0x2a8   : > { %v13997_v12 = vcombine.high %v1663_v5, %v1671_v8 }
 0x2aa   : > { %4539 = vmatpush1.bf16.msra.mxu1 %v13882_v14  ;;  %4621 = vmatpush1.bf16.msra.mxu0 %v13884_v15  ;;  %v1686_v14 = vld [vmem:[#allocation13 + $0x740] sm:$0xff]  ;;  %v1679_v15 = vld [vmem:[#allocation13 + $0x708] sm:$0xff] }
 0x2ab   : > { %4540 = vmatprep.subr.bf16.mxu1 %v13899_v19  ;;  %4622 = vmatprep.subr.bf16.mxu0 %v13901_v22  ;;  %v14011_v16 = vcombine.high %v1678_v13, %v1686_v14  ;;  %v14010_v18 = vcombine.low %v1678_v13, %v1686_v14  ;;  %v14012_v10 = vcombine.low %v1679_v15, %v1687_v17 }
 0x2ac   : > { %v14013_v19 = vcombine.high %v1679_v15, %v1687_v17 }
 0x2ae   : > { %4541 = vmatpush1.bf16.msra.mxu1 %v13898_v20  ;;  %4623 = vmatpush1.bf16.msra.mxu0 %v13900_v21  ;;  %v1702_v20 = vld [vmem:[#allocation13 + $0x7c0] sm:$0xff]  ;;  %v1695_v21 = vld [vmem:[#allocation13 + $0x788] sm:$0xff] }
 0x2af   : > { %4542 = vmatprep.subr.bf16.mxu1 %v13915_v26  ;;  %4624 = vmatprep.subr.bf16.mxu0 %v13917_v30  ;;  %v14027_v22 = vcombine.high %v1694_v7, %v1702_v20  ;;  %v14026_v24 = vcombine.low %v1694_v7, %v1702_v20  ;;  %v14028_v25 = vcombine.low %v1695_v21, %v1703_v23 }
 0x2b0   : > { %v14029_v26 = vcombine.high %v1695_v21, %v1703_v23 }
 0x2b2   : > { %4543 = vmatpush1.bf16.msra.mxu1 %v13914_v28  ;;  %4625 = vmatpush1.bf16.msra.mxu0 %v13916_v29  ;;  %v16692_v28 = vld [vmem:[#allocation13 + $0x840] sm:$0xff]  ;;  %v16694_v29 = vld [vmem:[#allocation13 + $0x808] sm:$0xff] }
 0x2b3   : > { %4544 = vmatprep.subr.bf16.mxu1 %v13931_v34  ;;  %4626 = vmatprep.subr.bf16.mxu0 %v13933_v38  ;;  %v14043_v30 = vcombine.high %v16690_v27, %v16692_v28  ;;  %v14042_v32 = vcombine.low %v16690_v27, %v16692_v28  ;;  %v14044_v33 = vcombine.low %v16694_v29, %v16698_v31 }
 0x2b4   : > { %v14045_v34 = vcombine.high %v16694_v29, %v16698_v31 }
 0x2b6   : > { %4545 = vmatpush1.bf16.msra.mxu1 %v13930_v36  ;;  %4627 = vmatpush1.bf16.msra.mxu0 %v13932_v37 }
 0x2b7   : > { %4546 = vmatprep.subr.bf16.mxu1 %v13947_v42  ;;  %4628 = vmatprep.subr.bf16.mxu0 %v13949_v46 }
 0x2ba   : > { %4547 = vmatpush1.bf16.msra.mxu1 %v13946_v44  ;;  %4629 = vmatpush1.bf16.msra.mxu0 %v13948_v45 }
 0x2bb   : > { %4548 = vmatprep.subr.bf16.mxu1 %v13963_v50  ;;  %4630 = vmatprep.subr.bf16.mxu0 %v13965_v56 }
 0x2be   : > { %4549 = vmatpush1.bf16.msra.mxu1 %v13962_v52  ;;  %4631 = vmatpush1.bf16.msra.mxu0 %v13964_v54 }
 0x2bf   : > { %4550 = vmatprep.subr.bf16.mxu1 %v13979_v60  ;;  %4632 = vmatprep.subr.bf16.mxu0 %v13981_v2 }
 0x2c2   : > { %4551 = vmatpush1.bf16.msra.mxu1 %v13978_v0  ;;  %4633 = vmatpush1.bf16.msra.mxu0 %v13980_v1 }
 0x2c3   : > { %4552 = vmatprep.subr.bf16.mxu1 %v13995_v6  ;;  %4634 = vmatprep.subr.bf16.mxu0 %v13997_v12 }
 0x2c6   : > { %4553 = vmatpush1.bf16.msra.mxu1 %v13994_v9  ;;  %4635 = vmatpush1.bf16.msra.mxu0 %v13996_v11 }
 0x2c7   : > { %4554 = vmatprep.subr.bf16.mxu1 %v14011_v16  ;;  %4636 = vmatprep.subr.bf16.mxu0 %v14013_v19 }
 0x2ca   : > { %4555 = vmatpush1.bf16.msra.mxu1 %v14010_v18  ;;  %4637 = vmatpush1.bf16.msra.mxu0 %v14012_v10 }
 0x2cb   : > { %4556 = vmatprep.subr.bf16.mxu1 %v14027_v22  ;;  %4638 = vmatprep.subr.bf16.mxu0 %v14029_v26 }
 0x2ce   : > { %4557 = vmatpush1.bf16.msra.mxu1 %v14026_v24  ;;  %4639 = vmatpush1.bf16.msra.mxu0 %v14028_v25 }
 0x2cf   : > { %4567 = vmatprep.subr.bf16.mxu1 %v14043_v30  ;;  %4649 = vmatprep.subr.bf16.mxu0 %v14045_v34 }
 0x364   : > { %v16706_v35 = vpop.f32.mrb[0].mxu1  ;;  %v16708_v36 = vpop.f32.mrb[4].mxu0 }
 0x365   : > { %v1252_v37 = vrot.slane %v16706_v35, 4  ;;  %v1280_v38 = vmul.f32 %v16706_v35, %v16706_v35  ;;  %v1264_v39 = vrot.slane %v16708_v36, 4  ;;  %v1282_v40 = vmul.f32 %v16708_v36, %v16708_v36  ;;  %v16716_v41 = vpop.f32.mrb[1].mxu1  ;;  %v16718_v42 = vpop.f32.mrb[5].mxu0 }
 0x366   : > { %v1258_v43 = vrot.slane %v16716_v41, 4  ;;  %v1281_v44 = vmul.f32 %v16716_v41, %v16716_v41  ;;  %v1270_v45 = vrot.slane %v16718_v42, 4  ;;  %v1283_v46 = vmul.f32 %v16718_v42, %v16718_v42  ;;  %v1206_v47 = vpop.f32.mrb[2].mxu1  ;;  %v1247_v48 = vpop.f32.mrb[6].mxu0 }
 0x367   : > { %v1253_v49 = vadd.f32 %v1252_v37, %v16706_v35  ;;  %v1284_v50 = vrot.slane %v1280_v38, 4  ;;  %v1265_v51 = vadd.f32 %v1264_v39, %v16708_v36  ;;  %v1296_v52 = vrot.slane %v1282_v40, 4  ;;  %v1207_v54 = vpop.f32.mrb[3].mxu1  ;;  %v1248_v56 = vpop.f32.mrb[7].mxu0 }
 0x368   : > { %v1259_v57 = vadd.f32 %v1258_v43, %v16716_v41  ;;  %v1290_v58 = vrot.slane %v1281_v44, 4  ;;  %v1271_v59 = vadd.f32 %v1270_v45, %v16718_v42  ;;  %v1302_v60 = vrot.slane %v1283_v46, 4 }
 0x369   : > { %v1254_v63 = vrot.slane %v1253_v49, 2  ;;  %v1285_v0 = vadd.f32 %v1284_v50, %v1280_v38  ;;  %v1266_v1 = vrot.slane %v1265_v51, 2  ;;  %v1297_v2 = vadd.f32 %v1296_v52, %v1282_v40 }
 0x36a   : > { %v1260_v3 = vrot.slane %v1259_v57, 2  ;;  %v1291_v4 = vadd.f32 %v1290_v58, %v1281_v44  ;;  %v1272_v5 = vrot.slane %v1271_v59, 2  ;;  %v1303_v6 = vadd.f32 %v1302_v60, %v1283_v46 }
 0x36b   : > { %v1255_v8 = vadd.f32 %v1254_v63, %v1253_v49  ;;  %v1286_v9 = vrot.slane %v1285_v0, 2  ;;  %v1267_v11 = vadd.f32 %v1266_v1, %v1265_v51  ;;  %v1298_v12 = vrot.slane %v1297_v2, 2 }
 0x36c   : > { %v1261_v13 = vadd.f32 %v1260_v3, %v1259_v57  ;;  %v1292_v14 = vrot.slane %v1291_v4, 2  ;;  %v1273_v15 = vadd.f32 %v1272_v5, %v1271_v59  ;;  %v1304_v16 = vrot.slane %v1303_v6, 2 }
 0x36d   : > { %v1256_v17 = vrot.slane %v1255_v8, 1  ;;  %v1287_v18 = vadd.f32 %v1286_v9, %v1285_v0  ;;  %v1268_v10 = vrot.slane %v1267_v11, 1  ;;  %v1299_v19 = vadd.f32 %v1298_v12, %v1297_v2 }
 0x36e   : > { %v1262_v7 = vrot.slane %v1261_v13, 1  ;;  %v1293_v20 = vadd.f32 %v1292_v14, %v1291_v4  ;;  %v1274_v21 = vrot.slane %v1273_v15, 1  ;;  %v1305_v22 = vadd.f32 %v1304_v16, %v1303_v6 }
 0x36f   : > { %v1257_v23 = vadd.f32 %v1256_v17, %v1255_v8  ;;  %v1288_v24 = vrot.slane %v1287_v18, 1  ;;  %v1269_v25 = vadd.f32 %v1268_v10, %v1267_v11  ;;  %v1300_v26 = vrot.slane %v1299_v19, 1 }
 0x370   : > { %v1263_v30 = vadd.f32 %v1262_v7, %v1261_v13  ;;  %v1294_v34 = vrot.slane %v1293_v20, 1  ;;  %v1275_v37 = vadd.f32 %v1274_v21, %v1273_v15  ;;  %v1306_v38 = vrot.slane %v1305_v22, 1 }
 0x371   : > { %v1276_v39 = vmul.f32 0.125, %v1257_v23  ;;  %v1289_v40 = vadd.f32 %v1288_v24, %v1287_v18  ;;  %v1278_v43 = vmul.f32 0.125, %v1269_v25  ;;  %v1301_v44 = vadd.f32 %v1300_v26, %v1299_v19  ;;  %v1250_v19 = vld [vmem:[#allocation10] sm:$0xf] }
 0x372   : > { %v1277_v45 = vmul.f32 0.125, %v1263_v30  ;;  %v1295_v46 = vadd.f32 %v1294_v34, %v1293_v20  ;;  %v1279_v47 = vmul.f32 0.125, %v1275_v37  ;;  %v1307_v48 = vadd.f32 %v1306_v38, %v1305_v22 }
 0x373   : > { %v1308_v49 = vmul.f32 0.125, %v1289_v40  ;;  %v1312_v50 = vmul.f32 %v1276_v39, %v1276_v39  ;;  %v1310_v51 = vmul.f32 0.125, %v1301_v44  ;;  %v1314_v52 = vmul.f32 %v1278_v43, %v1278_v43 }
 0x374   : > { %v1309_v54 = vmul.f32 0.125, %v1295_v46  ;;  %v1313_v56 = vmul.f32 %v1277_v45, %v1277_v45  ;;  %v1311_v57 = vmul.f32 0.125, %v1307_v48  ;;  %v1315_v58 = vmul.f32 %v1279_v47, %v1279_v47 }
 0x375   : > { %v1316_v59 = vsub.f32 %v1308_v49, %v1312_v50  ;;  %v1318_v60 = vsub.f32 %v1310_v51, %v1314_v52  ;;  %v16734_v20 = vsub.s32 2, %v16670_v53  ;;  %v16737_v21 = vsub.s32 3, %v16670_v53 }
 0x376   : > { %v1317_v63 = vsub.f32 %v1309_v54, %v1313_v56  ;;  %v1319_v0 = vsub.f32 %v1311_v57, %v1315_v58  ;;  %v1251_v56 = vld [vmem:[#allocation12] sm:$0xf] }
 0x377   : > { %v1320_v1 = vmax.f32 %v1316_v59, 0.0  ;;  %v1322_v2 = vmax.f32 %v1318_v60, 0.0 }
 0x378   : > { %v1321_v3 = vmax.f32 %v1317_v63, 0.0  ;;  %v1323_v4 = vmax.f32 %v1319_v0, 0.0  ;;  %v1726_v63 = vld [vmem:[#allocation13 + $0x880] sm:$0xff] }
 0x379   : > { %v1324_v5 = vadd.f32 1e-05, %v1320_v1  ;;  %v1326_v6 = vadd.f32 1e-05, %v1322_v2  ;;  %v1734_v1 = vld [vmem:[#allocation13 + $0x8c0] sm:$0xff]  ;;  %v1727_v2 = vld [vmem:[#allocation13 + $0x888] sm:$0xff] }
 0x37a   : > { %v1325_v8 = vadd.f32 1e-05, %v1321_v3  ;;  %v1327_v9 = vadd.f32 1e-05, %v1323_v4  ;;  %v1735_v3 = vld [vmem:[#allocation13 + $0x8c8] sm:$0xff] }
 0x37b   : > { %15739 = vrsqrt.f32 %v1324_v5 }
 0x37c   : > { %15741 = vrsqrt.f32 %v1326_v6  ;;  %v1742_v6 = vld [vmem:[#allocation13 + $0x900] sm:$0xff] }
 0x37d   : > { %15743 = vrsqrt.f32 %v1325_v8  ;;  %v14059_v8 = vcombine.high %v1726_v63, %v1734_v1 }
 0x37e   : > { %15745 = vrsqrt.f32 %v1327_v9  ;;  %v14061_v9 = vcombine.high %v1727_v2, %v1735_v3 }
 0x385   : > { %v15740_v11 = vpop.eup %15739 }
 0x386   : > { %v15742_v12 = vpop.eup %15741 }
 0x387   : > { %v15744_v13 = vpop.eup %15743 }
 0x388   : > { %v15746_v14 = vpop.eup %15745  ;;  %v1336_v15 = vcombine.low %v15740_v11, %v15744_v13  ;;  %v1750_v11 = vld [vmem:[#allocation13 + $0x940] sm:$0xff]  ;;  %v1751_v13 = vld [vmem:[#allocation13 + $0x948] sm:$0xff] }
 0x389   : > { %v1337_v16 = vcombine.low %v15742_v12, %v15746_v14  ;;  %v1743_v12 = vld [vmem:[#allocation13 + $0x908] sm:$0xff]  ;;  %v14074_v27 = vcombine.low %v1742_v6, %v1750_v11 }
 0x38a   : > { %v1344_v17 = vrot.slane %v1336_v15, %v16673_v55  ;;  %v14058_v15 = vcombine.low %v1726_v63, %v1734_v1  ;;  %v14076_v28 = vcombine.low %v1743_v12, %v1751_v13  ;;  %v1846_v1 = vld [vmem:[#allocation13 + $0xc40] sm:$0xff] }
 0x38b   : > { %v1351_v18 = vrot.slane %v1337_v16, %v16673_v55  ;;  %v14060_v16 = vcombine.low %v1727_v2, %v1735_v3  ;;  %v1839_v2 = vld [vmem:[#allocation13 + $0xc08] sm:$0xff] }
 0x38c   : > { %v1847_v3 = vld [vmem:[#allocation13 + $0xc48] sm:$0xff] }
 0x38d   : > { %v1352_v10 = vcombine.low %v1344_v17, %v1351_v18  ;;  %v14075_v17 = vcombine.high %v1742_v6, %v1750_v11  ;;  %v14077_v18 = vcombine.high %v1743_v12, %v1751_v13  ;;  %v14173_v11 = vcombine.high %v1839_v2, %v1847_v3  ;;  %v1854_v12 = vld [vmem:[#allocation13 + $0xc80] sm:$0xff] }
 0x38e   : > { %v1862_v13 = vld [vmem:[#allocation13 + $0xcc0] sm:$0xff] }
 0x38f   : > { %v1359_v7 = vrot.slane %v1352_v10, %v16673_v55  ;;  %v1758_v10 = vld [vmem:[#allocation13 + $0x980] sm:$0xff] }
 0x391   : > { %v1361_v22 = vmul.f32 %v1359_v7, %v1250_v19  ;;  %v1766_v19 = vld [vmem:[#allocation13 + $0x9c0] sm:$0xff]  ;;  %v1759_v7 = vld [vmem:[#allocation13 + $0x988] sm:$0xff] }
 0x392   : > { %v14091_v29 = vcombine.high %v1758_v10, %v1766_v19 }
 0x393   : > { %v1366_v23 = vrot.slane %v1361_v22, %v16678_v61  ;;  %v1370_v24 = vrot.slane %v1361_v22, %v16681_v62  ;;  %v1374_v25 = vrot.slane %v1361_v22, %v16734_v20  ;;  %v1378_v26 = vrot.slane %v1361_v22, %v16737_v21  ;;  %v1767_v22 = vld [vmem:[#allocation13 + $0x9c8] sm:$0xff] }
 0x394   : > { %v14093_v31 = vcombine.high %v1759_v7, %v1767_v22 }
 0x395   : > { %v1383_v30 = vmul.f32 %v1366_v23, %v16706_v35  ;;  %v1384_v34 = vmul.f32 %v1370_v24, %v16716_v41  ;;  %v1385_v37 = vmul.f32 %v1374_v25, %v16708_v36  ;;  %v1386_v38 = vmul.f32 %v1378_v26, %v16718_v42 }
 0x396   : > { %v1387_v40 = vmul.f32 %v1366_v23, %v1276_v39  ;;  %v1388_v44 = vmul.f32 %v1370_v24, %v1277_v45  ;;  %v1389_v46 = vmul.f32 %v1374_v25, %v1278_v43  ;;  %v1390_v48 = vmul.f32 %v1378_v26, %v1279_v47  ;;  %v1775_v23 = vld [vmem:[#allocation13 + $0xa08] sm:$0xff] }
 0x397   : > { %v1783_v24 = vld [vmem:[#allocation13 + $0xa48] sm:$0xff]  ;;  %v14090_v25 = vcombine.low %v1758_v10, %v1766_v19  ;;  %v14092_v26 = vcombine.low %v1759_v7, %v1767_v22  ;;  %v14187_v10 = vcombine.high %v1854_v12, %v1862_v13  ;;  %v1870_v7 = vld [vmem:[#allocation13 + $0xd00] sm:$0xff] }
 0x398   : > { %v1395_v49 = vcombine.low %v1387_v40, %v1388_v44  ;;  %v1396_v50 = vcombine.low %v1389_v46, %v1390_v48  ;;  %v1791_v40 = vld [vmem:[#allocation13 + $0xa88] sm:$0xff]  ;;  %v14108_v48 = vcombine.low %v1775_v23, %v1783_v24  ;;  %v1878_v22 = vld [vmem:[#allocation13 + $0xd40] sm:$0xff] }
 0x399   : > { %v1799_v44 = vld [vmem:[#allocation13 + $0xac8] sm:$0xff] }
 0x39a   : > { %v1403_v51 = vrot.slane %v1395_v49, %v16673_v55  ;;  %v1410_v52 = vrot.slane %v1396_v50, %v16673_v55  ;;  %v14125_v50 = vcombine.high %v1791_v40, %v1799_v44 }
 0x39c   : > { %v1411_v54 = vcombine.low %v1403_v51, %v1410_v52  ;;  %v1806_v51 = vld [vmem:[#allocation13 + $0xb00] sm:$0xff] }
 0x39d   : > { %v1814_v52 = vld [vmem:[#allocation13 + $0xb40] sm:$0xff] }
 0x39e   : > { %v1418_v35 = vrot.slane %v1411_v54, %v16673_v55  ;;  %v1807_v54 = vld [vmem:[#allocation13 + $0xb08] sm:$0xff] }
 0x3a0   : > { %v1420_v57 = vsub.f32 %v1251_v56, %v1418_v35  ;;  %v1815_v56 = vld [vmem:[#allocation13 + $0xb48] sm:$0xff] }
 0x3a2   : > { %v1425_v41 = vrot.slane %v1420_v57, %v16678_v61  ;;  %v1429_v36 = vrot.slane %v1420_v57, %v16681_v62  ;;  %v1433_v42 = vrot.slane %v1420_v57, %v16734_v20  ;;  %v1437_v39 = vrot.slane %v1420_v57, %v16737_v21 }
 0x3a3   : > { %v14124_v57 = vcombine.low %v1791_v40, %v1799_v44  ;;  %v1902_v40 = vld [vmem:[#allocation13 + $0xe00] sm:$0xff] }
 0x3a4   : > { %v1442_v43 = vadd.f32 %v1425_v41, %v1383_v30  ;;  %v1443_v45 = vadd.f32 %v1429_v36, %v1384_v34  ;;  %v16754_v47 = vadd.f32 %v1433_v42, %v1385_v37  ;;  %v1445_v58 = vadd.f32 %v1437_v39, %v1386_v38  ;;  %v1790_v37 = vld [vmem:[#allocation13 + $0xa80] sm:$0xff] }
 0x3a5   : > { %v14109_v34 = vcombine.high %v1775_v23, %v1783_v24  ;;  %v1798_v38 = vld [vmem:[#allocation13 + $0xac0] sm:$0xff]  ;;  %v14139_v41 = vcombine.high %v1806_v51, %v1814_v52  ;;  %v14141_v36 = vcombine.high %v1807_v54, %v1815_v56 }
 0x3a6   : > { %v1446_v59 = vmax.f32 %v1442_v43, 0.0  ;;  %v1447_v60 = vmax.f32 %v1443_v45, 0.0  ;;  %v1449_v0 = vmax.f32 %v1445_v58, 0.0  ;;  %v14123_v49 = vcombine.high %v1790_v37, %v1798_v38  ;;  %v1822_v42 = vld [vmem:[#allocation13 + $0xb80] sm:$0xff]  ;;  %v1823_v43 = vld [vmem:[#allocation13 + $0xb88] sm:$0xff] }
 0x3a7   : > { %v14122_v35 = vcombine.low %v1790_v37, %v1798_v38  ;;  %v1830_v39 = vld [vmem:[#allocation13 + $0xbc0] sm:$0xff]  ;;  %v1831_v45 = vld [vmem:[#allocation13 + $0xbc8] sm:$0xff]  ;;  %v14138_v58 = vcombine.low %v1806_v51, %v1814_v52 }
 0x3a8   : > { %v16756_v4 = vpack.c.bf16 %v1446_v59, %v1446_v59  ;;  %v16758_v5 = vpack.c.bf16 %v1447_v60, %v1447_v60  ;;  %v16762_v14 = vpack.c.bf16 %v1449_v0, %v1449_v0  ;;  %v14140_v59 = vcombine.low %v1807_v54, %v1815_v56  ;;  %v1838_v0 = vld [vmem:[#allocation13 + $0xc00] sm:$0xff] }
 0x3a9   : > { %v14155_v60 = vcombine.high %v1822_v42, %v1830_v39  ;;  %v14157_v63 = vcombine.high %v1823_v43, %v1831_v45  ;;  %v14154_v6 = vcombine.low %v1822_v42, %v1830_v39  ;;  %v1886_v23 = vld [vmem:[#allocation13 + $0xd80] sm:$0xff] }
 0x3aa   : > { %4558 = vmatprep.mubr.bf16.mxu1 %v16758_v5  ;;  %4640 = vmatprep.mubr.bf16.mxu0 %v16758_v5  ;;  %v1894_v24 = vld [vmem:[#allocation13 + $0xdc0] sm:$0xff] }
 0x3ab   : > { %4559 = vmatmul.mubr.bf16.vlgmr.msra.gmra.mrb[4].mxu1 %v16756_v4  ;;  %4641 = vmatmul.mubr.bf16.vlgmr.msra.gmra.mrb[8].mxu0 %v16756_v4  ;;  %v14219_v37 = vcombine.high %v1886_v23, %v1894_v24  ;;  %v1910_v44 = vld [vmem:[#allocation13 + $0xe40] sm:$0xff] }
 0x3ac   : > { %4568 = vmatpush1.bf16.msra.mxu1 %v14042_v32  ;;  %4650 = vmatpush1.bf16.msra.mxu0 %v14044_v33  ;;  %v1774_v32 = vld [vmem:[#allocation13 + $0xa00] sm:$0xff]  ;;  %v14235_v51 = vcombine.high %v1902_v40, %v1910_v44 }
 0x3ad   : > { %4599 = vmatprep.mubr.bf16.mxu1 %v16762_v14  ;;  %4681 = vmatprep.mubr.bf16.mxu0 %v16762_v14  ;;  %v1782_v33 = vld [vmem:[#allocation13 + $0xa40] sm:$0xff] }
 0x3ae   : > { %4569 = vmatprep.subr.bf16.mxu1 %v14059_v8  ;;  %4651 = vmatprep.subr.bf16.mxu0 %v14061_v9  ;;  %v14107_v30 = vcombine.high %v1774_v32, %v1782_v33  ;;  %v14106_v46 = vcombine.low %v1774_v32, %v1782_v33  ;;  %v14156_v8 = vcombine.low %v1823_v43, %v1831_v45  ;;  %v1918_v54 = vld [vmem:[#allocation13 + $0xe80] sm:$0xff] }
 0x3af   : > { %v14171_v9 = vcombine.high %v1838_v0, %v1846_v1  ;;  %v14203_v32 = vcombine.high %v1870_v7, %v1878_v22  ;;  %v1926_v56 = vld [vmem:[#allocation13 + $0xec0] sm:$0xff] }
 0x3b0   : > { %4570 = vmatpush1.bf16.msra.mxu1 %v14058_v15  ;;  %4652 = vmatpush1.bf16.msra.mxu0 %v14060_v16  ;;  %v1855_v15 = vld [vmem:[#allocation13 + $0xc88] sm:$0xff]  ;;  %v14251_v42 = vcombine.high %v1918_v54, %v1926_v56  ;;  %v1934_v43 = vld [vmem:[#allocation13 + $0xf00] sm:$0xff] }
 0x3b1   : > { %4571 = vmatprep.subr.bf16.mxu1 %v14075_v17  ;;  %4653 = vmatprep.subr.bf16.mxu0 %v14077_v18  ;;  %v1863_v16 = vld [vmem:[#allocation13 + $0xcc8] sm:$0xff]  ;;  %v14170_v17 = vcombine.low %v1838_v0, %v1846_v1  ;;  %v14172_v18 = vcombine.low %v1839_v2, %v1847_v3  ;;  %v1942_v45 = vld [vmem:[#allocation13 + $0xf40] sm:$0xff] }
 0x3b2   : > { %v14189_v19 = vcombine.high %v1855_v15, %v1863_v16  ;;  %v14267_v0 = vcombine.high %v1934_v43, %v1942_v45  ;;  %v1950_v2 = vld [vmem:[#allocation13 + $0xf80] sm:$0xff] }
 0x3b3   : > { %v1958_v3 = vld [vmem:[#allocation13 + $0xfc0] sm:$0xff] }
 0x3b4   : > { %4572 = vmatpush1.bf16.msra.mxu1 %v14074_v27  ;;  %4654 = vmatpush1.bf16.msra.mxu0 %v14076_v28  ;;  %v1871_v27 = vld [vmem:[#allocation13 + $0xd08] sm:$0xff] }
 0x3b5   : > { %4573 = vmatprep.subr.bf16.mxu1 %v14091_v29  ;;  %4655 = vmatprep.subr.bf16.mxu0 %v14093_v31  ;;  %v1879_v28 = vld [vmem:[#allocation13 + $0xd48] sm:$0xff]  ;;  %v14186_v29 = vcombine.low %v1854_v12, %v1862_v13  ;;  %v14188_v31 = vcombine.low %v1855_v15, %v1863_v16  ;;  %v14283_v12 = vcombine.high %v1950_v2, %v1958_v3  ;;  %v1456_v15 = vld [vmem:[#allocation13 + $0x10] sm:$0xff] }
 0x3b6   : > { %v14205_v33 = vcombine.high %v1871_v27, %v1879_v28  ;;  %v1464_v16 = vld [vmem:[#allocation13 + $0x50] sm:$0xff] }
 0x3b8   : > { %4574 = vmatpush1.bf16.msra.mxu1 %v14090_v25  ;;  %4656 = vmatpush1.bf16.msra.mxu0 %v14092_v26  ;;  %v1887_v25 = vld [vmem:[#allocation13 + $0xd88] sm:$0xff] }
 0x3b9   : > { %4575 = vmatprep.subr.bf16.mxu1 %v14107_v30  ;;  %4657 = vmatprep.subr.bf16.mxu0 %v14109_v34  ;;  %v1895_v26 = vld [vmem:[#allocation13 + $0xdc8] sm:$0xff]  ;;  %v14202_v30 = vcombine.low %v1870_v7, %v1878_v22  ;;  %v14204_v34 = vcombine.low %v1871_v27, %v1879_v28  ;;  %v1448_v7 = vmax.f32 %v16754_v47, 0.0  ;;  %v13791_v22 = vcombine.high %v1456_v15, %v1464_v16  ;;  %v1472_v28 = vld [vmem:[#allocation13 + $0x90] sm:$0xff] }
 0x3ba   : > { %v14221_v38 = vcombine.high %v1887_v25, %v1895_v26  ;;  %v1496_v47 = vld [vmem:[#allocation13 + $0x150] sm:$0xff] }
 0x3bc   : > { %4576 = vmatpush1.bf16.msra.mxu1 %v14106_v46  ;;  %4658 = vmatpush1.bf16.msra.mxu0 %v14108_v48  ;;  %v1903_v46 = vld [vmem:[#allocation13 + $0xe08] sm:$0xff] }
 0x3bd   : > { %4577 = vmatprep.subr.bf16.mxu1 %v14123_v49  ;;  %4659 = vmatprep.subr.bf16.mxu0 %v14125_v50  ;;  %v1911_v48 = vld [vmem:[#allocation13 + $0xe48] sm:$0xff]  ;;  %v14218_v49 = vcombine.low %v1886_v23, %v1894_v24  ;;  %v14220_v50 = vcombine.low %v1887_v25, %v1895_v26  ;;  %v16775_v23 = vpack.c.bf16 %v1448_v7, %v1448_v7  ;;  %v1577_v7 = vld [vmem:[#allocation13 + $0x3d8] sm:$0xff] }
 0x3be   : > { %v14237_v52 = vcombine.high %v1903_v46, %v1911_v48 }
 0x3c0   : > { %4578 = vmatpush1.bf16.msra.mxu1 %v14122_v35  ;;  %4660 = vmatpush1.bf16.msra.mxu0 %v14124_v57  ;;  %v1919_v35 = vld [vmem:[#allocation13 + $0xe88] sm:$0xff] }
 0x3c1   : > { %4579 = vmatprep.subr.bf16.mxu1 %v14139_v41  ;;  %4661 = vmatprep.subr.bf16.mxu0 %v14141_v36  ;;  %v1927_v57 = vld [vmem:[#allocation13 + $0xec8] sm:$0xff]  ;;  %v14234_v41 = vcombine.low %v1902_v40, %v1910_v44  ;;  %v14236_v36 = vcombine.low %v1903_v46, %v1911_v48  ;;  %v1504_v48 = vld [vmem:[#allocation13 + $0x190] sm:$0xff] }
 0x3c2   : > { %v14253_v39 = vcombine.high %v1919_v35, %v1927_v57 }
 0x3c4   : > { %4580 = vmatpush1.bf16.msra.mxu1 %v14138_v58  ;;  %4662 = vmatpush1.bf16.msra.mxu0 %v14140_v59  ;;  %v1935_v58 = vld [vmem:[#allocation13 + $0xf08] sm:$0xff] }
 0x3c5   : > { %4581 = vmatprep.subr.bf16.mxu1 %v14155_v60  ;;  %4663 = vmatprep.subr.bf16.mxu0 %v14157_v63  ;;  %v1943_v59 = vld [vmem:[#allocation13 + $0xf48] sm:$0xff]  ;;  %v14250_v60 = vcombine.low %v1918_v54, %v1926_v56  ;;  %v14252_v63 = vcombine.low %v1919_v35, %v1927_v57  ;;  %v1520_v57 = vld [vmem:[#allocation13 + $0x210] sm:$0xff] }
 0x3c6   : > { %v14269_v1 = vcombine.high %v1935_v58, %v1943_v59 }
 0x3c8   : > { %4582 = vmatpush1.bf16.msra.mxu1 %v14154_v6  ;;  %4664 = vmatpush1.bf16.msra.mxu0 %v14156_v8  ;;  %v1951_v6 = vld [vmem:[#allocation13 + $0xf88] sm:$0xff] }
 0x3c9   : > { %4583 = vmatprep.subr.bf16.mxu1 %v14171_v9  ;;  %4665 = vmatprep.subr.bf16.mxu0 %v14173_v11  ;;  %v1959_v8 = vld [vmem:[#allocation13 + $0xfc8] sm:$0xff]  ;;  %v14266_v9 = vcombine.low %v1934_v43, %v1942_v45  ;;  %v14268_v11 = vcombine.low %v1935_v58, %v1943_v59  ;;  %v1536_v59 = vld [vmem:[#allocation13 + $0x290] sm:$0xff] }
 0x3ca   : > { %v14285_v13 = vcombine.high %v1951_v6, %v1959_v8 }
 0x3cc   : > { %4584 = vmatpush1.bf16.msra.mxu1 %v14170_v17  ;;  %4666 = vmatpush1.bf16.msra.mxu0 %v14172_v18  ;;  %v1457_v17 = vld [vmem:[#allocation13 + $0x18] sm:$0xff] }
 0x3cd   : > { %4585 = vmatprep.subr.bf16.mxu1 %v14187_v10  ;;  %4667 = vmatprep.subr.bf16.mxu0 %v14189_v19  ;;  %v1465_v18 = vld [vmem:[#allocation13 + $0x58] sm:$0xff]  ;;  %v14282_v10 = vcombine.low %v1950_v2, %v1958_v3  ;;  %v14284_v19 = vcombine.low %v1951_v6, %v1959_v8  ;;  %v1552_v8 = vld [vmem:[#allocation13 + $0x310] sm:$0xff] }
 0x3ce   : > { %v13793_v27 = vcombine.high %v1457_v17, %v1465_v18  ;;  %v13792_v24 = vcombine.low %v1457_v17, %v1465_v18  ;;  %v1568_v18 = vld [vmem:[#allocation13 + $0x390] sm:$0xff] }
 0x3d0   : > { %4586 = vmatpush1.bf16.msra.mxu1 %v14186_v29  ;;  %4668 = vmatpush1.bf16.msra.mxu0 %v14188_v31  ;;  %v1480_v29 = vld [vmem:[#allocation13 + $0xd0] sm:$0xff]  ;;  %v1473_v31 = vld [vmem:[#allocation13 + $0x98] sm:$0xff] }
 0x3d1   : > { %4587 = vmatprep.subr.bf16.mxu1 %v14203_v32  ;;  %4669 = vmatprep.subr.bf16.mxu0 %v14205_v33  ;;  %v1481_v32 = vld [vmem:[#allocation13 + $0xd8] sm:$0xff]  ;;  %v13790_v33 = vcombine.low %v1456_v15, %v1464_v16  ;;  %v13807_v25 = vcombine.high %v1472_v28, %v1480_v29 }
 0x3d2   : > { %v13809_v26 = vcombine.high %v1473_v31, %v1481_v32  ;;  %v13808_v40 = vcombine.low %v1473_v31, %v1481_v32  ;;  %v1584_v31 = vld [vmem:[#allocation13 + $0x410] sm:$0xff] }
 0x3d3   : > { %v1592_v32 = vld [vmem:[#allocation13 + $0x450] sm:$0xff] }
 0x3d4   : > { %4588 = vmatpush1.bf16.msra.mxu1 %v14202_v30  ;;  %4670 = vmatpush1.bf16.msra.mxu0 %v14204_v34  ;;  %v1488_v30 = vld [vmem:[#allocation13 + $0x110] sm:$0xff]  ;;  %v1489_v34 = vld [vmem:[#allocation13 + $0x118] sm:$0xff] }
 0x3d5   : > { %4589 = vmatprep.subr.bf16.mxu1 %v14219_v37  ;;  %4671 = vmatprep.subr.bf16.mxu0 %v14221_v38  ;;  %v1497_v37 = vld [vmem:[#allocation13 + $0x158] sm:$0xff]  ;;  %v13806_v38 = vcombine.low %v1472_v28, %v1480_v29  ;;  %v13823_v44 = vcombine.high %v1488_v30, %v1496_v47 }
 0x3d6   : > { %v13825_v46 = vcombine.high %v1489_v34, %v1497_v37  ;;  %v13824_v54 = vcombine.low %v1489_v34, %v1497_v37  ;;  %v1600_v34 = vld [vmem:[#allocation13 + $0x490] sm:$0xff] }
 0x3d7   : > { %v1608_v37 = vld [vmem:[#allocation13 + $0x4d0] sm:$0xff] }
 0x3d8   : > { %4590 = vmatpush1.bf16.msra.mxu1 %v14218_v49  ;;  %4672 = vmatpush1.bf16.msra.mxu0 %v14220_v50  ;;  %v1512_v49 = vld [vmem:[#allocation13 + $0x1d0] sm:$0xff]  ;;  %v1505_v50 = vld [vmem:[#allocation13 + $0x198] sm:$0xff] }
 0x3d9   : > { %4591 = vmatprep.subr.bf16.mxu1 %v14235_v51  ;;  %4673 = vmatprep.subr.bf16.mxu0 %v14237_v52  ;;  %v1513_v51 = vld [vmem:[#allocation13 + $0x1d8] sm:$0xff]  ;;  %v13822_v52 = vcombine.low %v1488_v30, %v1496_v47  ;;  %v13839_v56 = vcombine.high %v1504_v48, %v1512_v49  ;;  %v13919_v30 = vcombine.high %v1584_v31, %v1592_v32 }
 0x3da   : > { %v13841_v35 = vcombine.high %v1505_v50, %v1513_v51  ;;  %v13840_v43 = vcombine.low %v1505_v50, %v1513_v51  ;;  %v1616_v50 = vld [vmem:[#allocation13 + $0x510] sm:$0xff] }
 0x3db   : > { %v1624_v51 = vld [vmem:[#allocation13 + $0x550] sm:$0xff] }
 0x3dc   : > { %4592 = vmatpush1.bf16.msra.mxu1 %v14234_v41  ;;  %4674 = vmatpush1.bf16.msra.mxu0 %v14236_v36  ;;  %v1528_v41 = vld [vmem:[#allocation13 + $0x250] sm:$0xff]  ;;  %v1521_v36 = vld [vmem:[#allocation13 + $0x218] sm:$0xff] }
 0x3dd   : > { %4593 = vmatprep.subr.bf16.mxu1 %v14251_v42  ;;  %4675 = vmatprep.subr.bf16.mxu0 %v14253_v39  ;;  %v1529_v42 = vld [vmem:[#allocation13 + $0x258] sm:$0xff]  ;;  %v13838_v39 = vcombine.low %v1504_v48, %v1512_v49  ;;  %v13855_v45 = vcombine.high %v1520_v57, %v1528_v41  ;;  %v13935_v48 = vcombine.high %v1600_v34, %v1608_v37 }
 0x3de   : > { %v13857_v58 = vcombine.high %v1521_v36, %v1529_v42  ;;  %v13856_v2 = vcombine.low %v1521_v36, %v1529_v42  ;;  %v1632_v36 = vld [vmem:[#allocation13 + $0x590] sm:$0xff] }
 0x3df   : > { %v1640_v42 = vld [vmem:[#allocation13 + $0x5d0] sm:$0xff] }
 0x3e0   : > { %4594 = vmatpush1.bf16.msra.mxu1 %v14250_v60  ;;  %4676 = vmatpush1.bf16.msra.mxu0 %v14252_v63  ;;  %v1544_v60 = vld [vmem:[#allocation13 + $0x2d0] sm:$0xff]  ;;  %v1537_v63 = vld [vmem:[#allocation13 + $0x298] sm:$0xff] }
 0x3e1   : > { %4595 = vmatprep.subr.bf16.mxu1 %v14267_v0  ;;  %4677 = vmatprep.subr.bf16.mxu0 %v14269_v1  ;;  %v1545_v0 = vld [vmem:[#allocation13 + $0x2d8] sm:$0xff]  ;;  %v13854_v1 = vcombine.low %v1520_v57, %v1528_v41  ;;  %v13871_v3 = vcombine.high %v1536_v59, %v1544_v60  ;;  %v13951_v57 = vcombine.high %v1616_v50, %v1624_v51 }
 0x3e2   : > { %v13873_v6 = vcombine.high %v1537_v63, %v1545_v0  ;;  %v13872_v15 = vcombine.low %v1537_v63, %v1545_v0  ;;  %v1648_v63 = vld [vmem:[#allocation13 + $0x610] sm:$0xff] }
 0x3e3   : > { %v1656_v0 = vld [vmem:[#allocation13 + $0x650] sm:$0xff] }
 0x3e4   : > { %4596 = vmatpush1.bf16.msra.mxu1 %v14266_v9  ;;  %4678 = vmatpush1.bf16.msra.mxu0 %v14268_v11  ;;  %v1560_v9 = vld [vmem:[#allocation13 + $0x350] sm:$0xff]  ;;  %v1553_v11 = vld [vmem:[#allocation13 + $0x318] sm:$0xff] }
 0x3e5   : > { %4597 = vmatprep.subr.bf16.mxu1 %v14283_v12  ;;  %4679 = vmatprep.subr.bf16.mxu0 %v14285_v13  ;;  %v1561_v12 = vld [vmem:[#allocation13 + $0x358] sm:$0xff]  ;;  %v13870_v13 = vcombine.low %v1536_v59, %v1544_v60  ;;  %v13887_v16 = vcombine.high %v1552_v8, %v1560_v9  ;;  %v13967_v59 = vcombine.high %v1632_v36, %v1640_v42 }
 0x3e6   : > { %v13889_v17 = vcombine.high %v1553_v11, %v1561_v12 }
 0x3e8   : > { %4598 = vmatpush1.bf16.msra.mxu1 %v14282_v10  ;;  %4680 = vmatpush1.bf16.msra.mxu0 %v14284_v19  ;;  %v1576_v10 = vld [vmem:[#allocation13 + $0x3d0] sm:$0xff]  ;;  %v1569_v19 = vld [vmem:[#allocation13 + $0x398] sm:$0xff] }
 0x3e9   : > { %4690 = vmatprep.subr.bf16.mxu1 %v13791_v22  ;;  %4772 = vmatprep.subr.bf16.mxu0 %v13793_v27  ;;  %v13886_v22 = vcombine.low %v1552_v8, %v1560_v9  ;;  %v13888_v27 = vcombine.low %v1553_v11, %v1561_v12  ;;  %v13903_v28 = vcombine.high %v1568_v18, %v1576_v10  ;;  %v1664_v11 = vld [vmem:[#allocation13 + $0x690] sm:$0xff] }
 0x3ea   : > { %v13905_v29 = vcombine.high %v1569_v19, %v1577_v7  ;;  %v13983_v8 = vcombine.high %v1648_v63, %v1656_v0  ;;  %v1672_v12 = vld [vmem:[#allocation13 + $0x6d0] sm:$0xff] }
 0x3eb   : > { %4600 = vmatmul.mubr.bf16.vlgmr.msra.gmra.mrb[4].mxu1 %v16775_v23  ;;  %4682 = vmatmul.mubr.bf16.vlgmr.msra.gmra.mrb[8].mxu0 %v16775_v23 }
 0x3ec   : > { %4691 = vmatpush1.bf16.msra.mxu1 %v13790_v33  ;;  %4722 = vmatprep.mubr.bf16.mxu1 %v16758_v5  ;;  %v1585_v33 = vld [vmem:[#allocation13 + $0x418] sm:$0xff] }
 0x3ed   : > { %4773 = vmatpush1.bf16.msra.mxu0 %v13792_v24  ;;  %4804 = vmatprep.mubr.bf16.mxu0 %v16758_v5  ;;  %v1593_v24 = vld [vmem:[#allocation13 + $0x458] sm:$0xff] }
 0x3ee   : > { %4692 = vmatprep.subr.bf16.mxu1 %v13807_v25  ;;  %4774 = vmatprep.subr.bf16.mxu0 %v13809_v26  ;;  %v13902_v25 = vcombine.low %v1568_v18, %v1576_v10  ;;  %v13904_v26 = vcombine.low %v1569_v19, %v1577_v7  ;;  %v13921_v47 = vcombine.high %v1585_v33, %v1593_v24  ;;  %v1680_v19 = vld [vmem:[#allocation13 + $0x710] sm:$0xff] }
 0x3ef   : > { %v13999_v18 = vcombine.high %v1664_v11, %v1672_v12  ;;  %v1688_v7 = vld [vmem:[#allocation13 + $0x750] sm:$0xff] }
 0x3f0   : > { %4693 = vmatpush1.bf16.msra.mxu1 %v13806_v38  ;;  %v1601_v38 = vld [vmem:[#allocation13 + $0x498] sm:$0xff] }
 0x3f1   : > { %4775 = vmatpush1.bf16.msra.mxu0 %v13808_v40  ;;  %4694 = vmatprep.subr.bf16.mxu1 %v13823_v44  ;;  %v1609_v40 = vld [vmem:[#allocation13 + $0x4d8] sm:$0xff]  ;;  %v13918_v44 = vcombine.low %v1584_v31, %v1592_v32  ;;  %v14015_v31 = vcombine.high %v1680_v19, %v1688_v7 }
 0x3f2   : > { %4776 = vmatprep.subr.bf16.mxu0 %v13825_v46  ;;  %v13920_v46 = vcombine.low %v1585_v33, %v1593_v24  ;;  %v13937_v49 = vcombine.high %v1601_v38, %v1609_v40  ;;  %v1696_v33 = vld [vmem:[#allocation13 + $0x790] sm:$0xff] }
 0x3f3   : > { %v1704_v24 = vld [vmem:[#allocation13 + $0x7d0] sm:$0xff] }
 0x3f4   : > { %4695 = vmatpush1.bf16.msra.mxu1 %v13822_v52  ;;  %v1617_v52 = vld [vmem:[#allocation13 + $0x518] sm:$0xff] }
 0x3f5   : > { %4777 = vmatpush1.bf16.msra.mxu0 %v13824_v54  ;;  %4696 = vmatprep.subr.bf16.mxu1 %v13839_v56  ;;  %v1625_v54 = vld [vmem:[#allocation13 + $0x558] sm:$0xff]  ;;  %v13934_v56 = vcombine.low %v1600_v34, %v1608_v37  ;;  %v14031_v34 = vcombine.high %v1696_v33, %v1704_v24 }
 0x3f6   : > { %4778 = vmatprep.subr.bf16.mxu0 %v13841_v35  ;;  %v13936_v35 = vcombine.low %v1601_v38, %v1609_v40  ;;  %v13953_v41 = vcombine.high %v1617_v52, %v1625_v54  ;;  %v1712_v38 = vld [vmem:[#allocation13 + $0x810] sm:$0xff] }
 0x3f7   : > { %v1720_v40 = vld [vmem:[#allocation13 + $0x850] sm:$0xff] }
 0x3f8   : > { %4697 = vmatpush1.bf16.msra.mxu1 %v13838_v39  ;;  %v1633_v39 = vld [vmem:[#allocation13 + $0x598] sm:$0xff] }
 0x3f9   : > { %4779 = vmatpush1.bf16.msra.mxu0 %v13840_v43  ;;  %4698 = vmatprep.subr.bf16.mxu1 %v13855_v45  ;;  %v1641_v43 = vld [vmem:[#allocation13 + $0x5d8] sm:$0xff]  ;;  %v13950_v45 = vcombine.low %v1616_v50, %v1624_v51  ;;  %v14047_v50 = vcombine.high %v1712_v38, %v1720_v40 }
 0x3fa   : > { %4780 = vmatprep.subr.bf16.mxu0 %v13857_v58  ;;  %v13952_v58 = vcombine.low %v1617_v52, %v1625_v54  ;;  %v13969_v60 = vcombine.high %v1633_v39, %v1641_v43  ;;  %v1728_v52 = vld [vmem:[#allocation13 + $0x890] sm:$0xff] }
 0x3fb   : > { %v1736_v54 = vld [vmem:[#allocation13 + $0x8d0] sm:$0xff] }
 0x3fc   : > { %4699 = vmatpush1.bf16.msra.mxu1 %v13854_v1  ;;  %v1649_v1 = vld [vmem:[#allocation13 + $0x618] sm:$0xff] }
 0x3fd   : > { %4781 = vmatpush1.bf16.msra.mxu0 %v13856_v2  ;;  %4700 = vmatprep.subr.bf16.mxu1 %v13871_v3  ;;  %v1657_v2 = vld [vmem:[#allocation13 + $0x658] sm:$0xff]  ;;  %v13966_v3 = vcombine.low %v1632_v36, %v1640_v42  ;;  %v14063_v36 = vcombine.high %v1728_v52, %v1736_v54  ;;  %v1744_v42 = vld [vmem:[#allocation13 + $0x910] sm:$0xff] }
 0x3fe   : > { %4782 = vmatprep.subr.bf16.mxu0 %v13873_v6  ;;  %v13968_v6 = vcombine.low %v1633_v39, %v1641_v43  ;;  %v13985_v9 = vcombine.high %v1649_v1, %v1657_v2  ;;  %v1752_v39 = vld [vmem:[#allocation13 + $0x950] sm:$0xff] }
 0x400   : > { %4701 = vmatpush1.bf16.msra.mxu1 %v13870_v13  ;;  %v1665_v13 = vld [vmem:[#allocation13 + $0x698] sm:$0xff] }
 0x401   : > { %4783 = vmatpush1.bf16.msra.mxu0 %v13872_v15  ;;  %4702 = vmatprep.subr.bf16.mxu1 %v13887_v16  ;;  %v1673_v15 = vld [vmem:[#allocation13 + $0x6d8] sm:$0xff]  ;;  %v13982_v16 = vcombine.low %v1648_v63, %v1656_v0  ;;  %v14079_v63 = vcombine.high %v1744_v42, %v1752_v39 }
 0x402   : > { %4784 = vmatprep.subr.bf16.mxu0 %v13889_v17  ;;  %v13984_v17 = vcombine.low %v1649_v1, %v1657_v2  ;;  %v14001_v10 = vcombine.high %v1665_v13, %v1673_v15  ;;  %v1760_v1 = vld [vmem:[#allocation13 + $0x990] sm:$0xff] }
 0x403   : > { %v1768_v2 = vld [vmem:[#allocation13 + $0x9d0] sm:$0xff] }
 0x404   : > { %4703 = vmatpush1.bf16.msra.mxu1 %v13886_v22  ;;  %v1681_v22 = vld [vmem:[#allocation13 + $0x718] sm:$0xff] }
 0x405   : > { %4785 = vmatpush1.bf16.msra.mxu0 %v13888_v27  ;;  %4704 = vmatprep.subr.bf16.mxu1 %v13903_v28  ;;  %v1689_v27 = vld [vmem:[#allocation13 + $0x758] sm:$0xff]  ;;  %v13998_v28 = vcombine.low %v1664_v11, %v1672_v12  ;;  %v14095_v11 = vcombine.high %v1760_v1, %v1768_v2 }
 0x406   : > { %4786 = vmatprep.subr.bf16.mxu0 %v13905_v29  ;;  %v14000_v29 = vcombine.low %v1665_v13, %v1673_v15  ;;  %v14017_v32 = vcombine.high %v1681_v22, %v1689_v27  ;;  %v1776_v13 = vld [vmem:[#allocation13 + $0xa10] sm:$0xff] }
 0x407   : > { %v1784_v15 = vld [vmem:[#allocation13 + $0xa50] sm:$0xff] }
 0x408   : > { %4705 = vmatpush1.bf16.msra.mxu1 %v13902_v25  ;;  %v1697_v25 = vld [vmem:[#allocation13 + $0x798] sm:$0xff] }
 0x409   : > { %4787 = vmatpush1.bf16.msra.mxu0 %v13904_v26  ;;  %4706 = vmatprep.subr.bf16.mxu1 %v13919_v30  ;;  %v1705_v26 = vld [vmem:[#allocation13 + $0x7d8] sm:$0xff]  ;;  %v14014_v30 = vcombine.low %v1680_v19, %v1688_v7  ;;  %v14111_v19 = vcombine.high %v1776_v13, %v1784_v15 }
 0x40a   : > { %4788 = vmatprep.subr.bf16.mxu0 %v13921_v47  ;;  %v14016_v47 = vcombine.low %v1681_v22, %v1689_v27  ;;  %v14033_v37 = vcombine.high %v1697_v25, %v1705_v26  ;;  %v1792_v22 = vld [vmem:[#allocation13 + $0xa90] sm:$0xff] }
 0x40b   : > { %v1800_v27 = vld [vmem:[#allocation13 + $0xad0] sm:$0xff] }
 0x40c   : > { %4707 = vmatpush1.bf16.msra.mxu1 %v13918_v44  ;;  %v1713_v44 = vld [vmem:[#allocation13 + $0x818] sm:$0xff] }
 0x40d   : > { %4789 = vmatpush1.bf16.msra.mxu0 %v13920_v46  ;;  %4708 = vmatprep.subr.bf16.mxu1 %v13935_v48  ;;  %v1721_v46 = vld [vmem:[#allocation13 + $0x858] sm:$0xff]  ;;  %v14030_v48 = vcombine.low %v1696_v33, %v1704_v24  ;;  %v14127_v33 = vcombine.high %v1792_v22, %v1800_v27 }
 0x40e   : > { %4790 = vmatprep.subr.bf16.mxu0 %v13937_v49  ;;  %v14032_v49 = vcombine.low %v1697_v25, %v1705_v26  ;;  %v14049_v51 = vcombine.high %v1713_v44, %v1721_v46  ;;  %v1808_v25 = vld [vmem:[#allocation13 + $0xb10] sm:$0xff] }
 0x40f   : > { %v1816_v26 = vld [vmem:[#allocation13 + $0xb50] sm:$0xff] }
 0x410   : > { %4709 = vmatpush1.bf16.msra.mxu1 %v13934_v56  ;;  %v14046_v56 = vcombine.low %v1712_v38, %v1720_v40  ;;  %v14143_v38 = vcombine.high %v1808_v25, %v1816_v26 }
 0x411   : > { %4791 = vmatpush1.bf16.msra.mxu0 %v13936_v35  ;;  %4710 = vmatprep.subr.bf16.mxu1 %v13951_v57  ;;  %v1729_v35 = vld [vmem:[#allocation13 + $0x898] sm:$0xff] }
 0x412   : > { %4792 = vmatprep.subr.bf16.mxu0 %v13953_v41  ;;  %v1737_v57 = vld [vmem:[#allocation13 + $0x8d8] sm:$0xff]  ;;  %v14048_v41 = vcombine.low %v1713_v44, %v1721_v46  ;;  %v1824_v44 = vld [vmem:[#allocation13 + $0xb90] sm:$0xff] }
 0x413   : > { %v14065_v43 = vcombine.high %v1729_v35, %v1737_v57  ;;  %v1832_v46 = vld [vmem:[#allocation13 + $0xbd0] sm:$0xff] }
 0x414   : > { %4711 = vmatpush1.bf16.msra.mxu1 %v13950_v45  ;;  %v1745_v45 = vld [vmem:[#allocation13 + $0x918] sm:$0xff] }
 0x415   : > { %4793 = vmatpush1.bf16.msra.mxu0 %v13952_v58  ;;  %4712 = vmatprep.subr.bf16.mxu1 %v13967_v59  ;;  %v1753_v58 = vld [vmem:[#allocation13 + $0x958] sm:$0xff]  ;;  %v14062_v59 = vcombine.low %v1728_v52, %v1736_v54  ;;  %v14159_v52 = vcombine.high %v1824_v44, %v1832_v46 }
 0x416   : > { %4794 = vmatprep.subr.bf16.mxu0 %v13969_v60  ;;  %v14064_v60 = vcombine.low %v1729_v35, %v1737_v57  ;;  %v14081_v0 = vcombine.high %v1745_v45, %v1753_v58  ;;  %v1848_v35 = vld [vmem:[#allocation13 + $0xc50] sm:$0xff]  ;;  %v1841_v57 = vld [vmem:[#allocation13 + $0xc18] sm:$0xff] }
 0x418   : > { %4713 = vmatpush1.bf16.msra.mxu1 %v13966_v3  ;;  %v1761_v3 = vld [vmem:[#allocation13 + $0x998] sm:$0xff] }
 0x419   : > { %4795 = vmatpush1.bf16.msra.mxu0 %v13968_v6  ;;  %4714 = vmatprep.subr.bf16.mxu1 %v13983_v8  ;;  %v1769_v6 = vld [vmem:[#allocation13 + $0x9d8] sm:$0xff]  ;;  %v14078_v8 = vcombine.low %v1744_v42, %v1752_v39 }
 0x41a   : > { %4796 = vmatprep.subr.bf16.mxu0 %v13985_v9  ;;  %v14080_v9 = vcombine.low %v1745_v45, %v1753_v58  ;;  %v14097_v12 = vcombine.high %v1761_v3, %v1769_v6  ;;  %v1856_v45 = vld [vmem:[#allocation13 + $0xc90] sm:$0xff] }
 0x41b   : > { %v1864_v58 = vld [vmem:[#allocation13 + $0xcd0] sm:$0xff] }
 0x41c   : > { %4715 = vmatpush1.bf16.msra.mxu1 %v13982_v16  ;;  %v1777_v16 = vld [vmem:[#allocation13 + $0xa18] sm:$0xff] }
 0x41d   : > { %4797 = vmatpush1.bf16.msra.mxu0 %v13984_v17  ;;  %4716 = vmatprep.subr.bf16.mxu1 %v13999_v18  ;;  %v1785_v17 = vld [vmem:[#allocation13 + $0xa58] sm:$0xff]  ;;  %v14094_v18 = vcombine.low %v1760_v1, %v1768_v2  ;;  %v14191_v1 = vcombine.high %v1856_v45, %v1864_v58 }
 0x41e   : > { %4798 = vmatprep.subr.bf16.mxu0 %v14001_v10  ;;  %v14096_v10 = vcombine.low %v1761_v3, %v1769_v6  ;;  %v14113_v7 = vcombine.high %v1777_v16, %v1785_v17  ;;  %v1872_v3 = vld [vmem:[#allocation13 + $0xd10] sm:$0xff] }
 0x41f   : > { %v1880_v6 = vld [vmem:[#allocation13 + $0xd50] sm:$0xff] }
 0x420   : > { %4717 = vmatpush1.bf16.msra.mxu1 %v13998_v28  ;;  %v1793_v28 = vld [vmem:[#allocation13 + $0xa98] sm:$0xff] }
 0x421   : > { %4799 = vmatpush1.bf16.msra.mxu0 %v14000_v29  ;;  %4718 = vmatprep.subr.bf16.mxu1 %v14015_v31  ;;  %v1801_v29 = vld [vmem:[#allocation13 + $0xad8] sm:$0xff]  ;;  %v14110_v31 = vcombine.low %v1776_v13, %v1784_v15  ;;  %v14207_v13 = vcombine.high %v1872_v3, %v1880_v6 }
 0x422   : > { %4800 = vmatprep.subr.bf16.mxu0 %v14017_v32  ;;  %v14112_v32 = vcombine.low %v1777_v16, %v1785_v17  ;;  %v14129_v24 = vcombine.high %v1793_v28, %v1801_v29  ;;  %v1888_v16 = vld [vmem:[#allocation13 + $0xd90] sm:$0xff] }
 0x423   : > { %v1896_v17 = vld [vmem:[#allocation13 + $0xdd0] sm:$0xff] }
 0x424   : > { %4719 = vmatpush1.bf16.msra.mxu1 %v14014_v30  ;;  %v1809_v30 = vld [vmem:[#allocation13 + $0xb18] sm:$0xff] }
 0x425   : > { %4801 = vmatpush1.bf16.msra.mxu0 %v14016_v47  ;;  %4720 = vmatprep.subr.bf16.mxu1 %v14031_v34  ;;  %v1817_v47 = vld [vmem:[#allocation13 + $0xb58] sm:$0xff]  ;;  %v14126_v34 = vcombine.low %v1792_v22, %v1800_v27  ;;  %v14223_v22 = vcombine.high %v1888_v16, %v1896_v17 }
 0x426   : > { %4802 = vmatprep.subr.bf16.mxu0 %v14033_v37  ;;  %v14128_v37 = vcombine.low %v1793_v28, %v1801_v29  ;;  %v14145_v40 = vcombine.high %v1809_v30, %v1817_v47  ;;  %v1904_v28 = vld [vmem:[#allocation13 + $0xe10] sm:$0xff] }
 0x427   : > { %v1912_v29 = vld [vmem:[#allocation13 + $0xe50] sm:$0xff] }
 0x428   : > { %4721 = vmatpush1.bf16.msra.mxu1 %v14030_v48  ;;  %v1825_v48 = vld [vmem:[#allocation13 + $0xb98] sm:$0xff] }
 0x429   : > { %4803 = vmatpush1.bf16.msra.mxu0 %v14032_v49  ;;  %4731 = vmatprep.subr.bf16.mxu1 %v14047_v50  ;;  %v1833_v49 = vld [vmem:[#allocation13 + $0xbd8] sm:$0xff]  ;;  %v14142_v50 = vcombine.low %v1808_v25, %v1816_v26  ;;  %v14239_v25 = vcombine.high %v1904_v28, %v1912_v29 }
 0x42a   : > { %4813 = vmatprep.subr.bf16.mxu0 %v14049_v51  ;;  %v14144_v51 = vcombine.low %v1809_v30, %v1817_v47  ;;  %v14161_v54 = vcombine.high %v1825_v48, %v1833_v49  ;;  %v14160_v42 = vcombine.low %v1825_v48, %v1833_v49  ;;  %v1920_v30 = vld [vmem:[#allocation13 + $0xe90] sm:$0xff] }
 0x42b   : > { %4723 = vmatmul.mubr.bf16.vlgmr.msra.gmra.mrb[8].mxu1 %v16756_v4  ;;  %v1928_v47 = vld [vmem:[#allocation13 + $0xed0] sm:$0xff] }
 0x42c   : > { %4805 = vmatmul.mubr.bf16.vlgmr.msra.gmra.mrb[12].mxu0 %v16756_v4  ;;  %4732 = vmatpush1.bf16.msra.mxu1 %v14046_v56  ;;  %v1840_v56 = vld [vmem:[#allocation13 + $0xc10] sm:$0xff] }
 0x42d   : > { %4763 = vmatprep.mubr.bf16.mxu1 %v16762_v14  ;;  %4814 = vmatpush1.bf16.msra.mxu0 %v14048_v41  ;;  %v1849_v41 = vld [vmem:[#allocation13 + $0xc58] sm:$0xff]  ;;  %v14175_v39 = vcombine.high %v1840_v56, %v1848_v35  ;;  %v1936_v48 = vld [vmem:[#allocation13 + $0xf10] sm:$0xff] }
 0x42e   : > { %4845 = vmatprep.mubr.bf16.mxu0 %v16762_v14  ;;  %4733 = vmatprep.subr.bf16.mxu1 %v14063_v36  ;;  %v14158_v36 = vcombine.low %v1824_v44, %v1832_v46  ;;  %v14255_v44 = vcombine.high %v1920_v30, %v1928_v47  ;;  %v1944_v49 = vld [vmem:[#allocation13 + $0xf50] sm:$0xff] }
 0x42f   : > { %4815 = vmatprep.subr.bf16.mxu0 %v14065_v43  ;;  %v14177_v43 = vcombine.high %v1841_v57, %v1849_v41 }
 0x430   : > { %4734 = vmatpush1.bf16.msra.mxu1 %v14062_v59  ;;  %v1857_v59 = vld [vmem:[#allocation13 + $0xc98] sm:$0xff] }
 0x431   : > { %4816 = vmatpush1.bf16.msra.mxu0 %v14064_v60  ;;  %4735 = vmatprep.subr.bf16.mxu1 %v14079_v63  ;;  %v1865_v60 = vld [vmem:[#allocation13 + $0xcd8] sm:$0xff]  ;;  %v14174_v63 = vcombine.low %v1840_v56, %v1848_v35  ;;  %v14271_v56 = vcombine.high %v1936_v48, %v1944_v49 }
 0x432   : > { %4817 = vmatprep.subr.bf16.mxu0 %v14081_v0  ;;  %v14176_v0 = vcombine.low %v1841_v57, %v1849_v41  ;;  %v14193_v2 = vcombine.high %v1857_v59, %v1865_v60  ;;  %v1952_v57 = vld [vmem:[#allocation13 + $0xf90] sm:$0xff] }
 0x433   : > { %v1960_v41 = vld [vmem:[#allocation13 + $0xfd0] sm:$0xff] }
 0x434   : > { %4736 = vmatpush1.bf16.msra.mxu1 %v14078_v8  ;;  %v1873_v8 = vld [vmem:[#allocation13 + $0xd18] sm:$0xff] }
 0x435   : > { %4818 = vmatpush1.bf16.msra.mxu0 %v14080_v9  ;;  %4737 = vmatprep.subr.bf16.mxu1 %v14095_v11  ;;  %v1881_v9 = vld [vmem:[#allocation13 + $0xd58] sm:$0xff]  ;;  %v14190_v11 = vcombine.low %v1856_v45, %v1864_v58  ;;  %v14287_v45 = vcombine.high %v1952_v57, %v1960_v41 }
 0x436   : > { %4819 = vmatprep.subr.bf16.mxu0 %v14097_v12  ;;  %v14192_v12 = vcombine.low %v1857_v59, %v1865_v60  ;;  %v14209_v15 = vcombine.high %v1873_v8, %v1881_v9  ;;  %v1458_v59 = vld [vmem:[#allocation13 + $0x20] sm:$0xff] }
 0x437   : > { %v1466_v60 = vld [vmem:[#allocation13 + $0x60] sm:$0xff] }
 0x438   : > { %4738 = vmatpush1.bf16.msra.mxu1 %v14094_v18  ;;  %v1889_v18 = vld [vmem:[#allocation13 + $0xd98] sm:$0xff] }
 0x439   : > { %4820 = vmatpush1.bf16.msra.mxu0 %v14096_v10  ;;  %4739 = vmatprep.subr.bf16.mxu1 %v14111_v19  ;;  %v1897_v10 = vld [vmem:[#allocation13 + $0xdd8] sm:$0xff]  ;;  %v14206_v19 = vcombine.low %v1872_v3, %v1880_v6  ;;  %v13795_v3 = vcombine.high %v1458_v59, %v1466_v60 }
 0x43a   : > { %4821 = vmatprep.subr.bf16.mxu0 %v14113_v7  ;;  %v14208_v7 = vcombine.low %v1873_v8, %v1881_v9  ;;  %v14225_v27 = vcombine.high %v1889_v18, %v1897_v10  ;;  %v1474_v8 = vld [vmem:[#allocation13 + $0xa0] sm:$0xff] }
 0x43b   : > { %v1482_v9 = vld [vmem:[#allocation13 + $0xe0] sm:$0xff] }
 0x43c   : > { %4740 = vmatpush1.bf16.msra.mxu1 %v14110_v31  ;;  %v1905_v31 = vld [vmem:[#allocation13 + $0xe18] sm:$0xff] }
 0x43d   : > { %4822 = vmatpush1.bf16.msra.mxu0 %v14112_v32  ;;  %4741 = vmatprep.subr.bf16.mxu1 %v14127_v33  ;;  %v1913_v32 = vld [vmem:[#allocation13 + $0xe58] sm:$0xff]  ;;  %v14222_v33 = vcombine.low %v1888_v16, %v1896_v17  ;;  %v13811_v16 = vcombine.high %v1474_v8, %v1482_v9  ;;  %v1490_v17 = vld [vmem:[#allocation13 + $0x120] sm:$0xff] }
 0x43e   : > { %4823 = vmatprep.subr.bf16.mxu0 %v14129_v24  ;;  %v14224_v24 = vcombine.low %v1889_v18, %v1897_v10  ;;  %v14241_v26 = vcombine.high %v1905_v31, %v1913_v32  ;;  %v1498_v18 = vld [vmem:[#allocation13 + $0x160] sm:$0xff] }
 0x440   : > { %4742 = vmatpush1.bf16.msra.mxu1 %v14126_v34  ;;  %v1921_v34 = vld [vmem:[#allocation13 + $0xe98] sm:$0xff] }
 0x441   : > { %4824 = vmatpush1.bf16.msra.mxu0 %v14128_v37  ;;  %4743 = vmatprep.subr.bf16.mxu1 %v14143_v38  ;;  %v1929_v37 = vld [vmem:[#allocation13 + $0xed8] sm:$0xff]  ;;  %v14238_v38 = vcombine.low %v1904_v28, %v1912_v29  ;;  %v13827_v28 = vcombine.high %v1490_v17, %v1498_v18 }
 0x442   : > { %4825 = vmatprep.subr.bf16.mxu0 %v14145_v40  ;;  %v14240_v40 = vcombine.low %v1905_v31, %v1913_v32  ;;  %v14257_v46 = vcombine.high %v1921_v34, %v1929_v37  ;;  %v1506_v31 = vld [vmem:[#allocation13 + $0x1a0] sm:$0xff] }
 0x443   : > { %v1514_v32 = vld [vmem:[#allocation13 + $0x1e0] sm:$0xff] }
 0x444   : > { %4744 = vmatpush1.bf16.msra.mxu1 %v14142_v50  ;;  %v1937_v50 = vld [vmem:[#allocation13 + $0xf18] sm:$0xff] }
 0x445   : > { %4826 = vmatpush1.bf16.msra.mxu0 %v14144_v51  ;;  %4745 = vmatprep.subr.bf16.mxu1 %v14159_v52  ;;  %v1945_v51 = vld [vmem:[#allocation13 + $0xf58] sm:$0xff]  ;;  %v14254_v52 = vcombine.low %v1920_v30, %v1928_v47  ;;  %v13843_v30 = vcombine.high %v1506_v31, %v1514_v32 }
 0x446   : > { %4827 = vmatprep.subr.bf16.mxu0 %v14161_v54  ;;  %v14256_v54 = vcombine.low %v1921_v34, %v1929_v37  ;;  %v14273_v35 = vcombine.high %v1937_v50, %v1945_v51  ;;  %v1522_v34 = vld [vmem:[#allocation13 + $0x220] sm:$0xff] }
 0x447   : > { %v1530_v37 = vld [vmem:[#allocation13 + $0x260] sm:$0xff] }
 0x448   : > { %4746 = vmatpush1.bf16.msra.mxu1 %v14158_v36  ;;  %v1953_v36 = vld [vmem:[#allocation13 + $0xf98] sm:$0xff] }
 0x449   : > { %4828 = vmatpush1.bf16.msra.mxu0 %v14160_v42  ;;  %4747 = vmatprep.subr.bf16.mxu1 %v14175_v39  ;;  %v1961_v42 = vld [vmem:[#allocation13 + $0xfd8] sm:$0xff]  ;;  %v14270_v39 = vcombine.low %v1936_v48, %v1944_v49  ;;  %v13859_v48 = vcombine.high %v1522_v34, %v1530_v37 }
 0x44a   : > { %4829 = vmatprep.subr.bf16.mxu0 %v14177_v43  ;;  %v14272_v43 = vcombine.low %v1937_v50, %v1945_v51  ;;  %v14289_v58 = vcombine.high %v1953_v36, %v1961_v42  ;;  %v1538_v50 = vld [vmem:[#allocation13 + $0x2a0] sm:$0xff] }
 0x44b   : > { %v1546_v51 = vld [vmem:[#allocation13 + $0x2e0] sm:$0xff] }
 0x44c   : > { %4748 = vmatpush1.bf16.msra.mxu1 %v14174_v63  ;;  %v1459_v63 = vld [vmem:[#allocation13 + $0x28] sm:$0xff] }
 0x44d   : > { %4830 = vmatpush1.bf16.msra.mxu0 %v14176_v0  ;;  %4749 = vmatprep.subr.bf16.mxu1 %v14191_v1  ;;  %v1467_v0 = vld [vmem:[#allocation13 + $0x68] sm:$0xff]  ;;  %v14286_v1 = vcombine.low %v1952_v57, %v1960_v41  ;;  %v13875_v57 = vcombine.high %v1538_v50, %v1546_v51 }
 0x44e   : > { %4831 = vmatprep.subr.bf16.mxu0 %v14193_v2  ;;  %v14288_v2 = vcombine.low %v1953_v36, %v1961_v42  ;;  %v13797_v6 = vcombine.high %v1459_v63, %v1467_v0  ;;  %v1554_v36 = vld [vmem:[#allocation13 + $0x320] sm:$0xff] }
 0x44f   : > { %v1562_v42 = vld [vmem:[#allocation13 + $0x360] sm:$0xff] }
 0x450   : > { %4750 = vmatpush1.bf16.msra.mxu1 %v14190_v11  ;;  %v13794_v11 = vcombine.low %v1458_v59, %v1466_v60  ;;  %v13891_v59 = vcombine.high %v1554_v36, %v1562_v42 }
 0x451   : > { %4832 = vmatpush1.bf16.msra.mxu0 %v14192_v12  ;;  %4751 = vmatprep.subr.bf16.mxu1 %v14207_v13  ;;  %v1475_v12 = vld [vmem:[#allocation13 + $0xa8] sm:$0xff] }
 0x452   : > { %4833 = vmatprep.subr.bf16.mxu0 %v14209_v15  ;;  %v1483_v13 = vld [vmem:[#allocation13 + $0xe8] sm:$0xff]  ;;  %v13796_v15 = vcombine.low %v1459_v63, %v1467_v0  ;;  %v1570_v63 = vld [vmem:[#allocation13 + $0x3a0] sm:$0xff] }
 0x453   : > { %v13813_v10 = vcombine.high %v1475_v12, %v1483_v13  ;;  %v1578_v0 = vld [vmem:[#allocation13 + $0x3e0] sm:$0xff] }
 0x454   : > { %4752 = vmatpush1.bf16.msra.mxu1 %v14206_v19  ;;  %v1491_v19 = vld [vmem:[#allocation13 + $0x128] sm:$0xff] }
 0x455   : > { %4834 = vmatpush1.bf16.msra.mxu0 %v14208_v7  ;;  %4753 = vmatprep.subr.bf16.mxu1 %v14223_v22  ;;  %v1499_v7 = vld [vmem:[#allocation13 + $0x168] sm:$0xff]  ;;  %v13810_v22 = vcombine.low %v1474_v8, %v1482_v9  ;;  %v13907_v8 = vcombine.high %v1570_v63, %v1578_v0 }
 0x456   : > { %4835 = vmatprep.subr.bf16.mxu0 %v14225_v27  ;;  %v13812_v27 = vcombine.low %v1475_v12, %v1483_v13  ;;  %v13829_v29 = vcombine.high %v1491_v19, %v1499_v7  ;;  %v1594_v12 = vld [vmem:[#allocation13 + $0x460] sm:$0xff]  ;;  %v1587_v13 = vld [vmem:[#allocation13 + $0x428] sm:$0xff] }
 0x458   : > { %4754 = vmatpush1.bf16.msra.mxu1 %v14222_v33  ;;  %v1507_v33 = vld [vmem:[#allocation13 + $0x1a8] sm:$0xff] }
 0x459   : > { %4836 = vmatpush1.bf16.msra.mxu0 %v14224_v24  ;;  %4755 = vmatprep.subr.bf16.mxu1 %v14239_v25  ;;  %v1515_v24 = vld [vmem:[#allocation13 + $0x1e8] sm:$0xff]  ;;  %v13826_v25 = vcombine.low %v1490_v17, %v1498_v18 }
 0x45a   : > { %4837 = vmatprep.subr.bf16.mxu0 %v14241_v26  ;;  %v13828_v26 = vcombine.low %v1491_v19, %v1499_v7  ;;  %v13845_v47 = vcombine.high %v1507_v33, %v1515_v24  ;;  %v1602_v19 = vld [vmem:[#allocation13 + $0x4a0] sm:$0xff] }
 0x45b   : > { %v1610_v7 = vld [vmem:[#allocation13 + $0x4e0] sm:$0xff] }
 0x45c   : > { %4756 = vmatpush1.bf16.msra.mxu1 %v14238_v38  ;;  %v1523_v38 = vld [vmem:[#allocation13 + $0x228] sm:$0xff] }
 0x45d   : > { %4838 = vmatpush1.bf16.msra.mxu0 %v14240_v40  ;;  %4757 = vmatprep.subr.bf16.mxu1 %v14255_v44  ;;  %v1531_v40 = vld [vmem:[#allocation13 + $0x268] sm:$0xff]  ;;  %v13842_v44 = vcombine.low %v1506_v31, %v1514_v32  ;;  %v13939_v31 = vcombine.high %v1602_v19, %v1610_v7 }
 0x45e   : > { %4839 = vmatprep.subr.bf16.mxu0 %v14257_v46  ;;  %v13844_v46 = vcombine.low %v1507_v33, %v1515_v24  ;;  %v13861_v49 = vcombine.high %v1523_v38, %v1531_v40  ;;  %v1618_v33 = vld [vmem:[#allocation13 + $0x520] sm:$0xff] }
 0x45f   : > { %v1626_v24 = vld [vmem:[#allocation13 + $0x560] sm:$0xff] }
 0x460   : > { %4758 = vmatpush1.bf16.msra.mxu1 %v14254_v52  ;;  %v1539_v52 = vld [vmem:[#allocation13 + $0x2a8] sm:$0xff] }
 0x461   : > { %4840 = vmatpush1.bf16.msra.mxu0 %v14256_v54  ;;  %4759 = vmatprep.subr.bf16.mxu1 %v14271_v56  ;;  %v1547_v54 = vld [vmem:[#allocation13 + $0x2e8] sm:$0xff]  ;;  %v13858_v56 = vcombine.low %v1522_v34, %v1530_v37  ;;  %v13955_v34 = vcombine.high %v1618_v33, %v1626_v24 }
 0x462   : > { %4841 = vmatprep.subr.bf16.mxu0 %v14273_v35  ;;  %v13860_v35 = vcombine.low %v1523_v38, %v1531_v40  ;;  %v13877_v41 = vcombine.high %v1539_v52, %v1547_v54  ;;  %v1634_v38 = vld [vmem:[#allocation13 + $0x5a0] sm:$0xff] }
 0x463   : > { %v1642_v40 = vld [vmem:[#allocation13 + $0x5e0] sm:$0xff] }
 0x464   : > { %4760 = vmatpush1.bf16.msra.mxu1 %v14270_v39  ;;  %v1555_v39 = vld [vmem:[#allocation13 + $0x328] sm:$0xff] }
 0x465   : > { %4842 = vmatpush1.bf16.msra.mxu0 %v14272_v43  ;;  %4761 = vmatprep.subr.bf16.mxu1 %v14287_v45  ;;  %v1563_v43 = vld [vmem:[#allocation13 + $0x368] sm:$0xff]  ;;  %v13874_v45 = vcombine.low %v1538_v50, %v1546_v51  ;;  %v13971_v50 = vcombine.high %v1634_v38, %v1642_v40 }
 0x466   : > { %4843 = vmatprep.subr.bf16.mxu0 %v14289_v58  ;;  %v13876_v58 = vcombine.low %v1539_v52, %v1547_v54  ;;  %v13893_v60 = vcombine.high %v1555_v39, %v1563_v43  ;;  %v1650_v52 = vld [vmem:[#allocation13 + $0x620] sm:$0xff] }
 0x467   : > { %v1658_v54 = vld [vmem:[#allocation13 + $0x660] sm:$0xff] }
 0x468   : > { %4762 = vmatpush1.bf16.msra.mxu1 %v14286_v1  ;;  %v1571_v1 = vld [vmem:[#allocation13 + $0x3a8] sm:$0xff] }
 0x469   : > { %4844 = vmatpush1.bf16.msra.mxu0 %v14288_v2  ;;  %4854 = vmatprep.subr.bf16.mxu1 %v13795_v3  ;;  %v1579_v2 = vld [vmem:[#allocation13 + $0x3e8] sm:$0xff]  ;;  %v13890_v3 = vcombine.low %v1554_v36, %v1562_v42  ;;  %v13987_v36 = vcombine.high %v1650_v52, %v1658_v54 }
 0x46a   : > { %4936 = vmatprep.subr.bf16.mxu0 %v13797_v6  ;;  %v13892_v6 = vcombine.low %v1555_v39, %v1563_v43  ;;  %v13909_v9 = vcombine.high %v1571_v1, %v1579_v2  ;;  %v13908_v17 = vcombine.low %v1571_v1, %v1579_v2  ;;  %v1666_v39 = vld [vmem:[#allocation13 + $0x6a0] sm:$0xff] }
 0x46b   : > { %4764 = vmatmul.mubr.bf16.vlgmr.msra.gmra.mrb[8].mxu1 %v16775_v23  ;;  %v1674_v43 = vld [vmem:[#allocation13 + $0x6e0] sm:$0xff] }
 0x46c   : > { %4846 = vmatmul.mubr.bf16.vlgmr.msra.gmra.mrb[12].mxu0 %v16775_v23  ;;  %4855 = vmatpush1.bf16.msra.mxu1 %v13794_v11  ;;  %v1586_v11 = vld [vmem:[#allocation13 + $0x420] sm:$0xff] }
 0x46d   : > { %4886 = vmatprep.mubr.bf16.mxu1 %v16758_v5  ;;  %4937 = vmatpush1.bf16.msra.mxu0 %v13796_v15  ;;  %v1595_v15 = vld [vmem:[#allocation13 + $0x468] sm:$0xff]  ;;  %v13923_v18 = vcombine.high %v1586_v11, %v1594_v12  ;;  %v1682_v1 = vld [vmem:[#allocation13 + $0x720] sm:$0xff] }
 0x46e   : > { %4968 = vmatprep.mubr.bf16.mxu0 %v16758_v5  ;;  %4856 = vmatprep.subr.bf16.mxu1 %v13811_v16  ;;  %v13906_v16 = vcombine.low %v1570_v63, %v1578_v0  ;;  %v14003_v63 = vcombine.high %v1666_v39, %v1674_v43  ;;  %v1690_v2 = vld [vmem:[#allocation13 + $0x760] sm:$0xff] }
 0x46f   : > { %4938 = vmatprep.subr.bf16.mxu0 %v13813_v10  ;;  %v13925_v10 = vcombine.high %v1587_v13, %v1595_v15 }
 0x470   : > { %4857 = vmatpush1.bf16.msra.mxu1 %v13810_v22  ;;  %v1603_v22 = vld [vmem:[#allocation13 + $0x4a8] sm:$0xff] }
 0x471   : > { %4939 = vmatpush1.bf16.msra.mxu0 %v13812_v27  ;;  %4858 = vmatprep.subr.bf16.mxu1 %v13827_v28  ;;  %v1611_v27 = vld [vmem:[#allocation13 + $0x4e8] sm:$0xff]  ;;  %v13922_v28 = vcombine.low %v1586_v11, %v1594_v12  ;;  %v14019_v11 = vcombine.high %v1682_v1, %v1690_v2 }
 0x472   : > { %4940 = vmatprep.subr.bf16.mxu0 %v13829_v29  ;;  %v13924_v29 = vcombine.low %v1587_v13, %v1595_v15  ;;  %v13941_v32 = vcombine.high %v1603_v22, %v1611_v27  ;;  %v1698_v13 = vld [vmem:[#allocation13 + $0x7a0] sm:$0xff] }
 0x473   : > { %v1706_v15 = vld [vmem:[#allocation13 + $0x7e0] sm:$0xff] }
 0x474   : > { %4859 = vmatpush1.bf16.msra.mxu1 %v13826_v25  ;;  %v1619_v25 = vld [vmem:[#allocation13 + $0x528] sm:$0xff] }
 0x475   : > { %4941 = vmatpush1.bf16.msra.mxu0 %v13828_v26  ;;  %4860 = vmatprep.subr.bf16.mxu1 %v13843_v30  ;;  %v1627_v26 = vld [vmem:[#allocation13 + $0x568] sm:$0xff]  ;;  %v13938_v30 = vcombine.low %v1602_v19, %v1610_v7  ;;  %v14035_v19 = vcombine.high %v1698_v13, %v1706_v15 }
 0x476   : > { %4942 = vmatprep.subr.bf16.mxu0 %v13845_v47  ;;  %v13940_v47 = vcombine.low %v1603_v22, %v1611_v27  ;;  %v13957_v37 = vcombine.high %v1619_v25, %v1627_v26  ;;  %v1714_v22 = vld [vmem:[#allocation13 + $0x820] sm:$0xff] }
 0x477   : > { %v1722_v27 = vld [vmem:[#allocation13 + $0x860] sm:$0xff] }
 0x478   : > { %4861 = vmatpush1.bf16.msra.mxu1 %v13842_v44  ;;  %v1635_v44 = vld [vmem:[#allocation13 + $0x5a8] sm:$0xff] }
 0x479   : > { %4943 = vmatpush1.bf16.msra.mxu0 %v13844_v46  ;;  %4862 = vmatprep.subr.bf16.mxu1 %v13859_v48  ;;  %v1643_v46 = vld [vmem:[#allocation13 + $0x5e8] sm:$0xff]  ;;  %v13954_v48 = vcombine.low %v1618_v33, %v1626_v24  ;;  %v14051_v33 = vcombine.high %v1714_v22, %v1722_v27 }
 0x47a   : > { %4944 = vmatprep.subr.bf16.mxu0 %v13861_v49  ;;  %v13956_v49 = vcombine.low %v1619_v25, %v1627_v26  ;;  %v13973_v51 = vcombine.high %v1635_v44, %v1643_v46  ;;  %v1730_v25 = vld [vmem:[#allocation13 + $0x8a0] sm:$0xff] }
 0x47b   : > { %v1738_v26 = vld [vmem:[#allocation13 + $0x8e0] sm:$0xff] }
 0x47c   : > { %4863 = vmatpush1.bf16.msra.mxu1 %v13858_v56  ;;  %v1651_v56 = vld [vmem:[#allocation13 + $0x628] sm:$0xff] }
 0x47d   : > { %4945 = vmatpush1.bf16.msra.mxu0 %v13860_v35  ;;  %4864 = vmatprep.subr.bf16.mxu1 %v13875_v57  ;;  %v1659_v35 = vld [vmem:[#allocation13 + $0x668] sm:$0xff]  ;;  %v13970_v57 = vcombine.low %v1634_v38, %v1642_v40  ;;  %v14067_v38 = vcombine.high %v1730_v25, %v1738_v26  ;;  %v1746_v40 = vld [vmem:[#allocation13 + $0x920] sm:$0xff] }
 0x47e   : > { %4946 = vmatprep.subr.bf16.mxu0 %v13877_v41  ;;  %v13972_v41 = vcombine.low %v1635_v44, %v1643_v46  ;;  %v13989_v42 = vcombine.high %v1651_v56, %v1659_v35  ;;  %v1754_v44 = vld [vmem:[#allocation13 + $0x960] sm:$0xff] }
 0x480   : > { %4865 = vmatpush1.bf16.msra.mxu1 %v13874_v45  ;;  %v1667_v45 = vld [vmem:[#allocation13 + $0x6a8] sm:$0xff] }
 0x481   : > { %4947 = vmatpush1.bf16.msra.mxu0 %v13876_v58  ;;  %4866 = vmatprep.subr.bf16.mxu1 %v13891_v59  ;;  %v1675_v58 = vld [vmem:[#allocation13 + $0x6e8] sm:$0xff]  ;;  %v13986_v59 = vcombine.low %v1650_v52, %v1658_v54  ;;  %v14083_v52 = vcombine.high %v1746_v40, %v1754_v44 }
 0x482   : > { %4948 = vmatprep.subr.bf16.mxu0 %v13893_v60  ;;  %v13988_v60 = vcombine.low %v1651_v56, %v1659_v35  ;;  %v14005_v0 = vcombine.high %v1667_v45, %v1675_v58  ;;  %v1762_v56 = vld [vmem:[#allocation13 + $0x9a0] sm:$0xff] }
 0x483   : > { %v1770_v35 = vld [vmem:[#allocation13 + $0x9e0] sm:$0xff] }
 0x484   : > { %4867 = vmatpush1.bf16.msra.mxu1 %v13890_v3  ;;  %v1683_v3 = vld [vmem:[#allocation13 + $0x728] sm:$0xff] }
 0x485   : > { %4949 = vmatpush1.bf16.msra.mxu0 %v13892_v6  ;;  %4868 = vmatprep.subr.bf16.mxu1 %v13907_v8  ;;  %v1691_v6 = vld [vmem:[#allocation13 + $0x768] sm:$0xff]  ;;  %v14002_v8 = vcombine.low %v1666_v39, %v1674_v43  ;;  %v14099_v39 = vcombine.high %v1762_v56, %v1770_v35 }
 0x486   : > { %4950 = vmatprep.subr.bf16.mxu0 %v13909_v9  ;;  %v14004_v9 = vcombine.low %v1667_v45, %v1675_v58  ;;  %v14021_v12 = vcombine.high %v1683_v3, %v1691_v6  ;;  %v1778_v45 = vld [vmem:[#allocation13 + $0xa20] sm:$0xff] }
 0x487   : > { %v1786_v58 = vld [vmem:[#allocation13 + $0xa60] sm:$0xff] }
 0x488   : > { %4869 = vmatpush1.bf16.msra.mxu1 %v13906_v16  ;;  %v1699_v16 = vld [vmem:[#allocation13 + $0x7a8] sm:$0xff] }
 0x489   : > { %4951 = vmatpush1.bf16.msra.mxu0 %v13908_v17  ;;  %4870 = vmatprep.subr.bf16.mxu1 %v13923_v18  ;;  %v1707_v17 = vld [vmem:[#allocation13 + $0x7e8] sm:$0xff]  ;;  %v14018_v18 = vcombine.low %v1682_v1, %v1690_v2  ;;  %v16795_v1 = vld [vmem:[#allocation13 + $0xae0] sm:$0xff] }
 0x48a   : > { %4952 = vmatprep.subr.bf16.mxu0 %v13925_v10  ;;  %v14020_v10 = vcombine.low %v1683_v3, %v1691_v6  ;;  %v14037_v7 = vcombine.high %v1699_v16, %v1707_v17  ;;  %v16797_v2 = vld [vmem:[#allocation13 + $0xaa8] sm:$0xff]  ;;  %v14115_v6 = vcombine.high %v1778_v45, %v1786_v58 }
 0x48c   : > { %4871 = vmatpush1.bf16.msra.mxu1 %v13922_v28  ;;  %v1715_v28 = vld [vmem:[#allocation13 + $0x828] sm:$0xff] }
 0x48d   : > { %4953 = vmatpush1.bf16.msra.mxu0 %v13924_v29  ;;  %4872 = vmatprep.subr.bf16.mxu1 %v13939_v31  ;;  %v1723_v29 = vld [vmem:[#allocation13 + $0x868] sm:$0xff]  ;;  %v14034_v31 = vcombine.low %v1698_v13, %v1706_v15 }
 0x48e   : > { %4954 = vmatprep.subr.bf16.mxu0 %v13941_v32  ;;  %v14036_v32 = vcombine.low %v1699_v16, %v1707_v17  ;;  %v14053_v24 = vcombine.high %v1715_v28, %v1723_v29  ;;  %v16805_v13 = vld [vmem:[#allocation13 + $0xb28] sm:$0xff]  ;;  %v16809_v16 = vld [vmem:[#allocation13 + $0xba0] sm:$0xff] }
 0x48f   : > { %v16807_v15 = vld [vmem:[#allocation13 + $0xb68] sm:$0xff]  ;;  %v16811_v17 = vld [vmem:[#allocation13 + $0xbe0] sm:$0xff] }
 0x490   : > { %4873 = vmatpush1.bf16.msra.mxu1 %v13938_v30  ;;  %v14050_v30 = vcombine.low %v1714_v22, %v1722_v27  ;;  %v16817_v22 = vld [vmem:[#allocation13 + $0xc20] sm:$0xff] }
 0x491   : > { %4955 = vmatpush1.bf16.msra.mxu0 %v13940_v47  ;;  %4874 = vmatprep.subr.bf16.mxu1 %v13955_v34  ;;  %v1731_v47 = vld [vmem:[#allocation13 + $0x8a8] sm:$0xff]  ;;  %v16819_v27 = vld [vmem:[#allocation13 + $0xc60] sm:$0xff] }
 0x492   : > { %4956 = vmatprep.subr.bf16.mxu0 %v13957_v37  ;;  %v1739_v34 = vld [vmem:[#allocation13 + $0x8e8] sm:$0xff]  ;;  %v14052_v37 = vcombine.low %v1715_v28, %v1723_v29 }
 0x493   : > { %v14069_v46 = vcombine.high %v1731_v47, %v1739_v34  ;;  %v16821_v28 = vld [vmem:[#allocation13 + $0xc28] sm:$0xff] }
 0x494   : > { %4875 = vmatpush1.bf16.msra.mxu1 %v13954_v48  ;;  %v1747_v48 = vld [vmem:[#allocation13 + $0x928] sm:$0xff] }
 0x495   : > { %4957 = vmatpush1.bf16.msra.mxu0 %v13956_v49  ;;  %4876 = vmatprep.subr.bf16.mxu1 %v13971_v50  ;;  %v1755_v49 = vld [vmem:[#allocation13 + $0x968] sm:$0xff]  ;;  %v14066_v50 = vcombine.low %v1730_v25, %v1738_v26  ;;  %v16833_v25 = vld [vmem:[#allocation13 + $0xce0] sm:$0xff] }
 0x496   : > { %4958 = vmatprep.subr.bf16.mxu0 %v13973_v51  ;;  %v14068_v51 = vcombine.low %v1731_v47, %v1739_v34  ;;  %v14085_v54 = vcombine.high %v1747_v48, %v1755_v49 }
 0x498   : > { %4877 = vmatpush1.bf16.msra.mxu1 %v13970_v57  ;;  %v1763_v57 = vld [vmem:[#allocation13 + $0x9a8] sm:$0xff] }
 0x499   : > { %4959 = vmatpush1.bf16.msra.mxu0 %v13972_v41  ;;  %4878 = vmatprep.subr.bf16.mxu1 %v13987_v36  ;;  %v1771_v41 = vld [vmem:[#allocation13 + $0x9e8] sm:$0xff]  ;;  %v14082_v36 = vcombine.low %v1746_v40, %v1754_v44  ;;  %v16847_v40 = vld [vmem:[#allocation13 + $0xd20] sm:$0xff]  ;;  %v14149_v44 = vcombine.high %v16805_v13, %v16807_v15 }
 0x49a   : > { %4960 = vmatprep.subr.bf16.mxu0 %v13989_v42  ;;  %v14084_v42 = vcombine.low %v1747_v48, %v1755_v49  ;;  %v14101_v43 = vcombine.high %v1763_v57, %v1771_v41  ;;  %v14100_v3 = vcombine.low %v1763_v57, %v1771_v41  ;;  %v14163_v48 = vcombine.high %v16809_v16, %v16811_v17 }
 0x49c   : > { %4879 = vmatpush1.bf16.msra.mxu1 %v13986_v59  ;;  %v1779_v59 = vld [vmem:[#allocation13 + $0xa28] sm:$0xff] }
 0x49d   : > { %4961 = vmatpush1.bf16.msra.mxu0 %v13988_v60  ;;  %4880 = vmatprep.subr.bf16.mxu1 %v14003_v63  ;;  %v1787_v60 = vld [vmem:[#allocation13 + $0xa68] sm:$0xff]  ;;  %v14098_v63 = vcombine.low %v1762_v56, %v1770_v35 }
 0x49e   : > { %4962 = vmatprep.subr.bf16.mxu0 %v14005_v0  ;;  %v16793_v0 = vld [vmem:[#allocation13 + $0xaa0] sm:$0xff] }
 0x49f   : > { %v14130_v29 = vcombine.low %v16793_v0, %v16795_v1 }
 0x4a0   : > { %4881 = vmatpush1.bf16.msra.mxu1 %v14002_v8  ;;  %v16799_v8 = vld [vmem:[#allocation13 + $0xae8] sm:$0xff] }
 0x4a1   : > { %4963 = vmatpush1.bf16.msra.mxu0 %v14004_v9  ;;  %4882 = vmatprep.subr.bf16.mxu1 %v14019_v11  ;;  %v16801_v9 = vld [vmem:[#allocation13 + $0xb20] sm:$0xff]  ;;  %v14133_v26 = vcombine.high %v16797_v2, %v16799_v8 }
 0x4a2   : > { %4964 = vmatprep.subr.bf16.mxu0 %v14021_v12  ;;  %v16803_v11 = vld [vmem:[#allocation13 + $0xb60] sm:$0xff]  ;;  %v14117_v12 = vcombine.high %v1779_v59, %v1787_v60 }
 0x4a3   : > { %v14147_v47 = vcombine.high %v16801_v9, %v16803_v11 }
 0x4a4   : > { %4883 = vmatpush1.bf16.msra.mxu1 %v14018_v18  ;;  %v16813_v18 = vld [vmem:[#allocation13 + $0xba8] sm:$0xff] }
 0x4a5   : > { %4965 = vmatpush1.bf16.msra.mxu0 %v14020_v10  ;;  %4884 = vmatprep.subr.bf16.mxu1 %v14035_v19  ;;  %v16815_v10 = vld [vmem:[#allocation13 + $0xbe8] sm:$0xff]  ;;  %v14114_v19 = vcombine.low %v1778_v45, %v1786_v58 }
 0x4a6   : > { %4966 = vmatprep.subr.bf16.mxu0 %v14037_v7  ;;  %v14116_v7 = vcombine.low %v1779_v59, %v1787_v60 }
 0x4a8   : > { %4885 = vmatpush1.bf16.msra.mxu1 %v14034_v31  ;;  %v14131_v31 = vcombine.high %v16793_v0, %v16795_v1 }
 0x4a9   : > { %4967 = vmatpush1.bf16.msra.mxu0 %v14036_v32  ;;  %4895 = vmatprep.subr.bf16.mxu1 %v14051_v33  ;;  %v14132_v32 = vcombine.low %v16797_v2, %v16799_v8  ;;  %v16829_v33 = vld [vmem:[#allocation13 + $0xc68] sm:$0xff] }
 0x4aa   : > { %4977 = vmatprep.subr.bf16.mxu0 %v14053_v24  ;;  %v16831_v24 = vld [vmem:[#allocation13 + $0xca0] sm:$0xff] }
 0x4ab   : > { %4887 = vmatmul.mubr.bf16.vlgmr.msra.gmra.mrb[12].mxu1 %v16756_v4 }
 0x4ac   : > { %4969 = vmatmul.mubr.bf16.vlgmr.msra.gmra.mrb[16].mxu0 %v16756_v4  ;;  %4896 = vmatpush1.bf16.msra.mxu1 %v14050_v30  ;;  %v14146_v30 = vcombine.low %v16801_v9, %v16803_v11 }
 0x4ad   : > { %4927 = vmatprep.mubr.bf16.mxu1 %v16762_v14  ;;  %4978 = vmatpush1.bf16.msra.mxu0 %v14052_v37  ;;  %v16843_v37 = vld [vmem:[#allocation13 + $0xca8] sm:$0xff] }
 0x4ae   : > { %5009 = vmatprep.mubr.bf16.mxu0 %v16762_v14  ;;  %4897 = vmatprep.subr.bf16.mxu1 %v14067_v38  ;;  %v16845_v38 = vld [vmem:[#allocation13 + $0xce8] sm:$0xff] }
 0x4af   : > { %4979 = vmatprep.subr.bf16.mxu0 %v14069_v46 }
 0x4b0   : > { %4898 = vmatpush1.bf16.msra.mxu1 %v14066_v50  ;;  %v16857_v50 = vld [vmem:[#allocation13 + $0xd60] sm:$0xff] }
 0x4b1   : > { %4980 = vmatpush1.bf16.msra.mxu0 %v14068_v51  ;;  %4899 = vmatprep.subr.bf16.mxu1 %v14083_v52  ;;  %v16859_v51 = vld [vmem:[#allocation13 + $0xd28] sm:$0xff] }
 0x4b2   : > { %4981 = vmatprep.subr.bf16.mxu0 %v14085_v54  ;;  %v16861_v52 = vld [vmem:[#allocation13 + $0xd68] sm:$0xff]  ;;  %v14165_v54 = vcombine.high %v16813_v18, %v16815_v10 }
 0x4b4   : > { %4900 = vmatpush1.bf16.msra.mxu1 %v14082_v36 }
 0x4b5   : > { %4982 = vmatpush1.bf16.msra.mxu0 %v14084_v42  ;;  %4901 = vmatprep.subr.bf16.mxu1 %v14099_v39 }
 0x4b6   : > { %4983 = vmatprep.subr.bf16.mxu0 %v14101_v43 }
 0x4b8   : > { %4902 = vmatpush1.bf16.msra.mxu1 %v14098_v63 }
 0x4b9   : > { %4984 = vmatpush1.bf16.msra.mxu0 %v14100_v3  ;;  %4903 = vmatprep.subr.bf16.mxu1 %v14115_v6 }
 0x4ba   : > { %4985 = vmatprep.subr.bf16.mxu0 %v14117_v12 }
 0x4bc   : > { %4904 = vmatpush1.bf16.msra.mxu1 %v14114_v19 }
 0x4bd   : > { %4986 = vmatpush1.bf16.msra.mxu0 %v14116_v7  ;;  %4905 = vmatprep.subr.bf16.mxu1 %v14131_v31 }
 0x4be   : > { %v16877_v39 = vpop.f32.mrb[4].mxu1  ;;  %v16879_v43 = vpop.f32.mrb[8].mxu0  ;;  %4987 = vmatprep.subr.bf16.mxu0 %v14133_v26 }
 0x4bf   : > { %19023 = vst [vmem:[#allocation28_spill] sm:$0xff] %v16877_v39  ;;  %19024 = vst [vmem:[#allocation29_spill] sm:$0xff] %v16879_v43  ;;  %v5186_v63 = vrot.slane %v16877_v39, 4  ;;  %v5298_v0 = vmul.f32 %v16877_v39, %v16877_v39  ;;  %v5198_v1 = vrot.slane %v16879_v43, 4  ;;  %v5300_v2 = vmul.f32 %v16879_v43, %v16879_v43  ;;  %v16895_v3 = vpop.f32.mrb[5].mxu1  ;;  %v16897_v6 = vpop.f32.mrb[9].mxu0 }
 0x4c0   : > { %19025 = vst [vmem:[#allocation30_spill] sm:$0xff] %v16895_v3  ;;  %19026 = vst [vmem:[#allocation31_spill] sm:$0xff] %v16897_v6  ;;  %v5192_v8 = vrot.slane %v16895_v3, 4  ;;  %v5299_v12 = vmul.f32 %v16895_v3, %v16895_v3  ;;  %v5204_v19 = vrot.slane %v16897_v6, 4  ;;  %v5301_v7 = vmul.f32 %v16897_v6, %v16897_v6  ;;  %v4605_v31 = vpop.f32.mrb[6].mxu1  ;;  %v4687_v26 = vpop.f32.mrb[10].mxu0  ;;  %4906 = vmatpush1.bf16.msra.mxu1 %v14130_v29 }
 0x4c1   : > { %v5187_v60 = vadd.f32 %v5186_v63, %v16877_v39  ;;  %v5314_v59 = vrot.slane %v5298_v0, 4  ;;  %v5199_v45 = vadd.f32 %v5198_v1, %v16879_v43  ;;  %v5326_v36 = vrot.slane %v5300_v2, 4  ;;  %4988 = vmatpush1.bf16.msra.mxu0 %v14132_v32  ;;  %v4606_v58 = vpop.f32.mrb[7].mxu1  ;;  %v4688_v42 = vpop.f32.mrb[11].mxu0  ;;  %4907 = vmatprep.subr.bf16.mxu1 %v14147_v47 }
 0x4c2   : > { %v5193_v57 = vadd.f32 %v5192_v8, %v16895_v3  ;;  %v5320_v56 = vrot.slane %v5299_v12, 4  ;;  %v5205_v41 = vadd.f32 %v5204_v19, %v16897_v6  ;;  %v5332_v35 = vrot.slane %v5301_v7, 4  ;;  %4989 = vmatprep.subr.bf16.mxu0 %v14149_v44 }
 0x4c3   : > { %v5188_v31 = vrot.slane %v5187_v60, 2  ;;  %v5315_v26 = vadd.f32 %v5314_v59, %v5298_v0  ;;  %v5200_v29 = vrot.slane %v5199_v45, 2  ;;  %v5327_v49 = vadd.f32 %v5326_v36, %v5300_v2 }
 0x4c4   : > { %v5194_v63 = vrot.slane %v5193_v57, 2  ;;  %v5321_v46 = vadd.f32 %v5320_v56, %v5299_v12  ;;  %v5206_v34 = vrot.slane %v5205_v41, 2  ;;  %v5333_v1 = vadd.f32 %v5332_v35, %v5301_v7  ;;  %4908 = vmatpush1.bf16.msra.mxu1 %v14146_v30 }
 0x4c5   : > { %v5189_v32 = vadd.f32 %v5188_v31, %v5187_v60  ;;  %v5316_v47 = vrot.slane %v5315_v26, 2  ;;  %v5201_v42 = vadd.f32 %v5200_v29, %v5199_v45  ;;  %v5328_v58 = vrot.slane %v5327_v49, 2  ;;  %4909 = vmatprep.subr.bf16.mxu1 %v14163_v48 }
 0x4c6   : > { %v19027_v8 = vcombine.low %v16805_v13, %v16807_v15  ;;  %v5195_v44 = vadd.f32 %v5194_v63, %v5193_v57  ;;  %v5322_v59 = vrot.slane %v5321_v46, 2  ;;  %v5207_v36 = vadd.f32 %v5206_v34, %v5205_v41 }
 0x4c7   : > { %v5334_v0 = vrot.slane %v5333_v1, 2  ;;  %v5190_v56 = vrot.slane %v5189_v32, 1  ;;  %v5317_v35 = vadd.f32 %v5316_v47, %v5315_v26  ;;  %v5202_v2 = vrot.slane %v5201_v42, 1 }
 0x4c8   : > { %4990 = vmatpush1.bf16.msra.mxu0 %v19027_v8  ;;  %v5329_v12 = vadd.f32 %v5328_v58, %v5327_v49  ;;  %v5196_v9 = vrot.slane %v5195_v44, 1  ;;  %v5323_v11 = vadd.f32 %v5322_v59, %v5321_v46  ;;  %v5208_v30 = vrot.slane %v5207_v36, 1 }
 0x4c9   : > { %4991 = vmatprep.subr.bf16.mxu0 %v14165_v54  ;;  %v5335_v60 = vadd.f32 %v5334_v0, %v5333_v1  ;;  %v19028_v45 = vcombine.low %v16809_v16, %v16811_v17  ;;  %v5191_v13 = vadd.f32 %v5190_v56, %v5189_v32  ;;  %v5318_v15 = vrot.slane %v5317_v35, 1  ;;  %v1890_v56 = vld [vmem:[#allocation13 + $0xda0] sm:$0xff] }
 0x4ca   : > { %v5203_v48 = vadd.f32 %v5202_v2, %v5201_v42  ;;  %v5330_v57 = vrot.slane %v5329_v12, 1  ;;  %v19029_v34 = vcombine.low %v16813_v18, %v16815_v10  ;;  %v19030_v54 = vcombine.high %v16817_v22, %v16819_v27  ;;  %v1891_v2 = vld [vmem:[#allocation13 + $0xda8] sm:$0xff] }
 0x4cb   : > { %4910 = vmatpush1.bf16.msra.mxu1 %v19028_v45  ;;  %v5197_v49 = vadd.f32 %v5196_v9, %v5195_v44  ;;  %v5324_v46 = vrot.slane %v5323_v11, 1  ;;  %v5209_v41 = vadd.f32 %v5208_v30, %v5207_v36  ;;  %v5336_v19 = vrot.slane %v5335_v60, 1 }
 0x4cc   : > { %4992 = vmatpush1.bf16.msra.mxu0 %v19029_v34  ;;  %4911 = vmatprep.subr.bf16.mxu1 %v19030_v54  ;;  %v19031_v16 = vcombine.high %v16821_v28, %v16829_v33  ;;  %v16927_v17 = vmul.f32 0.125, %v5191_v13  ;;  %v5319_v7 = vadd.f32 %v5318_v15, %v5317_v35  ;;  %v16929_v31 = vmul.f32 0.125, %v5203_v48  ;;  %v1898_v35 = vld [vmem:[#allocation13 + $0xde0] sm:$0xff] }
 0x4cd   : > { %v5331_v26 = vadd.f32 %v5330_v57, %v5329_v12  ;;  %v16931_v18 = vmul.f32 0.125, %v5197_v49  ;;  %v5325_v10 = vadd.f32 %v5324_v46, %v5323_v11  ;;  %v16933_v29 = vmul.f32 0.125, %v5209_v41  ;;  %v1899_v12 = vld [vmem:[#allocation13 + $0xde8] sm:$0xff]  ;;  %v1906_v46 = vld [vmem:[#allocation13 + $0xe20] sm:$0xff] }
 0x4ce   : > { %4993 = vmatprep.subr.bf16.mxu0 %v19031_v16  ;;  %v5337_v63 = vadd.f32 %v5336_v19, %v5335_v60  ;;  %v19032_v1 = vcombine.low %v16817_v22, %v16819_v27  ;;  %v5410_v32 = vmul.f32 0.125, %v5319_v7  ;;  %v5426_v47 = vmul.f32 %v16927_v17, %v16927_v17  ;;  %v1914_v41 = vld [vmem:[#allocation13 + $0xe60] sm:$0xff]  ;;  %v1915_v16 = vld [vmem:[#allocation13 + $0xe68] sm:$0xff] }
 0x4cf   : > { %v5412_v42 = vmul.f32 0.125, %v5331_v26  ;;  %v5428_v58 = vmul.f32 %v16929_v31, %v16929_v31  ;;  %v19033_v8 = vcombine.low %v16821_v28, %v16829_v33  ;;  %v19034_v44 = vcombine.high %v16831_v24, %v16833_v25 }
 0x4d0   : > { %4912 = vmatpush1.bf16.msra.mxu1 %v19032_v1  ;;  %v5411_v59 = vmul.f32 0.125, %v5325_v10  ;;  %v5427_v22 = vmul.f32 %v16931_v18, %v16931_v18  ;;  %v5413_v27 = vmul.f32 0.125, %v5337_v63  ;;  %v5429_v36 = vmul.f32 %v16933_v29, %v16933_v29  ;;  %v1930_v63 = vld [vmem:[#allocation13 + $0xee0] sm:$0xff]  ;;  %v1923_v1 = vld [vmem:[#allocation13 + $0xea8] sm:$0xff] }
 0x4d1   : > { %4994 = vmatpush1.bf16.msra.mxu0 %v19033_v8  ;;  %4913 = vmatprep.subr.bf16.mxu1 %v19034_v44  ;;  %v19035_v0 = vcombine.high %v16843_v37, %v16845_v38  ;;  %v5442_v28 = vsub.f32 %v5410_v32, %v5426_v47  ;;  %v5444_v33 = vsub.f32 %v5412_v42, %v5428_v58  ;;  %v1931_v32 = vld [vmem:[#allocation13 + $0xee8] sm:$0xff]  ;;  %v1938_v44 = vld [vmem:[#allocation13 + $0xf20] sm:$0xff] }
 0x4d2   : > { %v5443_v9 = vsub.f32 %v5411_v59, %v5427_v22  ;;  %v5445_v11 = vsub.f32 %v5413_v27, %v5429_v36  ;;  %v19036_v30 = vcombine.low %v16831_v24, %v16833_v25  ;;  %v14210_v60 = vcombine.low %v16847_v40, %v16857_v50  ;;  %v1946_v59 = vld [vmem:[#allocation13 + $0xf60] sm:$0xff]  ;;  %v1939_v22 = vld [vmem:[#allocation13 + $0xf28] sm:$0xff] }
 0x4d3   : > { %4995 = vmatprep.subr.bf16.mxu0 %v19035_v0  ;;  %v5458_v45 = vmax.f32 %v5442_v28, 0.0  ;;  %v5460_v13 = vmax.f32 %v5444_v33, 0.0  ;;  %v19037_v15 = vcombine.low %v16843_v37, %v16845_v38  ;;  %v19038_v48 = vcombine.high %v16847_v40, %v16857_v50  ;;  %v1907_v38 = vld [vmem:[#allocation13 + $0xe28] sm:$0xff]  ;;  %v1954_v28 = vld [vmem:[#allocation13 + $0xfa0] sm:$0xff] }
 0x4d4   : > { %4914 = vmatpush1.bf16.msra.mxu1 %v19036_v30  ;;  %v14212_v57 = vcombine.low %v16859_v51, %v16861_v52  ;;  %v14227_v34 = vcombine.high %v1890_v56, %v1898_v35  ;;  %v5459_v54 = vmax.f32 %v5443_v9, 0.0  ;;  %v5461_v24 = vmax.f32 %v5445_v11, 0.0  ;;  %v1947_v27 = vld [vmem:[#allocation13 + $0xf68] sm:$0xff]  ;;  %v1962_v33 = vld [vmem:[#allocation13 + $0xfe0] sm:$0xff] }
 0x4d5   : > { %4996 = vmatpush1.bf16.msra.mxu0 %v19037_v15  ;;  %4915 = vmatprep.subr.bf16.mxu1 %v19038_v48  ;;  %v19039_v25 = vcombine.high %v16859_v51, %v16861_v52  ;;  %v14229_v49 = vcombine.high %v1891_v2, %v1899_v12  ;;  %v5474_v19 = vadd.f32 1e-05, %v5458_v45  ;;  %v5476_v37 = vadd.f32 1e-05, %v5460_v13  ;;  %v1922_v52 = vld [vmem:[#allocation13 + $0xea0] sm:$0xff]  ;;  %v1963_v9 = vld [vmem:[#allocation13 + $0xfe8] sm:$0xff] }
 0x4d6   : > { %v5475_v7 = vadd.f32 1e-05, %v5459_v54  ;;  %v5477_v40 = vadd.f32 1e-05, %v5461_v24  ;;  %v14226_v50 = vcombine.low %v1890_v56, %v1898_v35  ;;  %v14228_v26 = vcombine.low %v1891_v2, %v1899_v12  ;;  %v1955_v12 = vld [vmem:[#allocation13 + $0xfa8] sm:$0xff]  ;;  %v1468_v54 = vld [vmem:[#allocation13 + $0x70] sm:$0xff] }
 0x4d7   : > { %4997 = vmatprep.subr.bf16.mxu0 %v19039_v25  ;;  %15747 = vrsqrt.f32 %v5474_v19  ;;  %v14243_v10 = vcombine.high %v1906_v46, %v1914_v41  ;;  %v14245_v51 = vcombine.high %v1907_v38, %v1915_v16  ;;  %v14242_v47 = vcombine.low %v1906_v46, %v1914_v41  ;;  %v1461_v25 = vld [vmem:[#allocation13 + $0x38] sm:$0xff] }
 0x4d8   : > { %4916 = vmatpush1.bf16.msra.mxu1 %v14210_v60  ;;  %15749 = vrsqrt.f32 %v5476_v37  ;;  %v14244_v42 = vcombine.low %v1907_v38, %v1915_v16  ;;  %v14259_v58 = vcombine.high %v1922_v52, %v1930_v63  ;;  %v14261_v8 = vcombine.high %v1923_v1, %v1931_v32 }
 0x4d9   : > { %4998 = vmatpush1.bf16.msra.mxu0 %v14212_v57  ;;  %4917 = vmatprep.subr.bf16.mxu1 %v14227_v34  ;;  %15751 = vrsqrt.f32 %v5475_v7  ;;  %v14258_v36 = vcombine.low %v1922_v52, %v1930_v63  ;;  %v14260_v0 = vcombine.low %v1923_v1, %v1931_v32  ;;  %v14275_v56 = vcombine.high %v1938_v44, %v1946_v59  ;;  %v1460_v34 = vld [vmem:[#allocation13 + $0x30] sm:$0xff] }
 0x4da   : > { %4999 = vmatprep.subr.bf16.mxu0 %v14229_v49  ;;  %15753 = vrsqrt.f32 %v5477_v40  ;;  %v14277_v35 = vcombine.high %v1939_v22, %v1947_v27  ;;  %v14274_v30 = vcombine.low %v1938_v44, %v1946_v59  ;;  %v14276_v45 = vcombine.low %v1939_v22, %v1947_v27  ;;  %v1469_v49 = vld [vmem:[#allocation13 + $0x78] sm:$0xff]  ;;  %v1476_v40 = vld [vmem:[#allocation13 + $0xb0] sm:$0xff] }
 0x4db   : > { %v14291_v13 = vcombine.high %v1954_v28, %v1962_v33  ;;  %v14293_v57 = vcombine.high %v1955_v12, %v1963_v9  ;;  %v14290_v41 = vcombine.low %v1954_v28, %v1962_v33  ;;  %v14292_v37 = vcombine.low %v1955_v12, %v1963_v9  ;;  %v1492_v1 = vld [vmem:[#allocation13 + $0x130] sm:$0xff] }
 0x4dc   : > { %4918 = vmatpush1.bf16.msra.mxu1 %v14226_v50  ;;  %v13799_v38 = vcombine.high %v1460_v34, %v1468_v54  ;;  %v13801_v16 = vcombine.high %v1461_v25, %v1469_v49  ;;  %v1484_v50 = vld [vmem:[#allocation13 + $0xf0] sm:$0xff]  ;;  %v13800_v52 = vcombine.low %v1461_v25, %v1469_v49 }
 0x4dd   : > { %5000 = vmatpush1.bf16.msra.mxu0 %v14228_v26  ;;  %4919 = vmatprep.subr.bf16.mxu1 %v14243_v10  ;;  %v13798_v26 = vcombine.low %v1460_v34, %v1468_v54  ;;  %v1477_v10 = vld [vmem:[#allocation13 + $0xb8] sm:$0xff]  ;;  %v13815_v63 = vcombine.high %v1476_v40, %v1484_v50  ;;  %v1500_v32 = vld [vmem:[#allocation13 + $0x170] sm:$0xff] }
 0x4de   : > { %5001 = vmatprep.subr.bf16.mxu0 %v14245_v51  ;;  %v1485_v51 = vld [vmem:[#allocation13 + $0xf8] sm:$0xff]  ;;  %v13831_v59 = vcombine.high %v1492_v1, %v1500_v32  ;;  %v1508_v27 = vld [vmem:[#allocation13 + $0x1b0] sm:$0xff] }
 0x4df   : > { %v13816_v44 = vcombine.low %v1477_v10, %v1485_v51  ;;  %v1524_v12 = vld [vmem:[#allocation13 + $0x230] sm:$0xff]  ;;  %v1549_v34 = vld [vmem:[#allocation13 + $0x2f8] sm:$0xff] }
 0x4e0   : > { %4920 = vmatpush1.bf16.msra.mxu1 %v14242_v47  ;;  %v13817_v47 = vcombine.high %v1477_v10, %v1485_v51  ;;  %v1532_v9 = vld [vmem:[#allocation13 + $0x270] sm:$0xff] }
 0x4e1   : > { %5002 = vmatpush1.bf16.msra.mxu0 %v14244_v42  ;;  %4921 = vmatprep.subr.bf16.mxu1 %v14259_v58  ;;  %v15748_v2 = vpop.eup %15747  ;;  %v1493_v42 = vld [vmem:[#allocation13 + $0x138] sm:$0xff]  ;;  %v13862_v54 = vcombine.low %v1524_v12, %v1532_v9  ;;  %v1572_v51 = vld [vmem:[#allocation13 + $0x3b0] sm:$0xff] }
 0x4e2   : > { %5003 = vmatprep.subr.bf16.mxu0 %v14261_v8  ;;  %v15750_v11 = vpop.eup %15749  ;;  %v1501_v58 = vld [vmem:[#allocation13 + $0x178] sm:$0xff]  ;;  %v13814_v8 = vcombine.low %v1476_v40, %v1484_v50 }
 0x4e3   : > { %v15752_v60 = vpop.eup %15751  ;;  %v13833_v22 = vcombine.high %v1493_v42, %v1501_v58  ;;  %v13832_v28 = vcombine.low %v1493_v42, %v1501_v58 }
 0x4e4   : > { %4922 = vmatpush1.bf16.msra.mxu1 %v14258_v36  ;;  %v15754_v15 = vpop.eup %15753  ;;  %v5522_v48 = vcombine.low %v15748_v2, %v15752_v60  ;;  %v1516_v36 = vld [vmem:[#allocation13 + $0x1f0] sm:$0xff] }
 0x4e5   : > { %5004 = vmatpush1.bf16.msra.mxu0 %v14260_v0  ;;  %4923 = vmatprep.subr.bf16.mxu1 %v14275_v56  ;;  %v5523_v24 = vcombine.low %v15750_v11, %v15754_v15  ;;  %v1509_v0 = vld [vmem:[#allocation13 + $0x1b8] sm:$0xff]  ;;  %v13847_v33 = vcombine.high %v1508_v27, %v1516_v36  ;;  %v1540_v15 = vld [vmem:[#allocation13 + $0x2b0] sm:$0xff] }
 0x4e6   : > { %5005 = vmatprep.subr.bf16.mxu0 %v14277_v35  ;;  %v16972_v46 = vrot.slane %v5522_v48, %v16673_v55  ;;  %v1517_v56 = vld [vmem:[#allocation13 + $0x1f8] sm:$0xff]  ;;  %v13830_v35 = vcombine.low %v1492_v1, %v1500_v32  ;;  %v1548_v48 = vld [vmem:[#allocation13 + $0x2f0] sm:$0xff] }
 0x4e7   : > { %v16975_v19 = vrot.slane %v5523_v24, %v16673_v55  ;;  %v13849_v2 = vcombine.high %v1509_v0, %v1517_v56  ;;  %v1525_v11 = vld [vmem:[#allocation13 + $0x238] sm:$0xff]  ;;  %v13848_v60 = vcombine.low %v1509_v0, %v1517_v56  ;;  %v13879_v25 = vcombine.high %v1540_v15, %v1548_v48 }
 0x4e8   : > { %4924 = vmatpush1.bf16.msra.mxu1 %v14274_v30  ;;  %v1533_v30 = vld [vmem:[#allocation13 + $0x278] sm:$0xff]  ;;  %v13878_v40 = vcombine.low %v1540_v15, %v1548_v48 }
 0x4e9   : > { %5006 = vmatpush1.bf16.msra.mxu0 %v14276_v45  ;;  %4925 = vmatprep.subr.bf16.mxu1 %v14291_v13  ;;  %v13863_v45 = vcombine.high %v1524_v12, %v1532_v9  ;;  %v13865_v13 = vcombine.high %v1525_v11, %v1533_v30  ;;  %v13864_v24 = vcombine.low %v1525_v11, %v1533_v30  ;;  %v1581_v1 = vld [vmem:[#allocation13 + $0x3f8] sm:$0xff] }
 0x4ea   : > { %5007 = vmatprep.subr.bf16.mxu0 %v14293_v57  ;;  %v1541_v57 = vld [vmem:[#allocation13 + $0x2b8] sm:$0xff] }
 0x4eb   : > { %v13881_v49 = vcombine.high %v1541_v57, %v1549_v34  ;;  %v13880_v50 = vcombine.low %v1541_v57, %v1549_v34 }
 0x4ec   : > { %4926 = vmatpush1.bf16.msra.mxu1 %v14290_v41  ;;  %v1556_v41 = vld [vmem:[#allocation13 + $0x330] sm:$0xff] }
 0x4ed   : > { %5008 = vmatpush1.bf16.msra.mxu0 %v14292_v37  ;;  %5018 = vmatprep.subr.bf16.mxu1 %v13799_v38  ;;  %v1564_v37 = vld [vmem:[#allocation13 + $0x370] sm:$0xff]  ;;  %v1557_v38 = vld [vmem:[#allocation13 + $0x338] sm:$0xff] }
 0x4ee   : > { %5100 = vmatprep.subr.bf16.mxu0 %v13801_v16  ;;  %v1565_v16 = vld [vmem:[#allocation13 + $0x378] sm:$0xff]  ;;  %v13894_v32 = vcombine.low %v1556_v41, %v1564_v37 }
 0x4ef   : > { %4928 = vmatmul.mubr.bf16.vlgmr.msra.gmra.mrb[12].mxu1 %v16775_v23  ;;  %v13897_v10 = vcombine.high %v1557_v38, %v1565_v16 }
 0x4f0   : > { %5010 = vmatmul.mubr.bf16.vlgmr.msra.gmra.mrb[16].mxu0 %v16775_v23  ;;  %5019 = vmatpush1.bf16.msra.mxu1 %v13798_v26  ;;  %v13895_v26 = vcombine.high %v1556_v41, %v1564_v37 }
 0x4f1   : > { %5050 = vmatprep.mubr.bf16.mxu1 %v16758_v5  ;;  %5101 = vmatpush1.bf16.msra.mxu0 %v13800_v52  ;;  %v1580_v52 = vld [vmem:[#allocation13 + $0x3f0] sm:$0xff] }
 0x4f2   : > { %5132 = vmatprep.mubr.bf16.mxu0 %v16758_v5  ;;  %5020 = vmatprep.subr.bf16.mxu1 %v13815_v63  ;;  %v13846_v5 = vcombine.low %v1508_v27, %v1516_v36  ;;  %v1573_v63 = vld [vmem:[#allocation13 + $0x3b8] sm:$0xff]  ;;  %v13911_v42 = vcombine.high %v1572_v51, %v1580_v52  ;;  %v13910_v27 = vcombine.low %v1572_v51, %v1580_v52 }
 0x4f3   : > { %5102 = vmatprep.subr.bf16.mxu0 %v13817_v47  ;;  %v13896_v47 = vcombine.low %v1557_v38, %v1565_v16  ;;  %v13913_v58 = vcombine.high %v1573_v63, %v1581_v1  ;;  %v13912_v36 = vcombine.low %v1573_v63, %v1581_v1 }
 0x4f4   : > { %5021 = vmatpush1.bf16.msra.mxu1 %v13814_v8  ;;  %v1588_v8 = vld [vmem:[#allocation13 + $0x430] sm:$0xff] }
 0x4f5   : > { %5103 = vmatpush1.bf16.msra.mxu0 %v13816_v44  ;;  %5022 = vmatprep.subr.bf16.mxu1 %v13831_v59  ;;  %v1596_v44 = vld [vmem:[#allocation13 + $0x470] sm:$0xff]  ;;  %v1589_v59 = vld [vmem:[#allocation13 + $0x438] sm:$0xff] }
 0x4f6   : > { %5104 = vmatprep.subr.bf16.mxu0 %v13833_v22  ;;  %v1597_v22 = vld [vmem:[#allocation13 + $0x478] sm:$0xff]  ;;  %v13927_v0 = vcombine.high %v1588_v8, %v1596_v44  ;;  %v13926_v12 = vcombine.low %v1588_v8, %v1596_v44 }
 0x4f7   : > { %v13929_v56 = vcombine.high %v1589_v59, %v1597_v22  ;;  %v13928_v9 = vcombine.low %v1589_v59, %v1597_v22 }
 0x4f8   : > { %5023 = vmatpush1.bf16.msra.mxu1 %v13830_v35  ;;  %v1604_v35 = vld [vmem:[#allocation13 + $0x4b0] sm:$0xff] }
 0x4f9   : > { %5105 = vmatpush1.bf16.msra.mxu0 %v13832_v28  ;;  %5024 = vmatprep.subr.bf16.mxu1 %v13847_v33  ;;  %v1612_v28 = vld [vmem:[#allocation13 + $0x4f0] sm:$0xff]  ;;  %v1605_v33 = vld [vmem:[#allocation13 + $0x4b8] sm:$0xff] }
 0x4fa   : > { %5106 = vmatprep.subr.bf16.mxu0 %v13849_v2  ;;  %v1613_v2 = vld [vmem:[#allocation13 + $0x4f8] sm:$0xff]  ;;  %v13943_v11 = vcombine.high %v1604_v35, %v1612_v28  ;;  %v13942_v15 = vcombine.low %v1604_v35, %v1612_v28 }
 0x4fb   : > { %v13945_v30 = vcombine.high %v1605_v33, %v1613_v2  ;;  %v13944_v48 = vcombine.low %v1605_v33, %v1613_v2 }
 0x4fc   : > { %5025 = vmatpush1.bf16.msra.mxu1 %v13846_v5  ;;  %v1620_v5 = vld [vmem:[#allocation13 + $0x530] sm:$0xff] }
 0x4fd   : > { %5107 = vmatpush1.bf16.msra.mxu0 %v13848_v60  ;;  %5026 = vmatprep.subr.bf16.mxu1 %v13863_v45  ;;  %v1628_v60 = vld [vmem:[#allocation13 + $0x570] sm:$0xff]  ;;  %v1621_v45 = vld [vmem:[#allocation13 + $0x538] sm:$0xff] }
 0x4fe   : > { %5108 = vmatprep.subr.bf16.mxu0 %v13865_v13  ;;  %v1629_v13 = vld [vmem:[#allocation13 + $0x578] sm:$0xff]  ;;  %v13959_v57 = vcombine.high %v1620_v5, %v1628_v60  ;;  %v13958_v41 = vcombine.low %v1620_v5, %v1628_v60 }
 0x4ff   : > { %v13961_v34 = vcombine.high %v1621_v45, %v1629_v13  ;;  %v13960_v37 = vcombine.low %v1621_v45, %v1629_v13 }
 0x500   : > { %5027 = vmatpush1.bf16.msra.mxu1 %v13862_v54  ;;  %v1636_v54 = vld [vmem:[#allocation13 + $0x5b0] sm:$0xff] }
 0x501   : > { %5109 = vmatpush1.bf16.msra.mxu0 %v13864_v24  ;;  %5028 = vmatprep.subr.bf16.mxu1 %v13879_v25  ;;  %v1644_v24 = vld [vmem:[#allocation13 + $0x5f0] sm:$0xff]  ;;  %v1637_v25 = vld [vmem:[#allocation13 + $0x5b8] sm:$0xff] }
 0x502   : > { %5110 = vmatprep.subr.bf16.mxu0 %v13881_v49  ;;  %v1645_v49 = vld [vmem:[#allocation13 + $0x5f8] sm:$0xff]  ;;  %v13975_v38 = vcombine.high %v1636_v54, %v1644_v24  ;;  %v13974_v51 = vcombine.low %v1636_v54, %v1644_v24 }
 0x503   : > { %v13977_v16 = vcombine.high %v1637_v25, %v1645_v49  ;;  %v13976_v52 = vcombine.low %v1637_v25, %v1645_v49 }
 0x504   : > { %5029 = vmatpush1.bf16.msra.mxu1 %v13878_v40  ;;  %v1652_v40 = vld [vmem:[#allocation13 + $0x630] sm:$0xff] }
 0x505   : > { %5111 = vmatpush1.bf16.msra.mxu0 %v13880_v50  ;;  %5030 = vmatprep.subr.bf16.mxu1 %v13895_v26  ;;  %v1660_v50 = vld [vmem:[#allocation13 + $0x670] sm:$0xff]  ;;  %v1653_v26 = vld [vmem:[#allocation13 + $0x638] sm:$0xff] }
 0x506   : > { %5112 = vmatprep.subr.bf16.mxu0 %v13897_v10  ;;  %v1661_v10 = vld [vmem:[#allocation13 + $0x678] sm:$0xff]  ;;  %v13991_v63 = vcombine.high %v1652_v40, %v1660_v50  ;;  %v13990_v8 = vcombine.low %v1652_v40, %v1660_v50 }
 0x507   : > { %v13993_v1 = vcombine.high %v1653_v26, %v1661_v10  ;;  %v13992_v44 = vcombine.low %v1653_v26, %v1661_v10  ;;  %v1741_v40 = vld [vmem:[#allocation13 + $0x8f8] sm:$0xff]  ;;  %v1748_v10 = vld [vmem:[#allocation13 + $0x930] sm:$0xff] }
 0x508   : > { %5031 = vmatpush1.bf16.msra.mxu1 %v13894_v32  ;;  %v1668_v32 = vld [vmem:[#allocation13 + $0x6b0] sm:$0xff] }
 0x509   : > { %5113 = vmatpush1.bf16.msra.mxu0 %v13896_v47  ;;  %5032 = vmatprep.subr.bf16.mxu1 %v13911_v42  ;;  %v1676_v47 = vld [vmem:[#allocation13 + $0x6f0] sm:$0xff]  ;;  %v1669_v42 = vld [vmem:[#allocation13 + $0x6b8] sm:$0xff] }
 0x50a   : > { %5114 = vmatprep.subr.bf16.mxu0 %v13913_v58  ;;  %v1677_v58 = vld [vmem:[#allocation13 + $0x6f8] sm:$0xff]  ;;  %v14007_v59 = vcombine.high %v1668_v32, %v1676_v47  ;;  %v14006_v35 = vcombine.low %v1668_v32, %v1676_v47 }
 0x50b   : > { %v14009_v22 = vcombine.high %v1669_v42, %v1677_v58  ;;  %v14008_v28 = vcombine.low %v1669_v42, %v1677_v58 }
 0x50c   : > { %5033 = vmatpush1.bf16.msra.mxu1 %v13910_v27  ;;  %v1684_v27 = vld [vmem:[#allocation13 + $0x730] sm:$0xff] }
 0x50d   : > { %5115 = vmatpush1.bf16.msra.mxu0 %v13912_v36  ;;  %5034 = vmatprep.subr.bf16.mxu1 %v13927_v0  ;;  %v1692_v36 = vld [vmem:[#allocation13 + $0x770] sm:$0xff]  ;;  %v1685_v0 = vld [vmem:[#allocation13 + $0x738] sm:$0xff] }
 0x50e   : > { %5116 = vmatprep.subr.bf16.mxu0 %v13929_v56  ;;  %v1693_v56 = vld [vmem:[#allocation13 + $0x778] sm:$0xff]  ;;  %v14023_v33 = vcombine.high %v1684_v27, %v1692_v36  ;;  %v14022_v5 = vcombine.low %v1684_v27, %v1692_v36 }
 0x50f   : > { %v14025_v2 = vcombine.high %v1685_v0, %v1693_v56  ;;  %v14024_v60 = vcombine.low %v1685_v0, %v1693_v56  ;;  %v1780_v56 = vld [vmem:[#allocation13 + $0xa30] sm:$0xff] }
 0x510   : > { %5035 = vmatpush1.bf16.msra.mxu1 %v13926_v12  ;;  %v1700_v12 = vld [vmem:[#allocation13 + $0x7b0] sm:$0xff] }
 0x511   : > { %5117 = vmatpush1.bf16.msra.mxu0 %v13928_v9  ;;  %5036 = vmatprep.subr.bf16.mxu1 %v13943_v11  ;;  %v1708_v9 = vld [vmem:[#allocation13 + $0x7f0] sm:$0xff]  ;;  %v1701_v11 = vld [vmem:[#allocation13 + $0x7b8] sm:$0xff] }
 0x512   : > { %5118 = vmatprep.subr.bf16.mxu0 %v13945_v30  ;;  %v1709_v30 = vld [vmem:[#allocation13 + $0x7f8] sm:$0xff]  ;;  %v14039_v45 = vcombine.high %v1700_v12, %v1708_v9  ;;  %v14038_v54 = vcombine.low %v1700_v12, %v1708_v9  ;;  %v16987_v9 = vld [vmem:[#allocation13 + $0xab0] sm:$0xff] }
 0x513   : > { %v14041_v13 = vcombine.high %v1701_v11, %v1709_v30  ;;  %v14040_v24 = vcombine.low %v1701_v11, %v1709_v30  ;;  %v16989_v11 = vld [vmem:[#allocation13 + $0xaf0] sm:$0xff]  ;;  %v16991_v30 = vld [vmem:[#allocation13 + $0xab8] sm:$0xff] }
 0x514   : > { %5037 = vmatpush1.bf16.msra.mxu1 %v13942_v15  ;;  %v1716_v15 = vld [vmem:[#allocation13 + $0x830] sm:$0xff] }
 0x515   : > { %5119 = vmatpush1.bf16.msra.mxu0 %v13944_v48  ;;  %5038 = vmatprep.subr.bf16.mxu1 %v13959_v57  ;;  %v1724_v48 = vld [vmem:[#allocation13 + $0x870] sm:$0xff]  ;;  %v1717_v57 = vld [vmem:[#allocation13 + $0x838] sm:$0xff] }
 0x516   : > { %5120 = vmatprep.subr.bf16.mxu0 %v13961_v34  ;;  %v1725_v34 = vld [vmem:[#allocation13 + $0x878] sm:$0xff]  ;;  %v14055_v25 = vcombine.high %v1716_v15, %v1724_v48 }
 0x517   : > { %v14057_v49 = vcombine.high %v1717_v57, %v1725_v34  ;;  %v14056_v50 = vcombine.low %v1717_v57, %v1725_v34  ;;  %v17003_v57 = vld [vmem:[#allocation13 + $0xbb0] sm:$0xff] }
 0x518   : > { %5039 = vmatpush1.bf16.msra.mxu1 %v13958_v41  ;;  %v1732_v41 = vld [vmem:[#allocation13 + $0x8b0] sm:$0xff] }
 0x519   : > { %5121 = vmatpush1.bf16.msra.mxu0 %v13960_v37  ;;  %5040 = vmatprep.subr.bf16.mxu1 %v13975_v38  ;;  %v1740_v37 = vld [vmem:[#allocation13 + $0x8f0] sm:$0xff]  ;;  %v14054_v38 = vcombine.low %v1716_v15, %v1724_v48  ;;  %v16999_v15 = vld [vmem:[#allocation13 + $0xb38] sm:$0xff] }
 0x51a   : > { %5122 = vmatprep.subr.bf16.mxu0 %v13977_v16  ;;  %v1733_v16 = vld [vmem:[#allocation13 + $0x8b8] sm:$0xff]  ;;  %v14071_v26 = vcombine.high %v1732_v41, %v1740_v37  ;;  %v14070_v32 = vcombine.low %v1732_v41, %v1740_v37  ;;  %v14135_v41 = vcombine.high %v16987_v9, %v16989_v11  ;;  %v17013_v37 = vld [vmem:[#allocation13 + $0xc30] sm:$0xff] }
 0x51b   : > { %v14072_v47 = vcombine.low %v1733_v16, %v1741_v40  ;;  %v17001_v48 = vld [vmem:[#allocation13 + $0xb78] sm:$0xff] }
 0x51c   : > { %5041 = vmatpush1.bf16.msra.mxu1 %v13974_v51  ;;  %v1756_v51 = vld [vmem:[#allocation13 + $0x970] sm:$0xff] }
 0x51d   : > { %5123 = vmatpush1.bf16.msra.mxu0 %v13976_v52  ;;  %5042 = vmatprep.subr.bf16.mxu1 %v13991_v63  ;;  %v14073_v52 = vcombine.high %v1733_v16, %v1741_v40  ;;  %v1749_v63 = vld [vmem:[#allocation13 + $0x938] sm:$0xff]  ;;  %v14087_v42 = vcombine.high %v1748_v10, %v1756_v51  ;;  %v14086_v27 = vcombine.low %v1748_v10, %v1756_v51 }
 0x51e   : > { %5124 = vmatprep.subr.bf16.mxu0 %v13993_v1  ;;  %v1757_v1 = vld [vmem:[#allocation13 + $0x978] sm:$0xff]  ;;  %v14134_v40 = vcombine.low %v16987_v9, %v16989_v11 }
 0x51f   : > { %v14089_v58 = vcombine.high %v1749_v63, %v1757_v1  ;;  %v17017_v16 = vld [vmem:[#allocation13 + $0xc38] sm:$0xff] }
 0x520   : > { %5043 = vmatpush1.bf16.msra.mxu1 %v13990_v8  ;;  %v1764_v8 = vld [vmem:[#allocation13 + $0x9b0] sm:$0xff]  ;;  %v17027_v51 = vld [vmem:[#allocation13 + $0xc78] sm:$0xff] }
 0x521   : > { %5125 = vmatpush1.bf16.msra.mxu0 %v13992_v44  ;;  %5044 = vmatprep.subr.bf16.mxu1 %v14007_v59  ;;  %v1772_v44 = vld [vmem:[#allocation13 + $0x9f0] sm:$0xff]  ;;  %v1765_v59 = vld [vmem:[#allocation13 + $0x9b8] sm:$0xff] }
 0x522   : > { %5126 = vmatprep.subr.bf16.mxu0 %v14009_v22  ;;  %v1773_v22 = vld [vmem:[#allocation13 + $0x9f8] sm:$0xff]  ;;  %v14103_v36 = vcombine.high %v1764_v8, %v1772_v44 }
 0x523   : > { %v14105_v0 = vcombine.high %v1765_v59, %v1773_v22 }
 0x524   : > { %5045 = vmatpush1.bf16.msra.mxu1 %v14006_v35  ;;  %v1788_v35 = vld [vmem:[#allocation13 + $0xa70] sm:$0xff] }
 0x525   : > { %5127 = vmatpush1.bf16.msra.mxu0 %v14008_v28  ;;  %5046 = vmatprep.subr.bf16.mxu1 %v14023_v33  ;;  %v1781_v28 = vld [vmem:[#allocation13 + $0xa38] sm:$0xff]  ;;  %v14119_v12 = vcombine.high %v1780_v56, %v1788_v35  ;;  %v14118_v34 = vcombine.low %v1780_v56, %v1788_v35 }
 0x526   : > { %5128 = vmatprep.subr.bf16.mxu0 %v14025_v2  ;;  %v1789_v33 = vld [vmem:[#allocation13 + $0xa78] sm:$0xff]  ;;  %v14104_v2 = vcombine.low %v1765_v59, %v1773_v22 }
 0x527   : > { %v17059_v56 = vld [vmem:[#allocation13 + $0xd78] sm:$0xff] }
 0x528   : > { %5047 = vmatpush1.bf16.msra.mxu1 %v14022_v5  ;;  %v14121_v5 = vcombine.high %v1781_v28, %v1789_v33 }
 0x529   : > { %5129 = vmatpush1.bf16.msra.mxu0 %v14024_v60  ;;  %5048 = vmatprep.subr.bf16.mxu1 %v14039_v45  ;;  %v16993_v60 = vld [vmem:[#allocation13 + $0xaf8] sm:$0xff]  ;;  %v16995_v45 = vld [vmem:[#allocation13 + $0xb30] sm:$0xff] }
 0x52a   : > { %5130 = vmatprep.subr.bf16.mxu0 %v14041_v13  ;;  %v16997_v13 = vld [vmem:[#allocation13 + $0xb70] sm:$0xff] }
 0x52c   : > { %5049 = vmatpush1.bf16.msra.mxu1 %v14038_v54  ;;  %v17005_v54 = vld [vmem:[#allocation13 + $0xbf0] sm:$0xff] }
 0x52d   : > { %5131 = vmatpush1.bf16.msra.mxu0 %v14040_v24  ;;  %5059 = vmatprep.subr.bf16.mxu1 %v14055_v25  ;;  %v17007_v24 = vld [vmem:[#allocation13 + $0xbb8] sm:$0xff]  ;;  %v14167_v59 = vcombine.high %v17003_v57, %v17005_v54 }
 0x52e   : > { %5141 = vmatprep.subr.bf16.mxu0 %v14057_v49  ;;  %v17009_v25 = vld [vmem:[#allocation13 + $0xbf8] sm:$0xff]  ;;  %v14120_v49 = vcombine.low %v1781_v28, %v1789_v33 }
 0x52f   : > { %5051 = vmatmul.mubr.bf16.vlgmr.msra.gmra.mrb[16].mxu1 %v16756_v4 }
 0x530   : > { %5133 = vmatmul.mubr.bf16.vlgmr.msra.gmra.mrb[20].mxu0 %v16756_v4  ;;  %5060 = vmatpush1.bf16.msra.mxu1 %v14054_v38  ;;  %v14088_v4 = vcombine.low %v1749_v63, %v1757_v1  ;;  %v17015_v38 = vld [vmem:[#allocation13 + $0xc70] sm:$0xff]  ;;  %v14151_v1 = vcombine.high %v16995_v45, %v16997_v13 }
 0x531   : > { %5091 = vmatprep.mubr.bf16.mxu1 %v16762_v14  ;;  %5142 = vmatpush1.bf16.msra.mxu0 %v14056_v50  ;;  %v14136_v50 = vcombine.low %v16991_v30, %v16993_v60  ;;  %v17031_v63 = vld [vmem:[#allocation13 + $0xcf0] sm:$0xff] }
 0x532   : > { %5173 = vmatprep.mubr.bf16.mxu0 %v16762_v14  ;;  %5061 = vmatprep.subr.bf16.mxu1 %v14071_v26  ;;  %v14102_v14 = vcombine.low %v1764_v8, %v1772_v44  ;;  %v14137_v26 = vcombine.high %v16991_v30, %v16993_v60  ;;  %v17043_v8 = vld [vmem:[#allocation13 + $0xcf8] sm:$0xff]  ;;  %v17045_v44 = vld [vmem:[#allocation13 + $0xd30] sm:$0xff] }
 0x533   : > { %5143 = vmatprep.subr.bf16.mxu0 %v14073_v52  ;;  %v17029_v52 = vld [vmem:[#allocation13 + $0xcb0] sm:$0xff] }
 0x534   : > { %5062 = vmatpush1.bf16.msra.mxu1 %v14070_v32 }
 0x535   : > { %5144 = vmatpush1.bf16.msra.mxu0 %v14072_v47  ;;  %5063 = vmatprep.subr.bf16.mxu1 %v14087_v42  ;;  %v14153_v47 = vcombine.high %v16999_v15, %v17001_v48 }
 0x536   : > { %5145 = vmatprep.subr.bf16.mxu0 %v14089_v58  ;;  %v17041_v58 = vld [vmem:[#allocation13 + $0xcb8] sm:$0xff] }
 0x538   : > { %5064 = vmatpush1.bf16.msra.mxu1 %v14086_v27  ;;  %v14169_v27 = vcombine.high %v17007_v24, %v17009_v25 }
 0x539   : > { %5146 = vmatpush1.bf16.msra.mxu0 %v14088_v4  ;;  %5065 = vmatprep.subr.bf16.mxu1 %v14103_v36  ;;  %v17055_v36 = vld [vmem:[#allocation13 + $0xd70] sm:$0xff] }
 0x53a   : > { %5147 = vmatprep.subr.bf16.mxu0 %v14105_v0  ;;  %v17057_v0 = vld [vmem:[#allocation13 + $0xd38] sm:$0xff] }
 0x53c   : > { %5066 = vmatpush1.bf16.msra.mxu1 %v14102_v14 }
 0x53d   : > { %5148 = vmatpush1.bf16.msra.mxu0 %v14104_v2  ;;  %5067 = vmatprep.subr.bf16.mxu1 %v14119_v12 }
 0x53e   : > { %5149 = vmatprep.subr.bf16.mxu0 %v14121_v5  ;;  %v17067_v14 = vpop.f32.mrb[8].mxu1 }
 0x53f   : > { %19040 = vst [vmem:[#allocation32_spill] sm:$0xff] %v17067_v14  ;;  %v5210_v30 = vrot.slane %v17067_v14, 4  ;;  %v5302_v5 = vmul.f32 %v17067_v14, %v17067_v14  ;;  %v17080_v60 = vpop.f32.mrb[12].mxu0 }
 0x540   : > { %5068 = vmatpush1.bf16.msra.mxu1 %v14118_v34  ;;  %v17082_v34 = vpop.f32.mrb[9].mxu1  ;;  %v5304_v7 = vmul.f32 %v17080_v60, %v17080_v60  ;;  %v17094_v11 = vpop.f32.mrb[13].mxu0 }
 0x541   : > { %5150 = vmatpush1.bf16.msra.mxu0 %v14120_v49  ;;  %5069 = vmatprep.subr.bf16.mxu1 %v14135_v41  ;;  %v5216_v9 = vrot.slane %v17082_v34, 4  ;;  %v5303_v2 = vmul.f32 %v17082_v34, %v17082_v34  ;;  %v4769_v12 = vpop.f32.mrb[10].mxu1  ;;  %v5211_v28 = vadd.f32 %v5210_v30, %v17067_v14  ;;  %v5338_v49 = vrot.slane %v5302_v5, 4  ;;  %v4851_v33 = vpop.f32.mrb[14].mxu0 }
 0x542   : > { %5151 = vmatprep.subr.bf16.mxu0 %v14137_v26  ;;  %v5222_v26 = vrot.slane %v17080_v60, 4  ;;  %v5228_v4 = vrot.slane %v17094_v11, 4  ;;  %v5305_v41 = vmul.f32 %v17094_v11, %v17094_v11  ;;  %v4770_v35 = vpop.f32.mrb[11].mxu1  ;;  %v5350_v42 = vrot.slane %v5304_v7, 4  ;;  %v4852_v12 = vpop.f32.mrb[15].mxu0 }
 0x543   : > { %v5217_v32 = vadd.f32 %v5216_v9, %v17082_v34  ;;  %v5344_v10 = vrot.slane %v5303_v2, 4  ;;  %v5339_v30 = vadd.f32 %v5338_v49, %v5302_v5 }
 0x544   : > { %5070 = vmatpush1.bf16.msra.mxu1 %v14134_v40  ;;  %v5223_v22 = vadd.f32 %v5222_v26, %v17080_v60  ;;  %v5212_v40 = vrot.slane %v5211_v28, 2  ;;  %v5229_v14 = vadd.f32 %v5228_v4, %v17094_v11  ;;  %v5356_v43 = vrot.slane %v5305_v41, 4 }
 0x545   : > { %5152 = vmatpush1.bf16.msra.mxu0 %v14136_v50  ;;  %5071 = vmatprep.subr.bf16.mxu1 %v14151_v1  ;;  %v5351_v39 = vadd.f32 %v5350_v42, %v5304_v7  ;;  %v5218_v3 = vrot.slane %v5217_v32, 2  ;;  %v5345_v33 = vadd.f32 %v5344_v10, %v5303_v2  ;;  %v19041_v50 = vcombine.low %v16995_v45, %v16997_v13 }
 0x546   : > { %5153 = vmatprep.subr.bf16.mxu0 %v14153_v47  ;;  %v5224_v6 = vrot.slane %v5223_v22, 2  ;;  %v5213_v1 = vadd.f32 %v5212_v40, %v5211_v28  ;;  %v5340_v35 = vrot.slane %v5339_v30, 2  ;;  %v5230_v26 = vrot.slane %v5229_v14, 2 }
 0x547   : > { %v5357_v9 = vadd.f32 %v5356_v43, %v5305_v41  ;;  %v19042_v47 = vcombine.low %v16999_v15, %v17001_v48  ;;  %v5352_v4 = vrot.slane %v5351_v39, 2  ;;  %v5219_v49 = vadd.f32 %v5218_v3, %v5217_v32 }
 0x548   : > { %5072 = vmatpush1.bf16.msra.mxu1 %v19041_v50  ;;  %v5225_v5 = vadd.f32 %v5224_v6, %v5223_v22  ;;  %v5346_v12 = vrot.slane %v5345_v33, 2  ;;  %v5214_v7 = vrot.slane %v5213_v1, 1  ;;  %v5341_v10 = vadd.f32 %v5340_v35, %v5339_v30 }
 0x549   : > { %5154 = vmatpush1.bf16.msra.mxu0 %v19042_v47  ;;  %5073 = vmatprep.subr.bf16.mxu1 %v14167_v59  ;;  %v5231_v42 = vadd.f32 %v5230_v26, %v5229_v14  ;;  %v5358_v2 = vrot.slane %v5357_v9, 2  ;;  %v5353_v13 = vadd.f32 %v5352_v4, %v5351_v39  ;;  %v5220_v28 = vrot.slane %v5219_v49, 1 }
 0x54a   : > { %5155 = vmatprep.subr.bf16.mxu0 %v14169_v27  ;;  %v5226_v45 = vrot.slane %v5225_v5, 1  ;;  %v5347_v40 = vadd.f32 %v5346_v12, %v5345_v33  ;;  %v19043_v43 = vcombine.low %v17003_v57, %v17005_v54  ;;  %v5215_v15 = vadd.f32 %v5214_v7, %v5213_v1 }
 0x54b   : > { %v5342_v48 = vrot.slane %v5341_v10, 1  ;;  %v5232_v59 = vrot.slane %v5231_v42, 1  ;;  %v5359_v6 = vadd.f32 %v5358_v2, %v5357_v9  ;;  %v19044_v3 = vcombine.low %v17007_v24, %v17009_v25  ;;  %v1900_v2 = vld [vmem:[#allocation13 + $0xdf0] sm:$0xff] }
 0x54c   : > { %5074 = vmatpush1.bf16.msra.mxu1 %v19043_v43  ;;  %v19045_v32 = vcombine.high %v17013_v37, %v17015_v38  ;;  %v5227_v22 = vadd.f32 %v5226_v45, %v5225_v5  ;;  %v5354_v39 = vrot.slane %v5353_v13, 1  ;;  %v5221_v27 = vadd.f32 %v5220_v28, %v5219_v49  ;;  %v1901_v28 = vld [vmem:[#allocation13 + $0xdf8] sm:$0xff] }
 0x54d   : > { %5156 = vmatpush1.bf16.msra.mxu0 %v19044_v3  ;;  %v5348_v14 = vrot.slane %v5347_v40, 1  ;;  %v19046_v57 = vcombine.high %v17017_v16, %v17027_v51  ;;  %v17121_v54 = vmul.f32 0.125, %v5215_v15  ;;  %v5343_v41 = vadd.f32 %v5342_v48, %v5341_v10 }
 0x54e   : > { %5075 = vmatprep.subr.bf16.mxu1 %v19045_v32  ;;  %v5233_v30 = vadd.f32 %v5232_v59, %v5231_v42  ;;  %v5360_v33 = vrot.slane %v5359_v6, 1  ;;  %v17123_v50 = vmul.f32 0.125, %v5227_v22  ;;  %v5355_v24 = vadd.f32 %v5354_v39, %v5353_v13  ;;  %v1892_v42 = vld [vmem:[#allocation13 + $0xdb0] sm:$0xff]  ;;  %v1893_v13 = vld [vmem:[#allocation13 + $0xdb8] sm:$0xff] }
 0x54f   : > { %5157 = vmatprep.subr.bf16.mxu0 %v19046_v57  ;;  %v17125_v25 = vmul.f32 0.125, %v5221_v27  ;;  %v5349_v1 = vadd.f32 %v5348_v14, %v5347_v40  ;;  %v19047_v35 = vcombine.low %v17013_v37, %v17015_v38  ;;  %v5414_v26 = vmul.f32 0.125, %v5343_v41  ;;  %v1908_v57 = vld [vmem:[#allocation13 + $0xe30] sm:$0xff] }
 0x550   : > { %v5430_v9 = vmul.f32 %v17121_v54, %v17121_v54  ;;  %v17132_v47 = vmul.f32 0.125, %v5233_v30  ;;  %v5361_v5 = vadd.f32 %v5360_v33, %v5359_v6  ;;  %v19048_v4 = vcombine.low %v17017_v16, %v17027_v51  ;;  %v1916_v41 = vld [vmem:[#allocation13 + $0xe70] sm:$0xff]  ;;  %v1917_v33 = vld [vmem:[#allocation13 + $0xe78] sm:$0xff] }
 0x551   : > { %5076 = vmatpush1.bf16.msra.mxu1 %v19047_v35  ;;  %v19049_v49 = vcombine.high %v17029_v52, %v17031_v63  ;;  %v5416_v12 = vmul.f32 0.125, %v5355_v24  ;;  %v5432_v37 = vmul.f32 %v17123_v50, %v17123_v50  ;;  %v5415_v38 = vmul.f32 0.125, %v5349_v1 }
 0x552   : > { %5158 = vmatpush1.bf16.msra.mxu0 %v19048_v4  ;;  %v5431_v7 = vmul.f32 %v17125_v25, %v17125_v25  ;;  %v19050_v10 = vcombine.high %v17041_v58, %v17043_v8  ;;  %v5446_v16 = vsub.f32 %v5414_v26, %v5430_v9  ;;  %v5417_v51 = vmul.f32 0.125, %v5361_v5  ;;  %v1932_v9 = vld [vmem:[#allocation13 + $0xef0] sm:$0xff]  ;;  %v1925_v5 = vld [vmem:[#allocation13 + $0xeb8] sm:$0xff] }
 0x553   : > { %5077 = vmatprep.subr.bf16.mxu1 %v19049_v49  ;;  %v5433_v45 = vmul.f32 %v17132_v47, %v17132_v47  ;;  %v5448_v40 = vsub.f32 %v5416_v12, %v5432_v37  ;;  %v19051_v15 = vcombine.low %v17029_v52, %v17031_v63  ;;  %v14214_v48 = vcombine.low %v17045_v44, %v17055_v36  ;;  %v1933_v4 = vld [vmem:[#allocation13 + $0xef8] sm:$0xff] }
 0x554   : > { %5159 = vmatprep.subr.bf16.mxu0 %v19050_v10  ;;  %v5447_v43 = vsub.f32 %v5415_v38, %v5431_v7  ;;  %v5462_v59 = vmax.f32 %v5446_v16, 0.0  ;;  %v19052_v3 = vcombine.low %v17041_v58, %v17043_v8  ;;  %v19053_v32 = vcombine.high %v17045_v44, %v17055_v36  ;;  %v1909_v8 = vld [vmem:[#allocation13 + $0xe38] sm:$0xff]  ;;  %v1940_v7 = vld [vmem:[#allocation13 + $0xf30] sm:$0xff] }
 0x555   : > { %5078 = vmatpush1.bf16.msra.mxu1 %v19051_v15  ;;  %v5449_v6 = vsub.f32 %v5417_v51, %v5433_v45  ;;  %v14216_v22 = vcombine.low %v17057_v0, %v17059_v56  ;;  %v14231_v39 = vcombine.high %v1892_v42, %v1900_v2  ;;  %v5464_v27 = vmax.f32 %v5448_v40, 0.0  ;;  %v1948_v10 = vld [vmem:[#allocation13 + $0xf70] sm:$0xff]  ;;  %v1957_v15 = vld [vmem:[#allocation13 + $0xfb8] sm:$0xff] }
 0x556   : > { %5160 = vmatpush1.bf16.msra.mxu0 %v19052_v3  ;;  %5079 = vmatprep.subr.bf16.mxu1 %v19053_v32  ;;  %v5463_v52 = vmax.f32 %v5447_v43, 0.0  ;;  %v19054_v63 = vcombine.high %v17057_v0, %v17059_v56  ;;  %v14233_v14 = vcombine.high %v1893_v13, %v1901_v28  ;;  %v5478_v30 = vadd.f32 1e-05, %v5462_v59  ;;  %v1924_v56 = vld [vmem:[#allocation13 + $0xeb0] sm:$0xff] }
 0x557   : > { %v5465_v58 = vmax.f32 %v5449_v6, 0.0  ;;  %v5480_v24 = vadd.f32 1e-05, %v5464_v27  ;;  %v14230_v36 = vcombine.low %v1892_v42, %v1900_v2  ;;  %v14232_v35 = vcombine.low %v1893_v13, %v1901_v28  ;;  %v1941_v42 = vld [vmem:[#allocation13 + $0xf38] sm:$0xff]  ;;  %v1956_v28 = vld [vmem:[#allocation13 + $0xfb0] sm:$0xff] }
 0x558   : > { %5161 = vmatprep.subr.bf16.mxu0 %v19054_v63  ;;  %v5479_v44 = vadd.f32 1e-05, %v5463_v52  ;;  %15755 = vrsqrt.f32 %v5478_v30  ;;  %v14247_v26 = vcombine.high %v1908_v57, %v1916_v41  ;;  %v14249_v0 = vcombine.high %v1909_v8, %v1917_v33  ;;  %v1949_v2 = vld [vmem:[#allocation13 + $0xf78] sm:$0xff]  ;;  %v1964_v40 = vld [vmem:[#allocation13 + $0xff0] sm:$0xff]  ;;  %v5986_v63 = vld [vmem:[%s16658_s5] sm:$0xff] }
 0x559   : > { %5080 = vmatpush1.bf16.msra.mxu1 %v14214_v48  ;;  %v5481_v1 = vadd.f32 1e-05, %v5465_v58  ;;  %15757 = vrsqrt.f32 %v5480_v24  ;;  %v14246_v49 = vcombine.low %v1908_v57, %v1916_v41  ;;  %v14248_v12 = vcombine.low %v1909_v8, %v1917_v33  ;;  %v1965_v48 = vld [vmem:[#allocation13 + $0xff8] sm:$0xff]  ;;  %v5987_v41 = vld [vmem:[%s16658_s5 + $0x8] sm:$0xff] }
 0x55a   : > { %5162 = vmatpush1.bf16.msra.mxu0 %v14216_v22  ;;  %5081 = vmatprep.subr.bf16.mxu1 %v14231_v39  ;;  %15759 = vrsqrt.f32 %v5479_v44  ;;  %v14263_v37 = vcombine.high %v1924_v56, %v1932_v9  ;;  %v14265_v38 = vcombine.high %v1925_v5, %v1933_v4  ;;  %v14262_v16 = vcombine.low %v1924_v56, %v1932_v9  ;;  %v5991_v30 = vld [vmem:[%s16658_s5 + $0x28] sm:$0xff] }
 0x55b   : > { %5163 = vmatprep.subr.bf16.mxu0 %v14233_v14  ;;  %15761 = vrsqrt.f32 %v5481_v1  ;;  %v14264_v51 = vcombine.low %v1925_v5, %v1933_v4  ;;  %v14279_v45 = vcombine.high %v1940_v7, %v1948_v10  ;;  %v14281_v13 = vcombine.high %v1941_v42, %v1949_v2  ;;  %v5990_v14 = vld [vmem:[%s16658_s5 + $0x20] sm:$0xff]  ;;  %v5999_v56 = vld [vmem:[%s16658_s5 + $0x68] sm:$0xff] }
 0x55c   : > { %v14278_v6 = vcombine.low %v1940_v7, %v1948_v10  ;;  %v14280_v32 = vcombine.low %v1941_v42, %v1949_v2  ;;  %v14295_v22 = vcombine.high %v1956_v28, %v1964_v40  ;;  %v14297_v52 = vcombine.high %v1957_v15, %v1965_v48  ;;  %v5994_v1 = vld [vmem:[%s16658_s5 + $0x40] sm:$0xff]  ;;  %v17185_v42 = vld [vmem:[%s16658_s5 + $0x88] sm:$0xff] }
 0x55d   : > { %5082 = vmatpush1.bf16.msra.mxu1 %v14230_v36  ;;  %v14294_v8 = vcombine.low %v1956_v28, %v1964_v40  ;;  %v14296_v24 = vcombine.low %v1957_v15, %v1965_v48  ;;  %v14299_v44 = vcombine.high %v5986_v63, %v5990_v14  ;;  %v14301_v36 = vcombine.high %v5987_v41, %v5991_v30  ;;  %v5182_v4 = vld [vmem:[#allocation15] sm:$0xff]  ;;  %v17210_v48 = vld [vmem:[%s16658_s5 + $0xe8] sm:$0xff] }
 0x55e   : > { %5164 = vmatpush1.bf16.msra.mxu0 %v14232_v35  ;;  %5083 = vmatprep.subr.bf16.mxu1 %v14247_v26  ;;  %v5998_v35 = vld [vmem:[%s16658_s5 + $0x60] sm:$0xff]  ;;  %v19055_v9 = vcombine.low %v16972_v46, %v16975_v19  ;;  %v17188_v46 = vld [vmem:[%s16658_s5 + $0xa8] sm:$0xff]  ;;  %v17191_v19 = vsub.s32 4, %v16670_v53  ;;  %v17194_v2 = vsub.s32 5, %v16670_v53  ;;  %v17206_v40 = vsub.s32 6, %v16670_v53 }
 0x55f   : > { %5165 = vmatprep.subr.bf16.mxu0 %v14249_v0  ;;  %v5995_v0 = vld [vmem:[%s16658_s5 + $0x48] sm:$0xff]  ;;  %v14307_v7 = vcombine.high %v5994_v1, %v5998_v35  ;;  %v6006_v10 = vld [vmem:[%s16658_s5 + $0xa0] sm:$0xff] }
 0x560   : > { %v5562_v5 = vrot.slane %v19055_v9, %v16673_v55  ;;  %v14308_v15 = vcombine.low %v5995_v0, %v5999_v56 }
 0x561   : > { %5084 = vmatpush1.bf16.msra.mxu1 %v14246_v49  ;;  %v14298_v49 = vcombine.low %v5986_v63, %v5990_v14 }
 0x562   : > { %5166 = vmatpush1.bf16.msra.mxu0 %v14248_v12  ;;  %5085 = vmatprep.subr.bf16.mxu1 %v14263_v37  ;;  %v15756_v43 = vpop.eup %15755  ;;  %v17180_v12 = vld [vmem:[%s16658_s5 + $0x80] sm:$0xff] }
 0x563   : > { %5167 = vmatprep.subr.bf16.mxu0 %v14265_v38  ;;  %v15758_v59 = vpop.eup %15757  ;;  %v14300_v38 = vcombine.low %v5987_v41, %v5991_v30 }
 0x564   : > { %v15760_v3 = vpop.eup %15759 }
 0x565   : > { %5086 = vmatpush1.bf16.msra.mxu1 %v14262_v16  ;;  %v15762_v39 = vpop.eup %15761  ;;  %v5524_v27 = vcombine.low %v15756_v43, %v15760_v3  ;;  %v14309_v16 = vcombine.high %v5995_v0, %v5999_v56  ;;  %v14306_v43 = vcombine.low %v5994_v1, %v5998_v35  ;;  %v17219_v3 = vsub.s32 7, %v16670_v53 }
 0x566   : > { %5168 = vmatpush1.bf16.msra.mxu0 %v14264_v51  ;;  %5087 = vmatprep.subr.bf16.mxu1 %v14279_v45  ;;  %v5525_v57 = vcombine.low %v15758_v59, %v15762_v39  ;;  %v17197_v51 = vld [vmem:[%s16658_s5 + $0xc0] sm:$0xff]  ;;  %v14316_v39 = vcombine.low %v17185_v42, %v17188_v46 }
 0x567   : > { %5169 = vmatprep.subr.bf16.mxu0 %v14281_v13  ;;  %v5546_v58 = vrot.slane %v5524_v27, %v16673_v55  ;;  %v17200_v45 = vld [vmem:[%s16658_s5 + $0xe0] sm:$0xff]  ;;  %v17203_v13 = vld [vmem:[%s16658_s5 + $0xc8] sm:$0xff] }
 0x568   : > { %v5553_v33 = vrot.slane %v5525_v57, %v16673_v55  ;;  %v17213_v59 = vld [vmem:[%s16658_s5 + $0x100] sm:$0xff]  ;;  %v14323_v53 = vcombine.high %v17197_v51, %v17200_v45  ;;  %v14324_v63 = vcombine.low %v17203_v13, %v17210_v48  ;;  %v14325_v14 = vcombine.high %v17203_v13, %v17210_v48  ;;  %v6027_v48 = vld [vmem:[%s16658_s5 + $0x148] sm:$0xff] }
 0x569   : > { %5088 = vmatpush1.bf16.msra.mxu1 %v14278_v6  ;;  %v17216_v6 = vld [vmem:[%s16658_s5 + $0x120] sm:$0xff] }
 0x56a   : > { %5170 = vmatpush1.bf16.msra.mxu0 %v14280_v32  ;;  %5089 = vmatprep.subr.bf16.mxu1 %v14295_v22  ;;  %v5555_v26 = vcombine.low %v5546_v58, %v5553_v33  ;;  %v14314_v32 = vcombine.low %v17180_v12, %v6006_v10  ;;  %v14315_v22 = vcombine.high %v17180_v12, %v6006_v10  ;;  %v6030_v13 = vld [vmem:[%s16658_s5 + $0x160] sm:$0xff] }
 0x56b   : > { %5171 = vmatprep.subr.bf16.mxu0 %v14297_v52  ;;  %v14317_v52 = vcombine.high %v17185_v42, %v17188_v46  ;;  %v14331_v57 = vcombine.high %v17213_v59, %v17216_v6 }
 0x56c   : > { %v5569_v37 = vrot.slane %v5555_v26, %v16673_v55 }
 0x56d   : > { %5090 = vmatpush1.bf16.msra.mxu1 %v14294_v8 }
 0x56e   : > { %5172 = vmatpush1.bf16.msra.mxu0 %v14296_v24  ;;  %12172 = vmatprep.subr.bf16.mxu1 %v14299_v44  ;;  %v5570_v28 = vcombine.low %v5562_v5, %v5569_v37 }
 0x56f   : > { %12500 = vmatprep.subr.bf16.mxu0 %v14301_v36 }
 0x570   : > { %5092 = vmatmul.mubr.bf16.vlgmr.msra.gmra.mrb[16].mxu1 %v16775_v23  ;;  %v5622_v27 = vmul.f32 %v5570_v28, %v5182_v4 }
 0x571   : > { %5174 = vmatmul.mubr.bf16.vlgmr.msra.gmra.mrb[20].mxu0 %v16775_v23  ;;  %12173 = vmatpush1.bf16.msra.mxu1 %v14298_v49  ;;  %v14322_v23 = vcombine.low %v17197_v51, %v17200_v45  ;;  %v6026_v45 = vld [vmem:[%s16658_s5 + $0x140] sm:$0xff] }
 0x572   : > { %12501 = vmatpush1.bf16.msra.mxu0 %v14300_v38  ;;  %12174 = vmatprep.subr.bf16.mxu1 %v14307_v7  ;;  %v5629_v41 = vrot.slane %v5622_v27, %v16678_v61  ;;  %v5633_v30 = vrot.slane %v5622_v27, %v16681_v62  ;;  %v5637_v58 = vrot.slane %v5622_v27, %v16734_v20 }
 0x573   : > { %12502 = vmatprep.subr.bf16.mxu0 %v14309_v16  ;;  %v5641_v8 = vrot.slane %v5622_v27, %v16737_v21  ;;  %v5645_v33 = vrot.slane %v5622_v27, %v17191_v19  ;;  %v5649_v24 = vrot.slane %v5622_v27, %v17194_v2  ;;  %v5653_v44 = vrot.slane %v5622_v27, %v17206_v40 }
 0x574   : > { %v5657_v36 = vrot.slane %v5622_v27, %v17219_v3  ;;  %v5722_v1 = vmul.f32 %v5629_v41, %v16927_v17  ;;  %v5723_v35 = vmul.f32 %v5633_v30, %v16931_v18  ;;  %v5724_v26 = vmul.f32 %v5637_v58, %v16929_v31  ;;  %v6019_v18 = vld [vmem:[%s16658_s5 + $0x108] sm:$0xff] }
 0x575   : > { %12175 = vmatpush1.bf16.msra.mxu1 %v14306_v43  ;;  %v5725_v0 = vmul.f32 %v5641_v8, %v16933_v29  ;;  %v5726_v9 = vmul.f32 %v5645_v33, %v17121_v54  ;;  %v5727_v5 = vmul.f32 %v5649_v24, %v17125_v25  ;;  %v5728_v4 = vmul.f32 %v5653_v44, %v17123_v50  ;;  %v6023_v31 = vld [vmem:[%s16658_s5 + $0x128] sm:$0xff]  ;;  %v19056_v29 = vld [vmem:[#allocation30_spill] sm:$0xff]  ;;  %v19057_v54 = vld [vmem:[#allocation28_spill] sm:$0xff] }
 0x576   : > { %12503 = vmatpush1.bf16.msra.mxu0 %v14308_v15  ;;  %v17251_v56 = vmul.f32 %v5657_v36, %v17094_v11  ;;  %12176 = vmatprep.subr.bf16.mxu1 %v14315_v22  ;;  %v5729_v49 = vmul.f32 %v5657_v36, %v17132_v47  ;;  %v5754_v17 = vcombine.low %v5722_v1, %v5723_v35  ;;  %v19058_v25 = vld [vmem:[#allocation31_spill] sm:$0xff]  ;;  %v19059_v47 = vld [vmem:[#allocation29_spill] sm:$0xff] }
 0x577   : > { %v5755_v12 = vcombine.low %v5724_v26, %v5725_v0  ;;  %12504 = vmatprep.subr.bf16.mxu0 %v14317_v52  ;;  %v17260_v37 = vmul.f32 %v5633_v30, %v19056_v29  ;;  %v5756_v11 = vcombine.low %v5726_v9, %v5727_v5  ;;  %v17263_v38 = vmul.f32 %v5629_v41, %v19057_v54  ;;  %v6038_v41 = vld [vmem:[%s16658_s5 + $0x1a0] sm:$0xff]  ;;  %v19060_v30 = vld [vmem:[#allocation32_spill] sm:$0xff]  ;;  %v6043_v0 = vld [vmem:[%s16658_s5 + $0x1c8] sm:$0xff] }
 0x578   : > { %v17266_v50 = vmul.f32 %v5641_v8, %v19058_v25  ;;  %v17269_v7 = vmul.f32 %v5637_v58, %v19059_v47  ;;  %v5757_v10 = vcombine.low %v5728_v4, %v5729_v49  ;;  %v5764_v42 = vrot.slane %v5754_v17, %v16673_v55  ;;  %v6046_v26 = vld [vmem:[%s16658_s5 + $0x1e0] sm:$0xff] }
 0x579   : > { %12177 = vmatpush1.bf16.msra.mxu1 %v14314_v32  ;;  %v5771_v46 = vrot.slane %v5755_v12, %v16673_v55  ;;  %v5778_v16 = vrot.slane %v5756_v11, %v16673_v55  ;;  %v14333_v51 = vcombine.high %v6019_v18, %v6023_v31  ;;  %v17277_v28 = vmul.f32 %v5649_v24, %v17082_v34  ;;  %v6031_v32 = vld [vmem:[%s16658_s5 + $0x168] sm:$0xff]  ;;  %v5184_v24 = vld [vmem:[#allocation16] sm:$0xff] }
 0x57a   : > { %12505 = vmatpush1.bf16.msra.mxu0 %v14316_v39  ;;  %12178 = vmatprep.subr.bf16.mxu1 %v14323_v53  ;;  %v5785_v43 = vrot.slane %v5757_v10, %v16673_v55  ;;  %v14330_v22 = vcombine.low %v17213_v59, %v17216_v6  ;;  %v14332_v39 = vcombine.low %v6019_v18, %v6023_v31  ;;  %v6035_v59 = vld [vmem:[%s16658_s5 + $0x188] sm:$0xff]  ;;  %v6050_v10 = vld [vmem:[%s16658_s5 + $0x200] sm:$0xff] }
 0x57b   : > { %12506 = vmatprep.subr.bf16.mxu0 %v14325_v14  ;;  %v5786_v15 = vcombine.low %v5764_v42, %v5771_v46  ;;  %v14339_v34 = vcombine.high %v6026_v45, %v6030_v13  ;;  %v14341_v53 = vcombine.high %v6027_v48, %v6031_v32  ;;  %v6034_v14 = vld [vmem:[%s16658_s5 + $0x180] sm:$0xff]  ;;  %v5710_v58 = vmul.f32 %v5645_v33, %v19060_v30  ;;  %v6039_v6 = vld [vmem:[%s16658_s5 + $0x1a8] sm:$0xff] }
 0x57c   : > { %v5787_v27 = vcombine.low %v5778_v16, %v5785_v43  ;;  %v17292_v8 = vmul.f32 %v5653_v44, %v17080_v60  ;;  %v14340_v1 = vcombine.low %v6027_v48, %v6031_v32  ;;  %v14347_v35 = vcombine.high %v6034_v14, %v6038_v41  ;;  %v6047_v33 = vld [vmem:[%s16658_s5 + $0x1e8] sm:$0xff]  ;;  %v6054_v42 = vld [vmem:[%s16658_s5 + $0x220] sm:$0xff] }
 0x57d   : > { %12179 = vmatpush1.bf16.msra.mxu1 %v14322_v23  ;;  %v5794_v52 = vrot.slane %v5786_v15, %v16673_v55  ;;  %v14349_v9 = vcombine.high %v6035_v59, %v6039_v6  ;;  %v14346_v4 = vcombine.low %v6034_v14, %v6038_v41  ;;  %v14348_v60 = vcombine.low %v6035_v59, %v6039_v6  ;;  %v6058_v48 = vld [vmem:[%s16658_s5 + $0x240] sm:$0xff]  ;;  %v6071_v59 = vld [vmem:[%s16658_s5 + $0x2a8] sm:$0xff] }
 0x57e   : > { %12507 = vmatpush1.bf16.msra.mxu0 %v14324_v63  ;;  %12180 = vmatprep.subr.bf16.mxu1 %v14331_v57  ;;  %v5801_v23 = vrot.slane %v5787_v27, %v16673_v55  ;;  %v14338_v63 = vcombine.low %v6026_v45, %v6030_v13  ;;  %v6042_v57 = vld [vmem:[%s16658_s5 + $0x1c0] sm:$0xff]  ;;  %v14357_v49 = vcombine.high %v6043_v0, %v6047_v33  ;;  %v6055_v45 = vld [vmem:[%s16658_s5 + $0x228] sm:$0xff] }
 0x57f   : > { %12508 = vmatprep.subr.bf16.mxu0 %v14333_v51  ;;  %v14355_v44 = vcombine.high %v6042_v57, %v6046_v26  ;;  %v14354_v16 = vcombine.low %v6042_v57, %v6046_v26  ;;  %v6051_v51 = vld [vmem:[%s16658_s5 + $0x208] sm:$0xff]  ;;  %v14363_v15 = vcombine.high %v6050_v10, %v6054_v42  ;;  %v6062_v32 = vld [vmem:[%s16658_s5 + $0x260] sm:$0xff] }
 0x580   : > { %v5802_v36 = vcombine.low %v5794_v52, %v5801_v23  ;;  %v6063_v27 = vld [vmem:[%s16658_s5 + $0x268] sm:$0xff]  ;;  %v14371_v52 = vcombine.high %v6058_v48, %v6062_v32  ;;  %v6066_v14 = vld [vmem:[%s16658_s5 + $0x280] sm:$0xff] }
 0x581   : > { %12181 = vmatpush1.bf16.msra.mxu1 %v14330_v22  ;;  %v6070_v41 = vld [vmem:[%s16658_s5 + $0x2a0] sm:$0xff]  ;;  %v6067_v23 = vld [vmem:[%s16658_s5 + $0x288] sm:$0xff] }
 0x582   : > { %12509 = vmatpush1.bf16.msra.mxu0 %v14332_v39  ;;  %12182 = vmatprep.subr.bf16.mxu1 %v14339_v34  ;;  %v5854_v5 = vsub.f32 %v5184_v24, %v5802_v36  ;;  %v14362_v39 = vcombine.low %v6050_v10, %v6054_v42  ;;  %v14379_v24 = vcombine.high %v6066_v14, %v6070_v41  ;;  %v6074_v57 = vld [vmem:[%s16658_s5 + $0x2c0] sm:$0xff]  ;;  %v6075_v26 = vld [vmem:[%s16658_s5 + $0x2c8] sm:$0xff] }
 0x583   : > { %12510 = vmatprep.subr.bf16.mxu0 %v14341_v53  ;;  %v14364_v53 = vcombine.low %v6051_v51, %v6055_v45  ;;  %v6078_v36 = vld [vmem:[%s16658_s5 + $0x2e0] sm:$0xff] }
 0x584   : > { %v5889_v17 = vrot.slane %v5854_v5, %v17219_v3  ;;  %v5865_v12 = vrot.slane %v5854_v5, %v16681_v62  ;;  %v5861_v18 = vrot.slane %v5854_v5, %v16678_v61  ;;  %v5873_v31 = vrot.slane %v5854_v5, %v16737_v21 }
 0x585   : > { %12183 = vmatpush1.bf16.msra.mxu1 %v14338_v63  ;;  %v5869_v29 = vrot.slane %v5854_v5, %v16734_v20  ;;  %v5881_v11 = vrot.slane %v5854_v5, %v17194_v2  ;;  %v5877_v54 = vrot.slane %v5854_v5, %v17191_v19  ;;  %v5885_v34 = vrot.slane %v5854_v5, %v17206_v40  ;;  %v6086_v5 = vld [vmem:[%s16658_s5 + $0x320] sm:$0xff] }
 0x586   : > { %12511 = vmatpush1.bf16.msra.mxu0 %v14340_v1  ;;  %12184 = vmatprep.subr.bf16.mxu1 %v14347_v35  ;;  %v17306_v25 = vadd.f32 %v5889_v17, %v17251_v56  ;;  %v5939_v47 = vadd.f32 %v5865_v12, %v17260_v37  ;;  %v17312_v46 = vadd.f32 %v5861_v18, %v17263_v38  ;;  %v6090_v18 = vld [vmem:[%s16658_s5 + $0x340] sm:$0xff] }
 0x587   : > { %12512 = vmatprep.subr.bf16.mxu0 %v14349_v9  ;;  %v17317_v13 = vadd.f32 %v5873_v31, %v17266_v50  ;;  %v17320_v56 = vadd.f32 %v5869_v29, %v17269_v7  ;;  %v17323_v37 = vadd.f32 %v5881_v11, %v17277_v28  ;;  %v14356_v38 = vcombine.low %v6043_v0, %v6047_v33  ;;  %v6059_v28 = vld [vmem:[%s16658_s5 + $0x248] sm:$0xff]  ;;  %v6082_v9 = vld [vmem:[%s16658_s5 + $0x300] sm:$0xff] }
 0x588   : > { %v5955_v43 = vmax.f32 %v5939_v47, 0.0  ;;  %v17327_v50 = vadd.f32 %v5877_v54, %v5710_v58  ;;  %v14365_v7 = vcombine.high %v6051_v51, %v6055_v45  ;;  %v14373_v30 = vcombine.high %v6059_v28, %v6063_v27  ;;  %v6079_v0 = vld [vmem:[%s16658_s5 + $0x2e8] sm:$0xff]  ;;  %v6094_v31 = vld [vmem:[%s16658_s5 + $0x360] sm:$0xff] }
 0x589   : > { %12185 = vmatpush1.bf16.msra.mxu1 %v14346_v4  ;;  %v14370_v58 = vcombine.low %v6058_v48, %v6062_v32  ;;  %v17341_v6 = vadd.f32 %v5885_v34, %v17292_v8  ;;  %v14372_v63 = vcombine.low %v6059_v28, %v6063_v27  ;;  %v14381_v1 = vcombine.high %v6067_v23, %v6071_v59  ;;  %v6091_v54 = vld [vmem:[%s16658_s5 + $0x348] sm:$0xff]  ;;  %v6102_v51 = vld [vmem:[%s16658_s5 + $0x3a0] sm:$0xff] }
 0x58a   : > { %12513 = vmatpush1.bf16.msra.mxu0 %v14348_v60  ;;  %12186 = vmatprep.subr.bf16.mxu1 %v14355_v44  ;;  %v17329_v22 = vpack.c.bf16 %v5955_v43, %v5955_v43  ;;  %v14378_v35 = vcombine.low %v6066_v14, %v6070_v41  ;;  %v14387_v8 = vcombine.high %v6074_v57, %v6078_v36  ;;  %v6083_v44 = vld [vmem:[%s16658_s5 + $0x308] sm:$0xff]  ;;  %v6114_v41 = vld [vmem:[%s16658_s5 + $0x400] sm:$0xff] }
 0x58b   : > { %12514 = vmatprep.subr.bf16.mxu0 %v14357_v49  ;;  %v14380_v33 = vcombine.low %v6067_v23, %v6071_v59  ;;  %v14389_v4 = vcombine.high %v6075_v26, %v6079_v0  ;;  %v14386_v60 = vcombine.low %v6074_v57, %v6078_v36  ;;  %v6087_v49 = vld [vmem:[%s16658_s5 + $0x328] sm:$0xff]  ;;  %v14395_v17 = vcombine.high %v6082_v9, %v6086_v5 }
 0x58c   : > { %19061 = vst [vmem:[#allocation30_spill] sm:$0xff] %v17329_v22  ;;  %12204 = vmatprep.mubr.bf16.mxu1 %v17329_v22  ;;  %12532 = vmatprep.mubr.bf16.mxu0 %v17329_v22  ;;  %v14388_v12 = vcombine.low %v6075_v26, %v6079_v0  ;;  %v14397_v29 = vcombine.high %v6083_v44, %v6087_v49  ;;  %v6095_v47 = vld [vmem:[%s16658_s5 + $0x368] sm:$0xff]  ;;  %v6126_v26 = vld [vmem:[%s16658_s5 + $0x460] sm:$0xff] }
 0x58d   : > { %12187 = vmatpush1.bf16.msra.mxu1 %v14354_v16  ;;  %v14394_v11 = vcombine.low %v6082_v9, %v6086_v5  ;;  %v14403_v10 = vcombine.high %v6090_v18, %v6094_v31  ;;  %v14396_v42 = vcombine.low %v6083_v44, %v6087_v49  ;;  %v6098_v16 = vld [vmem:[%s16658_s5 + $0x380] sm:$0xff]  ;;  %v14405_v45 = vcombine.high %v6091_v54, %v6095_v47  ;;  %v6111_v34 = vld [vmem:[%s16658_s5 + $0x3e8] sm:$0xff] }
 0x58e   : > { %12515 = vmatpush1.bf16.msra.mxu0 %v14356_v38  ;;  %12188 = vmatprep.subr.bf16.mxu1 %v14363_v15  ;;  %v14402_v43 = vcombine.low %v6090_v18, %v6094_v31  ;;  %v6099_v38 = vld [vmem:[%s16658_s5 + $0x388] sm:$0xff]  ;;  %v14411_v48 = vcombine.high %v6098_v16, %v6102_v51  ;;  %v14404_v32 = vcombine.low %v6091_v54, %v6095_v47  ;;  %v6134_v44 = vld [vmem:[%s16658_s5 + $0x4a0] sm:$0xff] }
 0x58f   : > { %12516 = vmatprep.subr.bf16.mxu0 %v14365_v7  ;;  %v6103_v15 = vld [vmem:[%s16658_s5 + $0x3a8] sm:$0xff]  ;;  %v6106_v7 = vld [vmem:[%s16658_s5 + $0x3c0] sm:$0xff]  ;;  %v14410_v27 = vcombine.low %v6098_v16, %v6102_v51 }
 0x590   : > { %v14413_v28 = vcombine.high %v6099_v38, %v6103_v15  ;;  %v14412_v14 = vcombine.low %v6099_v38, %v6103_v15  ;;  %v6115_v59 = vld [vmem:[%s16658_s5 + $0x408] sm:$0xff]  ;;  %v6142_v54 = vld [vmem:[%s16658_s5 + $0x4e0] sm:$0xff] }
 0x591   : > { %12189 = vmatpush1.bf16.msra.mxu1 %v14362_v39  ;;  %v6110_v39 = vld [vmem:[%s16658_s5 + $0x3e0] sm:$0xff]  ;;  %v6127_v9 = vld [vmem:[%s16658_s5 + $0x468] sm:$0xff] }
 0x592   : > { %12190 = vmatprep.subr.bf16.mxu1 %v14371_v52  ;;  %12517 = vmatpush1.bf16.msra.mxu0 %v14364_v53  ;;  %v6107_v52 = vld [vmem:[%s16658_s5 + $0x3c8] sm:$0xff]  ;;  %v14419_v53 = vcombine.high %v6106_v7, %v6110_v39  ;;  %v14418_v23 = vcombine.low %v6106_v7, %v6110_v39  ;;  %v6150_v38 = vld [vmem:[%s16658_s5 + $0x520] sm:$0xff] }
 0x593   : > { %12518 = vmatprep.subr.bf16.mxu0 %v14373_v30  ;;  %v6118_v30 = vld [vmem:[%s16658_s5 + $0x420] sm:$0xff]  ;;  %v14420_v36 = vcombine.low %v6107_v52, %v6111_v34  ;;  %v6135_v18 = vld [vmem:[%s16658_s5 + $0x4a8] sm:$0xff] }
 0x594   : > { %v14427_v57 = vcombine.high %v6114_v41, %v6118_v30  ;;  %v6143_v16 = vld [vmem:[%s16658_s5 + $0x4e8] sm:$0xff] }
 0x595   : > { %12191 = vmatpush1.bf16.msra.mxu1 %v14370_v58  ;;  %v14421_v58 = vcombine.high %v6107_v52, %v6111_v34  ;;  %v6151_v7 = vld [vmem:[%s16658_s5 + $0x528] sm:$0xff] }
 0x596   : > { %12192 = vmatprep.subr.bf16.mxu1 %v14379_v24  ;;  %12519 = vmatpush1.bf16.msra.mxu0 %v14372_v63  ;;  %v6119_v24 = vld [vmem:[%s16658_s5 + $0x428] sm:$0xff]  ;;  %v5954_v63 = vmax.f32 %v17312_v46, 0.0 }
 0x597   : > { %12520 = vmatprep.subr.bf16.mxu0 %v14381_v1  ;;  %v5957_v1 = vmax.f32 %v17317_v13, 0.0  ;;  %v14429_v0 = vcombine.high %v6115_v59, %v6119_v24  ;;  %v6130_v13 = vld [vmem:[%s16658_s5 + $0x480] sm:$0xff]  ;;  %v17400_v34 = vld [vmem:[%s16658_s5 + $0x548] sm:$0xff] }
 0x598   : > { %v17373_v5 = vpack.c.bf16 %v5954_v63, %v5954_v63  ;;  %v14443_v31 = vcombine.high %v6130_v13, %v6134_v44  ;;  %v17421_v63 = vld [vmem:[%s16658_s5 + $0x5e0] sm:$0xff] }
 0x599   : > { %12193 = vmatpush1.bf16.msra.mxu1 %v14378_v35  ;;  %v6122_v35 = vld [vmem:[%s16658_s5 + $0x440] sm:$0xff] }
 0x59a   : > { %12194 = vmatprep.subr.bf16.mxu1 %v14387_v8  ;;  %12521 = vmatpush1.bf16.msra.mxu0 %v14380_v33  ;;  %v14426_v8 = vcombine.low %v6114_v41, %v6118_v30  ;;  %v6123_v33 = vld [vmem:[%s16658_s5 + $0x448] sm:$0xff]  ;;  %19062 = vst [vmem:[#allocation28_spill] sm:$0xff] %v17373_v5  ;;  %v14435_v46 = vcombine.high %v6122_v35, %v6126_v26  ;;  %v17409_v30 = vld [vmem:[%s16658_s5 + $0x5a0] sm:$0xff] }
 0x59b   : > { %12522 = vmatprep.subr.bf16.mxu0 %v14389_v4  ;;  %v14428_v4 = vcombine.low %v6115_v59, %v6119_v24  ;;  %v14437_v49 = vcombine.high %v6123_v33, %v6127_v9  ;;  %v17418_v24 = vld [vmem:[%s16658_s5 + $0x5c0] sm:$0xff] }
 0x59d   : > { %12195 = vmatpush1.bf16.msra.mxu1 %v14386_v60  ;;  %v17375_v60 = vpack.c.bf16 %v5957_v1, %v5957_v1  ;;  %v17429_v1 = vld [vmem:[%s16658_s5 + $0x5e8] sm:$0xff] }
 0x59e   : > { %12196 = vmatprep.subr.bf16.mxu1 %v14395_v17  ;;  %12523 = vmatpush1.bf16.msra.mxu0 %v14388_v12  ;;  %v14434_v17 = vcombine.low %v6122_v35, %v6126_v26  ;;  %v6131_v12 = vld [vmem:[%s16658_s5 + $0x488] sm:$0xff]  ;;  %v17432_v35 = vld [vmem:[%s16658_s5 + $0x600] sm:$0xff] }
 0x59f   : > { %12524 = vmatprep.subr.bf16.mxu0 %v14397_v29  ;;  %19063 = vst [vmem:[#allocation31_spill] sm:$0xff] %v17375_v60  ;;  %v14436_v29 = vcombine.low %v6123_v33, %v6127_v9  ;;  %v14445_v47 = vcombine.high %v6131_v12, %v6135_v18  ;;  %v17435_v26 = vld [vmem:[%s16658_s5 + $0x620] sm:$0xff]  ;;  %v17442_v9 = vld [vmem:[%s16658_s5 + $0x608] sm:$0xff] }
 0x5a1   : > { %12197 = vmatpush1.bf16.msra.mxu1 %v14394_v11  ;;  %v6138_v11 = vld [vmem:[%s16658_s5 + $0x4c0] sm:$0xff] }
 0x5a2   : > { %12198 = vmatprep.subr.bf16.mxu1 %v14403_v10  ;;  %12525 = vmatpush1.bf16.msra.mxu0 %v14396_v42  ;;  %v14442_v10 = vcombine.low %v6130_v13, %v6134_v44  ;;  %v6139_v42 = vld [vmem:[%s16658_s5 + $0x4c8] sm:$0xff]  ;;  %v14451_v51 = vcombine.high %v6138_v11, %v6142_v54 }
 0x5a3   : > { %12526 = vmatprep.subr.bf16.mxu0 %v14405_v45  ;;  %v14444_v45 = vcombine.low %v6131_v12, %v6135_v18  ;;  %v14453_v15 = vcombine.high %v6139_v42, %v6143_v16  ;;  %v14452_v52 = vcombine.low %v6139_v42, %v6143_v16  ;;  %v17459_v12 = vld [vmem:[%s16658_s5 + $0x660] sm:$0xff]  ;;  %v17462_v18 = vld [vmem:[%s16658_s5 + $0x648] sm:$0xff] }
 0x5a4   : > { %v17479_v42 = vld [vmem:[%s16658_s5 + $0x6a0] sm:$0xff] }
 0x5a5   : > { %12199 = vmatpush1.bf16.msra.mxu1 %v14402_v43  ;;  %v6146_v43 = vld [vmem:[%s16658_s5 + $0x500] sm:$0xff] }
 0x5a6   : > { %12200 = vmatprep.subr.bf16.mxu1 %v14411_v48  ;;  %12527 = vmatpush1.bf16.msra.mxu0 %v14404_v32  ;;  %v14450_v48 = vcombine.low %v6138_v11, %v6142_v54  ;;  %v6147_v32 = vld [vmem:[%s16658_s5 + $0x508] sm:$0xff]  ;;  %v14459_v39 = vcombine.high %v6146_v43, %v6150_v38  ;;  %v14458_v59 = vcombine.low %v6146_v43, %v6150_v38 }
 0x5a7   : > { %12528 = vmatprep.subr.bf16.mxu0 %v14413_v28  ;;  %v17394_v28 = vld [vmem:[%s16658_s5 + $0x540] sm:$0xff]  ;;  %v14461_v41 = vcombine.high %v6147_v32, %v6151_v7  ;;  %v14483_v54 = vcombine.high %v17418_v24, %v17421_v63 }
 0x5a9   : > { %12201 = vmatpush1.bf16.msra.mxu1 %v14410_v27  ;;  %v17397_v27 = vld [vmem:[%s16658_s5 + $0x560] sm:$0xff] }
 0x5aa   : > { %12202 = vmatprep.subr.bf16.mxu1 %v14419_v53  ;;  %12529 = vmatpush1.bf16.msra.mxu0 %v14412_v14  ;;  %v17403_v53 = vld [vmem:[%s16658_s5 + $0x568] sm:$0xff]  ;;  %v17406_v14 = vld [vmem:[%s16658_s5 + $0x580] sm:$0xff] }
 0x5ab   : > { %12530 = vmatprep.subr.bf16.mxu0 %v14421_v58  ;;  %v17412_v58 = vld [vmem:[%s16658_s5 + $0x588] sm:$0xff]  ;;  %v14468_v33 = vcombine.low %v17400_v34, %v17403_v53  ;;  %v14469_v13 = vcombine.high %v17400_v34, %v17403_v53  ;;  %v14474_v44 = vcombine.low %v17406_v14, %v17409_v30 }
 0x5ad   : > { %12203 = vmatpush1.bf16.msra.mxu1 %v14418_v23  ;;  %v17415_v23 = vld [vmem:[%s16658_s5 + $0x5a8] sm:$0xff] }
 0x5ae   : > { %12213 = vmatprep.subr.bf16.mxu1 %v14427_v57  ;;  %12531 = vmatpush1.bf16.msra.mxu0 %v14420_v36  ;;  %v17424_v57 = vld [vmem:[%s16658_s5 + $0x5c8] sm:$0xff]  ;;  %v14467_v36 = vcombine.high %v17394_v28, %v17397_v27 }
 0x5af   : > { %12541 = vmatprep.subr.bf16.mxu0 %v14429_v0  ;;  %v14460_v0 = vcombine.low %v6147_v32, %v6151_v7  ;;  %v14485_v16 = vcombine.high %v17424_v57, %v17429_v1 }
 0x5b0   : > { %12205 = vmatmul.mubr.bf16.vlgmr.msra.gmra.mrb[20].mxu1 %v17373_v5 }
 0x5b1   : > { %12214 = vmatpush1.bf16.msra.mxu1 %v14426_v8  ;;  %12245 = vmatprep.mubr.bf16.mxu1 %v17375_v60  ;;  %v14466_v8 = vcombine.low %v17394_v28, %v17397_v27 }
 0x5b2   : > { %12533 = vmatmul.mubr.bf16.vlgmr.msra.gmra.mrb[24].mxu0 %v17373_v5  ;;  %12215 = vmatprep.subr.bf16.mxu1 %v14435_v46  ;;  %v17445_v46 = vld [vmem:[%s16658_s5 + $0x628] sm:$0xff] }
 0x5b3   : > { %12542 = vmatpush1.bf16.msra.mxu0 %v14428_v4  ;;  %12573 = vmatprep.mubr.bf16.mxu0 %v17375_v60  ;;  %v17448_v4 = vld [vmem:[%s16658_s5 + $0x640] sm:$0xff] }
 0x5b4   : > { %12543 = vmatprep.subr.bf16.mxu0 %v14437_v49  ;;  %v14475_v49 = vcombine.high %v17406_v14, %v17409_v30 }
 0x5b5   : > { %12216 = vmatpush1.bf16.msra.mxu1 %v14434_v17 }
 0x5b6   : > { %12217 = vmatprep.subr.bf16.mxu1 %v14443_v31  ;;  %v17465_v31 = vld [vmem:[%s16658_s5 + $0x668] sm:$0xff] }
 0x5b7   : > { %12544 = vmatpush1.bf16.msra.mxu0 %v14436_v29  ;;  %v14477_v29 = vcombine.high %v17412_v58, %v17415_v23 }
 0x5b8   : > { %12545 = vmatprep.subr.bf16.mxu0 %v14445_v47 }
 0x5b9   : > { %12218 = vmatpush1.bf16.msra.mxu1 %v14442_v10  ;;  %v17476_v10 = vld [vmem:[%s16658_s5 + $0x680] sm:$0xff] }
 0x5ba   : > { %12219 = vmatprep.subr.bf16.mxu1 %v14451_v51 }
 0x5bb   : > { %12546 = vmatpush1.bf16.msra.mxu0 %v14444_v45 }
 0x5bc   : > { %12547 = vmatprep.subr.bf16.mxu0 %v14453_v15 }
 0x5bd   : > { %12220 = vmatpush1.bf16.msra.mxu1 %v14450_v48 }
 0x5be   : > { %12221 = vmatprep.subr.bf16.mxu1 %v14459_v39 }
 0x5bf   : > { %12548 = vmatpush1.bf16.msra.mxu0 %v14452_v52 }
 0x5c0   : > { %12549 = vmatprep.subr.bf16.mxu0 %v14461_v41 }
 0x5c1   : > { %12222 = vmatpush1.bf16.msra.mxu1 %v14458_v59 }
 0x5c2   : > { %12223 = vmatprep.subr.bf16.mxu1 %v14467_v36  ;;  %v17489_v38 = vpop.f32.mrb[12].mxu1 }
 0x5c3   : > { %12550 = vmatpush1.bf16.msra.mxu0 %v14460_v0  ;;  %19064 = vst [vmem:[#allocation29_spill] sm:$0xff] %v17489_v38  ;;  %v5234_v39 = vrot.slane %v17489_v38, 4  ;;  %v5306_v28 = vmul.f32 %v17489_v38, %v17489_v38  ;;  %v17502_v27 = vpop.f32.mrb[16].mxu0  ;;  %v17504_v52 = vpop.f32.mrb[13].mxu1 }
 0x5c4   : > { %19065 = vst [vmem:[#allocation32_spill] sm:$0xff] %v17502_v27  ;;  %19066 = vst [vmem:[#allocation33_spill] sm:$0xff] %v17504_v52  ;;  %12551 = vmatprep.subr.bf16.mxu0 %v14469_v13  ;;  %v5246_v14 = vrot.slane %v17502_v27, 4  ;;  %v5308_v41 = vmul.f32 %v17502_v27, %v17502_v27  ;;  %v5240_v30 = vrot.slane %v17504_v52, 4  ;;  %v5307_v59 = vmul.f32 %v17504_v52, %v17504_v52  ;;  %v17516_v36 = vpop.f32.mrb[17].mxu0  ;;  %v4933_v0 = vpop.f32.mrb[14].mxu1 }
 0x5c5   : > { %19067 = vst [vmem:[#allocation34_spill] sm:$0xff] %v17516_v36  ;;  %12224 = vmatpush1.bf16.msra.mxu1 %v14466_v8  ;;  %v5235_v13 = vadd.f32 %v5234_v39, %v17489_v38  ;;  %v5362_v7 = vrot.slane %v5306_v28, 4  ;;  %v5252_v48 = vrot.slane %v17516_v36, 4  ;;  %v5309_v53 = vmul.f32 %v17516_v36, %v17516_v36  ;;  %v5015_v34 = vpop.f32.mrb[18].mxu0  ;;  %v4934_v43 = vpop.f32.mrb[15].mxu1 }
 0x5c6   : > { %12225 = vmatprep.subr.bf16.mxu1 %v14475_v49  ;;  %v5247_v32 = vadd.f32 %v5246_v14, %v17502_v27  ;;  %v5374_v51 = vrot.slane %v5308_v41, 4  ;;  %v5241_v15 = vadd.f32 %v5240_v30, %v17504_v52  ;;  %v5368_v47 = vrot.slane %v5307_v59, 4  ;;  %v5016_v0 = vpop.f32.mrb[19].mxu0 }
 0x5c7   : > { %12552 = vmatpush1.bf16.msra.mxu0 %v14468_v33  ;;  %v5236_v8 = vrot.slane %v5235_v13, 2  ;;  %v5363_v45 = vadd.f32 %v5362_v7, %v5306_v28  ;;  %v5253_v39 = vadd.f32 %v5252_v48, %v17516_v36  ;;  %v5380_v11 = vrot.slane %v5309_v53, 4 }
 0x5c8   : > { %12553 = vmatprep.subr.bf16.mxu0 %v14477_v29  ;;  %v5248_v17 = vrot.slane %v5247_v32, 2  ;;  %v5375_v60 = vadd.f32 %v5374_v51, %v5308_v41  ;;  %v5242_v5 = vrot.slane %v5241_v15, 2  ;;  %v5369_v34 = vadd.f32 %v5368_v47, %v5307_v59 }
 0x5c9   : > { %12226 = vmatpush1.bf16.msra.mxu1 %v14474_v44  ;;  %v5237_v49 = vadd.f32 %v5236_v8, %v5235_v13  ;;  %v5364_v43 = vrot.slane %v5363_v45, 2  ;;  %v5254_v14 = vrot.slane %v5253_v39, 2  ;;  %v5381_v22 = vadd.f32 %v5380_v11, %v5309_v53 }
 0x5ca   : > { %12227 = vmatprep.subr.bf16.mxu1 %v14483_v54  ;;  %v5249_v30 = vadd.f32 %v5248_v17, %v5247_v32  ;;  %v5376_v27 = vrot.slane %v5375_v60, 2  ;;  %v5243_v33 = vadd.f32 %v5242_v5, %v5241_v15  ;;  %v5370_v0 = vrot.slane %v5369_v34, 2 }
 0x5cb   : > { %v19068_v7 = vcombine.low %v17412_v58, %v17415_v23  ;;  %v5238_v48 = vrot.slane %v5237_v49, 1  ;;  %v5365_v29 = vadd.f32 %v5364_v43, %v5363_v45  ;;  %v5255_v28 = vadd.f32 %v5254_v14, %v5253_v39 }
 0x5cc   : > { %v5382_v51 = vrot.slane %v5381_v22, 2  ;;  %v5250_v47 = vrot.slane %v5249_v30, 1  ;;  %v5377_v44 = vadd.f32 %v5376_v27, %v5375_v60  ;;  %v5244_v41 = vrot.slane %v5243_v33, 1 }
 0x5cd   : > { %12554 = vmatpush1.bf16.msra.mxu0 %v19068_v7  ;;  %v5371_v59 = vadd.f32 %v5370_v0, %v5369_v34  ;;  %v19069_v11 = vcombine.low %v17418_v24, %v17421_v63  ;;  %v5239_v17 = vadd.f32 %v5238_v48, %v5237_v49  ;;  %v5366_v5 = vrot.slane %v5365_v29, 1  ;;  %v6199_v49 = vld [vmem:[%s16658_s5 + $0x6a8] sm:$0xff] }
 0x5ce   : > { %12555 = vmatprep.subr.bf16.mxu0 %v14485_v16  ;;  %v5256_v54 = vrot.slane %v5255_v28, 1  ;;  %v5383_v15 = vadd.f32 %v5382_v51, %v5381_v22  ;;  %v19070_v58 = vcombine.high %v17432_v35, %v17435_v26  ;;  %v5251_v23 = vadd.f32 %v5250_v47, %v5249_v30  ;;  %v6206_v51 = vld [vmem:[%s16658_s5 + $0x6e0] sm:$0xff] }
 0x5cf   : > { %12228 = vmatpush1.bf16.msra.mxu1 %v19069_v11  ;;  %v5378_v16 = vrot.slane %v5377_v44, 1  ;;  %v5245_v45 = vadd.f32 %v5244_v41, %v5243_v33  ;;  %v5372_v60 = vrot.slane %v5371_v59, 1  ;;  %v19071_v32 = vcombine.low %v17424_v57, %v17429_v1  ;;  %v6195_v1 = vld [vmem:[%s16658_s5 + $0x688] sm:$0xff] }
 0x5d0   : > { %12229 = vmatprep.subr.bf16.mxu1 %v19070_v58  ;;  %v17537_v24 = vmul.f32 0.125, %v5239_v17  ;;  %v5367_v63 = vadd.f32 %v5366_v5, %v5365_v29  ;;  %v5257_v27 = vadd.f32 %v5256_v54, %v5255_v28  ;;  %v5384_v53 = vrot.slane %v5383_v15, 1  ;;  %v6202_v28 = vld [vmem:[%s16658_s5 + $0x6c0] sm:$0xff]  ;;  %v6203_v54 = vld [vmem:[%s16658_s5 + $0x6c8] sm:$0xff] }
 0x5d1   : > { %12556 = vmatpush1.bf16.msra.mxu0 %v19071_v32  ;;  %v19072_v22 = vcombine.high %v17442_v9, %v17445_v46  ;;  %v17542_v13 = vmul.f32 0.125, %v5251_v23  ;;  %v5379_v8 = vadd.f32 %v5378_v16, %v5377_v44  ;;  %v17544_v39 = vmul.f32 0.125, %v5245_v45 }
 0x5d2   : > { %v5373_v34 = vadd.f32 %v5372_v60, %v5371_v59  ;;  %v19073_v57 = vcombine.low %v17432_v35, %v17435_v26  ;;  %v5418_v43 = vmul.f32 0.125, %v5367_v63  ;;  %v5434_v14 = vmul.f32 %v17537_v24, %v17537_v24  ;;  %v6210_v63 = vld [vmem:[%s16658_s5 + $0x700] sm:$0xff] }
 0x5d3   : > { %12557 = vmatprep.subr.bf16.mxu0 %v19072_v22  ;;  %v17553_v30 = vmul.f32 0.125, %v5257_v27  ;;  %v5385_v33 = vadd.f32 %v5384_v53, %v5383_v15  ;;  %v19074_v0 = vcombine.high %v17448_v4, %v17459_v12  ;;  %v5420_v7 = vmul.f32 0.125, %v5379_v8  ;;  %v6207_v15 = vld [vmem:[%s16658_s5 + $0x6e8] sm:$0xff]  ;;  %v6214_v27 = vld [vmem:[%s16658_s5 + $0x720] sm:$0xff] }
 0x5d4   : > { %12230 = vmatpush1.bf16.msra.mxu1 %v19073_v57  ;;  %v5436_v48 = vmul.f32 %v17542_v13, %v17542_v13  ;;  %v5419_v35 = vmul.f32 0.125, %v5373_v34  ;;  %v5435_v26 = vmul.f32 %v17544_v39, %v17544_v39  ;;  %v19075_v29 = vcombine.low %v17442_v9, %v17445_v46  ;;  %v6211_v57 = vld [vmem:[%s16658_s5 + $0x708] sm:$0xff] }
 0x5d5   : > { %12231 = vmatprep.subr.bf16.mxu1 %v19074_v0  ;;  %v5450_v47 = vsub.f32 %v5418_v43, %v5434_v14  ;;  %v5421_v44 = vmul.f32 0.125, %v5385_v33  ;;  %v5437_v41 = vmul.f32 %v17553_v30, %v17553_v30  ;;  %v19076_v59 = vcombine.high %v17462_v18, %v17465_v31  ;;  %v6215_v43 = vld [vmem:[%s16658_s5 + $0x728] sm:$0xff]  ;;  %v6222_v14 = vld [vmem:[%s16658_s5 + $0x760] sm:$0xff] }
 0x5d6   : > { %12558 = vmatpush1.bf16.msra.mxu0 %v19075_v29  ;;  %v14509_v11 = vcombine.high %v6195_v1, %v6199_v49  ;;  %v5452_v17 = vsub.f32 %v5420_v7, %v5436_v48  ;;  %v5451_v5 = vsub.f32 %v5419_v35, %v5435_v26  ;;  %v19077_v9 = vcombine.low %v17448_v4, %v17459_v12  ;;  %v6219_v7 = vld [vmem:[%s16658_s5 + $0x748] sm:$0xff]  ;;  %v6226_v29 = vld [vmem:[%s16658_s5 + $0x780] sm:$0xff] }
 0x5d7   : > { %12559 = vmatprep.subr.bf16.mxu0 %v19076_v59  ;;  %v14506_v46 = vcombine.low %v17476_v10, %v17479_v42  ;;  %v5466_v58 = vmax.f32 %v5450_v47, 0.0  ;;  %v5453_v23 = vsub.f32 %v5421_v44, %v5437_v41  ;;  %v19078_v16 = vcombine.high %v17476_v10, %v17479_v42  ;;  %v6223_v48 = vld [vmem:[%s16658_s5 + $0x768] sm:$0xff] }
 0x5d8   : > { %12232 = vmatpush1.bf16.msra.mxu1 %v19077_v9  ;;  %v14515_v45 = vcombine.high %v6202_v28, %v6206_v51  ;;  %v5468_v60 = vmax.f32 %v5452_v17, 0.0  ;;  %v5467_v32 = vmax.f32 %v5451_v5, 0.0  ;;  %v19079_v4 = vcombine.low %v17462_v18, %v17465_v31  ;;  %v6227_v44 = vld [vmem:[%s16658_s5 + $0x788] sm:$0xff]  ;;  %v6234_v17 = vld [vmem:[%s16658_s5 + $0x7c0] sm:$0xff] }
 0x5d9   : > { %12233 = vmatprep.subr.bf16.mxu1 %v19078_v16  ;;  %v14508_v12 = vcombine.low %v6195_v1, %v6199_v49  ;;  %v5482_v53 = vadd.f32 1e-05, %v5466_v58  ;;  %v5469_v22 = vmax.f32 %v5453_v23, 0.0  ;;  %v14517_v8 = vcombine.high %v6203_v54, %v6207_v15  ;;  %v6218_v49 = vld [vmem:[%s16658_s5 + $0x740] sm:$0xff]  ;;  %v6231_v41 = vld [vmem:[%s16658_s5 + $0x7a8] sm:$0xff] }
 0x5da   : > { %12560 = vmatpush1.bf16.msra.mxu0 %v19079_v4  ;;  %v5484_v10 = vadd.f32 1e-05, %v5468_v60  ;;  %v5483_v42 = vadd.f32 1e-05, %v5467_v32  ;;  %v14514_v34 = vcombine.low %v6202_v28, %v6206_v51  ;;  %v14523_v31 = vcombine.high %v6210_v63, %v6214_v27  ;;  %v6230_v28 = vld [vmem:[%s16658_s5 + $0x7a0] sm:$0xff]  ;;  %v6235_v58 = vld [vmem:[%s16658_s5 + $0x7c8] sm:$0xff] }
 0x5db   : > { %12561 = vmatprep.subr.bf16.mxu0 %v14509_v11  ;;  %15763 = vrsqrt.f32 %v5482_v53  ;;  %v5485_v18 = vadd.f32 1e-05, %v5469_v22  ;;  %v14516_v1 = vcombine.low %v6203_v54, %v6207_v15  ;;  %v14525_v33 = vcombine.high %v6211_v57, %v6215_v43  ;;  %v6238_v5 = vld [vmem:[%s16658_s5 + $0x7e0] sm:$0xff]  ;;  %v6239_v23 = vld [vmem:[%s16658_s5 + $0x7e8] sm:$0xff] }
 0x5dc   : > { %12234 = vmatpush1.bf16.msra.mxu1 %v14506_v46  ;;  %15765 = vrsqrt.f32 %v5484_v10  ;;  %v14522_v0 = vcombine.low %v6210_v63, %v6214_v27  ;;  %v14531_v35 = vcombine.high %v6218_v49, %v6222_v14  ;;  %v14524_v26 = vcombine.low %v6211_v57, %v6215_v43  ;;  %v6246_v63 = vld [vmem:[%s16658_s5 + $0x820] sm:$0xff]  ;;  %v6243_v10 = vld [vmem:[%s16658_s5 + $0x808] sm:$0xff] }
 0x5dd   : > { %12235 = vmatprep.subr.bf16.mxu1 %v14515_v45  ;;  %15767 = vrsqrt.f32 %v5483_v42  ;;  %v14533_v51 = vcombine.high %v6219_v7, %v6223_v48  ;;  %v14530_v47 = vcombine.low %v6218_v49, %v6222_v14  ;;  %v14539_v59 = vcombine.high %v6226_v29, %v6230_v28  ;;  %v6247_v42 = vld [vmem:[%s16658_s5 + $0x828] sm:$0xff]  ;;  %v6254_v49 = vld [vmem:[%s16658_s5 + $0x860] sm:$0xff] }
 0x5de   : > { %12562 = vmatpush1.bf16.msra.mxu0 %v14508_v12  ;;  %15769 = vrsqrt.f32 %v5485_v18  ;;  %v14532_v11 = vcombine.low %v6219_v7, %v6223_v48  ;;  %v14541_v46 = vcombine.high %v6227_v44, %v6231_v41  ;;  %v14538_v15 = vcombine.low %v6226_v29, %v6230_v28  ;;  %v6242_v12 = vld [vmem:[%s16658_s5 + $0x800] sm:$0xff]  ;;  %v6251_v7 = vld [vmem:[%s16658_s5 + $0x848] sm:$0xff] }
 0x5df   : > { %12563 = vmatprep.subr.bf16.mxu0 %v14517_v8  ;;  %v14547_v45 = vcombine.high %v6234_v17, %v6238_v5  ;;  %v14540_v4 = vcombine.low %v6227_v44, %v6231_v41  ;;  %v14549_v53 = vcombine.high %v6235_v58, %v6239_v23  ;;  %v14546_v8 = vcombine.low %v6234_v17, %v6238_v5  ;;  %v6255_v48 = vld [vmem:[%s16658_s5 + $0x868] sm:$0xff]  ;;  %v6258_v29 = vld [vmem:[%s16658_s5 + $0x880] sm:$0xff] }
 0x5e0   : > { %12236 = vmatpush1.bf16.msra.mxu1 %v14514_v34  ;;  %v5956_v57 = vmax.f32 %v17320_v56, 0.0  ;;  %v14555_v43 = vcombine.high %v6242_v12, %v6246_v63  ;;  %v14548_v18 = vcombine.low %v6235_v58, %v6239_v23  ;;  %v6262_v28 = vld [vmem:[%s16658_s5 + $0x8a0] sm:$0xff]  ;;  %v6259_v44 = vld [vmem:[%s16658_s5 + $0x888] sm:$0xff] }
 0x5e1   : > { %12237 = vmatprep.subr.bf16.mxu1 %v14523_v31  ;;  %v5959_v31 = vmax.f32 %v17323_v37, 0.0  ;;  %v14556_v37 = vcombine.low %v6243_v10, %v6247_v42  ;;  %v6263_v41 = vld [vmem:[%s16658_s5 + $0x8a8] sm:$0xff]  ;;  %v6266_v17 = vld [vmem:[%s16658_s5 + $0x8c0] sm:$0xff] }
 0x5e2   : > { %12564 = vmatpush1.bf16.msra.mxu0 %v14516_v1  ;;  %v6250_v1 = vld [vmem:[%s16658_s5 + $0x840] sm:$0xff]  ;;  %v17619_v56 = vpack.c.bf16 %v5956_v57, %v5956_v57  ;;  %v14572_v23 = vcombine.low %v6259_v44, %v6263_v41  ;;  %v6283_v57 = vld [vmem:[%s16658_s5 + $0x948] sm:$0xff] }
 0x5e3   : > { %12565 = vmatprep.subr.bf16.mxu0 %v14525_v33  ;;  %v14557_v33 = vcombine.high %v6243_v10, %v6247_v42  ;;  %v6270_v5 = vld [vmem:[%s16658_s5 + $0x8e0] sm:$0xff] }
 0x5e4   : > { %12238 = vmatpush1.bf16.msra.mxu1 %v14522_v0  ;;  %v14554_v0 = vcombine.low %v6242_v12, %v6246_v63  ;;  %19080 = vst [vmem:[#allocation35_spill] sm:$0xff] %v17619_v56  ;;  %v14579_v58 = vcombine.high %v6266_v17, %v6270_v5  ;;  %v6279_v12 = vld [vmem:[%s16658_s5 + $0x928] sm:$0xff] }
 0x5e5   : > { %12239 = vmatprep.subr.bf16.mxu1 %v14531_v35  ;;  %v15764_v9 = vpop.eup %15763  ;;  %v14563_v35 = vcombine.high %v6250_v1, %v6254_v49 }
 0x5e6   : > { %12566 = vmatpush1.bf16.msra.mxu0 %v14524_v26  ;;  %v15766_v54 = vpop.eup %15765  ;;  %v17621_v26 = vpack.c.bf16 %v5959_v31, %v5959_v31 }
 0x5e7   : > { %12567 = vmatprep.subr.bf16.mxu0 %v14533_v51  ;;  %v15768_v16 = vpop.eup %15767  ;;  %v14565_v51 = vcombine.high %v6251_v7, %v6255_v48 }
 0x5e8   : > { %12240 = vmatpush1.bf16.msra.mxu1 %v14530_v47  ;;  %v15770_v60 = vpop.eup %15769  ;;  %v5571_v32 = vcombine.low %v15764_v9, %v15768_v16  ;;  %19081 = vst [vmem:[#allocation36_spill] sm:$0xff] %v17621_v26  ;;  %v14562_v47 = vcombine.low %v6250_v1, %v6254_v49  ;;  %v14573_v9 = vcombine.high %v6259_v44, %v6263_v41  ;;  %v6274_v16 = vld [vmem:[%s16658_s5 + $0x900] sm:$0xff]  ;;  %v6299_v44 = vld [vmem:[%s16658_s5 + $0x9c8] sm:$0xff] }
 0x5e9   : > { %12241 = vmatprep.subr.bf16.mxu1 %v14539_v59  ;;  %v5572_v27 = vcombine.low %v15766_v54, %v15770_v60  ;;  %v14571_v59 = vcombine.high %v6258_v29, %v6262_v28  ;;  %v6267_v54 = vld [vmem:[%s16658_s5 + $0x8c8] sm:$0xff]  ;;  %v6290_v1 = vld [vmem:[%s16658_s5 + $0x980] sm:$0xff] }
 0x5ea   : > { %12568 = vmatpush1.bf16.msra.mxu0 %v14532_v11  ;;  %v17604_v22 = vrot.slane %v5571_v32, %v16673_v55  ;;  %v14564_v11 = vcombine.low %v6251_v7, %v6255_v48  ;;  %v14578_v32 = vcombine.low %v6266_v17, %v6270_v5  ;;  %v6294_v49 = vld [vmem:[%s16658_s5 + $0x9a0] sm:$0xff]  ;;  %v6291_v7 = vld [vmem:[%s16658_s5 + $0x988] sm:$0xff] }
 0x5eb   : > { %12569 = vmatprep.subr.bf16.mxu0 %v14541_v46  ;;  %v17609_v34 = vrot.slane %v5572_v27, %v16673_v55  ;;  %v14570_v46 = vcombine.low %v6258_v29, %v6262_v28  ;;  %v6295_v48 = vld [vmem:[%s16658_s5 + $0x9a8] sm:$0xff]  ;;  %v6298_v29 = vld [vmem:[%s16658_s5 + $0x9c0] sm:$0xff] }
 0x5ec   : > { %12242 = vmatpush1.bf16.msra.mxu1 %v14538_v15  ;;  %v6271_v15 = vld [vmem:[%s16658_s5 + $0x8e8] sm:$0xff]  ;;  %v6302_v28 = vld [vmem:[%s16658_s5 + $0x9e0] sm:$0xff] }
 0x5ed   : > { %12243 = vmatprep.subr.bf16.mxu1 %v14547_v45  ;;  %v6278_v45 = vld [vmem:[%s16658_s5 + $0x920] sm:$0xff]  ;;  %v14581_v60 = vcombine.high %v6267_v54, %v6271_v15  ;;  %v14580_v27 = vcombine.low %v6267_v54, %v6271_v15  ;;  %v6303_v41 = vld [vmem:[%s16658_s5 + $0x9e8] sm:$0xff] }
 0x5ee   : > { %12570 = vmatpush1.bf16.msra.mxu0 %v14540_v4  ;;  %v6275_v4 = vld [vmem:[%s16658_s5 + $0x908] sm:$0xff]  ;;  %v14587_v63 = vcombine.high %v6274_v16, %v6278_v45  ;;  %v14586_v42 = vcombine.low %v6274_v16, %v6278_v45  ;;  %v6306_v17 = vld [vmem:[%s16658_s5 + $0xa00] sm:$0xff] }
 0x5ef   : > { %12571 = vmatprep.subr.bf16.mxu0 %v14549_v53  ;;  %v6282_v53 = vld [vmem:[%s16658_s5 + $0x940] sm:$0xff]  ;;  %v14589_v10 = vcombine.high %v6275_v4, %v6279_v12  ;;  %v14588_v31 = vcombine.low %v6275_v4, %v6279_v12  ;;  %v6307_v54 = vld [vmem:[%s16658_s5 + $0xa08] sm:$0xff] }
 0x5f0   : > { %12244 = vmatpush1.bf16.msra.mxu1 %v14546_v8  ;;  %v6286_v8 = vld [vmem:[%s16658_s5 + $0x960] sm:$0xff]  ;;  %v6311_v15 = vld [vmem:[%s16658_s5 + $0xa28] sm:$0xff] }
 0x5f1   : > { %12254 = vmatprep.subr.bf16.mxu1 %v14555_v43  ;;  %v6287_v43 = vld [vmem:[%s16658_s5 + $0x968] sm:$0xff]  ;;  %v6310_v5 = vld [vmem:[%s16658_s5 + $0xa20] sm:$0xff] }
 0x5f2   : > { %12572 = vmatpush1.bf16.msra.mxu0 %v14548_v18  ;;  %v14595_v18 = vcombine.high %v6282_v53, %v6286_v8  ;;  %v6314_v16 = vld [vmem:[%s16658_s5 + $0xa40] sm:$0xff]  ;;  %v6315_v4 = vld [vmem:[%s16658_s5 + $0xa48] sm:$0xff] }
 0x5f3   : > { %12246 = vmatmul.mubr.bf16.vlgmr.msra.gmra.mrb[20].mxu1 %v17619_v56  ;;  %12582 = vmatprep.subr.bf16.mxu0 %v14557_v33  ;;  %v14597_v33 = vcombine.high %v6283_v57, %v6287_v43  ;;  %v6318_v45 = vld [vmem:[%s16658_s5 + $0xa60] sm:$0xff]  ;;  %v6319_v12 = vld [vmem:[%s16658_s5 + $0xa68] sm:$0xff] }
 0x5f4   : > { %12255 = vmatpush1.bf16.msra.mxu1 %v14554_v0  ;;  %12286 = vmatprep.mubr.bf16.mxu1 %v17621_v26  ;;  %v14594_v0 = vcombine.low %v6282_v53, %v6286_v8  ;;  %v6322_v53 = vld [vmem:[%s16658_s5 + $0xa80] sm:$0xff] }
 0x5f5   : > { %12574 = vmatmul.mubr.bf16.vlgmr.msra.gmra.mrb[24].mxu0 %v17619_v56  ;;  %12256 = vmatprep.subr.bf16.mxu1 %v14563_v35  ;;  %v14603_v35 = vcombine.high %v6290_v1, %v6294_v49  ;;  %v6326_v8 = vld [vmem:[%s16658_s5 + $0xaa0] sm:$0xff] }
 0x5f6   : > { %12583 = vmatpush1.bf16.msra.mxu0 %v14556_v37  ;;  %12614 = vmatprep.mubr.bf16.mxu0 %v17621_v26  ;;  %v14596_v37 = vcombine.low %v6283_v57, %v6287_v43  ;;  %v6323_v57 = vld [vmem:[%s16658_s5 + $0xa88] sm:$0xff] }
 0x5f7   : > { %12584 = vmatprep.subr.bf16.mxu0 %v14565_v51  ;;  %v14605_v51 = vcombine.high %v6291_v7, %v6295_v48  ;;  %v6327_v43 = vld [vmem:[%s16658_s5 + $0xaa8] sm:$0xff] }
 0x5f8   : > { %12257 = vmatpush1.bf16.msra.mxu1 %v14562_v47  ;;  %v14602_v47 = vcombine.low %v6290_v1, %v6294_v49  ;;  %v6330_v1 = vld [vmem:[%s16658_s5 + $0xac0] sm:$0xff] }
 0x5f9   : > { %12258 = vmatprep.subr.bf16.mxu1 %v14571_v59  ;;  %v14611_v59 = vcombine.high %v6298_v29, %v6302_v28  ;;  %v6334_v49 = vld [vmem:[%s16658_s5 + $0xae0] sm:$0xff] }
 0x5fa   : > { %12585 = vmatpush1.bf16.msra.mxu0 %v14564_v11  ;;  %v14604_v11 = vcombine.low %v6291_v7, %v6295_v48  ;;  %v6331_v7 = vld [vmem:[%s16658_s5 + $0xac8] sm:$0xff] }
 0x5fb   : > { %12586 = vmatprep.subr.bf16.mxu0 %v14573_v9  ;;  %v14613_v9 = vcombine.high %v6299_v44, %v6303_v41  ;;  %v6335_v48 = vld [vmem:[%s16658_s5 + $0xae8] sm:$0xff] }
 0x5fc   : > { %12259 = vmatpush1.bf16.msra.mxu1 %v14570_v46  ;;  %v14610_v46 = vcombine.low %v6298_v29, %v6302_v28  ;;  %v6338_v29 = vld [vmem:[%s16658_s5 + $0xb00] sm:$0xff] }
 0x5fd   : > { %12260 = vmatprep.subr.bf16.mxu1 %v14579_v58  ;;  %v14619_v58 = vcombine.high %v6306_v17, %v6310_v5  ;;  %v6342_v28 = vld [vmem:[%s16658_s5 + $0xb20] sm:$0xff] }
 0x5fe   : > { %12587 = vmatpush1.bf16.msra.mxu0 %v14572_v23  ;;  %v14612_v23 = vcombine.low %v6299_v44, %v6303_v41  ;;  %v6339_v44 = vld [vmem:[%s16658_s5 + $0xb08] sm:$0xff] }
 0x5ff   : > { %12588 = vmatprep.subr.bf16.mxu0 %v14581_v60  ;;  %v14621_v60 = vcombine.high %v6307_v54, %v6311_v15  ;;  %v6343_v41 = vld [vmem:[%s16658_s5 + $0xb28] sm:$0xff] }
 0x600   : > { %12261 = vmatpush1.bf16.msra.mxu1 %v14578_v32  ;;  %v14618_v32 = vcombine.low %v6306_v17, %v6310_v5  ;;  %v6346_v17 = vld [vmem:[%s16658_s5 + $0xb40] sm:$0xff] }
 0x601   : > { %12262 = vmatprep.subr.bf16.mxu1 %v14587_v63  ;;  %v14627_v63 = vcombine.high %v6314_v16, %v6318_v45  ;;  %v6350_v5 = vld [vmem:[%s16658_s5 + $0xb60] sm:$0xff] }
 0x602   : > { %12589 = vmatpush1.bf16.msra.mxu0 %v14580_v27  ;;  %v14620_v27 = vcombine.low %v6307_v54, %v6311_v15  ;;  %v6347_v54 = vld [vmem:[%s16658_s5 + $0xb48] sm:$0xff] }
 0x603   : > { %12590 = vmatprep.subr.bf16.mxu0 %v14589_v10  ;;  %v14629_v10 = vcombine.high %v6315_v4, %v6319_v12  ;;  %v6351_v15 = vld [vmem:[%s16658_s5 + $0xb68] sm:$0xff] }
 0x604   : > { %12263 = vmatpush1.bf16.msra.mxu1 %v14586_v42  ;;  %v14626_v42 = vcombine.low %v6314_v16, %v6318_v45  ;;  %v6354_v16 = vld [vmem:[%s16658_s5 + $0xb80] sm:$0xff] }
 0x605   : > { %12264 = vmatprep.subr.bf16.mxu1 %v14595_v18  ;;  %v14635_v18 = vcombine.high %v6322_v53, %v6326_v8  ;;  %v6358_v45 = vld [vmem:[%s16658_s5 + $0xba0] sm:$0xff] }
 0x606   : > { %12591 = vmatpush1.bf16.msra.mxu0 %v14588_v31  ;;  %v14628_v31 = vcombine.low %v6315_v4, %v6319_v12  ;;  %v6355_v4 = vld [vmem:[%s16658_s5 + $0xb88] sm:$0xff] }
 0x607   : > { %12592 = vmatprep.subr.bf16.mxu0 %v14597_v33  ;;  %v14637_v33 = vcombine.high %v6323_v57, %v6327_v43  ;;  %v6359_v12 = vld [vmem:[%s16658_s5 + $0xba8] sm:$0xff] }
 0x608   : > { %12265 = vmatpush1.bf16.msra.mxu1 %v14594_v0  ;;  %v14634_v0 = vcombine.low %v6322_v53, %v6326_v8  ;;  %v6362_v53 = vld [vmem:[%s16658_s5 + $0xbc0] sm:$0xff] }
 0x609   : > { %12266 = vmatprep.subr.bf16.mxu1 %v14603_v35  ;;  %v14643_v35 = vcombine.high %v6330_v1, %v6334_v49  ;;  %v6366_v8 = vld [vmem:[%s16658_s5 + $0xbe0] sm:$0xff] }
 0x60a   : > { %12593 = vmatpush1.bf16.msra.mxu0 %v14596_v37  ;;  %v14636_v37 = vcombine.low %v6323_v57, %v6327_v43  ;;  %v6363_v57 = vld [vmem:[%s16658_s5 + $0xbc8] sm:$0xff] }
 0x60b   : > { %12594 = vmatprep.subr.bf16.mxu0 %v14605_v51  ;;  %v14645_v51 = vcombine.high %v6331_v7, %v6335_v48  ;;  %v6367_v43 = vld [vmem:[%s16658_s5 + $0xbe8] sm:$0xff] }
 0x60c   : > { %12267 = vmatpush1.bf16.msra.mxu1 %v14602_v47  ;;  %v14642_v47 = vcombine.low %v6330_v1, %v6334_v49  ;;  %v6370_v1 = vld [vmem:[%s16658_s5 + $0xc00] sm:$0xff] }
 0x60d   : > { %12268 = vmatprep.subr.bf16.mxu1 %v14611_v59  ;;  %v14651_v59 = vcombine.high %v6338_v29, %v6342_v28  ;;  %v6374_v49 = vld [vmem:[%s16658_s5 + $0xc20] sm:$0xff] }
 0x60e   : > { %12595 = vmatpush1.bf16.msra.mxu0 %v14604_v11  ;;  %v14644_v11 = vcombine.low %v6331_v7, %v6335_v48  ;;  %v6371_v7 = vld [vmem:[%s16658_s5 + $0xc08] sm:$0xff] }
 0x60f   : > { %12596 = vmatprep.subr.bf16.mxu0 %v14613_v9  ;;  %v14653_v9 = vcombine.high %v6339_v44, %v6343_v41  ;;  %v6375_v48 = vld [vmem:[%s16658_s5 + $0xc28] sm:$0xff] }
 0x610   : > { %12269 = vmatpush1.bf16.msra.mxu1 %v14610_v46  ;;  %v14650_v46 = vcombine.low %v6338_v29, %v6342_v28  ;;  %v14676_v29 = vcombine.low %v6363_v57, %v6367_v43  ;;  %v5961_v28 = vmax.f32 %v17306_v25, 0.0  ;;  %v6386_v25 = vld [vmem:[%s16658_s5 + $0xc80] sm:$0xff] }
 0x611   : > { %12270 = vmatprep.subr.bf16.mxu1 %v14619_v58  ;;  %v14659_v58 = vcombine.high %v6346_v17, %v6350_v5 }
 0x612   : > { %12597 = vmatpush1.bf16.msra.mxu0 %v14612_v23  ;;  %v14652_v23 = vcombine.low %v6339_v44, %v6343_v41  ;;  %v14685_v44 = vcombine.high %v6371_v7, %v6375_v48  ;;  %v14682_v41 = vcombine.low %v6370_v1, %v6374_v49 }
 0x613   : > { %12598 = vmatprep.subr.bf16.mxu0 %v14621_v60  ;;  %v14661_v60 = vcombine.high %v6347_v54, %v6351_v15 }
 0x614   : > { %12271 = vmatpush1.bf16.msra.mxu1 %v14618_v32  ;;  %v14658_v32 = vcombine.low %v6346_v17, %v6350_v5  ;;  %v14684_v5 = vcombine.low %v6371_v7, %v6375_v48  ;;  %v17720_v7 = vld [vmem:[%s16658_s5 + $0xd48] sm:$0xff] }
 0x615   : > { %12272 = vmatprep.subr.bf16.mxu1 %v14627_v63  ;;  %v14667_v63 = vcombine.high %v6354_v16, %v6358_v45  ;;  %v17723_v48 = vld [vmem:[%s16658_s5 + $0xd68] sm:$0xff] }
 0x616   : > { %12599 = vmatpush1.bf16.msra.mxu0 %v14620_v27  ;;  %v14660_v27 = vcombine.low %v6347_v54, %v6351_v15 }
 0x617   : > { %12600 = vmatprep.subr.bf16.mxu0 %v14629_v10  ;;  %v14669_v10 = vcombine.high %v6355_v4, %v6359_v12 }
 0x618   : > { %12273 = vmatpush1.bf16.msra.mxu1 %v14626_v42  ;;  %v14666_v42 = vcombine.low %v6354_v16, %v6358_v45 }
 0x619   : > { %12274 = vmatprep.subr.bf16.mxu1 %v14635_v18  ;;  %v14675_v18 = vcombine.high %v6362_v53, %v6366_v8 }
 0x61a   : > { %12601 = vmatpush1.bf16.msra.mxu0 %v14628_v31  ;;  %v14668_v31 = vcombine.low %v6355_v4, %v6359_v12 }
 0x61b   : > { %12602 = vmatprep.subr.bf16.mxu0 %v14637_v33  ;;  %v14677_v33 = vcombine.high %v6363_v57, %v6367_v43 }
 0x61c   : > { %12275 = vmatpush1.bf16.msra.mxu1 %v14634_v0  ;;  %v14674_v0 = vcombine.low %v6362_v53, %v6366_v8 }
 0x61d   : > { %12276 = vmatprep.subr.bf16.mxu1 %v14643_v35  ;;  %v5958_v35 = vmax.f32 %v17327_v50, 0.0 }
 0x61e   : > { %12603 = vmatpush1.bf16.msra.mxu0 %v14636_v37  ;;  %v14683_v37 = vcombine.high %v6370_v1, %v6374_v49  ;;  %v17714_v49 = vld [vmem:[%s16658_s5 + $0xd40] sm:$0xff] }
 0x61f   : > { %12604 = vmatprep.subr.bf16.mxu0 %v14645_v51  ;;  %v6378_v51 = vld [vmem:[%s16658_s5 + $0xc40] sm:$0xff]  ;;  %v17693_v17 = vpack.c.bf16 %v5958_v35, %v5958_v35 }
 0x620   : > { %12277 = vmatpush1.bf16.msra.mxu1 %v14642_v47  ;;  %v6382_v47 = vld [vmem:[%s16658_s5 + $0xc60] sm:$0xff] }
 0x621   : > { %12278 = vmatprep.subr.bf16.mxu1 %v14651_v59  ;;  %v6379_v59 = vld [vmem:[%s16658_s5 + $0xc48] sm:$0xff]  ;;  %19082 = vst [vmem:[#allocation37_spill] sm:$0xff] %v17693_v17  ;;  %v14691_v50 = vcombine.high %v6378_v51, %v6382_v47  ;;  %v14690_v15 = vcombine.low %v6378_v51, %v6382_v47  ;;  %v17726_v35 = vld [vmem:[%s16658_s5 + $0xd80] sm:$0xff] }
 0x622   : > { %12605 = vmatpush1.bf16.msra.mxu0 %v14644_v11  ;;  %v6383_v11 = vld [vmem:[%s16658_s5 + $0xc68] sm:$0xff] }
 0x623   : > { %12606 = vmatprep.subr.bf16.mxu0 %v14653_v9  ;;  %v17695_v9 = vpack.c.bf16 %v5961_v28, %v5961_v28  ;;  %v14693_v54 = vcombine.high %v6379_v59, %v6383_v11  ;;  %v14692_v45 = vcombine.low %v6379_v59, %v6383_v11  ;;  %v17732_v28 = vld [vmem:[%s16658_s5 + $0xd88] sm:$0xff] }
 0x624   : > { %12279 = vmatpush1.bf16.msra.mxu1 %v14650_v46  ;;  %v6390_v46 = vld [vmem:[%s16658_s5 + $0xca0] sm:$0xff]  ;;  %v17735_v51 = vld [vmem:[%s16658_s5 + $0xda8] sm:$0xff] }
 0x625   : > { %12280 = vmatprep.subr.bf16.mxu1 %v14659_v58  ;;  %19083 = vst [vmem:[#allocation38_spill] sm:$0xff] %v17695_v9  ;;  %v6387_v58 = vld [vmem:[%s16658_s5 + $0xc88] sm:$0xff]  ;;  %v14699_v16 = vcombine.high %v6386_v25, %v6390_v46  ;;  %v14698_v12 = vcombine.low %v6386_v25, %v6390_v46  ;;  %v17755_v25 = vld [vmem:[%s16658_s5 + $0xe20] sm:$0xff] }
 0x626   : > { %12607 = vmatpush1.bf16.msra.mxu0 %v14652_v23  ;;  %v6391_v23 = vld [vmem:[%s16658_s5 + $0xca8] sm:$0xff] }
 0x627   : > { %12608 = vmatprep.subr.bf16.mxu0 %v14661_v60  ;;  %v6394_v60 = vld [vmem:[%s16658_s5 + $0xcc0] sm:$0xff]  ;;  %v14701_v4 = vcombine.high %v6387_v58, %v6391_v23  ;;  %v14700_v8 = vcombine.low %v6387_v58, %v6391_v23  ;;  %v17744_v59 = vld [vmem:[%s16658_s5 + $0xdc8] sm:$0xff] }
 0x628   : > { %12281 = vmatpush1.bf16.msra.mxu1 %v14658_v32  ;;  %v6398_v32 = vld [vmem:[%s16658_s5 + $0xce0] sm:$0xff]  ;;  %v17762_v58 = vld [vmem:[%s16658_s5 + $0xe08] sm:$0xff] }
 0x629   : > { %12282 = vmatprep.subr.bf16.mxu1 %v14667_v63  ;;  %v6395_v63 = vld [vmem:[%s16658_s5 + $0xcc8] sm:$0xff]  ;;  %v14707_v53 = vcombine.high %v6394_v60, %v6398_v32  ;;  %v14706_v43 = vcombine.low %v6394_v60, %v6398_v32 }
 0x62a   : > { %12609 = vmatpush1.bf16.msra.mxu0 %v14660_v27  ;;  %v6399_v27 = vld [vmem:[%s16658_s5 + $0xce8] sm:$0xff] }
 0x62b   : > { %12610 = vmatprep.subr.bf16.mxu0 %v14669_v10  ;;  %v6402_v10 = vld [vmem:[%s16658_s5 + $0xd00] sm:$0xff]  ;;  %v14709_v57 = vcombine.high %v6395_v63, %v6399_v27  ;;  %v17765_v23 = vld [vmem:[%s16658_s5 + $0xe28] sm:$0xff] }
 0x62c   : > { %12283 = vmatpush1.bf16.msra.mxu1 %v14666_v42  ;;  %v6406_v42 = vld [vmem:[%s16658_s5 + $0xd20] sm:$0xff] }
 0x62d   : > { %12284 = vmatprep.subr.bf16.mxu1 %v14675_v18  ;;  %v6403_v18 = vld [vmem:[%s16658_s5 + $0xd08] sm:$0xff]  ;;  %v14715_v1 = vcombine.high %v6402_v10, %v6406_v42  ;;  %v14714_v47 = vcombine.low %v6402_v10, %v6406_v42 }
 0x62e   : > { %12611 = vmatpush1.bf16.msra.mxu0 %v14668_v31  ;;  %v6407_v31 = vld [vmem:[%s16658_s5 + $0xd28] sm:$0xff] }
 0x62f   : > { %12612 = vmatprep.subr.bf16.mxu0 %v14677_v33  ;;  %v17717_v33 = vld [vmem:[%s16658_s5 + $0xd60] sm:$0xff]  ;;  %v14716_v46 = vcombine.low %v6403_v18, %v6407_v31 }
 0x630   : > { %12285 = vmatpush1.bf16.msra.mxu1 %v14674_v0  ;;  %v14708_v0 = vcombine.low %v6395_v63, %v6399_v27  ;;  %v14723_v11 = vcombine.high %v17714_v49, %v17717_v33  ;;  %v17782_v63 = vld [vmem:[%s16658_s5 + $0xe48] sm:$0xff] }
 0x631   : > { %12295 = vmatprep.subr.bf16.mxu1 %v14683_v37  ;;  %v14717_v37 = vcombine.high %v6403_v18, %v6407_v31  ;;  %v17785_v27 = vld [vmem:[%s16658_s5 + $0xe68] sm:$0xff] }
 0x632   : > { %12613 = vmatpush1.bf16.msra.mxu0 %v14676_v29  ;;  %v17729_v29 = vld [vmem:[%s16658_s5 + $0xda0] sm:$0xff] }
 0x633   : > { %12287 = vmatmul.mubr.bf16.vlgmr.msra.gmra.mrb[20].mxu1 %v17693_v17  ;;  %12623 = vmatprep.subr.bf16.mxu0 %v14685_v44  ;;  %v17738_v44 = vld [vmem:[%s16658_s5 + $0xdc0] sm:$0xff]  ;;  %v14730_v60 = vcombine.low %v17726_v35, %v17729_v29  ;;  %v14731_v32 = vcombine.high %v17726_v35, %v17729_v29 }
 0x634   : > { %12296 = vmatpush1.bf16.msra.mxu1 %v14682_v41  ;;  %12327 = vmatprep.mubr.bf16.mxu1 %v17695_v9  ;;  %v17741_v41 = vld [vmem:[%s16658_s5 + $0xde0] sm:$0xff] }
 0x635   : > { %12615 = vmatmul.mubr.bf16.vlgmr.msra.gmra.mrb[24].mxu0 %v17693_v17  ;;  %12297 = vmatprep.subr.bf16.mxu1 %v14691_v50  ;;  %v17749_v50 = vld [vmem:[%s16658_s5 + $0xde8] sm:$0xff]  ;;  %v14739_v10 = vcombine.high %v17738_v44, %v17741_v41 }
 0x636   : > { %12624 = vmatpush1.bf16.msra.mxu0 %v14684_v5  ;;  %12655 = vmatprep.mubr.bf16.mxu0 %v17695_v9  ;;  %v17752_v5 = vld [vmem:[%s16658_s5 + $0xe00] sm:$0xff]  ;;  %v14741_v18 = vcombine.high %v17744_v59, %v17749_v50 }
 0x637   : > { %12625 = vmatprep.subr.bf16.mxu0 %v14693_v54  ;;  %v14722_v54 = vcombine.low %v17714_v49, %v17717_v33 }
 0x638   : > { %12298 = vmatpush1.bf16.msra.mxu1 %v14690_v15  ;;  %v14724_v15 = vcombine.low %v17720_v7, %v17723_v48 }
 0x639   : > { %12299 = vmatprep.subr.bf16.mxu1 %v14699_v16  ;;  %v17768_v16 = vld [vmem:[%s16658_s5 + $0xe40] sm:$0xff] }
 0x63a   : > { %12626 = vmatpush1.bf16.msra.mxu0 %v14692_v45  ;;  %v14725_v45 = vcombine.high %v17720_v7, %v17723_v48 }
 0x63b   : > { %12627 = vmatprep.subr.bf16.mxu0 %v14701_v4 }
 0x63c   : > { %12300 = vmatpush1.bf16.msra.mxu1 %v14698_v12  ;;  %v17779_v12 = vld [vmem:[%s16658_s5 + $0xe60] sm:$0xff] }
 0x63d   : > { %12301 = vmatprep.subr.bf16.mxu1 %v14707_v53  ;;  %v14733_v53 = vcombine.high %v17732_v28, %v17735_v51 }
 0x63e   : > { %12628 = vmatpush1.bf16.msra.mxu0 %v14700_v8 }
 0x63f   : > { %12629 = vmatprep.subr.bf16.mxu0 %v14709_v57  ;;  %v17796_v57 = vld [vmem:[%s16658_s5 + $0xe80] sm:$0xff] }
 0x640   : > { %12302 = vmatpush1.bf16.msra.mxu1 %v14706_v43  ;;  %v17799_v43 = vld [vmem:[%s16658_s5 + $0xea0] sm:$0xff] }
 0x641   : > { %12303 = vmatprep.subr.bf16.mxu1 %v14715_v1 }
 0x642   : > { %12630 = vmatpush1.bf16.msra.mxu0 %v14708_v0 }
 0x643   : > { %12631 = vmatprep.subr.bf16.mxu0 %v14717_v37  ;;  %v17809_v33 = vpop.f32.mrb[16].mxu1 }
 0x644   : > { %12304 = vmatpush1.bf16.msra.mxu1 %v14714_v47  ;;  %19084 = vst [vmem:[#allocation39_spill] sm:$0xff] %v17809_v33  ;;  %v5258_v37 = vrot.slane %v17809_v33, 4  ;;  %v5310_v29 = vmul.f32 %v17809_v33, %v17809_v33  ;;  %v17822_v47 = vpop.f32.mrb[20].mxu0 }
 0x645   : > { %12305 = vmatprep.subr.bf16.mxu1 %v14723_v11  ;;  %19085 = vst [vmem:[#allocation40_spill] sm:$0xff] %v17822_v47  ;;  %v17824_v11 = vpop.f32.mrb[17].mxu1  ;;  %v5270_v7 = vrot.slane %v17822_v47, 4  ;;  %v5312_v35 = vmul.f32 %v17822_v47, %v17822_v47  ;;  %v17836_v31 = vpop.f32.mrb[21].mxu0 }
 0x646   : > { %12632 = vmatpush1.bf16.msra.mxu0 %v14716_v46  ;;  %19086 = vst [vmem:[#allocation41_spill] sm:$0xff] %v17824_v11  ;;  %v5264_v49 = vrot.slane %v17824_v11, 4  ;;  %v5311_v48 = vmul.f32 %v17824_v11, %v17824_v11  ;;  %v5097_v0 = vpop.f32.mrb[18].mxu1  ;;  %v5386_v46 = vrot.slane %v5310_v29, 4  ;;  %v5276_v42 = vrot.slane %v17836_v31, 4  ;;  %v5179_v1 = vpop.f32.mrb[22].mxu0 }
 0x647   : > { %12633 = vmatprep.subr.bf16.mxu0 %v14725_v45  ;;  %v5259_v45 = vadd.f32 %v5258_v37, %v17809_v33  ;;  %v5313_v14 = vmul.f32 %v17836_v31, %v17836_v31  ;;  %v5098_v8 = vpop.f32.mrb[19].mxu1  ;;  %v5271_v4 = vadd.f32 %v5270_v7, %v17822_v47  ;;  %v5398_v9 = vrot.slane %v5312_v35, 4  ;;  %v5180_v0 = vpop.f32.mrb[23].mxu0 }
 0x648   : > { %12306 = vmatpush1.bf16.msra.mxu1 %v14722_v54  ;;  %v5265_v17 = vadd.f32 %v5264_v49, %v17824_v11  ;;  %v5392_v26 = vrot.slane %v5311_v48, 4  ;;  %v5387_v56 = vadd.f32 %v5386_v46, %v5310_v29  ;;  %v5277_v37 = vadd.f32 %v5276_v42, %v17836_v31 }
 0x649   : > { %12307 = vmatprep.subr.bf16.mxu1 %v14731_v32  ;;  %v5260_v54 = vrot.slane %v5259_v45, 2  ;;  %v5404_v33 = vrot.slane %v5313_v14, 4  ;;  %v5272_v36 = vrot.slane %v5271_v4, 2  ;;  %v5399_v38 = vadd.f32 %v5398_v9, %v5312_v35 }
 0x64a   : > { %12634 = vmatpush1.bf16.msra.mxu0 %v14724_v15  ;;  %v5266_v52 = vrot.slane %v5265_v17, 2  ;;  %v5393_v1 = vadd.f32 %v5392_v26, %v5311_v48  ;;  %v5388_v8 = vrot.slane %v5387_v56, 2  ;;  %v5278_v7 = vrot.slane %v5277_v37, 2 }
 0x64b   : > { %12635 = vmatprep.subr.bf16.mxu0 %v14733_v53  ;;  %v5261_v32 = vadd.f32 %v5260_v54, %v5259_v45  ;;  %v5405_v47 = vadd.f32 %v5404_v33, %v5313_v14  ;;  %v5273_v49 = vadd.f32 %v5272_v36, %v5271_v4  ;;  %v5400_v11 = vrot.slane %v5399_v38, 2 }
 0x64c   : > { %12308 = vmatpush1.bf16.msra.mxu1 %v14730_v60  ;;  %v5267_v15 = vadd.f32 %v5266_v52, %v5265_v17  ;;  %v5394_v0 = vrot.slane %v5393_v1, 2  ;;  %v19087_v29 = vcombine.low %v17732_v28, %v17735_v51  ;;  %v5389_v53 = vadd.f32 %v5388_v8, %v5387_v56 }
 0x64d   : > { %12309 = vmatprep.subr.bf16.mxu1 %v14739_v10  ;;  %v5262_v42 = vrot.slane %v5261_v32, 1  ;;  %v5279_v46 = vadd.f32 %v5278_v7, %v5277_v37  ;;  %v5406_v9 = vrot.slane %v5405_v47, 2  ;;  %v5274_v26 = vrot.slane %v5273_v49, 1 }
 0x64e   : > { %12636 = vmatpush1.bf16.msra.mxu0 %v19087_v29  ;;  %v5401_v60 = vadd.f32 %v5400_v11, %v5399_v38  ;;  %v5268_v48 = vrot.slane %v5267_v15, 1  ;;  %v5395_v35 = vadd.f32 %v5394_v0, %v5393_v1  ;;  %v19088_v14 = vcombine.low %v17738_v44, %v17741_v41 }
 0x64f   : > { %12637 = vmatprep.subr.bf16.mxu0 %v14741_v18  ;;  %v5263_v36 = vadd.f32 %v5262_v42, %v5261_v32  ;;  %v5390_v52 = vrot.slane %v5389_v53, 1  ;;  %v5280_v17 = vrot.slane %v5279_v46, 1  ;;  %v5407_v4 = vadd.f32 %v5406_v9, %v5405_v47  ;;  %v6455_v32 = vld [vmem:[%s16658_s5 + $0xea8] sm:$0xff]  ;;  %v6462_v9 = vld [vmem:[%s16658_s5 + $0xee0] sm:$0xff] }
 0x650   : > { %12310 = vmatpush1.bf16.msra.mxu1 %v19088_v14  ;;  %v19089_v28 = vcombine.high %v17752_v5, %v17755_v25  ;;  %v5275_v56 = vadd.f32 %v5274_v26, %v5273_v49  ;;  %v5402_v51 = vrot.slane %v5401_v60, 1  ;;  %v5269_v10 = vadd.f32 %v5268_v48, %v5267_v15 }
 0x651   : > { %v5396_v38 = vrot.slane %v5395_v35, 1  ;;  %v19090_v18 = vcombine.low %v17744_v59, %v17749_v50  ;;  %v17857_v44 = vmul.f32 0.125, %v5263_v36  ;;  %v5391_v41 = vadd.f32 %v5390_v52, %v5389_v53  ;;  %v6451_v50 = vld [vmem:[%s16658_s5 + $0xe88] sm:$0xff] }
 0x652   : > { %12311 = vmatprep.subr.bf16.mxu1 %v19089_v28  ;;  %v5281_v33 = vadd.f32 %v5280_v17, %v5279_v46  ;;  %v5408_v11 = vrot.slane %v5407_v4, 1  ;;  %v19091_v47 = vcombine.high %v17762_v58, %v17765_v23  ;;  %v17862_v45 = vmul.f32 0.125, %v5275_v56  ;;  %v6458_v46 = vld [vmem:[%s16658_s5 + $0xec0] sm:$0xff]  ;;  %v6459_v17 = vld [vmem:[%s16658_s5 + $0xec8] sm:$0xff] }
 0x653   : > { %12638 = vmatpush1.bf16.msra.mxu0 %v19090_v18  ;;  %v5403_v54 = vadd.f32 %v5402_v51, %v5401_v60  ;;  %v17864_v37 = vmul.f32 0.125, %v5269_v10  ;;  %v5397_v1 = vadd.f32 %v5396_v38, %v5395_v35  ;;  %v19092_v59 = vcombine.low %v17752_v5, %v17755_v25 }
 0x654   : > { %12639 = vmatprep.subr.bf16.mxu0 %v19091_v47  ;;  %v5422_v8 = vmul.f32 0.125, %v5391_v41  ;;  %v5438_v7 = vmul.f32 %v17857_v44, %v17857_v44  ;;  %v17873_v49 = vmul.f32 0.125, %v5281_v33  ;;  %v5409_v15 = vadd.f32 %v5408_v11, %v5407_v4  ;;  %v6463_v4 = vld [vmem:[%s16658_s5 + $0xee8] sm:$0xff]  ;;  %v6466_v41 = vld [vmem:[%s16658_s5 + $0xf00] sm:$0xff] }
 0x655   : > { %12312 = vmatpush1.bf16.msra.mxu1 %v19092_v59  ;;  %v19093_v0 = vcombine.high %v17768_v16, %v17779_v12  ;;  %v5424_v29 = vmul.f32 0.125, %v5403_v54  ;;  %v5440_v42 = vmul.f32 %v17862_v45, %v17862_v45  ;;  %v5423_v5 = vmul.f32 0.125, %v5397_v1  ;;  %v6470_v33 = vld [vmem:[%s16658_s5 + $0xf20] sm:$0xff]  ;;  %v6467_v59 = vld [vmem:[%s16658_s5 + $0xf08] sm:$0xff] }
 0x656   : > { %v5439_v25 = vmul.f32 %v17864_v37, %v17864_v37  ;;  %v19094_v53 = vcombine.low %v17762_v58, %v17765_v23  ;;  %v5454_v26 = vsub.f32 %v5422_v8, %v5438_v7  ;;  %v5425_v60 = vmul.f32 0.125, %v5409_v15  ;;  %v6471_v8 = vld [vmem:[%s16658_s5 + $0xf28] sm:$0xff]  ;;  %v6478_v7 = vld [vmem:[%s16658_s5 + $0xf60] sm:$0xff] }
 0x657   : > { %12313 = vmatprep.subr.bf16.mxu1 %v19093_v0  ;;  %v5441_v48 = vmul.f32 %v17873_v49, %v17873_v49  ;;  %v19095_v35 = vcombine.high %v17782_v63, %v17785_v27  ;;  %v14765_v14 = vcombine.high %v6451_v50, %v6455_v32  ;;  %v5456_v36 = vsub.f32 %v5424_v29, %v5440_v42  ;;  %v6475_v29 = vld [vmem:[%s16658_s5 + $0xf48] sm:$0xff] }
 0x658   : > { %12640 = vmatpush1.bf16.msra.mxu0 %v19094_v53  ;;  %v5455_v52 = vsub.f32 %v5423_v5, %v5439_v25  ;;  %v19096_v58 = vcombine.low %v17768_v16, %v17779_v12  ;;  %v14762_v23 = vcombine.low %v17796_v57, %v17799_v43  ;;  %v5470_v28 = vmax.f32 %v5454_v26, 0.0  ;;  %v6479_v42 = vld [vmem:[%s16658_s5 + $0xf68] sm:$0xff]  ;;  %v6482_v53 = vld [vmem:[%s16658_s5 + $0xf80] sm:$0xff] }
 0x659   : > { %12641 = vmatprep.subr.bf16.mxu0 %v19095_v35  ;;  %v5457_v56 = vsub.f32 %v5425_v60, %v5441_v48  ;;  %v19097_v51 = vcombine.high %v17796_v57, %v17799_v43  ;;  %v14771_v10 = vcombine.high %v6458_v46, %v6462_v9  ;;  %v5472_v38 = vmax.f32 %v5456_v36, 0.0  ;;  %v6483_v60 = vld [vmem:[%s16658_s5 + $0xf88] sm:$0xff]  ;;  %v6490_v36 = vld [vmem:[%s16658_s5 + $0xfc0] sm:$0xff] }
 0x65a   : > { %12314 = vmatpush1.bf16.msra.mxu1 %v19096_v58  ;;  %v5471_v18 = vmax.f32 %v5455_v52, 0.0  ;;  %v19098_v16 = vcombine.low %v17782_v63, %v17785_v27  ;;  %v14764_v12 = vcombine.low %v6451_v50, %v6455_v32  ;;  %v5486_v11 = vadd.f32 1e-05, %v5470_v28  ;;  %v6474_v32 = vld [vmem:[%s16658_s5 + $0xf40] sm:$0xff]  ;;  %v6487_v48 = vld [vmem:[%s16658_s5 + $0xfa8] sm:$0xff] }
 0x65b   : > { %12315 = vmatprep.subr.bf16.mxu1 %v19097_v51  ;;  %v5473_v47 = vmax.f32 %v5457_v56, 0.0  ;;  %v14773_v54 = vcombine.high %v6459_v17, %v6463_v4  ;;  %v5488_v57 = vadd.f32 1e-05, %v5472_v38  ;;  %v14770_v1 = vcombine.low %v6458_v46, %v6462_v9  ;;  %v6486_v46 = vld [vmem:[%s16658_s5 + $0xfa0] sm:$0xff]  ;;  %v6491_v28 = vld [vmem:[%s16658_s5 + $0xfc8] sm:$0xff] }
 0x65c   : > { %12642 = vmatpush1.bf16.msra.mxu0 %v19098_v16  ;;  %v5487_v43 = vadd.f32 1e-05, %v5471_v18  ;;  %15771 = vrsqrt.f32 %v5486_v11  ;;  %v14779_v27 = vcombine.high %v6466_v41, %v6470_v33  ;;  %v14772_v50 = vcombine.low %v6459_v17, %v6463_v4  ;;  %v6494_v52 = vld [vmem:[%s16658_s5 + $0xfe0] sm:$0xff]  ;;  %v6495_v56 = vld [vmem:[%s16658_s5 + $0xfe8] sm:$0xff] }
 0x65d   : > { %12643 = vmatprep.subr.bf16.mxu0 %v14765_v14  ;;  %v5489_v63 = vadd.f32 1e-05, %v5473_v47  ;;  %15773 = vrsqrt.f32 %v5488_v57  ;;  %v14781_v15 = vcombine.high %v6467_v59, %v6471_v8  ;;  %v14778_v0 = vcombine.low %v6466_v41, %v6470_v33  ;;  %v6502_v41 = vld [vmem:[%s16658_s5 + $0x1020] sm:$0xff]  ;;  %v6499_v57 = vld [vmem:[%s16658_s5 + $0x1008] sm:$0xff] }
 0x65e   : > { %12316 = vmatpush1.bf16.msra.mxu1 %v14762_v23  ;;  %15775 = vrsqrt.f32 %v5487_v43  ;;  %v14787_v5 = vcombine.high %v6474_v32, %v6478_v7  ;;  %v14780_v25 = vcombine.low %v6467_v59, %v6471_v8  ;;  %v14789_v9 = vcombine.high %v6475_v29, %v6479_v42  ;;  %v6503_v43 = vld [vmem:[%s16658_s5 + $0x1028] sm:$0xff] }
 0x65f   : > { %12317 = vmatprep.subr.bf16.mxu1 %v14771_v10  ;;  %15777 = vrsqrt.f32 %v5489_v63  ;;  %v14786_v26 = vcombine.low %v6474_v32, %v6478_v7  ;;  %v14795_v35 = vcombine.high %v6482_v53, %v6486_v46  ;;  %v14788_v14 = vcombine.low %v6475_v29, %v6479_v42  ;;  %v6507_v29 = vld [vmem:[%s16658_s5 + $0x1048] sm:$0xff] }
 0x660   : > { %12644 = vmatpush1.bf16.msra.mxu0 %v14764_v12  ;;  %v14797_v23 = vcombine.high %v6483_v60, %v6487_v48  ;;  %v14794_v4 = vcombine.low %v6482_v53, %v6486_v46  ;;  %v14803_v10 = vcombine.high %v6490_v36, %v6494_v52  ;;  %v14796_v16 = vcombine.low %v6483_v60, %v6487_v48  ;;  %v6498_v12 = vld [vmem:[%s16658_s5 + $0x1000] sm:$0xff]  ;;  %v6511_v42 = vld [vmem:[%s16658_s5 + $0x1068] sm:$0xff] }
 0x661   : > { %12645 = vmatprep.subr.bf16.mxu0 %v14773_v54  ;;  %v14805_v11 = vcombine.high %v6491_v28, %v6495_v56  ;;  %v14802_v54 = vcombine.low %v6490_v36, %v6494_v52  ;;  %v5960_v59 = vmax.f32 %v17341_v6, 0.0  ;;  %v14811_v8 = vcombine.high %v6498_v12, %v6502_v41  ;;  %v6514_v6 = vld [vmem:[%s16658_s5 + $0x1080] sm:$0xff]  ;;  %v17942_v60 = vld [vmem:[%s16658_s5 + $0x1088] sm:$0xff] }
 0x662   : > { %12318 = vmatpush1.bf16.msra.mxu1 %v14770_v1  ;;  %v14804_v63 = vcombine.low %v6491_v28, %v6495_v56  ;;  %v14813_v7 = vcombine.high %v6499_v57, %v6503_v43  ;;  %v17945_v48 = vld [vmem:[%s16658_s5 + $0x10a8] sm:$0xff]  ;;  %v14821_v52 = vcombine.high %v6507_v29, %v6511_v42  ;;  %v14820_v28 = vcombine.low %v6507_v29, %v6511_v42 }
 0x663   : > { %12319 = vmatprep.subr.bf16.mxu1 %v14779_v27  ;;  %v6506_v27 = vld [vmem:[%s16658_s5 + $0x1040] sm:$0xff]  ;;  %v17938_v46 = vpack.c.bf16 %v5960_v59, %v5960_v59 }
 0x664   : > { %12646 = vmatpush1.bf16.msra.mxu0 %v14772_v50  ;;  %v6510_v50 = vld [vmem:[%s16658_s5 + $0x1060] sm:$0xff] }
 0x665   : > { %12647 = vmatprep.subr.bf16.mxu0 %v14781_v15  ;;  %v5183_v15 = vld [vmem:[#allocation15 + $0x8] sm:$0xff] }
 0x666   : > { %12320 = vmatpush1.bf16.msra.mxu1 %v14778_v0  ;;  %v15772_v58 = vpop.eup %15771  ;;  %v14810_v0 = vcombine.low %v6498_v12, %v6502_v41 }
 0x667   : > { %12321 = vmatprep.subr.bf16.mxu1 %v14787_v5  ;;  %v15774_v17 = vpop.eup %15773  ;;  %v19099_v5 = vcombine.low %v17604_v22, %v17609_v34  ;;  %v17951_v22 = vld [vmem:[%s16658_s5 + $0x10e0] sm:$0xff]  ;;  %v17954_v34 = vld [vmem:[%s16658_s5 + $0x10c8] sm:$0xff] }
 0x668   : > { %12648 = vmatpush1.bf16.msra.mxu0 %v14780_v25  ;;  %v15776_v51 = vpop.eup %15775 }
 0x669   : > { %12649 = vmatprep.subr.bf16.mxu0 %v14789_v9  ;;  %v15778_v38 = vpop.eup %15777  ;;  %v5573_v18 = vcombine.low %v15772_v58, %v15776_v51  ;;  %v5611_v25 = vrot.slane %v19099_v5, %v16673_v55  ;;  %v14819_v9 = vcombine.high %v6506_v27, %v6510_v50  ;;  %v17958_v58 = vld [vmem:[%s16658_s5 + $0x10e8] sm:$0xff] }
 0x66a   : > { %12322 = vmatpush1.bf16.msra.mxu1 %v14786_v26  ;;  %v5574_v33 = vcombine.low %v15774_v17, %v15778_v38  ;;  %v6518_v26 = vld [vmem:[%s16658_s5 + $0x10a0] sm:$0xff]  ;;  %v14828_v38 = vcombine.low %v17942_v60, %v17945_v48  ;;  %v14837_v41 = vcombine.high %v17954_v34, %v17958_v58  ;;  %v6535_v5 = vld [vmem:[%s16658_s5 + $0x1128] sm:$0xff] }
 0x66b   : > { %12323 = vmatprep.subr.bf16.mxu1 %v14795_v35  ;;  %v5595_v47 = vrot.slane %v5573_v18, %v16673_v55  ;;  %v14812_v35 = vcombine.low %v6499_v57, %v6503_v43  ;;  %v17964_v17 = vld [vmem:[%s16658_s5 + $0x1120] sm:$0xff]  ;;  %v14826_v56 = vcombine.low %v6514_v6, %v6518_v26  ;;  %v14827_v51 = vcombine.high %v6514_v6, %v6518_v26 }
 0x66c   : > { %12650 = vmatpush1.bf16.msra.mxu0 %v14788_v14  ;;  %v5602_v1 = vrot.slane %v5574_v33, %v16673_v55  ;;  %v17948_v14 = vld [vmem:[%s16658_s5 + $0x10c0] sm:$0xff]  ;;  %v14829_v18 = vcombine.high %v17942_v60, %v17945_v48  ;;  %v19104_v48 = vld [vmem:[#allocation41_spill] sm:$0xff] }
 0x66d   : > { %12651 = vmatprep.subr.bf16.mxu0 %v14797_v23  ;;  %v17961_v23 = vld [vmem:[%s16658_s5 + $0x1100] sm:$0xff]  ;;  %v14835_v12 = vcombine.high %v17948_v14, %v17951_v22 }
 0x66e   : > { %12324 = vmatpush1.bf16.msra.mxu1 %v14794_v4  ;;  %v5604_v32 = vcombine.low %v5595_v47, %v5602_v1  ;;  %v14818_v4 = vcombine.low %v6506_v27, %v6510_v50  ;;  %v14843_v33 = vcombine.high %v17961_v23, %v17964_v17 }
 0x66f   : > { %12325 = vmatprep.subr.bf16.mxu1 %v14803_v10 }
 0x670   : > { %12652 = vmatpush1.bf16.msra.mxu0 %v14796_v16  ;;  %v5618_v53 = vrot.slane %v5604_v32, %v16673_v55  ;;  %v14834_v16 = vcombine.low %v17948_v14, %v17951_v22  ;;  %v14836_v22 = vcombine.low %v17954_v34, %v17958_v58 }
 0x671   : > { %12653 = vmatprep.subr.bf16.mxu0 %v14805_v11 }
 0x672   : > { %12326 = vmatpush1.bf16.msra.mxu1 %v14802_v54  ;;  %v5619_v36 = vcombine.low %v5611_v25, %v5618_v53  ;;  %v19103_v53 = vld [vmem:[#allocation32_spill] sm:$0xff] }
 0x673   : > { %12336 = vmatprep.subr.bf16.mxu1 %v14811_v8 }
 0x674   : > { %12654 = vmatpush1.bf16.msra.mxu0 %v14804_v63  ;;  %v5623_v10 = vmul.f32 %v5619_v36, %v5183_v15  ;;  %v6538_v36 = vld [vmem:[%s16658_s5 + $0x1140] sm:$0xff] }
 0x675   : > { %12328 = vmatmul.mubr.bf16.vlgmr.msra.gmra.mrb[20].mxu1 %v17938_v46  ;;  %12664 = vmatprep.subr.bf16.mxu0 %v14813_v7 }
 0x676   : > { %12337 = vmatpush1.bf16.msra.mxu1 %v14810_v0  ;;  %v5661_v11 = vrot.slane %v5623_v10, %v16678_v61  ;;  %v5665_v47 = vrot.slane %v5623_v10, %v16681_v62  ;;  %v5669_v54 = vrot.slane %v5623_v10, %v16734_v20  ;;  %v5673_v57 = vrot.slane %v5623_v10, %v16737_v21 }
 0x677   : > { %12656 = vmatmul.mubr.bf16.vlgmr.msra.gmra.mrb[24].mxu0 %v17938_v46  ;;  %12338 = vmatprep.subr.bf16.mxu1 %v14819_v9  ;;  %v5677_v43 = vrot.slane %v5623_v10, %v17191_v19  ;;  %v5681_v1 = vrot.slane %v5623_v10, %v17194_v2  ;;  %v5685_v59 = vrot.slane %v5623_v10, %v17206_v40 }
 0x678   : > { %12665 = vmatpush1.bf16.msra.mxu0 %v14812_v35  ;;  %v5689_v8 = vrot.slane %v5623_v10, %v17219_v3  ;;  %v5730_v63 = vmul.f32 %v5661_v11, %v17537_v24  ;;  %v5731_v27 = vmul.f32 %v5665_v47, %v17544_v39  ;;  %v5732_v50 = vmul.f32 %v5669_v54, %v17542_v13  ;;  %v19100_v13 = vld [vmem:[#allocation33_spill] sm:$0xff]  ;;  %v6539_v10 = vld [vmem:[%s16658_s5 + $0x1148] sm:$0xff] }
 0x679   : > { %12666 = vmatprep.subr.bf16.mxu0 %v14821_v52  ;;  %v5733_v32 = vmul.f32 %v5673_v57, %v17553_v30  ;;  %v5734_v15 = vmul.f32 %v5677_v43, %v17857_v44  ;;  %v5735_v0 = vmul.f32 %v5681_v1, %v17864_v37  ;;  %v5736_v29 = vmul.f32 %v5685_v59, %v17862_v45  ;;  %v19101_v44 = vld [vmem:[#allocation29_spill] sm:$0xff]  ;;  %v19102_v37 = vld [vmem:[#allocation34_spill] sm:$0xff] }
 0x67a   : > { %12339 = vmatpush1.bf16.msra.mxu1 %v14818_v4  ;;  %v17992_v7 = vmul.f32 %v5689_v8, %v17836_v31  ;;  %v5737_v24 = vmul.f32 %v5689_v8, %v17873_v49  ;;  %v5803_v39 = vcombine.low %v5730_v63, %v5731_v27  ;;  %v17999_v6 = vmul.f32 %v5665_v47, %v19100_v13  ;;  %v6531_v31 = vld [vmem:[%s16658_s5 + $0x1108] sm:$0xff]  ;;  %v6542_v52 = vld [vmem:[%s16658_s5 + $0x1160] sm:$0xff] }
 0x67b   : > { %12340 = vmatprep.subr.bf16.mxu1 %v14827_v51  ;;  %v5804_v42 = vcombine.low %v5732_v50, %v5733_v32  ;;  %v5805_v30 = vcombine.low %v5734_v15, %v5735_v0  ;;  %v18004_v25 = vmul.f32 %v5661_v11, %v19101_v44  ;;  %v18007_v45 = vmul.f32 %v5673_v57, %v19102_v37  ;;  %v6546_v11 = vld [vmem:[%s16658_s5 + $0x1180] sm:$0xff]  ;;  %v19105_v47 = vld [vmem:[#allocation39_spill] sm:$0xff] }
 0x67c   : > { %12667 = vmatpush1.bf16.msra.mxu0 %v14820_v28  ;;  %v18010_v49 = vmul.f32 %v5669_v54, %v19103_v53  ;;  %v5806_v9 = vcombine.low %v5736_v29, %v5737_v24  ;;  %v5813_v26 = vrot.slane %v5803_v39, %v16673_v55  ;;  %v18015_v35 = vmul.f32 %v5681_v1, %v19104_v48  ;;  %v19106_v54 = vld [vmem:[#allocation40_spill] sm:$0xff]  ;;  %v5185_v1 = vld [vmem:[#allocation16 + $0x8] sm:$0xff]  ;;  %v6547_v8 = vld [vmem:[%s16658_s5 + $0x1188] sm:$0xff] }
 0x67d   : > { %12668 = vmatprep.subr.bf16.mxu0 %v14829_v18  ;;  %v5820_v60 = vrot.slane %v5804_v42, %v16673_v55  ;;  %v5827_v14 = vrot.slane %v5805_v30, %v16673_v55  ;;  %v14842_v51 = vcombine.low %v17961_v23, %v17964_v17  ;;  %v6543_v18 = vld [vmem:[%s16658_s5 + $0x1168] sm:$0xff]  ;;  %v14851_v34 = vcombine.high %v6538_v36, %v6542_v52  ;;  %v6554_v32 = vld [vmem:[%s16658_s5 + $0x11c0] sm:$0xff] }
 0x67e   : > { %12341 = vmatpush1.bf16.msra.mxu1 %v14826_v56  ;;  %v5834_v4 = vrot.slane %v5806_v9, %v16673_v55  ;;  %v14845_v56 = vcombine.high %v6531_v31, %v6535_v5  ;;  %v14844_v58 = vcombine.low %v6531_v31, %v6535_v5  ;;  %v18032_v57 = vmul.f32 %v5685_v59, %v19106_v54  ;;  %v6551_v63 = vld [vmem:[%s16658_s5 + $0x11a8] sm:$0xff]  ;;  %v6558_v15 = vld [vmem:[%s16658_s5 + $0x11e0] sm:$0xff] }
 0x67f   : > { %12342 = vmatprep.subr.bf16.mxu1 %v14835_v12  ;;  %v5835_v28 = vcombine.low %v5813_v26, %v5820_v60  ;;  %v14853_v17 = vcombine.high %v6539_v10, %v6543_v18  ;;  %v14861_v0 = vcombine.high %v6547_v8, %v6551_v63  ;;  %v6559_v29 = vld [vmem:[%s16658_s5 + $0x11e8] sm:$0xff]  ;;  %v14860_v39 = vcombine.low %v6547_v8, %v6551_v63  ;;  %v6562_v48 = vld [vmem:[%s16658_s5 + $0x1200] sm:$0xff] }
 0x680   : > { %12669 = vmatpush1.bf16.msra.mxu0 %v14828_v38  ;;  %v5836_v12 = vcombine.low %v5827_v14, %v5834_v4  ;;  %v14867_v42 = vcombine.high %v6554_v32, %v6558_v15  ;;  %v6566_v14 = vld [vmem:[%s16658_s5 + $0x1220] sm:$0xff]  ;;  %v6563_v4 = vld [vmem:[%s16658_s5 + $0x1208] sm:$0xff] }
 0x681   : > { %12670 = vmatprep.subr.bf16.mxu0 %v14837_v41  ;;  %v5843_v38 = vrot.slane %v5835_v28, %v16673_v55  ;;  %v6550_v41 = vld [vmem:[%s16658_s5 + $0x11a0] sm:$0xff]  ;;  %v6567_v28 = vld [vmem:[%s16658_s5 + $0x1228] sm:$0xff] }
 0x682   : > { %12343 = vmatpush1.bf16.msra.mxu1 %v14834_v16  ;;  %v5718_v16 = vmul.f32 %v5677_v43, %v19105_v47  ;;  %v5850_v23 = vrot.slane %v5836_v12, %v16673_v55  ;;  %v14859_v50 = vcombine.high %v6546_v11, %v6550_v41  ;;  %v14852_v43 = vcombine.low %v6539_v10, %v6543_v18  ;;  %v6555_v55 = vld [vmem:[%s16658_s5 + $0x11c8] sm:$0xff]  ;;  %v6570_v10 = vld [vmem:[%s16658_s5 + $0x1240] sm:$0xff] }
 0x683   : > { %12344 = vmatprep.subr.bf16.mxu1 %v14843_v33  ;;  %v14850_v33 = vcombine.low %v6538_v36, %v6542_v52  ;;  %v14858_v24 = vcombine.low %v6546_v11, %v6550_v41  ;;  %v14869_v44 = vcombine.high %v6555_v55, %v6559_v29  ;;  %v14866_v52 = vcombine.low %v6554_v32, %v6558_v15  ;;  %v6574_v18 = vld [vmem:[%s16658_s5 + $0x1260] sm:$0xff]  ;;  %v6587_v15 = vld [vmem:[%s16658_s5 + $0x12c8] sm:$0xff] }
 0x684   : > { %12671 = vmatpush1.bf16.msra.mxu0 %v14836_v22  ;;  %v5851_v27 = vcombine.low %v5843_v38, %v5850_v23  ;;  %v14877_v38 = vcombine.high %v6563_v4, %v6567_v28  ;;  %v14883_v11 = vcombine.high %v6570_v10, %v6574_v18  ;;  %v14876_v47 = vcombine.low %v6563_v4, %v6567_v28  ;;  %v6582_v54 = vld [vmem:[%s16658_s5 + $0x12a0] sm:$0xff] }
 0x685   : > { %12672 = vmatprep.subr.bf16.mxu0 %v14845_v56  ;;  %v6586_v63 = vld [vmem:[%s16658_s5 + $0x12c0] sm:$0xff] }
 0x686   : > { %12345 = vmatpush1.bf16.msra.mxu1 %v14842_v51  ;;  %v5855_v59 = vsub.f32 %v5185_v1, %v5851_v27  ;;  %v14868_v51 = vcombine.low %v6555_v55, %v6559_v29  ;;  %v6579_v1 = vld [vmem:[%s16658_s5 + $0x1288] sm:$0xff]  ;;  %v6590_v27 = vld [vmem:[%s16658_s5 + $0x12e0] sm:$0xff] }
 0x687   : > { %12346 = vmatprep.subr.bf16.mxu1 %v14851_v34  ;;  %v6571_v34 = vld [vmem:[%s16658_s5 + $0x1248] sm:$0xff]  ;;  %v6594_v55 = vld [vmem:[%s16658_s5 + $0x1300] sm:$0xff] }
 0x688   : > { %12673 = vmatpush1.bf16.msra.mxu0 %v14844_v58  ;;  %v5921_v13 = vrot.slane %v5855_v59, %v17219_v3  ;;  %v5897_v30 = vrot.slane %v5855_v59, %v16681_v62  ;;  %v5893_v31 = vrot.slane %v5855_v59, %v16678_v61  ;;  %v5905_v5 = vrot.slane %v5855_v59, %v16737_v21  ;;  %v6575_v58 = vld [vmem:[%s16658_s5 + $0x1268] sm:$0xff]  ;;  %v6598_v29 = vld [vmem:[%s16658_s5 + $0x1320] sm:$0xff] }
 0x689   : > { %12674 = vmatprep.subr.bf16.mxu0 %v14853_v17  ;;  %v5901_v37 = vrot.slane %v5855_v59, %v16734_v20  ;;  %v5913_v53 = vrot.slane %v5855_v59, %v17194_v2  ;;  %v5909_v9 = vrot.slane %v5855_v59, %v17191_v19  ;;  %v14885_v23 = vcombine.high %v6571_v34, %v6575_v58  ;;  %v6614_v4 = vld [vmem:[%s16658_s5 + $0x13a0] sm:$0xff] }
 0x68a   : > { %12347 = vmatpush1.bf16.msra.mxu1 %v14850_v33  ;;  %v18049_v26 = vadd.f32 %v5921_v13, %v17992_v7  ;;  %v5947_v60 = vadd.f32 %v5897_v30, %v17999_v6  ;;  %v18055_v22 = vadd.f32 %v5893_v31, %v18004_v25  ;;  %v18058_v36 = vadd.f32 %v5905_v5, %v18007_v45  ;;  %v6583_v33 = vld [vmem:[%s16658_s5 + $0x12a8] sm:$0xff]  ;;  %v6602_v5 = vld [vmem:[%s16658_s5 + $0x1340] sm:$0xff] }
 0x68b   : > { %12348 = vmatprep.subr.bf16.mxu1 %v14859_v50  ;;  %v18063_v7 = vadd.f32 %v5901_v37, %v18010_v49  ;;  %v18066_v6 = vadd.f32 %v5913_v53, %v18015_v35  ;;  %v5917_v25 = vrot.slane %v5855_v59, %v17206_v40  ;;  %v14875_v45 = vcombine.high %v6562_v48, %v6566_v14  ;;  %v6599_v13 = vld [vmem:[%s16658_s5 + $0x1328] sm:$0xff] }
 0x68c   : > { %12675 = vmatpush1.bf16.msra.mxu0 %v14852_v43  ;;  %v5963_v56 = vmax.f32 %v5947_v60, 0.0  ;;  %v18071_v12 = vadd.f32 %v5909_v9, %v5718_v16  ;;  %v14874_v35 = vcombine.low %v6562_v48, %v6566_v14  ;;  %v6578_v16 = vld [vmem:[%s16658_s5 + $0x1280] sm:$0xff]  ;;  %v14882_v17 = vcombine.low %v6570_v10, %v6574_v18  ;;  %v6591_v43 = vld [vmem:[%s16658_s5 + $0x12e8] sm:$0xff] }
 0x68d   : > { %12676 = vmatprep.subr.bf16.mxu0 %v14861_v0  ;;  %v18080_v41 = vadd.f32 %v5917_v25, %v18032_v57  ;;  %v14891_v8 = vcombine.high %v6578_v16, %v6582_v54  ;;  %v14884_v57 = vcombine.low %v6571_v34, %v6575_v58  ;;  %v14893_v50 = vcombine.high %v6579_v1, %v6583_v33  ;;  %v6603_v9 = vld [vmem:[%s16658_s5 + $0x1348] sm:$0xff]  ;;  %v6618_v18 = vld [vmem:[%s16658_s5 + $0x13c0] sm:$0xff] }
 0x68e   : > { %12349 = vmatpush1.bf16.msra.mxu1 %v14858_v24  ;;  %v18073_v49 = vpack.c.bf16 %v5963_v56, %v5963_v56  ;;  %v14890_v32 = vcombine.low %v6578_v16, %v6582_v54  ;;  %v14899_v59 = vcombine.high %v6586_v63, %v6590_v27  ;;  %v14892_v0 = vcombine.low %v6579_v1, %v6583_v33  ;;  %v6607_v60 = vld [vmem:[%s16658_s5 + $0x1368] sm:$0xff]  ;;  %v6626_v54 = vld [vmem:[%s16658_s5 + $0x1400] sm:$0xff] }
 0x68f   : > { %12350 = vmatprep.subr.bf16.mxu1 %v14867_v42  ;;  %v14901_v24 = vcombine.high %v6587_v15, %v6591_v43  ;;  %v6595_v42 = vld [vmem:[%s16658_s5 + $0x1308] sm:$0xff]  ;;  %v14907_v30 = vcombine.high %v6594_v55, %v6598_v29  ;;  %v14900_v31 = vcombine.low %v6587_v15, %v6591_v43  ;;  %v14906_v53 = vcombine.low %v6594_v55, %v6598_v29  ;;  %v6638_v15 = vld [vmem:[%s16658_s5 + $0x1460] sm:$0xff] }
 0x690   : > { %12677 = vmatpush1.bf16.msra.mxu0 %v14860_v39  ;;  %12368 = vmatprep.mubr.bf16.mxu1 %v18073_v49  ;;  %v14898_v39 = vcombine.low %v6586_v63, %v6590_v27  ;;  %v14909_v37 = vcombine.high %v6595_v42, %v6599_v13  ;;  %v14908_v14 = vcombine.low %v6595_v42, %v6599_v13  ;;  %v6611_v25 = vld [vmem:[%s16658_s5 + $0x1388] sm:$0xff]  ;;  %v6646_v42 = vld [vmem:[%s16658_s5 + $0x14a0] sm:$0xff] }
 0x691   : > { %12678 = vmatprep.subr.bf16.mxu0 %v14869_v44  ;;  %12696 = vmatprep.mubr.bf16.mxu0 %v18073_v49  ;;  %v6606_v44 = vld [vmem:[%s16658_s5 + $0x1360] sm:$0xff]  ;;  %v14917_v28 = vcombine.high %v6603_v9, %v6607_v60  ;;  %v14916_v10 = vcombine.low %v6603_v9, %v6607_v60  ;;  %v6619_v58 = vld [vmem:[%s16658_s5 + $0x13c8] sm:$0xff] }
 0x692   : > { %12351 = vmatpush1.bf16.msra.mxu1 %v14866_v52  ;;  %v14915_v48 = vcombine.high %v6602_v5, %v6606_v44  ;;  %v6610_v52 = vld [vmem:[%s16658_s5 + $0x1380] sm:$0xff]  ;;  %v14914_v56 = vcombine.low %v6602_v5, %v6606_v44  ;;  %v6627_v33 = vld [vmem:[%s16658_s5 + $0x1408] sm:$0xff] }
 0x693   : > { %12352 = vmatprep.subr.bf16.mxu1 %v14875_v45  ;;  %v14923_v45 = vcombine.high %v6610_v52, %v6614_v4  ;;  %v14922_v34 = vcombine.low %v6610_v52, %v6614_v4  ;;  %v6639_v55 = vld [vmem:[%s16658_s5 + $0x1468] sm:$0xff]  ;;  %v6654_v9 = vld [vmem:[%s16658_s5 + $0x14e0] sm:$0xff] }
 0x694   : > { %12679 = vmatpush1.bf16.msra.mxu0 %v14868_v51  ;;  %v6615_v51 = vld [vmem:[%s16658_s5 + $0x13a8] sm:$0xff] }
 0x695   : > { %12680 = vmatprep.subr.bf16.mxu0 %v14877_v38  ;;  %v6622_v38 = vld [vmem:[%s16658_s5 + $0x13e0] sm:$0xff]  ;;  %v14924_v16 = vcombine.low %v6611_v25, %v6615_v51  ;;  %v6647_v5 = vld [vmem:[%s16658_s5 + $0x14a8] sm:$0xff] }
 0x696   : > { %12353 = vmatpush1.bf16.msra.mxu1 %v14874_v35  ;;  %v14925_v35 = vcombine.high %v6611_v25, %v6615_v51  ;;  %v14930_v1 = vcombine.low %v6618_v18, %v6622_v38  ;;  %v6655_v52 = vld [vmem:[%s16658_s5 + $0x14e8] sm:$0xff]  ;;  %v6662_v25 = vld [vmem:[%s16658_s5 + $0x1520] sm:$0xff] }
 0x697   : > { %12354 = vmatprep.subr.bf16.mxu1 %v14883_v11  ;;  %v6623_v11 = vld [vmem:[%s16658_s5 + $0x13e8] sm:$0xff] }
 0x698   : > { %12681 = vmatpush1.bf16.msra.mxu0 %v14876_v47  ;;  %v14931_v47 = vcombine.high %v6618_v18, %v6622_v38  ;;  %v14932_v27 = vcombine.low %v6619_v58, %v6623_v11  ;;  %v6663_v18 = vld [vmem:[%s16658_s5 + $0x1528] sm:$0xff] }
 0x699   : > { %12682 = vmatprep.subr.bf16.mxu0 %v14885_v23  ;;  %v6630_v23 = vld [vmem:[%s16658_s5 + $0x1420] sm:$0xff] }
 0x69a   : > { %12355 = vmatpush1.bf16.msra.mxu1 %v14882_v17  ;;  %v14933_v17 = vcombine.high %v6619_v58, %v6623_v11  ;;  %v14939_v63 = vcombine.high %v6626_v54, %v6630_v23  ;;  %v6670_v58 = vld [vmem:[%s16658_s5 + $0x1560] sm:$0xff] }
 0x69b   : > { %12356 = vmatprep.subr.bf16.mxu1 %v14891_v8  ;;  %v6631_v8 = vld [vmem:[%s16658_s5 + $0x1428] sm:$0xff] }
 0x69c   : > { %12683 = vmatpush1.bf16.msra.mxu0 %v14884_v57  ;;  %v5962_v57 = vmax.f32 %v18055_v22, 0.0  ;;  %v14941_v43 = vcombine.high %v6627_v33, %v6631_v8 }
 0x69d   : > { %12684 = vmatprep.subr.bf16.mxu0 %v14893_v50  ;;  %v5965_v50 = vmax.f32 %v18058_v36, 0.0  ;;  %v6642_v36 = vld [vmem:[%s16658_s5 + $0x1480] sm:$0xff] }
 0x69e   : > { %12357 = vmatpush1.bf16.msra.mxu1 %v14890_v32  ;;  %v6634_v32 = vld [vmem:[%s16658_s5 + $0x1440] sm:$0xff]  ;;  %v18116_v29 = vpack.c.bf16 %v5962_v57, %v5962_v57  ;;  %v14955_v44 = vcombine.high %v6642_v36, %v6646_v42 }
 0x69f   : > { %12358 = vmatprep.subr.bf16.mxu1 %v14899_v59  ;;  %v14938_v59 = vcombine.low %v6626_v54, %v6630_v23  ;;  %v14947_v22 = vcombine.high %v6634_v32, %v6638_v15  ;;  %v6671_v54 = vld [vmem:[%s16658_s5 + $0x1568] sm:$0xff] }
 0x6a0   : > { %12685 = vmatpush1.bf16.msra.mxu0 %v14892_v0  ;;  %v6635_v0 = vld [vmem:[%s16658_s5 + $0x1448] sm:$0xff] }
 0x6a1   : > { %12686 = vmatprep.subr.bf16.mxu0 %v14901_v24  ;;  %v14940_v24 = vcombine.low %v6627_v33, %v6631_v8  ;;  %v14949_v13 = vcombine.high %v6635_v0, %v6639_v55  ;;  %v6678_v33 = vld [vmem:[%s16658_s5 + $0x15a0] sm:$0xff] }
 0x6a2   : > { %12359 = vmatpush1.bf16.msra.mxu1 %v14898_v39  ;;  %v18118_v39 = vpack.c.bf16 %v5965_v50, %v5965_v50 }
 0x6a3   : > { %12360 = vmatprep.subr.bf16.mxu1 %v14907_v30  ;;  %v14946_v30 = vcombine.low %v6634_v32, %v6638_v15  ;;  %v6682_v15 = vld [vmem:[%s16658_s5 + $0x15c0] sm:$0xff] }
 0x6a4   : > { %12687 = vmatpush1.bf16.msra.mxu0 %v14900_v31  ;;  %v6643_v31 = vld [vmem:[%s16658_s5 + $0x1488] sm:$0xff] }
 0x6a5   : > { %12688 = vmatprep.subr.bf16.mxu0 %v14909_v37  ;;  %v14948_v37 = vcombine.low %v6635_v0, %v6639_v55  ;;  %v14957_v60 = vcombine.high %v6643_v31, %v6647_v5  ;;  %v6683_v55 = vld [vmem:[%s16658_s5 + $0x15c8] sm:$0xff] }
 0x6a6   : > { %12361 = vmatpush1.bf16.msra.mxu1 %v14906_v53  ;;  %v6650_v53 = vld [vmem:[%s16658_s5 + $0x14c0] sm:$0xff] }
 0x6a7   : > { %12362 = vmatprep.subr.bf16.mxu1 %v14915_v48  ;;  %v14954_v48 = vcombine.low %v6642_v36, %v6646_v42  ;;  %v14963_v4 = vcombine.high %v6650_v53, %v6654_v9  ;;  %v6690_v42 = vld [vmem:[%s16658_s5 + $0x1600] sm:$0xff] }
 0x6a8   : > { %12689 = vmatpush1.bf16.msra.mxu0 %v14908_v14  ;;  %v6651_v14 = vld [vmem:[%s16658_s5 + $0x14c8] sm:$0xff] }
 0x6a9   : > { %12690 = vmatprep.subr.bf16.mxu0 %v14917_v28  ;;  %v14956_v28 = vcombine.low %v6643_v31, %v6647_v5  ;;  %v14965_v51 = vcombine.high %v6651_v14, %v6655_v52  ;;  %v6691_v5 = vld [vmem:[%s16658_s5 + $0x1608] sm:$0xff] }
 0x6aa   : > { %12363 = vmatpush1.bf16.msra.mxu1 %v14914_v56  ;;  %v6658_v56 = vld [vmem:[%s16658_s5 + $0x1500] sm:$0xff] }
 0x6ab   : > { %12364 = vmatprep.subr.bf16.mxu1 %v14923_v45  ;;  %v14962_v45 = vcombine.low %v6650_v53, %v6654_v9  ;;  %v14971_v38 = vcombine.high %v6658_v56, %v6662_v25  ;;  %v6698_v9 = vld [vmem:[%s16658_s5 + $0x1640] sm:$0xff] }
 0x6ac   : > { %12691 = vmatpush1.bf16.msra.mxu0 %v14916_v10  ;;  %v6659_v10 = vld [vmem:[%s16658_s5 + $0x1508] sm:$0xff] }
 0x6ad   : > { %12692 = vmatprep.subr.bf16.mxu0 %v14925_v35  ;;  %v14964_v35 = vcombine.low %v6651_v14, %v6655_v52  ;;  %v14973_v11 = vcombine.high %v6659_v10, %v6663_v18  ;;  %v6699_v52 = vld [vmem:[%s16658_s5 + $0x1648] sm:$0xff] }
 0x6ae   : > { %12365 = vmatpush1.bf16.msra.mxu1 %v14922_v34  ;;  %v6666_v34 = vld [vmem:[%s16658_s5 + $0x1540] sm:$0xff] }
 0x6af   : > { %12366 = vmatprep.subr.bf16.mxu1 %v14931_v47  ;;  %v14970_v47 = vcombine.low %v6658_v56, %v6662_v25  ;;  %v14979_v23 = vcombine.high %v6666_v34, %v6670_v58  ;;  %v14978_v57 = vcombine.low %v6666_v34, %v6670_v58  ;;  %v6706_v25 = vld [vmem:[%s16658_s5 + $0x1680] sm:$0xff] }
 0x6b0   : > { %12693 = vmatpush1.bf16.msra.mxu0 %v14924_v16  ;;  %v6667_v16 = vld [vmem:[%s16658_s5 + $0x1548] sm:$0xff]  ;;  %v6714_v58 = vld [vmem:[%s16658_s5 + $0x16c0] sm:$0xff] }
 0x6b1   : > { %12694 = vmatprep.subr.bf16.mxu0 %v14933_v17  ;;  %v14972_v17 = vcombine.low %v6659_v10, %v6663_v18  ;;  %v14981_v8 = vcombine.high %v6667_v16, %v6671_v54  ;;  %v14980_v32 = vcombine.low %v6667_v16, %v6671_v54  ;;  %v6707_v18 = vld [vmem:[%s16658_s5 + $0x1688] sm:$0xff] }
 0x6b2   : > { %12367 = vmatpush1.bf16.msra.mxu1 %v14930_v1  ;;  %v6674_v1 = vld [vmem:[%s16658_s5 + $0x1580] sm:$0xff]  ;;  %v6715_v54 = vld [vmem:[%s16658_s5 + $0x16c8] sm:$0xff] }
 0x6b3   : > { %12377 = vmatprep.subr.bf16.mxu1 %v14939_v63  ;;  %v6675_v63 = vld [vmem:[%s16658_s5 + $0x1588] sm:$0xff]  ;;  %v14987_v50 = vcombine.high %v6674_v1, %v6678_v33  ;;  %v14986_v0 = vcombine.low %v6674_v1, %v6678_v33  ;;  %v6722_v33 = vld [vmem:[%s16658_s5 + $0x1700] sm:$0xff] }
 0x6b4   : > { %12695 = vmatpush1.bf16.msra.mxu0 %v14932_v27  ;;  %v6679_v27 = vld [vmem:[%s16658_s5 + $0x15a8] sm:$0xff] }
 0x6b5   : > { %12369 = vmatmul.mubr.bf16.vlgmr.msra.gmra.mrb[20].mxu1 %v18116_v29  ;;  %12705 = vmatprep.subr.bf16.mxu0 %v14941_v43  ;;  %v6686_v43 = vld [vmem:[%s16658_s5 + $0x15e0] sm:$0xff]  ;;  %v14988_v36 = vcombine.low %v6675_v63, %v6679_v27 }
 0x6b6   : > { %12378 = vmatpush1.bf16.msra.mxu1 %v14938_v59  ;;  %12409 = vmatprep.mubr.bf16.mxu1 %v18118_v39  ;;  %v14989_v59 = vcombine.high %v6675_v63, %v6679_v27  ;;  %v14994_v31 = vcombine.low %v6682_v15, %v6686_v43  ;;  %v6723_v27 = vld [vmem:[%s16658_s5 + $0x1708] sm:$0xff] }
 0x6b7   : > { %12697 = vmatmul.mubr.bf16.vlgmr.msra.gmra.mrb[24].mxu0 %v18116_v29  ;;  %12379 = vmatprep.subr.bf16.mxu1 %v14947_v22  ;;  %v6687_v22 = vld [vmem:[%s16658_s5 + $0x15e8] sm:$0xff] }
 0x6b8   : > { %12706 = vmatpush1.bf16.msra.mxu0 %v14940_v24  ;;  %12737 = vmatprep.mubr.bf16.mxu0 %v18118_v39  ;;  %v14995_v24 = vcombine.high %v6682_v15, %v6686_v43  ;;  %v14996_v53 = vcombine.low %v6683_v55, %v6687_v22  ;;  %v6730_v43 = vld [vmem:[%s16658_s5 + $0x1740] sm:$0xff] }
 0x6b9   : > { %12707 = vmatprep.subr.bf16.mxu0 %v14949_v13  ;;  %v6694_v13 = vld [vmem:[%s16658_s5 + $0x1620] sm:$0xff] }
 0x6ba   : > { %12380 = vmatpush1.bf16.msra.mxu1 %v14946_v30  ;;  %v14997_v30 = vcombine.high %v6683_v55, %v6687_v22  ;;  %v15002_v14 = vcombine.low %v6690_v42, %v6694_v13  ;;  %v6731_v22 = vld [vmem:[%s16658_s5 + $0x1748] sm:$0xff] }
 0x6bb   : > { %12381 = vmatprep.subr.bf16.mxu1 %v14955_v44  ;;  %v6695_v44 = vld [vmem:[%s16658_s5 + $0x1628] sm:$0xff] }
 0x6bc   : > { %12708 = vmatpush1.bf16.msra.mxu0 %v14948_v37  ;;  %v15003_v37 = vcombine.high %v6690_v42, %v6694_v13  ;;  %v15004_v56 = vcombine.low %v6691_v5, %v6695_v44  ;;  %v6738_v13 = vld [vmem:[%s16658_s5 + $0x1780] sm:$0xff] }
 0x6bd   : > { %12709 = vmatprep.subr.bf16.mxu0 %v14957_v60  ;;  %v6702_v60 = vld [vmem:[%s16658_s5 + $0x1660] sm:$0xff] }
 0x6be   : > { %12382 = vmatpush1.bf16.msra.mxu1 %v14954_v48  ;;  %v15005_v48 = vcombine.high %v6691_v5, %v6695_v44  ;;  %v15010_v10 = vcombine.low %v6698_v9, %v6702_v60  ;;  %v6739_v44 = vld [vmem:[%s16658_s5 + $0x1788] sm:$0xff] }
 0x6bf   : > { %12383 = vmatprep.subr.bf16.mxu1 %v14963_v4  ;;  %v6703_v4 = vld [vmem:[%s16658_s5 + $0x1668] sm:$0xff] }
 0x6c0   : > { %12710 = vmatpush1.bf16.msra.mxu0 %v14956_v28  ;;  %v15011_v28 = vcombine.high %v6698_v9, %v6702_v60  ;;  %v15012_v34 = vcombine.low %v6699_v52, %v6703_v4  ;;  %v6746_v60 = vld [vmem:[%s16658_s5 + $0x17c0] sm:$0xff] }
 0x6c1   : > { %12711 = vmatprep.subr.bf16.mxu0 %v14965_v51  ;;  %v6710_v51 = vld [vmem:[%s16658_s5 + $0x16a0] sm:$0xff] }
 0x6c2   : > { %12384 = vmatpush1.bf16.msra.mxu1 %v14962_v45  ;;  %v15013_v45 = vcombine.high %v6699_v52, %v6703_v4  ;;  %v15018_v16 = vcombine.low %v6706_v25, %v6710_v51  ;;  %v6747_v4 = vld [vmem:[%s16658_s5 + $0x17c8] sm:$0xff] }
 0x6c3   : > { %12385 = vmatprep.subr.bf16.mxu1 %v14971_v38  ;;  %v6711_v38 = vld [vmem:[%s16658_s5 + $0x16a8] sm:$0xff] }
 0x6c4   : > { %12712 = vmatpush1.bf16.msra.mxu0 %v14964_v35  ;;  %v15019_v35 = vcombine.high %v6706_v25, %v6710_v51  ;;  %v15020_v1 = vcombine.low %v6707_v18, %v6711_v38  ;;  %v6754_v51 = vld [vmem:[%s16658_s5 + $0x1800] sm:$0xff] }
 0x6c5   : > { %12713 = vmatprep.subr.bf16.mxu0 %v14973_v11  ;;  %v6718_v11 = vld [vmem:[%s16658_s5 + $0x16e0] sm:$0xff] }
 0x6c6   : > { %12386 = vmatpush1.bf16.msra.mxu1 %v14970_v47  ;;  %v15021_v47 = vcombine.high %v6707_v18, %v6711_v38  ;;  %v15026_v63 = vcombine.low %v6714_v58, %v6718_v11  ;;  %v6755_v38 = vld [vmem:[%s16658_s5 + $0x1808] sm:$0xff] }
 0x6c7   : > { %12387 = vmatprep.subr.bf16.mxu1 %v14979_v23  ;;  %v6719_v23 = vld [vmem:[%s16658_s5 + $0x16e8] sm:$0xff] }
 0x6c8   : > { %12714 = vmatpush1.bf16.msra.mxu0 %v14972_v17  ;;  %v15027_v17 = vcombine.high %v6714_v58, %v6718_v11  ;;  %v15028_v15 = vcombine.low %v6715_v54, %v6719_v23 }
 0x6c9   : > { %12715 = vmatprep.subr.bf16.mxu0 %v14981_v8  ;;  %v6726_v8 = vld [vmem:[%s16658_s5 + $0x1720] sm:$0xff] }
 0x6ca   : > { %12388 = vmatpush1.bf16.msra.mxu1 %v14978_v57  ;;  %v15029_v57 = vcombine.high %v6715_v54, %v6719_v23  ;;  %v15034_v55 = vcombine.low %v6722_v33, %v6726_v8  ;;  %v6766_v54 = vld [vmem:[%s16658_s5 + $0x1860] sm:$0xff] }
 0x6cb   : > { %12389 = vmatprep.subr.bf16.mxu1 %v14987_v50  ;;  %v6727_v50 = vld [vmem:[%s16658_s5 + $0x1728] sm:$0xff] }
 0x6cc   : > { %12716 = vmatpush1.bf16.msra.mxu0 %v14980_v32  ;;  %v15035_v32 = vcombine.high %v6722_v33, %v6726_v8  ;;  %v15036_v42 = vcombine.low %v6723_v27, %v6727_v50  ;;  %v6767_v33 = vld [vmem:[%s16658_s5 + $0x1868] sm:$0xff] }
 0x6cd   : > { %12717 = vmatprep.subr.bf16.mxu0 %v14989_v59  ;;  %v6734_v59 = vld [vmem:[%s16658_s5 + $0x1760] sm:$0xff] }
 0x6ce   : > { %12390 = vmatpush1.bf16.msra.mxu1 %v14986_v0  ;;  %v15037_v0 = vcombine.high %v6723_v27, %v6727_v50  ;;  %v15042_v5 = vcombine.low %v6730_v43, %v6734_v59  ;;  %v6774_v27 = vld [vmem:[%s16658_s5 + $0x18a0] sm:$0xff] }
 0x6cf   : > { %12391 = vmatprep.subr.bf16.mxu1 %v14995_v24  ;;  %v6735_v24 = vld [vmem:[%s16658_s5 + $0x1768] sm:$0xff] }
 0x6d0   : > { %12718 = vmatpush1.bf16.msra.mxu0 %v14988_v36  ;;  %v15043_v36 = vcombine.high %v6730_v43, %v6734_v59  ;;  %v15044_v9 = vcombine.low %v6731_v22, %v6735_v24  ;;  %v6775_v43 = vld [vmem:[%s16658_s5 + $0x18a8] sm:$0xff] }
 0x6d1   : > { %12719 = vmatprep.subr.bf16.mxu0 %v14997_v30  ;;  %v6742_v30 = vld [vmem:[%s16658_s5 + $0x17a0] sm:$0xff] }
 0x6d2   : > { %12392 = vmatpush1.bf16.msra.mxu1 %v14994_v31  ;;  %v15045_v31 = vcombine.high %v6731_v22, %v6735_v24  ;;  %v15050_v52 = vcombine.low %v6738_v13, %v6742_v30  ;;  %v6782_v22 = vld [vmem:[%s16658_s5 + $0x18e0] sm:$0xff] }
 0x6d3   : > { %12393 = vmatprep.subr.bf16.mxu1 %v15003_v37  ;;  %v6743_v37 = vld [vmem:[%s16658_s5 + $0x17a8] sm:$0xff] }
 0x6d4   : > { %12720 = vmatpush1.bf16.msra.mxu0 %v14996_v53  ;;  %v15051_v53 = vcombine.high %v6738_v13, %v6742_v30  ;;  %v15052_v25 = vcombine.low %v6739_v44, %v6743_v37  ;;  %v6783_v13 = vld [vmem:[%s16658_s5 + $0x18e8] sm:$0xff] }
 0x6d5   : > { %12721 = vmatprep.subr.bf16.mxu0 %v15005_v48  ;;  %v6750_v48 = vld [vmem:[%s16658_s5 + $0x17e0] sm:$0xff] }
 0x6d6   : > { %12394 = vmatpush1.bf16.msra.mxu1 %v15002_v14  ;;  %v15053_v14 = vcombine.high %v6739_v44, %v6743_v37  ;;  %v15058_v18 = vcombine.low %v6746_v60, %v6750_v48  ;;  %v6790_v44 = vld [vmem:[%s16658_s5 + $0x1920] sm:$0xff] }
 0x6d7   : > { %12395 = vmatprep.subr.bf16.mxu1 %v15011_v28  ;;  %v6751_v28 = vld [vmem:[%s16658_s5 + $0x17e8] sm:$0xff] }
 0x6d8   : > { %12722 = vmatpush1.bf16.msra.mxu0 %v15004_v56  ;;  %v15059_v56 = vcombine.high %v6746_v60, %v6750_v48  ;;  %v15060_v11 = vcombine.low %v6747_v4, %v6751_v28  ;;  %v6791_v60 = vld [vmem:[%s16658_s5 + $0x1928] sm:$0xff] }
 0x6d9   : > { %12723 = vmatprep.subr.bf16.mxu0 %v15013_v45  ;;  %v6758_v45 = vld [vmem:[%s16658_s5 + $0x1820] sm:$0xff] }
 0x6da   : > { %12396 = vmatpush1.bf16.msra.mxu1 %v15010_v10  ;;  %v15061_v10 = vcombine.high %v6747_v4, %v6751_v28  ;;  %v15067_v58 = vcombine.high %v6754_v51, %v6758_v45  ;;  %v6798_v4 = vld [vmem:[%s16658_s5 + $0x1960] sm:$0xff] }
 0x6db   : > { %12397 = vmatprep.subr.bf16.mxu1 %v15019_v35  ;;  %v6759_v35 = vld [vmem:[%s16658_s5 + $0x1828] sm:$0xff] }
 0x6dc   : > { %12724 = vmatpush1.bf16.msra.mxu0 %v15012_v34  ;;  %v5964_v34 = vmax.f32 %v18063_v7, 0.0  ;;  %v15069_v23 = vcombine.high %v6755_v38, %v6759_v35 }
 0x6dd   : > { %12725 = vmatprep.subr.bf16.mxu0 %v15021_v47  ;;  %v5967_v47 = vmax.f32 %v18066_v6, 0.0  ;;  %v6770_v6 = vld [vmem:[%s16658_s5 + $0x1880] sm:$0xff] }
 0x6de   : > { %12398 = vmatpush1.bf16.msra.mxu1 %v15018_v16  ;;  %v6762_v16 = vld [vmem:[%s16658_s5 + $0x1840] sm:$0xff]  ;;  %v18190_v8 = vpack.c.bf16 %v5964_v34, %v5964_v34  ;;  %v15083_v59 = vcombine.high %v6770_v6, %v6774_v27 }
 0x6df   : > { %12399 = vmatprep.subr.bf16.mxu1 %v15027_v17  ;;  %v15066_v17 = vcombine.low %v6754_v51, %v6758_v45  ;;  %v15075_v7 = vcombine.high %v6762_v16, %v6766_v54  ;;  %v6799_v51 = vld [vmem:[%s16658_s5 + $0x1968] sm:$0xff] }
 0x6e0   : > { %12726 = vmatpush1.bf16.msra.mxu0 %v15020_v1  ;;  %v6763_v1 = vld [vmem:[%s16658_s5 + $0x1848] sm:$0xff] }
 0x6e1   : > { %12727 = vmatprep.subr.bf16.mxu0 %v15029_v57  ;;  %v15068_v57 = vcombine.low %v6755_v38, %v6759_v35  ;;  %v15077_v50 = vcombine.high %v6763_v1, %v6767_v33  ;;  %v6806_v38 = vld [vmem:[%s16658_s5 + $0x19a0] sm:$0xff] }
 0x6e2   : > { %12400 = vmatpush1.bf16.msra.mxu1 %v15026_v63  ;;  %v18192_v63 = vpack.c.bf16 %v5967_v47, %v5967_v47 }
 0x6e3   : > { %12401 = vmatprep.subr.bf16.mxu1 %v15035_v32  ;;  %v15074_v32 = vcombine.low %v6762_v16, %v6766_v54  ;;  %v6810_v54 = vld [vmem:[%s16658_s5 + $0x19c0] sm:$0xff] }
 0x6e4   : > { %12728 = vmatpush1.bf16.msra.mxu0 %v15028_v15  ;;  %v6771_v15 = vld [vmem:[%s16658_s5 + $0x1888] sm:$0xff] }
 0x6e5   : > { %12729 = vmatprep.subr.bf16.mxu0 %v15037_v0  ;;  %v15076_v0 = vcombine.low %v6763_v1, %v6767_v33  ;;  %v15085_v24 = vcombine.high %v6771_v15, %v6775_v43  ;;  %v6811_v33 = vld [vmem:[%s16658_s5 + $0x19c8] sm:$0xff] }
 0x6e6   : > { %12402 = vmatpush1.bf16.msra.mxu1 %v15034_v55  ;;  %v6778_v55 = vld [vmem:[%s16658_s5 + $0x18c0] sm:$0xff] }
 0x6e7   : > { %12403 = vmatprep.subr.bf16.mxu1 %v15043_v36  ;;  %v15082_v36 = vcombine.low %v6770_v6, %v6774_v27  ;;  %v15091_v30 = vcombine.high %v6778_v55, %v6782_v22  ;;  %v6818_v27 = vld [vmem:[%s16658_s5 + $0x1a00] sm:$0xff] }
 0x6e8   : > { %12730 = vmatpush1.bf16.msra.mxu0 %v15036_v42  ;;  %v6779_v42 = vld [vmem:[%s16658_s5 + $0x18c8] sm:$0xff] }
 0x6e9   : > { %12731 = vmatprep.subr.bf16.mxu0 %v15045_v31  ;;  %v15084_v31 = vcombine.low %v6771_v15, %v6775_v43  ;;  %v15093_v37 = vcombine.high %v6779_v42, %v6783_v13  ;;  %v6819_v43 = vld [vmem:[%s16658_s5 + $0x1a08] sm:$0xff] }
 0x6ea   : > { %12404 = vmatpush1.bf16.msra.mxu1 %v15042_v5  ;;  %v6786_v5 = vld [vmem:[%s16658_s5 + $0x1900] sm:$0xff] }
 0x6eb   : > { %12405 = vmatprep.subr.bf16.mxu1 %v15051_v53  ;;  %v15090_v53 = vcombine.low %v6778_v55, %v6782_v22  ;;  %v15099_v48 = vcombine.high %v6786_v5, %v6790_v44  ;;  %v6826_v22 = vld [vmem:[%s16658_s5 + $0x1a40] sm:$0xff] }
 0x6ec   : > { %12732 = vmatpush1.bf16.msra.mxu0 %v15044_v9  ;;  %v6787_v9 = vld [vmem:[%s16658_s5 + $0x1908] sm:$0xff] }
 0x6ed   : > { %12733 = vmatprep.subr.bf16.mxu0 %v15053_v14  ;;  %v15092_v14 = vcombine.low %v6779_v42, %v6783_v13  ;;  %v15101_v28 = vcombine.high %v6787_v9, %v6791_v60  ;;  %v6827_v13 = vld [vmem:[%s16658_s5 + $0x1a48] sm:$0xff] }
 0x6ee   : > { %12406 = vmatpush1.bf16.msra.mxu1 %v15050_v52  ;;  %v6794_v52 = vld [vmem:[%s16658_s5 + $0x1940] sm:$0xff] }
 0x6ef   : > { %12407 = vmatprep.subr.bf16.mxu1 %v15059_v56  ;;  %v15098_v56 = vcombine.low %v6786_v5, %v6790_v44  ;;  %v15107_v45 = vcombine.high %v6794_v52, %v6798_v4  ;;  %v15106_v34 = vcombine.low %v6794_v52, %v6798_v4  ;;  %v6834_v44 = vld [vmem:[%s16658_s5 + $0x1a80] sm:$0xff] }
 0x6f0   : > { %12734 = vmatpush1.bf16.msra.mxu0 %v15052_v25  ;;  %v6795_v25 = vld [vmem:[%s16658_s5 + $0x1948] sm:$0xff]  ;;  %v6842_v4 = vld [vmem:[%s16658_s5 + $0x1ac0] sm:$0xff] }
 0x6f1   : > { %12735 = vmatprep.subr.bf16.mxu0 %v15061_v10  ;;  %v15100_v10 = vcombine.low %v6787_v9, %v6791_v60  ;;  %v15109_v35 = vcombine.high %v6795_v25, %v6799_v51  ;;  %v15108_v16 = vcombine.low %v6795_v25, %v6799_v51  ;;  %v6835_v60 = vld [vmem:[%s16658_s5 + $0x1a88] sm:$0xff] }
 0x6f2   : > { %12408 = vmatpush1.bf16.msra.mxu1 %v15058_v18  ;;  %v6802_v18 = vld [vmem:[%s16658_s5 + $0x1980] sm:$0xff]  ;;  %v6843_v51 = vld [vmem:[%s16658_s5 + $0x1ac8] sm:$0xff] }
 0x6f3   : > { %12418 = vmatprep.subr.bf16.mxu1 %v15067_v58  ;;  %v6803_v58 = vld [vmem:[%s16658_s5 + $0x1988] sm:$0xff]  ;;  %v15115_v47 = vcombine.high %v6802_v18, %v6806_v38  ;;  %v15114_v1 = vcombine.low %v6802_v18, %v6806_v38  ;;  %v6850_v38 = vld [vmem:[%s16658_s5 + $0x1b00] sm:$0xff] }
 0x6f4   : > { %12736 = vmatpush1.bf16.msra.mxu0 %v15060_v11  ;;  %v6807_v11 = vld [vmem:[%s16658_s5 + $0x19a8] sm:$0xff] }
 0x6f5   : > { %12410 = vmatmul.mubr.bf16.vlgmr.msra.gmra.mrb[20].mxu1 %v18190_v8  ;;  %12746 = vmatprep.subr.bf16.mxu0 %v15069_v23  ;;  %v6814_v23 = vld [vmem:[%s16658_s5 + $0x19e0] sm:$0xff]  ;;  %v15116_v6 = vcombine.low %v6803_v58, %v6807_v11 }
 0x6f6   : > { %12419 = vmatpush1.bf16.msra.mxu1 %v15066_v17  ;;  %12450 = vmatprep.mubr.bf16.mxu1 %v18192_v63  ;;  %v15117_v17 = vcombine.high %v6803_v58, %v6807_v11  ;;  %v15122_v15 = vcombine.low %v6810_v54, %v6814_v23  ;;  %v6851_v11 = vld [vmem:[%s16658_s5 + $0x1b08] sm:$0xff] }
 0x6f7   : > { %12738 = vmatmul.mubr.bf16.vlgmr.msra.gmra.mrb[24].mxu0 %v18190_v8  ;;  %12420 = vmatprep.subr.bf16.mxu1 %v15075_v7  ;;  %v6815_v7 = vld [vmem:[%s16658_s5 + $0x19e8] sm:$0xff] }
 0x6f8   : > { %12747 = vmatpush1.bf16.msra.mxu0 %v15068_v57  ;;  %12778 = vmatprep.mubr.bf16.mxu0 %v18192_v63  ;;  %v15123_v57 = vcombine.high %v6810_v54, %v6814_v23  ;;  %v15124_v55 = vcombine.low %v6811_v33, %v6815_v7  ;;  %v6858_v23 = vld [vmem:[%s16658_s5 + $0x1b40] sm:$0xff] }
 0x6f9   : > { %12748 = vmatprep.subr.bf16.mxu0 %v15077_v50  ;;  %v6822_v50 = vld [vmem:[%s16658_s5 + $0x1a20] sm:$0xff] }
 0x6fa   : > { %12421 = vmatpush1.bf16.msra.mxu1 %v15074_v32  ;;  %v15125_v32 = vcombine.high %v6811_v33, %v6815_v7  ;;  %v15130_v42 = vcombine.low %v6818_v27, %v6822_v50  ;;  %v6859_v7 = vld [vmem:[%s16658_s5 + $0x1b48] sm:$0xff] }
 0x6fb   : > { %12422 = vmatprep.subr.bf16.mxu1 %v15083_v59  ;;  %v6823_v59 = vld [vmem:[%s16658_s5 + $0x1a28] sm:$0xff] }
 0x6fc   : > { %12749 = vmatpush1.bf16.msra.mxu0 %v15076_v0  ;;  %v15131_v0 = vcombine.high %v6818_v27, %v6822_v50  ;;  %v15132_v5 = vcombine.low %v6819_v43, %v6823_v59  ;;  %v6866_v50 = vld [vmem:[%s16658_s5 + $0x1b80] sm:$0xff] }
 0x6fd   : > { %12750 = vmatprep.subr.bf16.mxu0 %v15085_v24  ;;  %v6830_v24 = vld [vmem:[%s16658_s5 + $0x1a60] sm:$0xff] }
 0x6fe   : > { %12423 = vmatpush1.bf16.msra.mxu1 %v15082_v36  ;;  %v15133_v36 = vcombine.high %v6819_v43, %v6823_v59  ;;  %v15138_v9 = vcombine.low %v6826_v22, %v6830_v24  ;;  %v6867_v59 = vld [vmem:[%s16658_s5 + $0x1b88] sm:$0xff] }
 0x6ff   : > { %12424 = vmatprep.subr.bf16.mxu1 %v15091_v30  ;;  %v6831_v30 = vld [vmem:[%s16658_s5 + $0x1a68] sm:$0xff] }
 0x700   : > { %12751 = vmatpush1.bf16.msra.mxu0 %v15084_v31  ;;  %v15139_v31 = vcombine.high %v6826_v22, %v6830_v24  ;;  %v15140_v52 = vcombine.low %v6827_v13, %v6831_v30  ;;  %v6874_v24 = vld [vmem:[%s16658_s5 + $0x1bc0] sm:$0xff] }
 0x701   : > { %12752 = vmatprep.subr.bf16.mxu0 %v15093_v37  ;;  %v6838_v37 = vld [vmem:[%s16658_s5 + $0x1aa0] sm:$0xff] }
 0x702   : > { %12425 = vmatpush1.bf16.msra.mxu1 %v15090_v53  ;;  %v15141_v53 = vcombine.high %v6827_v13, %v6831_v30  ;;  %v15146_v25 = vcombine.low %v6834_v44, %v6838_v37  ;;  %v6875_v30 = vld [vmem:[%s16658_s5 + $0x1bc8] sm:$0xff] }
 0x703   : > { %12426 = vmatprep.subr.bf16.mxu1 %v15099_v48  ;;  %v6839_v48 = vld [vmem:[%s16658_s5 + $0x1aa8] sm:$0xff] }
 0x704   : > { %12753 = vmatpush1.bf16.msra.mxu0 %v15092_v14  ;;  %v15147_v14 = vcombine.high %v6834_v44, %v6838_v37  ;;  %v15148_v18 = vcombine.low %v6835_v60, %v6839_v48  ;;  %v6882_v37 = vld [vmem:[%s16658_s5 + $0x1c00] sm:$0xff] }
 0x705   : > { %12754 = vmatprep.subr.bf16.mxu0 %v15101_v28  ;;  %v6846_v28 = vld [vmem:[%s16658_s5 + $0x1ae0] sm:$0xff] }
 0x706   : > { %12427 = vmatpush1.bf16.msra.mxu1 %v15098_v56  ;;  %v15149_v56 = vcombine.high %v6835_v60, %v6839_v48  ;;  %v15154_v58 = vcombine.low %v6842_v4, %v6846_v28  ;;  %v6883_v48 = vld [vmem:[%s16658_s5 + $0x1c08] sm:$0xff] }
 0x707   : > { %12428 = vmatprep.subr.bf16.mxu1 %v15107_v45  ;;  %v6847_v45 = vld [vmem:[%s16658_s5 + $0x1ae8] sm:$0xff] }
 0x708   : > { %12755 = vmatpush1.bf16.msra.mxu0 %v15100_v10  ;;  %v15155_v10 = vcombine.high %v6842_v4, %v6846_v28  ;;  %v15156_v54 = vcombine.low %v6843_v51, %v6847_v45 }
 0x709   : > { %12756 = vmatprep.subr.bf16.mxu0 %v15109_v35  ;;  %v6854_v35 = vld [vmem:[%s16658_s5 + $0x1b20] sm:$0xff] }
 0x70a   : > { %12429 = vmatpush1.bf16.msra.mxu1 %v15106_v34  ;;  %v15157_v34 = vcombine.high %v6843_v51, %v6847_v45  ;;  %v15162_v33 = vcombine.low %v6850_v38, %v6854_v35  ;;  %v6894_v51 = vld [vmem:[%s16658_s5 + $0x1c60] sm:$0xff] }
 0x70b   : > { %12430 = vmatprep.subr.bf16.mxu1 %v15115_v47  ;;  %v6855_v47 = vld [vmem:[%s16658_s5 + $0x1b28] sm:$0xff] }
 0x70c   : > { %12757 = vmatpush1.bf16.msra.mxu0 %v15108_v16  ;;  %v15163_v16 = vcombine.high %v6850_v38, %v6854_v35  ;;  %v15164_v27 = vcombine.low %v6851_v11, %v6855_v47  ;;  %v6895_v38 = vld [vmem:[%s16658_s5 + $0x1c68] sm:$0xff] }
 0x70d   : > { %12758 = vmatprep.subr.bf16.mxu0 %v15117_v17  ;;  %v6862_v17 = vld [vmem:[%s16658_s5 + $0x1b60] sm:$0xff] }
 0x70e   : > { %12431 = vmatpush1.bf16.msra.mxu1 %v15114_v1  ;;  %v15165_v1 = vcombine.high %v6851_v11, %v6855_v47  ;;  %v15170_v43 = vcombine.low %v6858_v23, %v6862_v17  ;;  %v6902_v11 = vld [vmem:[%s16658_s5 + $0x1ca0] sm:$0xff] }
 0x70f   : > { %12432 = vmatprep.subr.bf16.mxu1 %v15123_v57  ;;  %v6863_v57 = vld [vmem:[%s16658_s5 + $0x1b68] sm:$0xff] }
 0x710   : > { %12759 = vmatpush1.bf16.msra.mxu0 %v15116_v6  ;;  %v15171_v6 = vcombine.high %v6858_v23, %v6862_v17  ;;  %v15172_v22 = vcombine.low %v6859_v7, %v6863_v57  ;;  %v6903_v23 = vld [vmem:[%s16658_s5 + $0x1ca8] sm:$0xff] }
 0x711   : > { %12760 = vmatprep.subr.bf16.mxu0 %v15125_v32  ;;  %v6870_v32 = vld [vmem:[%s16658_s5 + $0x1ba0] sm:$0xff] }
 0x712   : > { %12433 = vmatpush1.bf16.msra.mxu1 %v15122_v15  ;;  %v15173_v15 = vcombine.high %v6859_v7, %v6863_v57  ;;  %v15178_v13 = vcombine.low %v6866_v50, %v6870_v32  ;;  %v6910_v7 = vld [vmem:[%s16658_s5 + $0x1ce0] sm:$0xff] }
 0x713   : > { %12434 = vmatprep.subr.bf16.mxu1 %v15131_v0  ;;  %v6871_v0 = vld [vmem:[%s16658_s5 + $0x1ba8] sm:$0xff] }
 0x714   : > { %12761 = vmatpush1.bf16.msra.mxu0 %v15124_v55  ;;  %v15179_v55 = vcombine.high %v6866_v50, %v6870_v32  ;;  %v15180_v44 = vcombine.low %v6867_v59, %v6871_v0  ;;  %v6911_v50 = vld [vmem:[%s16658_s5 + $0x1ce8] sm:$0xff] }
 0x715   : > { %12762 = vmatprep.subr.bf16.mxu0 %v15133_v36  ;;  %v6878_v36 = vld [vmem:[%s16658_s5 + $0x1be0] sm:$0xff] }
 0x716   : > { %12435 = vmatpush1.bf16.msra.mxu1 %v15130_v42  ;;  %v15181_v42 = vcombine.high %v6867_v59, %v6871_v0  ;;  %v15186_v60 = vcombine.low %v6874_v24, %v6878_v36  ;;  %v6918_v59 = vld [vmem:[%s16658_s5 + $0x1d20] sm:$0xff] }
 0x717   : > { %12436 = vmatprep.subr.bf16.mxu1 %v15139_v31  ;;  %v6879_v31 = vld [vmem:[%s16658_s5 + $0x1be8] sm:$0xff] }
 0x718   : > { %12763 = vmatpush1.bf16.msra.mxu0 %v15132_v5  ;;  %v15187_v5 = vcombine.high %v6874_v24, %v6878_v36  ;;  %v15188_v28 = vcombine.low %v6875_v30, %v6879_v31  ;;  %v6919_v24 = vld [vmem:[%s16658_s5 + $0x1d28] sm:$0xff] }
 0x719   : > { %12764 = vmatprep.subr.bf16.mxu0 %v15141_v53  ;;  %v6886_v53 = vld [vmem:[%s16658_s5 + $0x1c20] sm:$0xff] }
 0x71a   : > { %12437 = vmatpush1.bf16.msra.mxu1 %v15138_v9  ;;  %v15189_v9 = vcombine.high %v6875_v30, %v6879_v31  ;;  %v15195_v4 = vcombine.high %v6882_v37, %v6886_v53  ;;  %v6926_v30 = vld [vmem:[%s16658_s5 + $0x1d60] sm:$0xff] }
 0x71b   : > { %12438 = vmatprep.subr.bf16.mxu1 %v15147_v14  ;;  %v6887_v14 = vld [vmem:[%s16658_s5 + $0x1c28] sm:$0xff] }
 0x71c   : > { %12765 = vmatpush1.bf16.msra.mxu0 %v15140_v52  ;;  %v5966_v52 = vmax.f32 %v18071_v12, 0.0  ;;  %v15197_v45 = vcombine.high %v6883_v48, %v6887_v14 }
 0x71d   : > { %12766 = vmatprep.subr.bf16.mxu0 %v15149_v56  ;;  %v5969_v56 = vmax.f32 %v18049_v26, 0.0  ;;  %v6898_v26 = vld [vmem:[%s16658_s5 + $0x1c80] sm:$0xff] }
 0x71e   : > { %12439 = vmatpush1.bf16.msra.mxu1 %v15146_v25  ;;  %v6890_v25 = vld [vmem:[%s16658_s5 + $0x1c40] sm:$0xff]  ;;  %v18264_v35 = vpack.c.bf16 %v5966_v52, %v5966_v52  ;;  %v15211_v17 = vcombine.high %v6898_v26, %v6902_v11 }
 0x71f   : > { %12440 = vmatprep.subr.bf16.mxu1 %v15155_v10  ;;  %v15194_v10 = vcombine.low %v6882_v37, %v6886_v53  ;;  %v15203_v12 = vcombine.high %v6890_v25, %v6894_v51  ;;  %v6927_v37 = vld [vmem:[%s16658_s5 + $0x1d68] sm:$0xff] }
 0x720   : > { %12767 = vmatpush1.bf16.msra.mxu0 %v15148_v18  ;;  %v6891_v18 = vld [vmem:[%s16658_s5 + $0x1c48] sm:$0xff] }
 0x721   : > { %12768 = vmatprep.subr.bf16.mxu0 %v15157_v34  ;;  %v15196_v34 = vcombine.low %v6883_v48, %v6887_v14  ;;  %v15205_v47 = vcombine.high %v6891_v18, %v6895_v38  ;;  %v6934_v48 = vld [vmem:[%s16658_s5 + $0x1da0] sm:$0xff] }
 0x722   : > { %12441 = vmatpush1.bf16.msra.mxu1 %v15154_v58  ;;  %v18266_v58 = vpack.c.bf16 %v5969_v56, %v5969_v56 }
 0x723   : > { %12442 = vmatprep.subr.bf16.mxu1 %v15163_v16  ;;  %v15202_v16 = vcombine.low %v6890_v25, %v6894_v51  ;;  %v6938_v51 = vld [vmem:[%s16658_s5 + $0x1dc0] sm:$0xff] }
 0x724   : > { %12769 = vmatpush1.bf16.msra.mxu0 %v15156_v54  ;;  %v6899_v54 = vld [vmem:[%s16658_s5 + $0x1c88] sm:$0xff] }
 0x725   : > { %12770 = vmatprep.subr.bf16.mxu0 %v15165_v1  ;;  %v15204_v1 = vcombine.low %v6891_v18, %v6895_v38  ;;  %v15213_v57 = vcombine.high %v6899_v54, %v6903_v23  ;;  %v6939_v38 = vld [vmem:[%s16658_s5 + $0x1dc8] sm:$0xff] }
 0x726   : > { %12443 = vmatpush1.bf16.msra.mxu1 %v15162_v33  ;;  %v6906_v33 = vld [vmem:[%s16658_s5 + $0x1cc0] sm:$0xff] }
 0x727   : > { %12444 = vmatprep.subr.bf16.mxu1 %v15171_v6  ;;  %v15210_v6 = vcombine.low %v6898_v26, %v6902_v11  ;;  %v15219_v32 = vcombine.high %v6906_v33, %v6910_v7  ;;  %v6946_v11 = vld [vmem:[%s16658_s5 + $0x1e00] sm:$0xff] }
 0x728   : > { %12771 = vmatpush1.bf16.msra.mxu0 %v15164_v27  ;;  %v6907_v27 = vld [vmem:[%s16658_s5 + $0x1cc8] sm:$0xff] }
 0x729   : > { %12772 = vmatprep.subr.bf16.mxu0 %v15173_v15  ;;  %v15212_v15 = vcombine.low %v6899_v54, %v6903_v23  ;;  %v15221_v0 = vcombine.high %v6907_v27, %v6911_v50  ;;  %v6947_v23 = vld [vmem:[%s16658_s5 + $0x1e08] sm:$0xff] }
 0x72a   : > { %12445 = vmatpush1.bf16.msra.mxu1 %v15170_v43  ;;  %v6914_v43 = vld [vmem:[%s16658_s5 + $0x1d00] sm:$0xff] }
 0x72b   : > { %12446 = vmatprep.subr.bf16.mxu1 %v15179_v55  ;;  %v15218_v55 = vcombine.low %v6906_v33, %v6910_v7  ;;  %v15227_v36 = vcombine.high %v6914_v43, %v6918_v59  ;;  %v6954_v7 = vld [vmem:[%s16658_s5 + $0x1e40] sm:$0xff] }
 0x72c   : > { %12773 = vmatpush1.bf16.msra.mxu0 %v15172_v22  ;;  %v6915_v22 = vld [vmem:[%s16658_s5 + $0x1d08] sm:$0xff] }
 0x72d   : > { %12774 = vmatprep.subr.bf16.mxu0 %v15181_v42  ;;  %v15220_v42 = vcombine.low %v6907_v27, %v6911_v50  ;;  %v15229_v31 = vcombine.high %v6915_v22, %v6919_v24  ;;  %v6955_v50 = vld [vmem:[%s16658_s5 + $0x1e48] sm:$0xff] }
 0x72e   : > { %12447 = vmatpush1.bf16.msra.mxu1 %v15178_v13  ;;  %v6922_v13 = vld [vmem:[%s16658_s5 + $0x1d40] sm:$0xff] }
 0x72f   : > { %12448 = vmatprep.subr.bf16.mxu1 %v15187_v5  ;;  %v15226_v5 = vcombine.low %v6914_v43, %v6918_v59  ;;  %v15235_v53 = vcombine.high %v6922_v13, %v6926_v30  ;;  %v15234_v52 = vcombine.low %v6922_v13, %v6926_v30  ;;  %v6962_v59 = vld [vmem:[%s16658_s5 + $0x1e80] sm:$0xff] }
 0x730   : > { %12775 = vmatpush1.bf16.msra.mxu0 %v15180_v44  ;;  %v6923_v44 = vld [vmem:[%s16658_s5 + $0x1d48] sm:$0xff]  ;;  %v6970_v30 = vld [vmem:[%s16658_s5 + $0x1ec0] sm:$0xff] }
 0x731   : > { %12776 = vmatprep.subr.bf16.mxu0 %v15189_v9  ;;  %v15228_v9 = vcombine.low %v6915_v22, %v6919_v24  ;;  %v15237_v14 = vcombine.high %v6923_v44, %v6927_v37  ;;  %v15236_v25 = vcombine.low %v6923_v44, %v6927_v37  ;;  %v6963_v24 = vld [vmem:[%s16658_s5 + $0x1e88] sm:$0xff] }
 0x732   : > { %12449 = vmatpush1.bf16.msra.mxu1 %v15186_v60  ;;  %v6930_v60 = vld [vmem:[%s16658_s5 + $0x1d80] sm:$0xff]  ;;  %v6971_v37 = vld [vmem:[%s16658_s5 + $0x1ec8] sm:$0xff] }
 0x733   : > { %12459 = vmatprep.subr.bf16.mxu1 %v15195_v4  ;;  %v6931_v4 = vld [vmem:[%s16658_s5 + $0x1d88] sm:$0xff]  ;;  %v15243_v56 = vcombine.high %v6930_v60, %v6934_v48  ;;  %v15242_v18 = vcombine.low %v6930_v60, %v6934_v48  ;;  %v6978_v48 = vld [vmem:[%s16658_s5 + $0x1f00] sm:$0xff] }
 0x734   : > { %12777 = vmatpush1.bf16.msra.mxu0 %v15188_v28  ;;  %v6935_v28 = vld [vmem:[%s16658_s5 + $0x1da8] sm:$0xff] }
 0x735   : > { %12451 = vmatmul.mubr.bf16.vlgmr.msra.gmra.mrb[20].mxu1 %v18264_v35  ;;  %12787 = vmatprep.subr.bf16.mxu0 %v15197_v45  ;;  %v6942_v45 = vld [vmem:[%s16658_s5 + $0x1de0] sm:$0xff]  ;;  %v15244_v26 = vcombine.low %v6931_v4, %v6935_v28 }
 0x736   : > { %12460 = vmatpush1.bf16.msra.mxu1 %v15194_v10  ;;  %12491 = vmatprep.mubr.bf16.mxu1 %v18266_v58  ;;  %v15245_v10 = vcombine.high %v6931_v4, %v6935_v28  ;;  %v15250_v54 = vcombine.low %v6938_v51, %v6942_v45  ;;  %v6979_v28 = vld [vmem:[%s16658_s5 + $0x1f08] sm:$0xff] }
 0x737   : > { %12779 = vmatmul.mubr.bf16.vlgmr.msra.gmra.mrb[24].mxu0 %v18264_v35  ;;  %12461 = vmatprep.subr.bf16.mxu1 %v15203_v12  ;;  %v6943_v12 = vld [vmem:[%s16658_s5 + $0x1de8] sm:$0xff] }
 0x738   : > { %12788 = vmatpush1.bf16.msra.mxu0 %v15196_v34  ;;  %12819 = vmatprep.mubr.bf16.mxu0 %v18266_v58  ;;  %v15251_v34 = vcombine.high %v6938_v51, %v6942_v45  ;;  %v15252_v33 = vcombine.low %v6939_v38, %v6943_v12  ;;  %v6986_v45 = vld [vmem:[%s16658_s5 + $0x1f40] sm:$0xff] }
 0x739   : > { %12789 = vmatprep.subr.bf16.mxu0 %v15205_v47  ;;  %v6950_v47 = vld [vmem:[%s16658_s5 + $0x1e20] sm:$0xff] }
 0x73a   : > { %12462 = vmatpush1.bf16.msra.mxu1 %v15202_v16  ;;  %v15253_v16 = vcombine.high %v6939_v38, %v6943_v12  ;;  %v15258_v27 = vcombine.low %v6946_v11, %v6950_v47  ;;  %v6987_v12 = vld [vmem:[%s16658_s5 + $0x1f48] sm:$0xff] }
 0x73b   : > { %12463 = vmatprep.subr.bf16.mxu1 %v15211_v17  ;;  %v6951_v17 = vld [vmem:[%s16658_s5 + $0x1e28] sm:$0xff] }
 0x73c   : > { %12790 = vmatpush1.bf16.msra.mxu0 %v15204_v1  ;;  %v15259_v1 = vcombine.high %v6946_v11, %v6950_v47  ;;  %v15260_v43 = vcombine.low %v6947_v23, %v6951_v17  ;;  %v6994_v47 = vld [vmem:[%s16658_s5 + $0x1f80] sm:$0xff] }
 0x73d   : > { %12791 = vmatprep.subr.bf16.mxu0 %v15213_v57  ;;  %v6958_v57 = vld [vmem:[%s16658_s5 + $0x1e60] sm:$0xff] }
 0x73e   : > { %12464 = vmatpush1.bf16.msra.mxu1 %v15210_v6  ;;  %v15261_v6 = vcombine.high %v6947_v23, %v6951_v17  ;;  %v15266_v22 = vcombine.low %v6954_v7, %v6958_v57  ;;  %v6995_v17 = vld [vmem:[%s16658_s5 + $0x1f88] sm:$0xff] }
 0x73f   : > { %12465 = vmatprep.subr.bf16.mxu1 %v15219_v32  ;;  %v6959_v32 = vld [vmem:[%s16658_s5 + $0x1e68] sm:$0xff] }
 0x740   : > { %12792 = vmatpush1.bf16.msra.mxu0 %v15212_v15  ;;  %v15267_v15 = vcombine.high %v6954_v7, %v6958_v57  ;;  %v15268_v13 = vcombine.low %v6955_v50, %v6959_v32  ;;  %v7002_v57 = vld [vmem:[%s16658_s5 + $0x1fc0] sm:$0xff] }
 0x741   : > { %12793 = vmatprep.subr.bf16.mxu0 %v15221_v0  ;;  %v6966_v0 = vld [vmem:[%s16658_s5 + $0x1ea0] sm:$0xff] }
 0x742   : > { %12466 = vmatpush1.bf16.msra.mxu1 %v15218_v55  ;;  %v15269_v55 = vcombine.high %v6955_v50, %v6959_v32  ;;  %v15274_v44 = vcombine.low %v6962_v59, %v6966_v0  ;;  %v7003_v32 = vld [vmem:[%s16658_s5 + $0x1fc8] sm:$0xff] }
 0x743   : > { %12467 = vmatprep.subr.bf16.mxu1 %v15227_v36  ;;  %v6967_v36 = vld [vmem:[%s16658_s5 + $0x1ea8] sm:$0xff] }
 0x744   : > { %12794 = vmatpush1.bf16.msra.mxu0 %v15220_v42  ;;  %v15275_v42 = vcombine.high %v6962_v59, %v6966_v0  ;;  %v15276_v60 = vcombine.low %v6963_v24, %v6967_v36  ;;  %v5988_v0 = vld [vmem:[%s16658_s5 + $0x10] sm:$0xff] }
 0x745   : > { %12795 = vmatprep.subr.bf16.mxu0 %v15229_v31  ;;  %v6974_v31 = vld [vmem:[%s16658_s5 + $0x1ee0] sm:$0xff] }
 0x746   : > { %12468 = vmatpush1.bf16.msra.mxu1 %v15226_v5  ;;  %v15277_v5 = vcombine.high %v6963_v24, %v6967_v36  ;;  %v15282_v4 = vcombine.low %v6970_v30, %v6974_v31  ;;  %v5989_v36 = vld [vmem:[%s16658_s5 + $0x18] sm:$0xff] }
 0x747   : > { %12469 = vmatprep.subr.bf16.mxu1 %v15235_v53  ;;  %v6975_v53 = vld [vmem:[%s16658_s5 + $0x1ee8] sm:$0xff] }
 0x748   : > { %12796 = vmatpush1.bf16.msra.mxu0 %v15228_v9  ;;  %v15283_v9 = vcombine.high %v6970_v30, %v6974_v31  ;;  %v15284_v51 = vcombine.low %v6971_v37, %v6975_v53 }
 0x749   : > { %12797 = vmatprep.subr.bf16.mxu0 %v15237_v14  ;;  %v6982_v14 = vld [vmem:[%s16658_s5 + $0x1f20] sm:$0xff] }
 0x74a   : > { %12470 = vmatpush1.bf16.msra.mxu1 %v15234_v52  ;;  %v15285_v52 = vcombine.high %v6971_v37, %v6975_v53  ;;  %v15290_v38 = vcombine.low %v6978_v48, %v6982_v14 }
 0x74b   : > { %12471 = vmatprep.subr.bf16.mxu1 %v15243_v56  ;;  %v6983_v56 = vld [vmem:[%s16658_s5 + $0x1f28] sm:$0xff] }
 0x74c   : > { %12798 = vmatpush1.bf16.msra.mxu0 %v15236_v25  ;;  %v15291_v25 = vcombine.high %v6978_v48, %v6982_v14  ;;  %v15292_v11 = vcombine.low %v6979_v28, %v6983_v56 }
 0x74d   : > { %12799 = vmatprep.subr.bf16.mxu0 %v15245_v10  ;;  %v6990_v10 = vld [vmem:[%s16658_s5 + $0x1f60] sm:$0xff] }
 0x74e   : > { %12472 = vmatpush1.bf16.msra.mxu1 %v15242_v18  ;;  %v15293_v18 = vcombine.high %v6979_v28, %v6983_v56  ;;  %v15298_v23 = vcombine.low %v6986_v45, %v6990_v10  ;;  %v19107_v56 = vld [vmem:[#allocation30_spill] sm:$0xff] }
 0x74f   : > { %12473 = vmatprep.subr.bf16.mxu1 %v15251_v34  ;;  %v6991_v34 = vld [vmem:[%s16658_s5 + $0x1f68] sm:$0xff] }
 0x750   : > { %12800 = vmatpush1.bf16.msra.mxu0 %v15244_v26  ;;  %v15299_v26 = vcombine.high %v6986_v45, %v6990_v10  ;;  %v15300_v7 = vcombine.low %v6987_v12, %v6991_v34  ;;  %v6009_v45 = vld [vmem:[%s16658_s5 + $0xb8] sm:$0xff] }
 0x751   : > { %12801 = vmatprep.subr.bf16.mxu0 %v15253_v16  ;;  %v6998_v16 = vld [vmem:[%s16658_s5 + $0x1fa0] sm:$0xff] }
 0x752   : > { %12474 = vmatpush1.bf16.msra.mxu1 %v15250_v54  ;;  %v15301_v54 = vcombine.high %v6987_v12, %v6991_v34  ;;  %v15306_v50 = vcombine.low %v6994_v47, %v6998_v16  ;;  %v6016_v12 = vld [vmem:[%s16658_s5 + $0xf0] sm:$0xff] }
 0x753   : > { %12475 = vmatprep.subr.bf16.mxu1 %v15259_v1  ;;  %v6999_v1 = vld [vmem:[%s16658_s5 + $0x1fa8] sm:$0xff] }
 0x754   : > { %12802 = vmatpush1.bf16.msra.mxu0 %v15252_v33  ;;  %v15307_v33 = vcombine.high %v6994_v47, %v6998_v16  ;;  %v15308_v59 = vcombine.low %v6995_v17, %v6999_v1  ;;  %v6017_v47 = vld [vmem:[%s16658_s5 + $0xf8] sm:$0xff] }
 0x755   : > { %12803 = vmatprep.subr.bf16.mxu0 %v15261_v6  ;;  %v7006_v6 = vld [vmem:[%s16658_s5 + $0x1fe0] sm:$0xff] }
 0x756   : > { %12476 = vmatpush1.bf16.msra.mxu1 %v15258_v27  ;;  %v15309_v27 = vcombine.high %v6995_v17, %v6999_v1  ;;  %v15314_v24 = vcombine.low %v7002_v57, %v7006_v6  ;;  %v6024_v17 = vld [vmem:[%s16658_s5 + $0x130] sm:$0xff] }
 0x757   : > { %12477 = vmatprep.subr.bf16.mxu1 %v15267_v15  ;;  %v7007_v15 = vld [vmem:[%s16658_s5 + $0x1fe8] sm:$0xff] }
 0x758   : > { %12804 = vmatpush1.bf16.msra.mxu0 %v15260_v43  ;;  %v15315_v43 = vcombine.high %v7002_v57, %v7006_v6  ;;  %v15316_v31 = vcombine.low %v7003_v32, %v7007_v15  ;;  %v6025_v57 = vld [vmem:[%s16658_s5 + $0x138] sm:$0xff] }
 0x759   : > { %12805 = vmatprep.subr.bf16.mxu0 %v15269_v55  ;;  %v5992_v55 = vld [vmem:[%s16658_s5 + $0x30] sm:$0xff] }
 0x75a   : > { %12478 = vmatpush1.bf16.msra.mxu1 %v15266_v22  ;;  %v15317_v22 = vcombine.high %v7003_v32, %v7007_v15  ;;  %v14303_v30 = vcombine.high %v5988_v0, %v5992_v55  ;;  %v14302_v53 = vcombine.low %v5988_v0, %v5992_v55  ;;  %v6032_v32 = vld [vmem:[%s16658_s5 + $0x170] sm:$0xff]  ;;  %v6033_v0 = vld [vmem:[%s16658_s5 + $0x178] sm:$0xff] }
 0x75b   : > { %12479 = vmatprep.subr.bf16.mxu1 %v15275_v42  ;;  %v5993_v42 = vld [vmem:[%s16658_s5 + $0x38] sm:$0xff] }
 0x75c   : > { %12806 = vmatpush1.bf16.msra.mxu0 %v15268_v13  ;;  %v5968_v13 = vmax.f32 %v18080_v41, 0.0  ;;  %v14305_v37 = vcombine.high %v5989_v36, %v5993_v42  ;;  %v14304_v41 = vcombine.low %v5989_v36, %v5993_v42  ;;  %v6040_v36 = vld [vmem:[%s16658_s5 + $0x1b0] sm:$0xff] }
 0x75d   : > { %12807 = vmatprep.subr.bf16.mxu0 %v15277_v5  ;;  %v5996_v5 = vld [vmem:[%s16658_s5 + $0x50] sm:$0xff] }
 0x75e   : > { %12480 = vmatpush1.bf16.msra.mxu1 %v15274_v44  ;;  %v6000_v44 = vld [vmem:[%s16658_s5 + $0x70] sm:$0xff]  ;;  %v18337_v48 = vpack.c.bf16 %v5968_v13, %v5968_v13 }
 0x75f   : > { %12481 = vmatprep.subr.bf16.mxu1 %v15283_v9  ;;  %v5997_v9 = vld [vmem:[%s16658_s5 + $0x58] sm:$0xff]  ;;  %v14311_v14 = vcombine.high %v5996_v5, %v6000_v44 }
 0x760   : > { %12808 = vmatpush1.bf16.msra.mxu0 %v15276_v60  ;;  %v6001_v60 = vld [vmem:[%s16658_s5 + $0x78] sm:$0xff] }
 0x761   : > { %12809 = vmatprep.subr.bf16.mxu0 %v15285_v52  ;;  %v6004_v52 = vld [vmem:[%s16658_s5 + $0x90] sm:$0xff]  ;;  %v14313_v28 = vcombine.high %v5997_v9, %v6001_v60 }
 0x762   : > { %12482 = vmatpush1.bf16.msra.mxu1 %v15282_v4  ;;  %v6008_v4 = vld [vmem:[%s16658_s5 + $0xb0] sm:$0xff] }
 0x763   : > { %12483 = vmatprep.subr.bf16.mxu1 %v15291_v25  ;;  %v14310_v25 = vcombine.low %v5996_v5, %v6000_v44  ;;  %v14319_v10 = vcombine.high %v6004_v52, %v6008_v4 }
 0x764   : > { %12810 = vmatpush1.bf16.msra.mxu0 %v15284_v51  ;;  %v6005_v51 = vld [vmem:[%s16658_s5 + $0x98] sm:$0xff] }
 0x765   : > { %12811 = vmatprep.subr.bf16.mxu0 %v15293_v18  ;;  %v14312_v18 = vcombine.low %v5997_v9, %v6001_v60  ;;  %v14321_v34 = vcombine.high %v6005_v51, %v6009_v45 }
 0x766   : > { %12484 = vmatpush1.bf16.msra.mxu1 %v15290_v38  ;;  %v6012_v38 = vld [vmem:[%s16658_s5 + $0xd0] sm:$0xff] }
 0x767   : > { %12485 = vmatprep.subr.bf16.mxu1 %v15299_v26  ;;  %v14318_v26 = vcombine.low %v6004_v52, %v6008_v4  ;;  %v14327_v16 = vcombine.high %v6012_v38, %v6016_v12 }
 0x768   : > { %12812 = vmatpush1.bf16.msra.mxu0 %v15292_v11  ;;  %v6013_v11 = vld [vmem:[%s16658_s5 + $0xd8] sm:$0xff] }
 0x769   : > { %12813 = vmatprep.subr.bf16.mxu0 %v15301_v54  ;;  %v14320_v54 = vcombine.low %v6005_v51, %v6009_v45  ;;  %v14329_v1 = vcombine.high %v6013_v11, %v6017_v47  ;;  %v6053_v45 = vld [vmem:[%s16658_s5 + $0x218] sm:$0xff] }
 0x76a   : > { %12486 = vmatpush1.bf16.msra.mxu1 %v15298_v23  ;;  %v6020_v23 = vld [vmem:[%s16658_s5 + $0x110] sm:$0xff] }
 0x76b   : > { %12487 = vmatprep.subr.bf16.mxu1 %v15307_v33  ;;  %v14326_v33 = vcombine.low %v6012_v38, %v6016_v12  ;;  %v14335_v6 = vcombine.high %v6020_v23, %v6024_v17  ;;  %v6060_v12 = vld [vmem:[%s16658_s5 + $0x250] sm:$0xff] }
 0x76c   : > { %12814 = vmatpush1.bf16.msra.mxu0 %v15300_v7  ;;  %v6021_v7 = vld [vmem:[%s16658_s5 + $0x118] sm:$0xff] }
 0x76d   : > { %12815 = vmatprep.subr.bf16.mxu0 %v15309_v27  ;;  %v14328_v27 = vcombine.low %v6013_v11, %v6017_v47  ;;  %v14337_v15 = vcombine.high %v6021_v7, %v6025_v57  ;;  %v6061_v47 = vld [vmem:[%s16658_s5 + $0x258] sm:$0xff] }
 0x76e   : > { %12488 = vmatpush1.bf16.msra.mxu1 %v15306_v50  ;;  %v6028_v50 = vld [vmem:[%s16658_s5 + $0x150] sm:$0xff] }
 0x76f   : > { %12489 = vmatprep.subr.bf16.mxu1 %v15315_v43  ;;  %v14334_v43 = vcombine.low %v6020_v23, %v6024_v17  ;;  %v14343_v55 = vcombine.high %v6028_v50, %v6032_v32  ;;  %v14342_v13 = vcombine.low %v6028_v50, %v6032_v32  ;;  %v6068_v17 = vld [vmem:[%s16658_s5 + $0x290] sm:$0xff] }
 0x770   : > { %12816 = vmatpush1.bf16.msra.mxu0 %v15308_v59  ;;  %v6029_v59 = vld [vmem:[%s16658_s5 + $0x158] sm:$0xff]  ;;  %v6076_v32 = vld [vmem:[%s16658_s5 + $0x2d0] sm:$0xff] }
 0x771   : > { %12817 = vmatprep.subr.bf16.mxu0 %v15317_v22  ;;  %v14336_v22 = vcombine.low %v6021_v7, %v6025_v57  ;;  %v14345_v42 = vcombine.high %v6029_v59, %v6033_v0  ;;  %v14344_v44 = vcombine.low %v6029_v59, %v6033_v0  ;;  %v6069_v57 = vld [vmem:[%s16658_s5 + $0x298] sm:$0xff] }
 0x772   : > { %12490 = vmatpush1.bf16.msra.mxu1 %v15314_v24  ;;  %v6036_v24 = vld [vmem:[%s16658_s5 + $0x190] sm:$0xff]  ;;  %v6077_v0 = vld [vmem:[%s16658_s5 + $0x2d8] sm:$0xff] }
 0x773   : > { %12828 = vmatprep.subr.bf16.mxu1 %v14303_v30  ;;  %v6037_v30 = vld [vmem:[%s16658_s5 + $0x198] sm:$0xff]  ;;  %v14351_v5 = vcombine.high %v6036_v24, %v6040_v36  ;;  %v14350_v60 = vcombine.low %v6036_v24, %v6040_v36  ;;  %v6084_v36 = vld [vmem:[%s16658_s5 + $0x310] sm:$0xff] }
 0x774   : > { %12818 = vmatpush1.bf16.msra.mxu0 %v15316_v31  ;;  %v6041_v31 = vld [vmem:[%s16658_s5 + $0x1b8] sm:$0xff] }
 0x775   : > { %12492 = vmatmul.mubr.bf16.vlgmr.msra.gmra.mrb[20].mxu1 %v18337_v48  ;;  %13156 = vmatprep.subr.bf16.mxu0 %v14305_v37  ;;  %v6044_v37 = vld [vmem:[%s16658_s5 + $0x1d0] sm:$0xff]  ;;  %v14353_v9 = vcombine.high %v6037_v30, %v6041_v31  ;;  %v14352_v4 = vcombine.low %v6037_v30, %v6041_v31  ;;  %v6085_v31 = vld [vmem:[%s16658_s5 + $0x318] sm:$0xff] }
 0x776   : > { %12829 = vmatpush1.bf16.msra.mxu1 %v14302_v53  ;;  %12860 = vmatprep.mubr.bf16.mxu1 %v19107_v56  ;;  %v6048_v53 = vld [vmem:[%s16658_s5 + $0x1f0] sm:$0xff] }
 0x777   : > { %12820 = vmatmul.mubr.bf16.vlgmr.msra.gmra.mrb[24].mxu0 %v18337_v48  ;;  %12830 = vmatprep.subr.bf16.mxu1 %v14311_v14  ;;  %v6045_v14 = vld [vmem:[%s16658_s5 + $0x1d8] sm:$0xff]  ;;  %v14359_v52 = vcombine.high %v6044_v37, %v6048_v53  ;;  %v14358_v51 = vcombine.low %v6044_v37, %v6048_v53  ;;  %v6092_v53 = vld [vmem:[%s16658_s5 + $0x350] sm:$0xff] }
 0x778   : > { %13157 = vmatpush1.bf16.msra.mxu0 %v14304_v41  ;;  %13188 = vmatprep.mubr.bf16.mxu0 %v19107_v56  ;;  %v6049_v41 = vld [vmem:[%s16658_s5 + $0x1f8] sm:$0xff]  ;;  %v6056_v56 = vld [vmem:[%s16658_s5 + $0x230] sm:$0xff] }
 0x779   : > { %13158 = vmatprep.subr.bf16.mxu0 %v14313_v28  ;;  %v6052_v28 = vld [vmem:[%s16658_s5 + $0x210] sm:$0xff]  ;;  %v14360_v38 = vcombine.low %v6045_v14, %v6049_v41 }
 0x77a   : > { %12831 = vmatpush1.bf16.msra.mxu1 %v14310_v25  ;;  %v14361_v25 = vcombine.high %v6045_v14, %v6049_v41  ;;  %v14366_v11 = vcombine.low %v6052_v28, %v6056_v56  ;;  %v6093_v41 = vld [vmem:[%s16658_s5 + $0x358] sm:$0xff] }
 0x77b   : > { %12832 = vmatprep.subr.bf16.mxu1 %v14319_v10  ;;  %v6057_v10 = vld [vmem:[%s16658_s5 + $0x238] sm:$0xff] }
 0x77c   : > { %13159 = vmatpush1.bf16.msra.mxu0 %v14312_v18  ;;  %v14367_v18 = vcombine.high %v6052_v28, %v6056_v56  ;;  %v14368_v23 = vcombine.low %v6053_v45, %v6057_v10  ;;  %v6100_v56 = vld [vmem:[%s16658_s5 + $0x390] sm:$0xff] }
 0x77d   : > { %13160 = vmatprep.subr.bf16.mxu0 %v14321_v34  ;;  %v6064_v34 = vld [vmem:[%s16658_s5 + $0x270] sm:$0xff] }
 0x77e   : > { %12833 = vmatpush1.bf16.msra.mxu1 %v14318_v26  ;;  %v14369_v26 = vcombine.high %v6053_v45, %v6057_v10  ;;  %v14374_v7 = vcombine.low %v6060_v12, %v6064_v34  ;;  %v6101_v10 = vld [vmem:[%s16658_s5 + $0x398] sm:$0xff] }
 0x77f   : > { %12834 = vmatprep.subr.bf16.mxu1 %v14327_v16  ;;  %v6065_v16 = vld [vmem:[%s16658_s5 + $0x278] sm:$0xff] }
 0x780   : > { %13161 = vmatpush1.bf16.msra.mxu0 %v14320_v54  ;;  %v14375_v54 = vcombine.high %v6060_v12, %v6064_v34  ;;  %v14376_v50 = vcombine.low %v6061_v47, %v6065_v16  ;;  %v6108_v34 = vld [vmem:[%s16658_s5 + $0x3d0] sm:$0xff] }
 0x781   : > { %13162 = vmatprep.subr.bf16.mxu0 %v14329_v1  ;;  %v6072_v1 = vld [vmem:[%s16658_s5 + $0x2b0] sm:$0xff] }
 0x782   : > { %12835 = vmatpush1.bf16.msra.mxu1 %v14326_v33  ;;  %v14377_v33 = vcombine.high %v6061_v47, %v6065_v16  ;;  %v14382_v59 = vcombine.low %v6068_v17, %v6072_v1  ;;  %v6109_v16 = vld [vmem:[%s16658_s5 + $0x3d8] sm:$0xff] }
 0x783   : > { %12836 = vmatprep.subr.bf16.mxu1 %v14335_v6  ;;  %v6073_v6 = vld [vmem:[%s16658_s5 + $0x2b8] sm:$0xff] }
 0x784   : > { %13163 = vmatpush1.bf16.msra.mxu0 %v14328_v27  ;;  %v14383_v27 = vcombine.high %v6068_v17, %v6072_v1  ;;  %v14384_v24 = vcombine.low %v6069_v57, %v6073_v6  ;;  %v6116_v1 = vld [vmem:[%s16658_s5 + $0x410] sm:$0xff] }
 0x785   : > { %13164 = vmatprep.subr.bf16.mxu0 %v14337_v15  ;;  %v6080_v15 = vld [vmem:[%s16658_s5 + $0x2f0] sm:$0xff] }
 0x786   : > { %12837 = vmatpush1.bf16.msra.mxu1 %v14334_v43  ;;  %v14385_v43 = vcombine.high %v6069_v57, %v6073_v6  ;;  %v14390_v30 = vcombine.low %v6076_v32, %v6080_v15  ;;  %v6117_v6 = vld [vmem:[%s16658_s5 + $0x418] sm:$0xff] }
 0x787   : > { %12838 = vmatprep.subr.bf16.mxu1 %v14343_v55  ;;  %v6081_v55 = vld [vmem:[%s16658_s5 + $0x2f8] sm:$0xff] }
 0x788   : > { %13165 = vmatpush1.bf16.msra.mxu0 %v14336_v22  ;;  %v14391_v22 = vcombine.high %v6076_v32, %v6080_v15  ;;  %v14392_v37 = vcombine.low %v6077_v0, %v6081_v55  ;;  %v6124_v15 = vld [vmem:[%s16658_s5 + $0x450] sm:$0xff] }
 0x789   : > { %13166 = vmatprep.subr.bf16.mxu0 %v14345_v42  ;;  %v6088_v42 = vld [vmem:[%s16658_s5 + $0x330] sm:$0xff] }
 0x78a   : > { %12839 = vmatpush1.bf16.msra.mxu1 %v14342_v13  ;;  %v14393_v13 = vcombine.high %v6077_v0, %v6081_v55  ;;  %v14398_v14 = vcombine.low %v6084_v36, %v6088_v42  ;;  %v6125_v55 = vld [vmem:[%s16658_s5 + $0x458] sm:$0xff] }
 0x78b   : > { %12840 = vmatprep.subr.bf16.mxu1 %v14351_v5  ;;  %v6089_v5 = vld [vmem:[%s16658_s5 + $0x338] sm:$0xff] }
 0x78c   : > { %13167 = vmatpush1.bf16.msra.mxu0 %v14344_v44  ;;  %v14399_v44 = vcombine.high %v6084_v36, %v6088_v42  ;;  %v14400_v28 = vcombine.low %v6085_v31, %v6089_v5  ;;  %v6132_v42 = vld [vmem:[%s16658_s5 + $0x490] sm:$0xff] }
 0x78d   : > { %13168 = vmatprep.subr.bf16.mxu0 %v14353_v9  ;;  %v6096_v9 = vld [vmem:[%s16658_s5 + $0x370] sm:$0xff] }
 0x78e   : > { %12841 = vmatpush1.bf16.msra.mxu1 %v14350_v60  ;;  %v14401_v60 = vcombine.high %v6085_v31, %v6089_v5  ;;  %v14406_v45 = vcombine.low %v6092_v53, %v6096_v9  ;;  %v19109_v5 = vld [vmem:[#allocation31_spill] sm:$0xff] }
 0x78f   : > { %12842 = vmatprep.subr.bf16.mxu1 %v14359_v52  ;;  %v6097_v52 = vld [vmem:[%s16658_s5 + $0x378] sm:$0xff] }
 0x790   : > { %13169 = vmatpush1.bf16.msra.mxu0 %v14352_v4  ;;  %v14407_v4 = vcombine.high %v6092_v53, %v6096_v9  ;;  %v14408_v12 = vcombine.low %v6093_v41, %v6097_v52  ;;  %v6137_v53 = vld [vmem:[%s16658_s5 + $0x4b8] sm:$0xff] }
 0x791   : > { %13170 = vmatprep.subr.bf16.mxu0 %v14361_v25  ;;  %v6104_v25 = vld [vmem:[%s16658_s5 + $0x3b0] sm:$0xff] }
 0x792   : > { %12843 = vmatpush1.bf16.msra.mxu1 %v14358_v51  ;;  %v14409_v51 = vcombine.high %v6093_v41, %v6097_v52  ;;  %v14414_v47 = vcombine.low %v6100_v56, %v6104_v25  ;;  %v6144_v41 = vld [vmem:[%s16658_s5 + $0x4f0] sm:$0xff] }
 0x793   : > { %12844 = vmatprep.subr.bf16.mxu1 %v14367_v18  ;;  %v6105_v18 = vld [vmem:[%s16658_s5 + $0x3b8] sm:$0xff] }
 0x794   : > { %13171 = vmatpush1.bf16.msra.mxu0 %v14360_v38  ;;  %v14415_v38 = vcombine.high %v6100_v56, %v6104_v25  ;;  %v14416_v17 = vcombine.low %v6101_v10, %v6105_v18  ;;  %v6145_v56 = vld [vmem:[%s16658_s5 + $0x4f8] sm:$0xff] }
 0x795   : > { %13172 = vmatprep.subr.bf16.mxu0 %v14369_v26  ;;  %v6112_v26 = vld [vmem:[%s16658_s5 + $0x3f0] sm:$0xff] }
 0x796   : > { %12845 = vmatpush1.bf16.msra.mxu1 %v14366_v11  ;;  %v14417_v11 = vcombine.high %v6101_v10, %v6105_v18  ;;  %v14422_v57 = vcombine.low %v6108_v34, %v6112_v26  ;;  %v6152_v10 = vld [vmem:[%s16658_s5 + $0x530] sm:$0xff] }
 0x797   : > { %12846 = vmatprep.subr.bf16.mxu1 %v14375_v54  ;;  %v6113_v54 = vld [vmem:[%s16658_s5 + $0x3f8] sm:$0xff] }
 0x798   : > { %13173 = vmatpush1.bf16.msra.mxu0 %v14368_v23  ;;  %v14423_v23 = vcombine.high %v6108_v34, %v6112_v26  ;;  %v14424_v32 = vcombine.low %v6109_v16, %v6113_v54  ;;  %v6153_v34 = vld [vmem:[%s16658_s5 + $0x538] sm:$0xff] }
 0x799   : > { %13174 = vmatprep.subr.bf16.mxu0 %v14377_v33  ;;  %v6120_v33 = vld [vmem:[%s16658_s5 + $0x430] sm:$0xff] }
 0x79a   : > { %12847 = vmatpush1.bf16.msra.mxu1 %v14374_v7  ;;  %v14425_v7 = vcombine.high %v6109_v16, %v6113_v54  ;;  %v14430_v0 = vcombine.low %v6116_v1, %v6120_v33  ;;  %v6160_v16 = vld [vmem:[%s16658_s5 + $0x570] sm:$0xff] }
 0x79b   : > { %12848 = vmatprep.subr.bf16.mxu1 %v14383_v27  ;;  %v6121_v27 = vld [vmem:[%s16658_s5 + $0x438] sm:$0xff] }
 0x79c   : > { %13175 = vmatpush1.bf16.msra.mxu0 %v14376_v50  ;;  %v14431_v50 = vcombine.high %v6116_v1, %v6120_v33  ;;  %v14432_v36 = vcombine.low %v6117_v6, %v6121_v27  ;;  %v6161_v1 = vld [vmem:[%s16658_s5 + $0x578] sm:$0xff] }
 0x79d   : > { %13176 = vmatprep.subr.bf16.mxu0 %v14385_v43  ;;  %v6128_v43 = vld [vmem:[%s16658_s5 + $0x470] sm:$0xff] }
 0x79e   : > { %12849 = vmatpush1.bf16.msra.mxu1 %v14382_v59  ;;  %v14433_v59 = vcombine.high %v6117_v6, %v6121_v27  ;;  %v6168_v6 = vld [vmem:[%s16658_s5 + $0x5b0] sm:$0xff] }
 0x79f   : > { %12850 = vmatprep.subr.bf16.mxu1 %v14391_v22  ;;  %v6129_v22 = vld [vmem:[%s16658_s5 + $0x478] sm:$0xff] }
 0x7a0   : > { %13177 = vmatpush1.bf16.msra.mxu0 %v14384_v24  ;;  %v14439_v24 = vcombine.high %v6124_v15, %v6128_v43  ;;  %v14441_v31 = vcombine.high %v6125_v55, %v6129_v22 }
 0x7a1   : > { %13178 = vmatprep.subr.bf16.mxu0 %v14393_v13  ;;  %v6136_v13 = vld [vmem:[%s16658_s5 + $0x4b0] sm:$0xff] }
 0x7a2   : > { %12851 = vmatpush1.bf16.msra.mxu1 %v14390_v30  ;;  %v19108_v30 = vld [vmem:[#allocation28_spill] sm:$0xff]  ;;  %v14447_v9 = vcombine.high %v6132_v42, %v6136_v13 }
 0x7a3   : > { %12852 = vmatprep.subr.bf16.mxu1 %v14399_v44  ;;  %v14438_v44 = vcombine.low %v6124_v15, %v6128_v43  ;;  %v6169_v15 = vld [vmem:[%s16658_s5 + $0x5b8] sm:$0xff] }
 0x7a4   : > { %13179 = vmatpush1.bf16.msra.mxu0 %v14392_v37  ;;  %v6133_v37 = vld [vmem:[%s16658_s5 + $0x498] sm:$0xff] }
 0x7a5   : > { %13180 = vmatprep.subr.bf16.mxu0 %v14401_v60  ;;  %v14440_v60 = vcombine.low %v6125_v55, %v6129_v22  ;;  %v14449_v52 = vcombine.high %v6133_v37, %v6137_v53  ;;  %v6176_v55 = vld [vmem:[%s16658_s5 + $0x5f0] sm:$0xff] }
 0x7a6   : > { %12853 = vmatpush1.bf16.msra.mxu1 %v14398_v14  ;;  %v6140_v14 = vld [vmem:[%s16658_s5 + $0x4d0] sm:$0xff] }
 0x7a7   : > { %12854 = vmatprep.subr.bf16.mxu1 %v14407_v4  ;;  %v14446_v4 = vcombine.low %v6132_v42, %v6136_v13  ;;  %v14455_v25 = vcombine.high %v6140_v14, %v6144_v41  ;;  %v6177_v42 = vld [vmem:[%s16658_s5 + $0x5f8] sm:$0xff] }
 0x7a8   : > { %13181 = vmatpush1.bf16.msra.mxu0 %v14400_v28  ;;  %v6141_v28 = vld [vmem:[%s16658_s5 + $0x4d8] sm:$0xff] }
 0x7a9   : > { %13182 = vmatprep.subr.bf16.mxu0 %v14409_v51  ;;  %v14448_v51 = vcombine.low %v6133_v37, %v6137_v53  ;;  %v14457_v18 = vcombine.high %v6141_v28, %v6145_v56  ;;  %v6181_v53 = vld [vmem:[%s16658_s5 + $0x618] sm:$0xff] }
 0x7aa   : > { %12855 = vmatpush1.bf16.msra.mxu1 %v14406_v45  ;;  %v6148_v45 = vld [vmem:[%s16658_s5 + $0x510] sm:$0xff] }
 0x7ab   : > { %12856 = vmatprep.subr.bf16.mxu1 %v14415_v38  ;;  %v14454_v38 = vcombine.low %v6140_v14, %v6144_v41  ;;  %v14463_v26 = vcombine.high %v6148_v45, %v6152_v10  ;;  %v6188_v41 = vld [vmem:[%s16658_s5 + $0x650] sm:$0xff] }
 0x7ac   : > { %13183 = vmatpush1.bf16.msra.mxu0 %v14408_v12  ;;  %v6149_v12 = vld [vmem:[%s16658_s5 + $0x518] sm:$0xff] }
 0x7ad   : > { %13184 = vmatprep.subr.bf16.mxu0 %v14417_v11  ;;  %v14456_v11 = vcombine.low %v6141_v28, %v6145_v56  ;;  %v14465_v54 = vcombine.high %v6149_v12, %v6153_v34  ;;  %v6189_v56 = vld [vmem:[%s16658_s5 + $0x658] sm:$0xff] }
 0x7ae   : > { %12857 = vmatpush1.bf16.msra.mxu1 %v14414_v47  ;;  %v6156_v47 = vld [vmem:[%s16658_s5 + $0x550] sm:$0xff] }
 0x7af   : > { %12858 = vmatprep.subr.bf16.mxu1 %v14423_v23  ;;  %v14462_v23 = vcombine.low %v6148_v45, %v6152_v10  ;;  %v14471_v33 = vcombine.high %v6156_v47, %v6160_v16  ;;  %v6196_v10 = vld [vmem:[%s16658_s5 + $0x690] sm:$0xff] }
 0x7b0   : > { %13185 = vmatpush1.bf16.msra.mxu0 %v14416_v17  ;;  %v6157_v17 = vld [vmem:[%s16658_s5 + $0x558] sm:$0xff] }
 0x7b1   : > { %13186 = vmatprep.subr.bf16.mxu0 %v14425_v7  ;;  %v14464_v7 = vcombine.low %v6149_v12, %v6153_v34  ;;  %v14473_v27 = vcombine.high %v6157_v17, %v6161_v1  ;;  %v6197_v34 = vld [vmem:[%s16658_s5 + $0x698] sm:$0xff] }
 0x7b2   : > { %12859 = vmatpush1.bf16.msra.mxu1 %v14422_v57  ;;  %v6164_v57 = vld [vmem:[%s16658_s5 + $0x590] sm:$0xff] }
 0x7b3   : > { %12869 = vmatprep.subr.bf16.mxu1 %v14431_v50  ;;  %v14470_v50 = vcombine.low %v6156_v47, %v6160_v16  ;;  %v14479_v43 = vcombine.high %v6164_v57, %v6168_v6  ;;  %v6204_v16 = vld [vmem:[%s16658_s5 + $0x6d0] sm:$0xff] }
 0x7b4   : > { %13187 = vmatpush1.bf16.msra.mxu0 %v14424_v32  ;;  %v6165_v32 = vld [vmem:[%s16658_s5 + $0x598] sm:$0xff] }
 0x7b5   : > { %12861 = vmatmul.mubr.bf16.vlgmr.msra.gmra.mrb[24].mxu1 %v19108_v30  ;;  %13197 = vmatprep.subr.bf16.mxu0 %v14433_v59  ;;  %v14472_v59 = vcombine.low %v6157_v17, %v6161_v1  ;;  %v14481_v22 = vcombine.high %v6165_v32, %v6169_v15  ;;  %v6205_v1 = vld [vmem:[%s16658_s5 + $0x6d8] sm:$0xff] }
 0x7b6   : > { %12870 = vmatpush1.bf16.msra.mxu1 %v14430_v0  ;;  %12901 = vmatprep.mubr.bf16.mxu1 %v19109_v5  ;;  %v6172_v0 = vld [vmem:[%s16658_s5 + $0x5d0] sm:$0xff] }
 0x7b7   : > { %13189 = vmatmul.mubr.bf16.vlgmr.msra.gmra.mrb[28].mxu0 %v19108_v30  ;;  %12871 = vmatprep.subr.bf16.mxu1 %v14439_v24  ;;  %v14478_v24 = vcombine.low %v6164_v57, %v6168_v6  ;;  %v14487_v13 = vcombine.high %v6172_v0, %v6176_v55  ;;  %v14480_v30 = vcombine.low %v6165_v32, %v6169_v15  ;;  %v6212_v6 = vld [vmem:[%s16658_s5 + $0x710] sm:$0xff]  ;;  %v6213_v15 = vld [vmem:[%s16658_s5 + $0x718] sm:$0xff] }
 0x7b8   : > { %13198 = vmatpush1.bf16.msra.mxu0 %v14432_v36  ;;  %13229 = vmatprep.mubr.bf16.mxu0 %v19109_v5  ;;  %v6173_v36 = vld [vmem:[%s16658_s5 + $0x5d8] sm:$0xff]  ;;  %v6184_v5 = vld [vmem:[%s16658_s5 + $0x630] sm:$0xff]  ;;  %v14486_v37 = vcombine.low %v6172_v0, %v6176_v55 }
 0x7b9   : > { %13199 = vmatprep.subr.bf16.mxu0 %v14441_v31  ;;  %v6180_v31 = vld [vmem:[%s16658_s5 + $0x610] sm:$0xff]  ;;  %v14488_v14 = vcombine.low %v6173_v36, %v6177_v42 }
 0x7ba   : > { %12872 = vmatpush1.bf16.msra.mxu1 %v14438_v44  ;;  %v14489_v44 = vcombine.high %v6173_v36, %v6177_v42  ;;  %v14494_v28 = vcombine.low %v6180_v31, %v6184_v5  ;;  %v6220_v55 = vld [vmem:[%s16658_s5 + $0x750] sm:$0xff]  ;;  %v6221_v42 = vld [vmem:[%s16658_s5 + $0x758] sm:$0xff] }
 0x7bb   : > { %12873 = vmatprep.subr.bf16.mxu1 %v14447_v9  ;;  %v6185_v9 = vld [vmem:[%s16658_s5 + $0x638] sm:$0xff] }
 0x7bc   : > { %13200 = vmatpush1.bf16.msra.mxu0 %v14440_v60  ;;  %v14495_v60 = vcombine.high %v6180_v31, %v6184_v5  ;;  %v14496_v45 = vcombine.low %v6181_v53, %v6185_v9  ;;  %v6228_v5 = vld [vmem:[%s16658_s5 + $0x790] sm:$0xff] }
 0x7bd   : > { %13201 = vmatprep.subr.bf16.mxu0 %v14449_v52  ;;  %v6192_v52 = vld [vmem:[%s16658_s5 + $0x670] sm:$0xff] }
 0x7be   : > { %12874 = vmatpush1.bf16.msra.mxu1 %v14446_v4  ;;  %v14497_v4 = vcombine.high %v6181_v53, %v6185_v9  ;;  %v14502_v12 = vcombine.low %v6188_v41, %v6192_v52  ;;  %v6229_v9 = vld [vmem:[%s16658_s5 + $0x798] sm:$0xff] }
 0x7bf   : > { %12875 = vmatprep.subr.bf16.mxu1 %v14455_v25  ;;  %v6193_v25 = vld [vmem:[%s16658_s5 + $0x678] sm:$0xff] }
 0x7c0   : > { %13202 = vmatpush1.bf16.msra.mxu0 %v14448_v51  ;;  %v14503_v51 = vcombine.high %v6188_v41, %v6192_v52  ;;  %v14504_v47 = vcombine.low %v6189_v56, %v6193_v25  ;;  %v6236_v52 = vld [vmem:[%s16658_s5 + $0x7d0] sm:$0xff] }
 0x7c1   : > { %13203 = vmatprep.subr.bf16.mxu0 %v14457_v18  ;;  %v6200_v18 = vld [vmem:[%s16658_s5 + $0x6b0] sm:$0xff] }
 0x7c2   : > { %12876 = vmatpush1.bf16.msra.mxu1 %v14454_v38  ;;  %v14505_v38 = vcombine.high %v6189_v56, %v6193_v25  ;;  %v14510_v17 = vcombine.low %v6196_v10, %v6200_v18  ;;  %v6237_v25 = vld [vmem:[%s16658_s5 + $0x7d8] sm:$0xff] }
 0x7c3   : > { %12877 = vmatprep.subr.bf16.mxu1 %v14463_v26  ;;  %v6201_v26 = vld [vmem:[%s16658_s5 + $0x6b8] sm:$0xff] }
 0x7c4   : > { %13204 = vmatpush1.bf16.msra.mxu0 %v14456_v11  ;;  %v14511_v11 = vcombine.high %v6196_v10, %v6200_v18  ;;  %v14512_v57 = vcombine.low %v6197_v34, %v6201_v26  ;;  %v6244_v18 = vld [vmem:[%s16658_s5 + $0x810] sm:$0xff] }
 0x7c5   : > { %13205 = vmatprep.subr.bf16.mxu0 %v14465_v54  ;;  %v6208_v54 = vld [vmem:[%s16658_s5 + $0x6f0] sm:$0xff] }
 0x7c6   : > { %12878 = vmatpush1.bf16.msra.mxu1 %v14462_v23  ;;  %v14513_v23 = vcombine.high %v6197_v34, %v6201_v26  ;;  %v14518_v32 = vcombine.low %v6204_v16, %v6208_v54  ;;  %v6245_v26 = vld [vmem:[%s16658_s5 + $0x818] sm:$0xff] }
 0x7c7   : > { %12879 = vmatprep.subr.bf16.mxu1 %v14471_v33  ;;  %v6209_v33 = vld [vmem:[%s16658_s5 + $0x6f8] sm:$0xff] }
 0x7c8   : > { %13206 = vmatpush1.bf16.msra.mxu0 %v14464_v7  ;;  %v14519_v7 = vcombine.high %v6204_v16, %v6208_v54  ;;  %v14520_v0 = vcombine.low %v6205_v1, %v6209_v33  ;;  %v6252_v54 = vld [vmem:[%s16658_s5 + $0x850] sm:$0xff] }
 0x7c9   : > { %13207 = vmatprep.subr.bf16.mxu0 %v14473_v27  ;;  %v6216_v27 = vld [vmem:[%s16658_s5 + $0x730] sm:$0xff] }
 0x7ca   : > { %12880 = vmatpush1.bf16.msra.mxu1 %v14470_v50  ;;  %v14521_v50 = vcombine.high %v6205_v1, %v6209_v33  ;;  %v14526_v36 = vcombine.low %v6212_v6, %v6216_v27  ;;  %v6253_v33 = vld [vmem:[%s16658_s5 + $0x858] sm:$0xff] }
 0x7cb   : > { %12881 = vmatprep.subr.bf16.mxu1 %v14479_v43  ;;  %v6217_v43 = vld [vmem:[%s16658_s5 + $0x738] sm:$0xff] }
 0x7cc   : > { %13208 = vmatpush1.bf16.msra.mxu0 %v14472_v59  ;;  %v14527_v59 = vcombine.high %v6212_v6, %v6216_v27  ;;  %v14528_v31 = vcombine.low %v6213_v15, %v6217_v43  ;;  %v6260_v27 = vld [vmem:[%s16658_s5 + $0x890] sm:$0xff] }
 0x7cd   : > { %13209 = vmatprep.subr.bf16.mxu0 %v14481_v22  ;;  %v6224_v22 = vld [vmem:[%s16658_s5 + $0x770] sm:$0xff] }
 0x7ce   : > { %12882 = vmatpush1.bf16.msra.mxu1 %v14478_v24  ;;  %v14529_v24 = vcombine.high %v6213_v15, %v6217_v43  ;;  %v14534_v53 = vcombine.low %v6220_v55, %v6224_v22  ;;  %v19111_v43 = vld [vmem:[#allocation36_spill] sm:$0xff] }
 0x7cf   : > { %12883 = vmatprep.subr.bf16.mxu1 %v14487_v13  ;;  %v6225_v13 = vld [vmem:[%s16658_s5 + $0x778] sm:$0xff] }
 0x7d0   : > { %13210 = vmatpush1.bf16.msra.mxu0 %v14480_v30  ;;  %v14535_v30 = vcombine.high %v6220_v55, %v6224_v22  ;;  %v14536_v41 = vcombine.low %v6221_v42, %v6225_v13  ;;  %v6265_v55 = vld [vmem:[%s16658_s5 + $0x8b8] sm:$0xff] }
 0x7d1   : > { %13211 = vmatprep.subr.bf16.mxu0 %v14489_v44  ;;  %v6232_v44 = vld [vmem:[%s16658_s5 + $0x7b0] sm:$0xff] }
 0x7d2   : > { %12884 = vmatpush1.bf16.msra.mxu1 %v14486_v37  ;;  %v14537_v37 = vcombine.high %v6221_v42, %v6225_v13  ;;  %v14542_v56 = vcombine.low %v6228_v5, %v6232_v44  ;;  %v6272_v42 = vld [vmem:[%s16658_s5 + $0x8f0] sm:$0xff] }
 0x7d3   : > { %12885 = vmatprep.subr.bf16.mxu1 %v14495_v60  ;;  %v6233_v60 = vld [vmem:[%s16658_s5 + $0x7b8] sm:$0xff] }
 0x7d4   : > { %13212 = vmatpush1.bf16.msra.mxu0 %v14488_v14  ;;  %v14543_v14 = vcombine.high %v6228_v5, %v6232_v44  ;;  %v14544_v10 = vcombine.low %v6229_v9, %v6233_v60  ;;  %v6273_v5 = vld [vmem:[%s16658_s5 + $0x8f8] sm:$0xff] }
 0x7d5   : > { %13213 = vmatprep.subr.bf16.mxu0 %v14497_v4  ;;  %v6240_v4 = vld [vmem:[%s16658_s5 + $0x7f0] sm:$0xff] }
 0x7d6   : > { %12886 = vmatpush1.bf16.msra.mxu1 %v14494_v28  ;;  %v14545_v28 = vcombine.high %v6229_v9, %v6233_v60  ;;  %v14550_v34 = vcombine.low %v6236_v52, %v6240_v4  ;;  %v6280_v9 = vld [vmem:[%s16658_s5 + $0x930] sm:$0xff] }
 0x7d7   : > { %12887 = vmatprep.subr.bf16.mxu1 %v14503_v51  ;;  %v6241_v51 = vld [vmem:[%s16658_s5 + $0x7f8] sm:$0xff] }
 0x7d8   : > { %13214 = vmatpush1.bf16.msra.mxu0 %v14496_v45  ;;  %v14551_v45 = vcombine.high %v6236_v52, %v6240_v4  ;;  %v14552_v16 = vcombine.low %v6237_v25, %v6241_v51  ;;  %v6281_v52 = vld [vmem:[%s16658_s5 + $0x938] sm:$0xff] }
 0x7d9   : > { %13215 = vmatprep.subr.bf16.mxu0 %v14505_v38  ;;  %v6248_v38 = vld [vmem:[%s16658_s5 + $0x830] sm:$0xff] }
 0x7da   : > { %12888 = vmatpush1.bf16.msra.mxu1 %v14502_v12  ;;  %v14553_v12 = vcombine.high %v6237_v25, %v6241_v51  ;;  %v14558_v1 = vcombine.low %v6244_v18, %v6248_v38  ;;  %v6288_v25 = vld [vmem:[%s16658_s5 + $0x970] sm:$0xff] }
 0x7db   : > { %12889 = vmatprep.subr.bf16.mxu1 %v14511_v11  ;;  %v6249_v11 = vld [vmem:[%s16658_s5 + $0x838] sm:$0xff] }
 0x7dc   : > { %13216 = vmatpush1.bf16.msra.mxu0 %v14504_v47  ;;  %v14559_v47 = vcombine.high %v6244_v18, %v6248_v38  ;;  %v14560_v6 = vcombine.low %v6245_v26, %v6249_v11  ;;  %v6289_v18 = vld [vmem:[%s16658_s5 + $0x978] sm:$0xff] }
 0x7dd   : > { %13217 = vmatprep.subr.bf16.mxu0 %v14513_v23  ;;  %v6256_v23 = vld [vmem:[%s16658_s5 + $0x870] sm:$0xff] }
 0x7de   : > { %12890 = vmatpush1.bf16.msra.mxu1 %v14510_v17  ;;  %v14561_v17 = vcombine.high %v6245_v26, %v6249_v11  ;;  %v6296_v26 = vld [vmem:[%s16658_s5 + $0x9b0] sm:$0xff] }
 0x7df   : > { %12891 = vmatprep.subr.bf16.mxu1 %v14519_v7  ;;  %v6257_v7 = vld [vmem:[%s16658_s5 + $0x878] sm:$0xff] }
 0x7e0   : > { %13218 = vmatpush1.bf16.msra.mxu0 %v14512_v57  ;;  %v14567_v57 = vcombine.high %v6252_v54, %v6256_v23  ;;  %v14569_v15 = vcombine.high %v6253_v33, %v6257_v7 }
 0x7e1   : > { %13219 = vmatprep.subr.bf16.mxu0 %v14521_v50  ;;  %v6264_v50 = vld [vmem:[%s16658_s5 + $0x8b0] sm:$0xff] }
 0x7e2   : > { %12892 = vmatpush1.bf16.msra.mxu1 %v14518_v32  ;;  %v19110_v32 = vld [vmem:[#allocation35_spill] sm:$0xff]  ;;  %v14575_v22 = vcombine.high %v6260_v27, %v6264_v50 }
 0x7e3   : > { %12893 = vmatprep.subr.bf16.mxu1 %v14527_v59  ;;  %v14566_v59 = vcombine.low %v6252_v54, %v6256_v23  ;;  %v6297_v54 = vld [vmem:[%s16658_s5 + $0x9b8] sm:$0xff] }
 0x7e4   : > { %13220 = vmatpush1.bf16.msra.mxu0 %v14520_v0  ;;  %v6261_v0 = vld [vmem:[%s16658_s5 + $0x898] sm:$0xff] }
 0x7e5   : > { %13221 = vmatprep.subr.bf16.mxu0 %v14529_v24  ;;  %v14568_v24 = vcombine.low %v6253_v33, %v6257_v7  ;;  %v14577_v13 = vcombine.high %v6261_v0, %v6265_v55  ;;  %v6304_v33 = vld [vmem:[%s16658_s5 + $0x9f0] sm:$0xff] }
 0x7e6   : > { %12894 = vmatpush1.bf16.msra.mxu1 %v14526_v36  ;;  %v6268_v36 = vld [vmem:[%s16658_s5 + $0x8d0] sm:$0xff] }
 0x7e7   : > { %12895 = vmatprep.subr.bf16.mxu1 %v14535_v30  ;;  %v14574_v30 = vcombine.low %v6260_v27, %v6264_v50  ;;  %v14583_v44 = vcombine.high %v6268_v36, %v6272_v42  ;;  %v6305_v27 = vld [vmem:[%s16658_s5 + $0x9f8] sm:$0xff] }
 0x7e8   : > { %13222 = vmatpush1.bf16.msra.mxu0 %v14528_v31  ;;  %v6269_v31 = vld [vmem:[%s16658_s5 + $0x8d8] sm:$0xff] }
 0x7e9   : > { %13223 = vmatprep.subr.bf16.mxu0 %v14537_v37  ;;  %v14576_v37 = vcombine.low %v6261_v0, %v6265_v55  ;;  %v14585_v60 = vcombine.high %v6269_v31, %v6273_v5  ;;  %v6309_v55 = vld [vmem:[%s16658_s5 + $0xa18] sm:$0xff] }
 0x7ea   : > { %12896 = vmatpush1.bf16.msra.mxu1 %v14534_v53  ;;  %v6276_v53 = vld [vmem:[%s16658_s5 + $0x910] sm:$0xff] }
 0x7eb   : > { %12897 = vmatprep.subr.bf16.mxu1 %v14543_v14  ;;  %v14582_v14 = vcombine.low %v6268_v36, %v6272_v42  ;;  %v14591_v4 = vcombine.high %v6276_v53, %v6280_v9  ;;  %v6316_v42 = vld [vmem:[%s16658_s5 + $0xa50] sm:$0xff] }
 0x7ec   : > { %13224 = vmatpush1.bf16.msra.mxu0 %v14536_v41  ;;  %v6277_v41 = vld [vmem:[%s16658_s5 + $0x918] sm:$0xff] }
 0x7ed   : > { %13225 = vmatprep.subr.bf16.mxu0 %v14545_v28  ;;  %v14584_v28 = vcombine.low %v6269_v31, %v6273_v5  ;;  %v14593_v51 = vcombine.high %v6277_v41, %v6281_v52  ;;  %v6317_v5 = vld [vmem:[%s16658_s5 + $0xa58] sm:$0xff] }
 0x7ee   : > { %12898 = vmatpush1.bf16.msra.mxu1 %v14542_v56  ;;  %v6284_v56 = vld [vmem:[%s16658_s5 + $0x950] sm:$0xff] }
 0x7ef   : > { %12899 = vmatprep.subr.bf16.mxu1 %v14551_v45  ;;  %v14590_v45 = vcombine.low %v6276_v53, %v6280_v9  ;;  %v14599_v38 = vcombine.high %v6284_v56, %v6288_v25  ;;  %v6324_v9 = vld [vmem:[%s16658_s5 + $0xa90] sm:$0xff] }
 0x7f0   : > { %13226 = vmatpush1.bf16.msra.mxu0 %v14544_v10  ;;  %v6285_v10 = vld [vmem:[%s16658_s5 + $0x958] sm:$0xff] }
 0x7f1   : > { %13227 = vmatprep.subr.bf16.mxu0 %v14553_v12  ;;  %v14592_v12 = vcombine.low %v6277_v41, %v6281_v52  ;;  %v14601_v11 = vcombine.high %v6285_v10, %v6289_v18  ;;  %v6325_v52 = vld [vmem:[%s16658_s5 + $0xa98] sm:$0xff] }
 0x7f2   : > { %12900 = vmatpush1.bf16.msra.mxu1 %v14550_v34  ;;  %v6292_v34 = vld [vmem:[%s16658_s5 + $0x990] sm:$0xff] }
 0x7f3   : > { %12910 = vmatprep.subr.bf16.mxu1 %v14559_v47  ;;  %v14598_v47 = vcombine.low %v6284_v56, %v6288_v25  ;;  %v14607_v23 = vcombine.high %v6292_v34, %v6296_v26  ;;  %v6332_v25 = vld [vmem:[%s16658_s5 + $0xad0] sm:$0xff] }
 0x7f4   : > { %13228 = vmatpush1.bf16.msra.mxu0 %v14552_v16  ;;  %v6293_v16 = vld [vmem:[%s16658_s5 + $0x998] sm:$0xff] }
 0x7f5   : > { %12902 = vmatmul.mubr.bf16.vlgmr.msra.gmra.mrb[24].mxu1 %v19110_v32  ;;  %13238 = vmatprep.subr.bf16.mxu0 %v14561_v17  ;;  %v14600_v17 = vcombine.low %v6285_v10, %v6289_v18  ;;  %v14609_v7 = vcombine.high %v6293_v16, %v6297_v54  ;;  %v6333_v18 = vld [vmem:[%s16658_s5 + $0xad8] sm:$0xff] }
 0x7f6   : > { %12911 = vmatpush1.bf16.msra.mxu1 %v14558_v1  ;;  %12942 = vmatprep.mubr.bf16.mxu1 %v19111_v43  ;;  %v6300_v1 = vld [vmem:[%s16658_s5 + $0x9d0] sm:$0xff] }
 0x7f7   : > { %13230 = vmatmul.mubr.bf16.vlgmr.msra.gmra.mrb[28].mxu0 %v19110_v32  ;;  %12912 = vmatprep.subr.bf16.mxu1 %v14567_v57  ;;  %v14606_v57 = vcombine.low %v6292_v34, %v6296_v26  ;;  %v14615_v50 = vcombine.high %v6300_v1, %v6304_v33  ;;  %v14608_v32 = vcombine.low %v6293_v16, %v6297_v54  ;;  %v6340_v26 = vld [vmem:[%s16658_s5 + $0xb10] sm:$0xff]  ;;  %v6341_v54 = vld [vmem:[%s16658_s5 + $0xb18] sm:$0xff] }
 0x7f8   : > { %13239 = vmatpush1.bf16.msra.mxu0 %v14560_v6  ;;  %13270 = vmatprep.mubr.bf16.mxu0 %v19111_v43  ;;  %v6301_v6 = vld [vmem:[%s16658_s5 + $0x9d8] sm:$0xff]  ;;  %v6312_v43 = vld [vmem:[%s16658_s5 + $0xa30] sm:$0xff]  ;;  %v14614_v0 = vcombine.low %v6300_v1, %v6304_v33 }
 0x7f9   : > { %13240 = vmatprep.subr.bf16.mxu0 %v14569_v15  ;;  %v6308_v15 = vld [vmem:[%s16658_s5 + $0xa10] sm:$0xff]  ;;  %v14616_v36 = vcombine.low %v6301_v6, %v6305_v27 }
 0x7fa   : > { %12913 = vmatpush1.bf16.msra.mxu1 %v14566_v59  ;;  %v14617_v59 = vcombine.high %v6301_v6, %v6305_v27  ;;  %v14622_v31 = vcombine.low %v6308_v15, %v6312_v43  ;;  %v6348_v33 = vld [vmem:[%s16658_s5 + $0xb50] sm:$0xff]  ;;  %v6349_v27 = vld [vmem:[%s16658_s5 + $0xb58] sm:$0xff] }
 0x7fb   : > { %12914 = vmatprep.subr.bf16.mxu1 %v14575_v22  ;;  %v6313_v22 = vld [vmem:[%s16658_s5 + $0xa38] sm:$0xff] }
 0x7fc   : > { %13241 = vmatpush1.bf16.msra.mxu0 %v14568_v24  ;;  %v14623_v24 = vcombine.high %v6308_v15, %v6312_v43  ;;  %v14624_v53 = vcombine.low %v6309_v55, %v6313_v22  ;;  %v6356_v43 = vld [vmem:[%s16658_s5 + $0xb90] sm:$0xff] }
 0x7fd   : > { %13242 = vmatprep.subr.bf16.mxu0 %v14577_v13  ;;  %v6320_v13 = vld [vmem:[%s16658_s5 + $0xa70] sm:$0xff] }
 0x7fe   : > { %12915 = vmatpush1.bf16.msra.mxu1 %v14574_v30  ;;  %v14625_v30 = vcombine.high %v6309_v55, %v6313_v22  ;;  %v14630_v41 = vcombine.low %v6316_v42, %v6320_v13  ;;  %v6357_v22 = vld [vmem:[%s16658_s5 + $0xb98] sm:$0xff] }
 0x7ff   : > { %12916 = vmatprep.subr.bf16.mxu1 %v14583_v44  ;;  %v6321_v44 = vld [vmem:[%s16658_s5 + $0xa78] sm:$0xff] }
 0x800   : > { %13243 = vmatpush1.bf16.msra.mxu0 %v14576_v37  ;;  %v14631_v37 = vcombine.high %v6316_v42, %v6320_v13  ;;  %v14632_v56 = vcombine.low %v6317_v5, %v6321_v44  ;;  %v6364_v13 = vld [vmem:[%s16658_s5 + $0xbd0] sm:$0xff] }
 0x801   : > { %13244 = vmatprep.subr.bf16.mxu0 %v14585_v60  ;;  %v6328_v60 = vld [vmem:[%s16658_s5 + $0xab0] sm:$0xff] }
 0x802   : > { %12917 = vmatpush1.bf16.msra.mxu1 %v14582_v14  ;;  %v14633_v14 = vcombine.high %v6317_v5, %v6321_v44  ;;  %v14638_v10 = vcombine.low %v6324_v9, %v6328_v60  ;;  %v6365_v44 = vld [vmem:[%s16658_s5 + $0xbd8] sm:$0xff] }
 0x803   : > { %12918 = vmatprep.subr.bf16.mxu1 %v14591_v4  ;;  %v6329_v4 = vld [vmem:[%s16658_s5 + $0xab8] sm:$0xff] }
 0x804   : > { %13245 = vmatpush1.bf16.msra.mxu0 %v14584_v28  ;;  %v14639_v28 = vcombine.high %v6324_v9, %v6328_v60  ;;  %v14640_v34 = vcombine.low %v6325_v52, %v6329_v4  ;;  %v6372_v60 = vld [vmem:[%s16658_s5 + $0xc10] sm:$0xff] }
 0x805   : > { %13246 = vmatprep.subr.bf16.mxu0 %v14593_v51  ;;  %v6336_v51 = vld [vmem:[%s16658_s5 + $0xaf0] sm:$0xff] }
 0x806   : > { %12919 = vmatpush1.bf16.msra.mxu1 %v14590_v45  ;;  %v14641_v45 = vcombine.high %v6325_v52, %v6329_v4  ;;  %v14646_v16 = vcombine.low %v6332_v25, %v6336_v51  ;;  %v6373_v4 = vld [vmem:[%s16658_s5 + $0xc18] sm:$0xff] }
 0x807   : > { %12920 = vmatprep.subr.bf16.mxu1 %v14599_v38  ;;  %v6337_v38 = vld [vmem:[%s16658_s5 + $0xaf8] sm:$0xff] }
 0x808   : > { %13247 = vmatpush1.bf16.msra.mxu0 %v14592_v12  ;;  %v14647_v12 = vcombine.high %v6332_v25, %v6336_v51  ;;  %v14648_v1 = vcombine.low %v6333_v18, %v6337_v38  ;;  %v6380_v51 = vld [vmem:[%s16658_s5 + $0xc50] sm:$0xff] }
 0x809   : > { %13248 = vmatprep.subr.bf16.mxu0 %v14601_v11  ;;  %v6344_v11 = vld [vmem:[%s16658_s5 + $0xb30] sm:$0xff] }
 0x80a   : > { %12921 = vmatpush1.bf16.msra.mxu1 %v14598_v47  ;;  %v14649_v47 = vcombine.high %v6333_v18, %v6337_v38  ;;  %v14654_v6 = vcombine.low %v6340_v26, %v6344_v11  ;;  %v6381_v38 = vld [vmem:[%s16658_s5 + $0xc58] sm:$0xff] }
 0x80b   : > { %12922 = vmatprep.subr.bf16.mxu1 %v14607_v23  ;;  %v6345_v23 = vld [vmem:[%s16658_s5 + $0xb38] sm:$0xff] }
 0x80c   : > { %13249 = vmatpush1.bf16.msra.mxu0 %v14600_v17  ;;  %v14655_v17 = vcombine.high %v6340_v26, %v6344_v11  ;;  %v14656_v15 = vcombine.low %v6341_v54, %v6345_v23  ;;  %v6388_v11 = vld [vmem:[%s16658_s5 + $0xc90] sm:$0xff] }
 0x80d   : > { %13250 = vmatprep.subr.bf16.mxu0 %v14609_v7  ;;  %v6352_v7 = vld [vmem:[%s16658_s5 + $0xb70] sm:$0xff] }
 0x80e   : > { %12923 = vmatpush1.bf16.msra.mxu1 %v14606_v57  ;;  %v14657_v57 = vcombine.high %v6341_v54, %v6345_v23  ;;  %v14662_v55 = vcombine.low %v6348_v33, %v6352_v7  ;;  %v19113_v23 = vld [vmem:[#allocation38_spill] sm:$0xff] }
 0x80f   : > { %12924 = vmatprep.subr.bf16.mxu1 %v14615_v50  ;;  %v6353_v50 = vld [vmem:[%s16658_s5 + $0xb78] sm:$0xff] }
 0x810   : > { %13251 = vmatpush1.bf16.msra.mxu0 %v14608_v32  ;;  %v14663_v32 = vcombine.high %v6348_v33, %v6352_v7  ;;  %v14664_v42 = vcombine.low %v6349_v27, %v6353_v50  ;;  %v6393_v33 = vld [vmem:[%s16658_s5 + $0xcb8] sm:$0xff] }
 0x811   : > { %13252 = vmatprep.subr.bf16.mxu0 %v14617_v59  ;;  %v6360_v59 = vld [vmem:[%s16658_s5 + $0xbb0] sm:$0xff] }
 0x812   : > { %12925 = vmatpush1.bf16.msra.mxu1 %v14614_v0  ;;  %v14665_v0 = vcombine.high %v6349_v27, %v6353_v50  ;;  %v14670_v5 = vcombine.low %v6356_v43, %v6360_v59  ;;  %v6400_v27 = vld [vmem:[%s16658_s5 + $0xcf0] sm:$0xff] }
 0x813   : > { %12926 = vmatprep.subr.bf16.mxu1 %v14623_v24  ;;  %v6361_v24 = vld [vmem:[%s16658_s5 + $0xbb8] sm:$0xff] }
 0x814   : > { %13253 = vmatpush1.bf16.msra.mxu0 %v14616_v36  ;;  %v14671_v36 = vcombine.high %v6356_v43, %v6360_v59  ;;  %v14672_v9 = vcombine.low %v6357_v22, %v6361_v24  ;;  %v6401_v43 = vld [vmem:[%s16658_s5 + $0xcf8] sm:$0xff] }
 0x815   : > { %13254 = vmatprep.subr.bf16.mxu0 %v14625_v30  ;;  %v6368_v30 = vld [vmem:[%s16658_s5 + $0xbf0] sm:$0xff] }
 0x816   : > { %12927 = vmatpush1.bf16.msra.mxu1 %v14622_v31  ;;  %v14673_v31 = vcombine.high %v6357_v22, %v6361_v24  ;;  %v14678_v52 = vcombine.low %v6364_v13, %v6368_v30  ;;  %v6408_v22 = vld [vmem:[%s16658_s5 + $0xd30] sm:$0xff] }
 0x817   : > { %12928 = vmatprep.subr.bf16.mxu1 %v14631_v37  ;;  %v6369_v37 = vld [vmem:[%s16658_s5 + $0xbf8] sm:$0xff] }
 0x818   : > { %13255 = vmatpush1.bf16.msra.mxu0 %v14624_v53  ;;  %v14679_v53 = vcombine.high %v6364_v13, %v6368_v30  ;;  %v14680_v25 = vcombine.low %v6365_v44, %v6369_v37  ;;  %v6409_v13 = vld [vmem:[%s16658_s5 + $0xd38] sm:$0xff] }
 0x819   : > { %13256 = vmatprep.subr.bf16.mxu0 %v14633_v14  ;;  %v6376_v14 = vld [vmem:[%s16658_s5 + $0xc30] sm:$0xff] }
 0x81a   : > { %12929 = vmatpush1.bf16.msra.mxu1 %v14630_v41  ;;  %v14681_v41 = vcombine.high %v6365_v44, %v6369_v37  ;;  %v14686_v18 = vcombine.low %v6372_v60, %v6376_v14  ;;  %v6416_v44 = vld [vmem:[%s16658_s5 + $0xd70] sm:$0xff] }
 0x81b   : > { %12930 = vmatprep.subr.bf16.mxu1 %v14639_v28  ;;  %v6377_v28 = vld [vmem:[%s16658_s5 + $0xc38] sm:$0xff] }
 0x81c   : > { %13257 = vmatpush1.bf16.msra.mxu0 %v14632_v56  ;;  %v14687_v56 = vcombine.high %v6372_v60, %v6376_v14  ;;  %v14688_v26 = vcombine.low %v6373_v4, %v6377_v28  ;;  %v6413_v60 = vld [vmem:[%s16658_s5 + $0xd58] sm:$0xff] }
 0x81d   : > { %13258 = vmatprep.subr.bf16.mxu0 %v14641_v45  ;;  %v6384_v45 = vld [vmem:[%s16658_s5 + $0xc70] sm:$0xff]  ;;  %v6417_v14 = vld [vmem:[%s16658_s5 + $0xd78] sm:$0xff] }
 0x81e   : > { %12931 = vmatpush1.bf16.msra.mxu1 %v14638_v10  ;;  %v14689_v10 = vcombine.high %v6373_v4, %v6377_v28  ;;  %v6420_v4 = vld [vmem:[%s16658_s5 + $0xd90] sm:$0xff] }
 0x81f   : > { %12932 = vmatprep.subr.bf16.mxu1 %v14647_v12  ;;  %v6385_v12 = vld [vmem:[%s16658_s5 + $0xc78] sm:$0xff]  ;;  %v6424_v28 = vld [vmem:[%s16658_s5 + $0xdb0] sm:$0xff] }
 0x820   : > { %13259 = vmatpush1.bf16.msra.mxu0 %v14640_v34  ;;  %v14695_v34 = vcombine.high %v6380_v51, %v6384_v45  ;;  %v14697_v54 = vcombine.high %v6381_v38, %v6385_v12 }
 0x821   : > { %13260 = vmatprep.subr.bf16.mxu0 %v14649_v47  ;;  %v6392_v47 = vld [vmem:[%s16658_s5 + $0xcb0] sm:$0xff] }
 0x822   : > { %12933 = vmatpush1.bf16.msra.mxu1 %v14646_v16  ;;  %v19112_v16 = vld [vmem:[#allocation37_spill] sm:$0xff]  ;;  %v14703_v7 = vcombine.high %v6388_v11, %v6392_v47 }
 0x823   : > { %12934 = vmatprep.subr.bf16.mxu1 %v14655_v17  ;;  %v14694_v17 = vcombine.low %v6380_v51, %v6384_v45 }
 0x824   : > { %13261 = vmatpush1.bf16.msra.mxu0 %v14648_v1  ;;  %v6389_v1 = vld [vmem:[%s16658_s5 + $0xc98] sm:$0xff] }
 0x825   : > { %13262 = vmatprep.subr.bf16.mxu0 %v14657_v57  ;;  %v14696_v57 = vcombine.low %v6381_v38, %v6385_v12  ;;  %v14705_v50 = vcombine.high %v6389_v1, %v6393_v33  ;;  %v14735_v12 = vcombine.high %v6420_v4, %v6424_v28 }
 0x826   : > { %12935 = vmatpush1.bf16.msra.mxu1 %v14654_v6  ;;  %v6396_v6 = vld [vmem:[%s16658_s5 + $0xcd0] sm:$0xff] }
 0x827   : > { %12936 = vmatprep.subr.bf16.mxu1 %v14663_v32  ;;  %v14702_v32 = vcombine.low %v6388_v11, %v6392_v47  ;;  %v14711_v59 = vcombine.high %v6396_v6, %v6400_v27  ;;  %v6432_v11 = vld [vmem:[%s16658_s5 + $0xdf0] sm:$0xff] }
 0x828   : > { %13263 = vmatpush1.bf16.msra.mxu0 %v14656_v15  ;;  %v6397_v15 = vld [vmem:[%s16658_s5 + $0xcd8] sm:$0xff] }
 0x829   : > { %13264 = vmatprep.subr.bf16.mxu0 %v14665_v0  ;;  %v14704_v0 = vcombine.low %v6389_v1, %v6393_v33  ;;  %v14713_v24 = vcombine.high %v6397_v15, %v6401_v43  ;;  %v14734_v1 = vcombine.low %v6420_v4, %v6424_v28  ;;  %v6429_v33 = vld [vmem:[%s16658_s5 + $0xdd8] sm:$0xff] }
 0x82a   : > { %12937 = vmatpush1.bf16.msra.mxu1 %v14662_v55  ;;  %v6404_v55 = vld [vmem:[%s16658_s5 + $0xd10] sm:$0xff] }
 0x82b   : > { %12938 = vmatprep.subr.bf16.mxu1 %v14671_v36  ;;  %v14710_v36 = vcombine.low %v6396_v6, %v6400_v27  ;;  %v14719_v30 = vcombine.high %v6404_v55, %v6408_v22 }
 0x82c   : > { %13265 = vmatpush1.bf16.msra.mxu0 %v14664_v42  ;;  %v6405_v42 = vld [vmem:[%s16658_s5 + $0xd18] sm:$0xff] }
 0x82d   : > { %13266 = vmatprep.subr.bf16.mxu0 %v14673_v31  ;;  %v14712_v31 = vcombine.low %v6397_v15, %v6401_v43  ;;  %v14721_v37 = vcombine.high %v6405_v42, %v6409_v13  ;;  %v6436_v43 = vld [vmem:[%s16658_s5 + $0xe10] sm:$0xff] }
 0x82e   : > { %12939 = vmatpush1.bf16.msra.mxu1 %v14670_v5  ;;  %v6412_v5 = vld [vmem:[%s16658_s5 + $0xd50] sm:$0xff] }
 0x82f   : > { %12940 = vmatprep.subr.bf16.mxu1 %v14679_v53  ;;  %v14718_v53 = vcombine.low %v6404_v55, %v6408_v22  ;;  %v14726_v45 = vcombine.low %v6412_v5, %v6416_v44 }
 0x830   : > { %13267 = vmatpush1.bf16.msra.mxu0 %v14672_v9  ;;  %v7010_v9 = vld [vmem:[%s547_s17] sm:$0xff] }
 0x831   : > { %13268 = vmatprep.subr.bf16.mxu0 %v14681_v41  ;;  %v14727_v41 = vcombine.high %v6412_v5, %v6416_v44  ;;  %v7019_v51 = vrot.slane %v7010_v9, %v16681_v62  ;;  %v7023_v38 = vrot.slane %v7010_v9, %v16734_v20  ;;  %v6428_v62 = vld [vmem:[%s16658_s5 + $0xdd0] sm:$0xff] }
 0x832   : > { %12941 = vmatpush1.bf16.msra.mxu1 %v14678_v52  ;;  %v14720_v52 = vcombine.low %v6405_v42, %v6409_v13  ;;  %v14743_v27 = vcombine.high %v6428_v62, %v6432_v11  ;;  %v14742_v22 = vcombine.low %v6428_v62, %v6432_v11  ;;  %v6461_v62 = vld [vmem:[%s16658_s5 + $0xed8] sm:$0xff] }
 0x833   : > { %12951 = vmatprep.subr.bf16.mxu1 %v14687_v56  ;;  %v7015_v56 = vrot.slane %v7010_v9, %v16678_v61  ;;  %v6465_v11 = vld [vmem:[%s16658_s5 + $0xef8] sm:$0xff] }
 0x834   : > { %13269 = vmatpush1.bf16.msra.mxu0 %v14680_v25  ;;  %v14729_v25 = vcombine.high %v6413_v60, %v6417_v14 }
 0x835   : > { %12943 = vmatmul.mubr.bf16.vlgmr.msra.gmra.mrb[24].mxu1 %v19112_v16  ;;  %13279 = vmatprep.subr.bf16.mxu0 %v14689_v10  ;;  %v6421_v10 = vld [vmem:[%s16658_s5 + $0xd98] sm:$0xff] }
 0x836   : > { %12952 = vmatpush1.bf16.msra.mxu1 %v14686_v18  ;;  %12983 = vmatprep.mubr.bf16.mxu1 %v19113_v23  ;;  %v6425_v18 = vld [vmem:[%s16658_s5 + $0xdb8] sm:$0xff] }
 0x837   : > { %13271 = vmatmul.mubr.bf16.vlgmr.msra.gmra.mrb[28].mxu0 %v19112_v16  ;;  %12953 = vmatprep.subr.bf16.mxu1 %v14695_v34  ;;  %v7027_v34 = vrot.slane %v7010_v9, %v16737_v21  ;;  %v14737_v20 = vcombine.high %v6421_v10, %v6425_v18  ;;  %v14736_v15 = vcombine.low %v6421_v10, %v6425_v18 }
 0x838   : > { %13280 = vmatpush1.bf16.msra.mxu0 %v14688_v26  ;;  %13311 = vmatprep.mubr.bf16.mxu0 %v19113_v23  ;;  %v14728_v26 = vcombine.low %v6413_v60, %v6417_v14  ;;  %v6452_v14 = vld [vmem:[%s16658_s5 + $0xe90] sm:$0xff] }
 0x839   : > { %13281 = vmatprep.subr.bf16.mxu0 %v14697_v54 }
 0x83a   : > { %12954 = vmatpush1.bf16.msra.mxu1 %v14694_v17 }
 0x83b   : > { %12955 = vmatprep.subr.bf16.mxu1 %v14703_v7  ;;  %v6433_v7 = vld [vmem:[%s16658_s5 + $0xdf8] sm:$0xff] }
 0x83c   : > { %13282 = vmatpush1.bf16.msra.mxu0 %v14696_v57  ;;  %v14745_v55 = vcombine.high %v6429_v33, %v6433_v7  ;;  %v14744_v13 = vcombine.low %v6429_v33, %v6433_v7  ;;  %v6473_v33 = vld [vmem:[%s16658_s5 + $0xf38] sm:$0xff] }
 0x83d   : > { %13283 = vmatprep.subr.bf16.mxu0 %v14705_v50 }
 0x83e   : > { %12956 = vmatpush1.bf16.msra.mxu1 %v14702_v32 }
 0x83f   : > { %12957 = vmatprep.subr.bf16.mxu1 %v14711_v59  ;;  %v6440_v59 = vld [vmem:[%s16658_s5 + $0xe30] sm:$0xff] }
 0x840   : > { %13284 = vmatpush1.bf16.msra.mxu0 %v14704_v0  ;;  %v14751_v42 = vcombine.high %v6436_v43, %v6440_v59  ;;  %v14750_v44 = vcombine.low %v6436_v43, %v6440_v59 }
 0x841   : > { %13285 = vmatprep.subr.bf16.mxu0 %v14713_v24  ;;  %v6437_v24 = vld [vmem:[%s16658_s5 + $0xe18] sm:$0xff] }
 0x842   : > { %12958 = vmatpush1.bf16.msra.mxu1 %v14710_v36  ;;  %v6441_v36 = vld [vmem:[%s16658_s5 + $0xe38] sm:$0xff] }
 0x843   : > { %12959 = vmatprep.subr.bf16.mxu1 %v14719_v30  ;;  %v6444_v30 = vld [vmem:[%s16658_s5 + $0xe50] sm:$0xff]  ;;  %v14753_v5 = vcombine.high %v6437_v24, %v6441_v36  ;;  %v14752_v60 = vcombine.low %v6437_v24, %v6441_v36  ;;  %v6485_v36 = vld [vmem:[%s16658_s5 + $0xf98] sm:$0xff] }
 0x844   : > { %13286 = vmatpush1.bf16.msra.mxu0 %v14712_v31  ;;  %v6448_v31 = vld [vmem:[%s16658_s5 + $0xe70] sm:$0xff] }
 0x845   : > { %13287 = vmatprep.subr.bf16.mxu0 %v14721_v37  ;;  %v6445_v37 = vld [vmem:[%s16658_s5 + $0xe58] sm:$0xff]  ;;  %v14759_v9 = vcombine.high %v6444_v30, %v6448_v31 }
 0x846   : > { %12960 = vmatpush1.bf16.msra.mxu1 %v14718_v53  ;;  %v6449_v53 = vld [vmem:[%s16658_s5 + $0xe78] sm:$0xff] }
 0x847   : > { %12961 = vmatprep.subr.bf16.mxu1 %v14727_v41  ;;  %v6456_v41 = vld [vmem:[%s16658_s5 + $0xeb0] sm:$0xff]  ;;  %v14761_v4 = vcombine.high %v6445_v37, %v6449_v53 }
 0x848   : > { %13288 = vmatpush1.bf16.msra.mxu0 %v14720_v52  ;;  %v12493_v61 = vpop.f32.mrb[20].mxu1  ;;  %v14767_v10 = vcombine.high %v6452_v14, %v6456_v41 }
 0x849   : > { %v15326_v47 = vadd.f32 %v12493_v61, %v7015_v56  ;;  %v12495_v16 = vpop.f32.mrb[21].mxu1  ;;  %13289 = vmatprep.subr.bf16.mxu0 %v14729_v25  ;;  %v14758_v56 = vcombine.low %v6444_v30, %v6448_v31  ;;  %v6453_v25 = vld [vmem:[%s16658_s5 + $0xe98] sm:$0xff]  ;;  %v6464_v61 = vld [vmem:[%s16658_s5 + $0xef0] sm:$0xff] }
 0x84a   : > { %v12821_v54 = vpop.f32.mrb[24].mxu0  ;;  %v15327_v23 = vadd.f32 %v12495_v16, %v7019_v51  ;;  %v12497_v17 = vpop.f32.mrb[22].mxu1  ;;  %12962 = vmatpush1.bf16.msra.mxu1 %v14726_v45  ;;  %v6457_v51 = vld [vmem:[%s16658_s5 + $0xeb8] sm:$0xff]  ;;  %v6492_v31 = vld [vmem:[%s16658_s5 + $0xfd0] sm:$0xff] }
 0x84b   : > { %15779 = vtanh.f32 %v15326_v47  ;;  %v15328_v21 = vadd.f32 %v12821_v54, %v7023_v38  ;;  %v12823_v57 = vpop.f32.mrb[25].mxu0  ;;  %v12498_v6 = vpop.f32.mrb[23].mxu1  ;;  %12963 = vmatprep.subr.bf16.mxu1 %v14735_v12  ;;  %v14760_v38 = vcombine.low %v6445_v37, %v6449_v53  ;;  %v6460_v12 = vld [vmem:[%s16658_s5 + $0xed0] sm:$0xff]  ;;  %v14768_v16 = vcombine.low %v6453_v25, %v6457_v51  ;;  %v6493_v53 = vld [vmem:[%s16658_s5 + $0xfd8] sm:$0xff] }
 0x84c   : > { %15781 = vtanh.f32 %v15327_v23  ;;  %v15329_v50 = vadd.f32 %v12823_v57, %v7027_v34  ;;  %v12825_v32 = vpop.f32.mrb[26].mxu0  ;;  %13290 = vmatpush1.bf16.msra.mxu0 %v14728_v26  ;;  %v14769_v34 = vcombine.high %v6453_v25, %v6457_v51  ;;  %v14766_v26 = vcombine.low %v6452_v14, %v6456_v41  ;;  %v6472_v54 = vld [vmem:[%s16658_s5 + $0xf30] sm:$0xff]  ;;  %v6505_v25 = vld [vmem:[%s16658_s5 + $0x1038] sm:$0xff] }
 0x84d   : > { %15783 = vtanh.f32 %v15328_v21  ;;  %v12826_v0 = vpop.f32.mrb[27].mxu0  ;;  %13291 = vmatprep.subr.bf16.mxu0 %v14737_v20  ;;  %v14775_v47 = vcombine.high %v6460_v12, %v6464_v61  ;;  %v6468_v20 = vld [vmem:[%s16658_s5 + $0xf10] sm:$0xff]  ;;  %v14777_v23 = vcombine.high %v6461_v62, %v6465_v11  ;;  %v14774_v17 = vcombine.low %v6460_v12, %v6464_v61  ;;  %v6477_v32 = vld [vmem:[%s16658_s5 + $0xf58] sm:$0xff] }
 0x84e   : > { %15785 = vtanh.f32 %v15329_v50  ;;  %12964 = vmatpush1.bf16.msra.mxu1 %v14734_v1  ;;  %v6469_v1 = vld [vmem:[%s16658_s5 + $0xf18] sm:$0xff]  ;;  %v14783_v7 = vcombine.high %v6468_v20, %v6472_v54  ;;  %v14776_v21 = vcombine.low %v6461_v62, %v6465_v11  ;;  %v6476_v57 = vld [vmem:[%s16658_s5 + $0xf50] sm:$0xff]  ;;  %v14782_v50 = vcombine.low %v6468_v20, %v6472_v54 }
 0x84f   : > { %12965 = vmatprep.subr.bf16.mxu1 %v14743_v27  ;;  %v6480_v6 = vld [vmem:[%s16658_s5 + $0xf70] sm:$0xff]  ;;  %v14785_v27 = vcombine.high %v6469_v1, %v6473_v33  ;;  %v14784_v59 = vcombine.low %v6469_v1, %v6473_v33  ;;  %v6509_v61 = vld [vmem:[%s16658_s5 + $0x1058] sm:$0xff] }
 0x850   : > { %13292 = vmatpush1.bf16.msra.mxu0 %v14736_v15  ;;  %v6481_v15 = vld [vmem:[%s16658_s5 + $0xf78] sm:$0xff]  ;;  %v14791_v43 = vcombine.high %v6476_v57, %v6480_v6  ;;  %v6484_v0 = vld [vmem:[%s16658_s5 + $0xf90] sm:$0xff]  ;;  %v14790_v24 = vcombine.low %v6476_v57, %v6480_v6 }
 0x851   : > { %13293 = vmatprep.subr.bf16.mxu0 %v14745_v55  ;;  %v6488_v55 = vld [vmem:[%s16658_s5 + $0xfb0] sm:$0xff]  ;;  %v14792_v30 = vcombine.low %v6477_v32, %v6481_v15  ;;  %v6517_v54 = vld [vmem:[%s16658_s5 + $0x1098] sm:$0xff] }
 0x852   : > { %12966 = vmatpush1.bf16.msra.mxu1 %v14742_v22  ;;  %v14793_v22 = vcombine.high %v6477_v32, %v6481_v15  ;;  %v14798_v37 = vcombine.low %v6484_v0, %v6488_v55  ;;  %v6500_v41 = vld [vmem:[%s16658_s5 + $0x1010] sm:$0xff]  ;;  %v6525_v6 = vld [vmem:[%s16658_s5 + $0x10d8] sm:$0xff] }
 0x853   : > { %12967 = vmatprep.subr.bf16.mxu1 %v14751_v42  ;;  %v6489_v42 = vld [vmem:[%s16658_s5 + $0xfb8] sm:$0xff]  ;;  %v6516_v11 = vld [vmem:[%s16658_s5 + $0x1090] sm:$0xff] }
 0x854   : > { %13294 = vmatpush1.bf16.msra.mxu0 %v14744_v13  ;;  %v14799_v13 = vcombine.high %v6484_v0, %v6488_v55  ;;  %v14800_v14 = vcombine.low %v6485_v36, %v6489_v42  ;;  %v6524_v33 = vld [vmem:[%s16658_s5 + $0x10d0] sm:$0xff]  ;;  %v6537_v0 = vld [vmem:[%s16658_s5 + $0x1138] sm:$0xff] }
 0x855   : > { %v15780_v52 = vpop.eup %15779  ;;  %13295 = vmatprep.subr.bf16.mxu0 %v14753_v5  ;;  %v6496_v5 = vld [vmem:[%s16658_s5 + $0xff0] sm:$0xff] }
 0x856   : > { %v15782_v28 = vpop.eup %15781  ;;  %13492 = vst [vmem:[%s18607_s0] sm:$0xff] %v15780_v52  ;;  %12968 = vmatpush1.bf16.msra.mxu1 %v14750_v44  ;;  %v14801_v44 = vcombine.high %v6485_v36, %v6489_v42  ;;  %v6504_v52 = vld [vmem:[%s16658_s5 + $0x1030] sm:$0xff] }
 0x857   : > { %v15784_v45 = vpop.eup %15783  ;;  %13493 = vst [vmem:[%s18607_s0 + $0x8] sm:$0xff] %v15782_v28  ;;  %12969 = vmatprep.subr.bf16.mxu1 %v14759_v9  ;;  %v6497_v9 = vld [vmem:[%s16658_s5 + $0xff8] sm:$0xff]  ;;  %v14806_v28 = vcombine.low %v6492_v31, %v6496_v5  ;;  %v14815_v51 = vcombine.high %v6500_v41, %v6504_v52  ;;  %v14814_v12 = vcombine.low %v6500_v41, %v6504_v52  ;;  %v6532_v32 = vld [vmem:[%s16658_s5 + $0x1110] sm:$0xff] }
 0x858   : > { %v15786_v18 = vpop.eup %15785  ;;  %13494 = vst [vmem:[%s18607_s0 + $0x10] sm:$0xff] %v15784_v45  ;;  %13296 = vmatpush1.bf16.msra.mxu0 %v14752_v60  ;;  %v14807_v60 = vcombine.high %v6492_v31, %v6496_v5  ;;  %v14808_v45 = vcombine.low %v6493_v53, %v6497_v9  ;;  %v6536_v15 = vld [vmem:[%s16658_s5 + $0x1130] sm:$0xff]  ;;  %v6545_v31 = vld [vmem:[%s16658_s5 + $0x1178] sm:$0xff] }
 0x859   : > { %13495 = vst [vmem:[%s18607_s0 + $0x18] sm:$0xff] %v15786_v18  ;;  %13297 = vmatprep.subr.bf16.mxu0 %v14761_v4  ;;  %v14809_v4 = vcombine.high %v6493_v53, %v6497_v9  ;;  %v6512_v18 = vld [vmem:[%s16658_s5 + $0x1070] sm:$0xff]  ;;  %v14847_v55 = vcombine.high %v6532_v32, %v6536_v15  ;;  %v6553_v41 = vld [vmem:[%s16658_s5 + $0x11b8] sm:$0xff] }
 0x85a   : > { %12970 = vmatpush1.bf16.msra.mxu1 %v14758_v56  ;;  %v6501_v56 = vld [vmem:[%s16658_s5 + $0x1018] sm:$0xff]  ;;  %v6544_v36 = vld [vmem:[%s16658_s5 + $0x1170] sm:$0xff] }
 0x85b   : > { %12971 = vmatprep.subr.bf16.mxu1 %v14767_v10  ;;  %v6508_v10 = vld [vmem:[%s16658_s5 + $0x1050] sm:$0xff]  ;;  %v14816_v62 = vcombine.low %v6501_v56, %v6505_v25 }
 0x85c   : > { %13298 = vmatpush1.bf16.msra.mxu0 %v14760_v38  ;;  %v14817_v38 = vcombine.high %v6501_v56, %v6505_v25  ;;  %v14822_v20 = vcombine.low %v6508_v10, %v6512_v18  ;;  %v6552_v53 = vld [vmem:[%s16658_s5 + $0x11b0] sm:$0xff] }
 0x85d   : > { %13299 = vmatprep.subr.bf16.mxu0 %v14769_v34  ;;  %v6513_v34 = vld [vmem:[%s16658_s5 + $0x1078] sm:$0xff]  ;;  %v6560_v56 = vld [vmem:[%s16658_s5 + $0x11f0] sm:$0xff] }
 0x85e   : > { %12972 = vmatpush1.bf16.msra.mxu1 %v14766_v26  ;;  %v14823_v26 = vcombine.high %v6508_v10, %v6512_v18  ;;  %v14824_v1 = vcombine.low %v6509_v61, %v6513_v34  ;;  %v6561_v10 = vld [vmem:[%s16658_s5 + $0x11f8] sm:$0xff] }
 0x85f   : > { %12973 = vmatprep.subr.bf16.mxu1 %v14775_v47  ;;  %v6520_v47 = vld [vmem:[%s16658_s5 + $0x10b0] sm:$0xff] }
 0x860   : > { %13300 = vmatpush1.bf16.msra.mxu0 %v14768_v16  ;;  %v14825_v16 = vcombine.high %v6509_v61, %v6513_v34  ;;  %v14830_v57 = vcombine.low %v6516_v11, %v6520_v47  ;;  %v6568_v61 = vld [vmem:[%s16658_s5 + $0x1230] sm:$0xff] }
 0x861   : > { %13301 = vmatprep.subr.bf16.mxu0 %v14777_v23  ;;  %v6521_v23 = vld [vmem:[%s16658_s5 + $0x10b8] sm:$0xff] }
 0x862   : > { %12974 = vmatpush1.bf16.msra.mxu1 %v14774_v17  ;;  %v14831_v17 = vcombine.high %v6516_v11, %v6520_v47  ;;  %v6569_v11 = vld [vmem:[%s16658_s5 + $0x1238] sm:$0xff] }
 0x863   : > { %12975 = vmatprep.subr.bf16.mxu1 %v14783_v7  ;;  %v6528_v7 = vld [vmem:[%s16658_s5 + $0x10f0] sm:$0xff] }
 0x864   : > { %13302 = vmatpush1.bf16.msra.mxu0 %v14776_v21  ;;  %v14833_v21 = vcombine.high %v6517_v54, %v6521_v23 }
 0x865   : > { %13303 = vmatprep.subr.bf16.mxu0 %v14785_v27  ;;  %v6529_v27 = vld [vmem:[%s16658_s5 + $0x10f8] sm:$0xff] }
 0x866   : > { %12976 = vmatpush1.bf16.msra.mxu1 %v14782_v50  ;;  %v14832_v50 = vcombine.low %v6517_v54, %v6521_v23  ;;  %v6576_v54 = vld [vmem:[%s16658_s5 + $0x1270] sm:$0xff] }
 0x867   : > { %12977 = vmatprep.subr.bf16.mxu1 %v14791_v43  ;;  %v14838_v43 = vcombine.low %v6524_v33, %v6528_v7 }
 0x868   : > { %13304 = vmatpush1.bf16.msra.mxu0 %v14784_v59  ;;  %v6533_v59 = vld [vmem:[%s16658_s5 + $0x1118] sm:$0xff] }
 0x869   : > { %13305 = vmatprep.subr.bf16.mxu0 %v14793_v22  ;;  %v14840_v22 = vcombine.low %v6525_v6, %v6529_v27  ;;  %v14849_v42 = vcombine.high %v6533_v59, %v6537_v0 }
 0x86a   : > { %12978 = vmatpush1.bf16.msra.mxu1 %v14790_v24  ;;  %v6540_v24 = vld [vmem:[%s16658_s5 + $0x1150] sm:$0xff] }
 0x86b   : > { %12979 = vmatprep.subr.bf16.mxu1 %v14799_v13  ;;  %v14846_v13 = vcombine.low %v6532_v32, %v6536_v15  ;;  %v14855_v5 = vcombine.high %v6540_v24, %v6544_v36  ;;  %v6585_v32 = vld [vmem:[%s16658_s5 + $0x12b8] sm:$0xff] }
 0x86c   : > { %13306 = vmatpush1.bf16.msra.mxu0 %v14792_v30  ;;  %v6541_v30 = vld [vmem:[%s16658_s5 + $0x1158] sm:$0xff] }
 0x86d   : > { %13307 = vmatprep.subr.bf16.mxu0 %v14801_v44  ;;  %v14848_v44 = vcombine.low %v6533_v59, %v6537_v0  ;;  %v14857_v9 = vcombine.high %v6541_v30, %v6545_v31  ;;  %v6592_v59 = vld [vmem:[%s16658_s5 + $0x12f0] sm:$0xff] }
 0x86e   : > { %12980 = vmatpush1.bf16.msra.mxu1 %v14798_v37  ;;  %v6548_v37 = vld [vmem:[%s16658_s5 + $0x1190] sm:$0xff] }
 0x86f   : > { %12981 = vmatprep.subr.bf16.mxu1 %v14807_v60  ;;  %v14854_v60 = vcombine.low %v6540_v24, %v6544_v36  ;;  %v14863_v52 = vcombine.high %v6548_v37, %v6552_v53  ;;  %v6593_v24 = vld [vmem:[%s16658_s5 + $0x12f8] sm:$0xff] }
 0x870   : > { %13308 = vmatpush1.bf16.msra.mxu0 %v14800_v14  ;;  %v6549_v14 = vld [vmem:[%s16658_s5 + $0x1198] sm:$0xff] }
 0x871   : > { %13309 = vmatprep.subr.bf16.mxu0 %v14809_v4  ;;  %v14856_v4 = vcombine.low %v6541_v30, %v6545_v31  ;;  %v14865_v25 = vcombine.high %v6549_v14, %v6553_v41  ;;  %v6600_v30 = vld [vmem:[%s16658_s5 + $0x1330] sm:$0xff] }
 0x872   : > { %12982 = vmatpush1.bf16.msra.mxu1 %v14806_v28  ;;  %v6556_v28 = vld [vmem:[%s16658_s5 + $0x11d0] sm:$0xff] }
 0x873   : > { %12992 = vmatprep.subr.bf16.mxu1 %v14815_v51  ;;  %v14862_v51 = vcombine.low %v6548_v37, %v6552_v53  ;;  %v14871_v18 = vcombine.high %v6556_v28, %v6560_v56  ;;  %v6601_v37 = vld [vmem:[%s16658_s5 + $0x1338] sm:$0xff] }
 0x874   : > { %13310 = vmatpush1.bf16.msra.mxu0 %v14808_v45  ;;  %v6557_v45 = vld [vmem:[%s16658_s5 + $0x11d8] sm:$0xff] }
 0x875   : > { %12984 = vmatmul.mubr.bf16.vlgmr.msra.gmra.mrb[24].mxu1 %v17938_v46  ;;  %13320 = vmatprep.subr.bf16.mxu0 %v14817_v38  ;;  %v14864_v38 = vcombine.low %v6549_v14, %v6553_v41  ;;  %v14873_v34 = vcombine.high %v6557_v45, %v6561_v10  ;;  %v6608_v14 = vld [vmem:[%s16658_s5 + $0x1370] sm:$0xff] }
 0x876   : > { %12993 = vmatpush1.bf16.msra.mxu1 %v14814_v12  ;;  %13024 = vmatprep.mubr.bf16.mxu1 %v18073_v49  ;;  %v6564_v12 = vld [vmem:[%s16658_s5 + $0x1210] sm:$0xff] }
 0x877   : > { %13312 = vmatmul.mubr.bf16.vlgmr.msra.gmra.mrb[28].mxu0 %v17938_v46  ;;  %12994 = vmatprep.subr.bf16.mxu1 %v14823_v26  ;;  %v14839_v46 = vcombine.high %v6524_v33, %v6528_v7  ;;  %v14870_v26 = vcombine.low %v6556_v28, %v6560_v56  ;;  %v14879_v47 = vcombine.high %v6564_v12, %v6568_v61  ;;  %v6577_v33 = vld [vmem:[%s16658_s5 + $0x1278] sm:$0xff] }
 0x878   : > { %13321 = vmatpush1.bf16.msra.mxu0 %v14816_v62  ;;  %13352 = vmatprep.mubr.bf16.mxu0 %v18073_v49  ;;  %v14841_v49 = vcombine.high %v6525_v6, %v6529_v27  ;;  %v6565_v62 = vld [vmem:[%s16658_s5 + $0x1218] sm:$0xff]  ;;  %v6584_v6 = vld [vmem:[%s16658_s5 + $0x12b0] sm:$0xff] }
 0x879   : > { %13322 = vmatprep.subr.bf16.mxu0 %v14825_v16  ;;  %v14872_v16 = vcombine.low %v6557_v45, %v6561_v10  ;;  %v14881_v23 = vcombine.high %v6565_v62, %v6569_v11  ;;  %v6609_v28 = vld [vmem:[%s16658_s5 + $0x1378] sm:$0xff]  ;;  %v6616_v45 = vld [vmem:[%s16658_s5 + $0x13b0] sm:$0xff] }
 0x87a   : > { %12995 = vmatpush1.bf16.msra.mxu1 %v14822_v20  ;;  %v6572_v20 = vld [vmem:[%s16658_s5 + $0x1250] sm:$0xff] }
 0x87b   : > { %12996 = vmatprep.subr.bf16.mxu1 %v14831_v17  ;;  %v14878_v17 = vcombine.low %v6564_v12, %v6568_v61  ;;  %v14887_v7 = vcombine.high %v6572_v20, %v6576_v54  ;;  %v6617_v12 = vld [vmem:[%s16658_s5 + $0x13b8] sm:$0xff] }
 0x87c   : > { %13323 = vmatpush1.bf16.msra.mxu0 %v14824_v1  ;;  %v6573_v1 = vld [vmem:[%s16658_s5 + $0x1258] sm:$0xff] }
 0x87d   : > { %13324 = vmatprep.subr.bf16.mxu0 %v14833_v21  ;;  %v14880_v21 = vcombine.low %v6565_v62, %v6569_v11  ;;  %v14889_v27 = vcombine.high %v6573_v1, %v6577_v33  ;;  %v6624_v62 = vld [vmem:[%s16658_s5 + $0x13f0] sm:$0xff] }
 0x87e   : > { %12997 = vmatpush1.bf16.msra.mxu1 %v14830_v57  ;;  %v6580_v57 = vld [vmem:[%s16658_s5 + $0x1290] sm:$0xff] }
 0x87f   : > { %12998 = vmatprep.subr.bf16.mxu1 %v14839_v46  ;;  %v14886_v46 = vcombine.low %v6572_v20, %v6576_v54  ;;  %v14895_v15 = vcombine.high %v6580_v57, %v6584_v6  ;;  %v6625_v20 = vld [vmem:[%s16658_s5 + $0x13f8] sm:$0xff] }
 0x880   : > { %13325 = vmatpush1.bf16.msra.mxu0 %v14832_v50  ;;  %v6581_v50 = vld [vmem:[%s16658_s5 + $0x1298] sm:$0xff] }
 0x881   : > { %13326 = vmatprep.subr.bf16.mxu0 %v14841_v49  ;;  %v14888_v49 = vcombine.low %v6573_v1, %v6577_v33  ;;  %v14897_v0 = vcombine.high %v6581_v50, %v6585_v32  ;;  %v6632_v1 = vld [vmem:[%s16658_s5 + $0x1430] sm:$0xff] }
 0x882   : > { %12999 = vmatpush1.bf16.msra.mxu1 %v14838_v43  ;;  %v6588_v43 = vld [vmem:[%s16658_s5 + $0x12d0] sm:$0xff] }
 0x883   : > { %13000 = vmatprep.subr.bf16.mxu1 %v14847_v55  ;;  %v14894_v55 = vcombine.low %v6580_v57, %v6584_v6  ;;  %v14903_v36 = vcombine.high %v6588_v43, %v6592_v59  ;;  %v6633_v57 = vld [vmem:[%s16658_s5 + $0x1438] sm:$0xff] }
 0x884   : > { %13327 = vmatpush1.bf16.msra.mxu0 %v14840_v22  ;;  %v6589_v22 = vld [vmem:[%s16658_s5 + $0x12d8] sm:$0xff] }
 0x885   : > { %13328 = vmatprep.subr.bf16.mxu0 %v14849_v42  ;;  %v14896_v42 = vcombine.low %v6581_v50, %v6585_v32  ;;  %v14905_v31 = vcombine.high %v6589_v22, %v6593_v24  ;;  %v6640_v50 = vld [vmem:[%s16658_s5 + $0x1470] sm:$0xff] }
 0x886   : > { %13001 = vmatpush1.bf16.msra.mxu1 %v14846_v13  ;;  %v6596_v13 = vld [vmem:[%s16658_s5 + $0x1310] sm:$0xff] }
 0x887   : > { %13002 = vmatprep.subr.bf16.mxu1 %v14855_v5  ;;  %v14902_v5 = vcombine.low %v6588_v43, %v6592_v59  ;;  %v14911_v53 = vcombine.high %v6596_v13, %v6600_v30  ;;  %v6641_v43 = vld [vmem:[%s16658_s5 + $0x1478] sm:$0xff] }
 0x888   : > { %13329 = vmatpush1.bf16.msra.mxu0 %v14848_v44  ;;  %v6597_v44 = vld [vmem:[%s16658_s5 + $0x1318] sm:$0xff] }
 0x889   : > { %13330 = vmatprep.subr.bf16.mxu0 %v14857_v9  ;;  %v14904_v9 = vcombine.low %v6589_v22, %v6593_v24  ;;  %v14913_v41 = vcombine.high %v6597_v44, %v6601_v37  ;;  %v6648_v22 = vld [vmem:[%s16658_s5 + $0x14b0] sm:$0xff] }
 0x88a   : > { %13003 = vmatpush1.bf16.msra.mxu1 %v14854_v60  ;;  %v6604_v60 = vld [vmem:[%s16658_s5 + $0x1350] sm:$0xff] }
 0x88b   : > { %13004 = vmatprep.subr.bf16.mxu1 %v14863_v52  ;;  %v14910_v52 = vcombine.low %v6596_v13, %v6600_v30  ;;  %v14919_v56 = vcombine.high %v6604_v60, %v6608_v14  ;;  %v6649_v13 = vld [vmem:[%s16658_s5 + $0x14b8] sm:$0xff] }
 0x88c   : > { %13331 = vmatpush1.bf16.msra.mxu0 %v14856_v4  ;;  %v6605_v4 = vld [vmem:[%s16658_s5 + $0x1358] sm:$0xff] }
 0x88d   : > { %13332 = vmatprep.subr.bf16.mxu0 %v14865_v25  ;;  %v14912_v25 = vcombine.low %v6597_v44, %v6601_v37  ;;  %v14921_v10 = vcombine.high %v6605_v4, %v6609_v28  ;;  %v6656_v44 = vld [vmem:[%s16658_s5 + $0x14f0] sm:$0xff] }
 0x88e   : > { %13005 = vmatpush1.bf16.msra.mxu1 %v14862_v51  ;;  %v6612_v51 = vld [vmem:[%s16658_s5 + $0x1390] sm:$0xff] }
 0x88f   : > { %13006 = vmatprep.subr.bf16.mxu1 %v14871_v18  ;;  %v14918_v18 = vcombine.low %v6604_v60, %v6608_v14  ;;  %v14927_v61 = vcombine.high %v6612_v51, %v6616_v45  ;;  %v6657_v60 = vld [vmem:[%s16658_s5 + $0x14f8] sm:$0xff] }
 0x890   : > { %13333 = vmatpush1.bf16.msra.mxu0 %v14864_v38  ;;  %v6613_v38 = vld [vmem:[%s16658_s5 + $0x1398] sm:$0xff] }
 0x891   : > { %13334 = vmatprep.subr.bf16.mxu0 %v14873_v34  ;;  %v14920_v34 = vcombine.low %v6605_v4, %v6609_v28  ;;  %v14929_v11 = vcombine.high %v6613_v38, %v6617_v12  ;;  %v6661_v28 = vld [vmem:[%s16658_s5 + $0x1518] sm:$0xff] }
 0x892   : > { %13007 = vmatpush1.bf16.msra.mxu1 %v14870_v26  ;;  %v6620_v26 = vld [vmem:[%s16658_s5 + $0x13d0] sm:$0xff] }
 0x893   : > { %13008 = vmatprep.subr.bf16.mxu1 %v14879_v47  ;;  %v14926_v47 = vcombine.low %v6612_v51, %v6616_v45  ;;  %v14935_v54 = vcombine.high %v6620_v26, %v6624_v62  ;;  %v6668_v45 = vld [vmem:[%s16658_s5 + $0x1550] sm:$0xff] }
 0x894   : > { %13335 = vmatpush1.bf16.msra.mxu0 %v14872_v16  ;;  %v6621_v16 = vld [vmem:[%s16658_s5 + $0x13d8] sm:$0xff] }
 0x895   : > { %13336 = vmatprep.subr.bf16.mxu0 %v14881_v23  ;;  %v14928_v23 = vcombine.low %v6613_v38, %v6617_v12  ;;  %v14937_v33 = vcombine.high %v6621_v16, %v6625_v20  ;;  %v6669_v12 = vld [vmem:[%s16658_s5 + $0x1558] sm:$0xff] }
 0x896   : > { %13009 = vmatpush1.bf16.msra.mxu1 %v14878_v17  ;;  %v6628_v17 = vld [vmem:[%s16658_s5 + $0x1410] sm:$0xff] }
 0x897   : > { %13010 = vmatprep.subr.bf16.mxu1 %v14887_v7  ;;  %v14934_v7 = vcombine.low %v6620_v26, %v6624_v62  ;;  %v14943_v6 = vcombine.high %v6628_v17, %v6632_v1  ;;  %v6676_v62 = vld [vmem:[%s16658_s5 + $0x1590] sm:$0xff] }
 0x898   : > { %13337 = vmatpush1.bf16.msra.mxu0 %v14880_v21  ;;  %v6629_v21 = vld [vmem:[%s16658_s5 + $0x1418] sm:$0xff] }
 0x899   : > { %13338 = vmatprep.subr.bf16.mxu0 %v14889_v27  ;;  %v14936_v27 = vcombine.low %v6621_v16, %v6625_v20  ;;  %v14945_v32 = vcombine.high %v6629_v21, %v6633_v57  ;;  %v6677_v20 = vld [vmem:[%s16658_s5 + $0x1598] sm:$0xff] }
 0x89a   : > { %13011 = vmatpush1.bf16.msra.mxu1 %v14886_v46  ;;  %v6636_v46 = vld [vmem:[%s16658_s5 + $0x1450] sm:$0xff] }
 0x89b   : > { %13012 = vmatprep.subr.bf16.mxu1 %v14895_v15  ;;  %v14942_v15 = vcombine.low %v6628_v17, %v6632_v1  ;;  %v14951_v59 = vcombine.high %v6636_v46, %v6640_v50  ;;  %v6684_v1 = vld [vmem:[%s16658_s5 + $0x15d0] sm:$0xff] }
 0x89c   : > { %13339 = vmatpush1.bf16.msra.mxu0 %v14888_v49  ;;  %v6637_v49 = vld [vmem:[%s16658_s5 + $0x1458] sm:$0xff] }
 0x89d   : > { %13340 = vmatprep.subr.bf16.mxu0 %v14897_v0  ;;  %v14944_v0 = vcombine.low %v6629_v21, %v6633_v57  ;;  %v14953_v24 = vcombine.high %v6637_v49, %v6641_v43  ;;  %v6685_v57 = vld [vmem:[%s16658_s5 + $0x15d8] sm:$0xff] }
 0x89e   : > { %13013 = vmatpush1.bf16.msra.mxu1 %v14894_v55  ;;  %v6644_v55 = vld [vmem:[%s16658_s5 + $0x1490] sm:$0xff] }
 0x89f   : > { %13014 = vmatprep.subr.bf16.mxu1 %v14903_v36  ;;  %v14950_v36 = vcombine.low %v6636_v46, %v6640_v50  ;;  %v14959_v30 = vcombine.high %v6644_v55, %v6648_v22  ;;  %v6692_v50 = vld [vmem:[%s16658_s5 + $0x1610] sm:$0xff] }
 0x8a0   : > { %13341 = vmatpush1.bf16.msra.mxu0 %v14896_v42  ;;  %v6645_v42 = vld [vmem:[%s16658_s5 + $0x1498] sm:$0xff] }
 0x8a1   : > { %13342 = vmatprep.subr.bf16.mxu0 %v14905_v31  ;;  %v14952_v31 = vcombine.low %v6637_v49, %v6641_v43  ;;  %v14961_v37 = vcombine.high %v6645_v42, %v6649_v13  ;;  %v14960_v14 = vcombine.low %v6645_v42, %v6649_v13  ;;  %v6693_v43 = vld [vmem:[%s16658_s5 + $0x1618] sm:$0xff] }
 0x8a2   : > { %13015 = vmatpush1.bf16.msra.mxu1 %v14902_v5  ;;  %v6652_v5 = vld [vmem:[%s16658_s5 + $0x14d0] sm:$0xff]  ;;  %v6701_v13 = vld [vmem:[%s16658_s5 + $0x1658] sm:$0xff] }
 0x8a3   : > { %13016 = vmatprep.subr.bf16.mxu1 %v14911_v53  ;;  %v14958_v53 = vcombine.low %v6644_v55, %v6648_v22  ;;  %v14966_v4 = vcombine.low %v6652_v5, %v6656_v44  ;;  %v6700_v22 = vld [vmem:[%s16658_s5 + $0x1650] sm:$0xff] }
 0x8a4   : > { %13343 = vmatpush1.bf16.msra.mxu0 %v14904_v9  ;;  %v6653_v9 = vld [vmem:[%s16658_s5 + $0x14d8] sm:$0xff] }
 0x8a5   : > { %13344 = vmatprep.subr.bf16.mxu0 %v14913_v41  ;;  %v6660_v41 = vld [vmem:[%s16658_s5 + $0x1510] sm:$0xff]  ;;  %v14968_v51 = vcombine.low %v6653_v9, %v6657_v60 }
 0x8a6   : > { %13017 = vmatpush1.bf16.msra.mxu1 %v14910_v52  ;;  %v6664_v52 = vld [vmem:[%s16658_s5 + $0x1530] sm:$0xff] }
 0x8a7   : > { %13018 = vmatprep.subr.bf16.mxu1 %v14919_v56  ;;  %v6665_v56 = vld [vmem:[%s16658_s5 + $0x1538] sm:$0xff]  ;;  %v14974_v38 = vcombine.low %v6660_v41, %v6664_v52 }
 0x8a8   : > { %13345 = vmatpush1.bf16.msra.mxu0 %v14912_v25  ;;  %v14975_v25 = vcombine.high %v6660_v41, %v6664_v52  ;;  %v14976_v26 = vcombine.low %v6661_v28, %v6665_v56  ;;  %v6716_v52 = vld [vmem:[%s16658_s5 + $0x16d0] sm:$0xff] }
 0x8a9   : > { %13346 = vmatprep.subr.bf16.mxu0 %v14921_v10  ;;  %v6672_v10 = vld [vmem:[%s16658_s5 + $0x1570] sm:$0xff] }
 0x8aa   : > { %13019 = vmatpush1.bf16.msra.mxu1 %v14918_v18  ;;  %v14977_v18 = vcombine.high %v6661_v28, %v6665_v56  ;;  %v14982_v16 = vcombine.low %v6668_v45, %v6672_v10  ;;  %v6717_v56 = vld [vmem:[%s16658_s5 + $0x16d8] sm:$0xff] }
 0x8ab   : > { %13020 = vmatprep.subr.bf16.mxu1 %v14927_v61  ;;  %v6673_v61 = vld [vmem:[%s16658_s5 + $0x1578] sm:$0xff] }
 0x8ac   : > { %13347 = vmatpush1.bf16.msra.mxu0 %v14920_v34  ;;  %v14983_v34 = vcombine.high %v6668_v45, %v6672_v10  ;;  %v14984_v17 = vcombine.low %v6669_v12, %v6673_v61  ;;  %v6724_v10 = vld [vmem:[%s16658_s5 + $0x1710] sm:$0xff] }
 0x8ad   : > { %13348 = vmatprep.subr.bf16.mxu0 %v14929_v11  ;;  %v6680_v11 = vld [vmem:[%s16658_s5 + $0x15b0] sm:$0xff] }
 0x8ae   : > { %13021 = vmatpush1.bf16.msra.mxu1 %v14926_v47  ;;  %v14985_v47 = vcombine.high %v6669_v12, %v6673_v61  ;;  %v14990_v21 = vcombine.low %v6676_v62, %v6680_v11  ;;  %v6725_v61 = vld [vmem:[%s16658_s5 + $0x1718] sm:$0xff] }
 0x8af   : > { %13022 = vmatprep.subr.bf16.mxu1 %v14935_v54  ;;  %v6681_v54 = vld [vmem:[%s16658_s5 + $0x15b8] sm:$0xff] }
 0x8b0   : > { %13349 = vmatpush1.bf16.msra.mxu0 %v14928_v23  ;;  %v14991_v23 = vcombine.high %v6676_v62, %v6680_v11  ;;  %v14992_v46 = vcombine.low %v6677_v20, %v6681_v54  ;;  %v6732_v11 = vld [vmem:[%s16658_s5 + $0x1750] sm:$0xff] }
 0x8b1   : > { %13350 = vmatprep.subr.bf16.mxu0 %v14937_v33  ;;  %v6688_v33 = vld [vmem:[%s16658_s5 + $0x15f0] sm:$0xff] }
 0x8b2   : > { %13023 = vmatpush1.bf16.msra.mxu1 %v14934_v7  ;;  %v14993_v7 = vcombine.high %v6677_v20, %v6681_v54  ;;  %v14998_v49 = vcombine.low %v6684_v1, %v6688_v33  ;;  %v6733_v54 = vld [vmem:[%s16658_s5 + $0x1758] sm:$0xff] }
 0x8b3   : > { %13033 = vmatprep.subr.bf16.mxu1 %v14943_v6  ;;  %v6689_v6 = vld [vmem:[%s16658_s5 + $0x15f8] sm:$0xff] }
 0x8b4   : > { %13351 = vmatpush1.bf16.msra.mxu0 %v14936_v27  ;;  %v14999_v27 = vcombine.high %v6684_v1, %v6688_v33  ;;  %v15000_v55 = vcombine.low %v6685_v57, %v6689_v6  ;;  %v6740_v33 = vld [vmem:[%s16658_s5 + $0x1790] sm:$0xff] }
 0x8b5   : > { %13025 = vmatmul.mubr.bf16.vlgmr.msra.gmra.mrb[24].mxu1 %v18116_v29  ;;  %13361 = vmatprep.subr.bf16.mxu0 %v14945_v32  ;;  %v6696_v32 = vld [vmem:[%s16658_s5 + $0x1630] sm:$0xff] }
 0x8b6   : > { %13034 = vmatpush1.bf16.msra.mxu1 %v14942_v15  ;;  %13065 = vmatprep.mubr.bf16.mxu1 %v18118_v39  ;;  %v15001_v15 = vcombine.high %v6685_v57, %v6689_v6  ;;  %v15006_v42 = vcombine.low %v6692_v50, %v6696_v32  ;;  %v6741_v6 = vld [vmem:[%s16658_s5 + $0x1798] sm:$0xff] }
 0x8b7   : > { %13353 = vmatmul.mubr.bf16.vlgmr.msra.gmra.mrb[28].mxu0 %v18116_v29  ;;  %13035 = vmatprep.subr.bf16.mxu1 %v14951_v59  ;;  %v14967_v29 = vcombine.high %v6652_v5, %v6656_v44  ;;  %v6697_v59 = vld [vmem:[%s16658_s5 + $0x1638] sm:$0xff]  ;;  %v6708_v44 = vld [vmem:[%s16658_s5 + $0x1690] sm:$0xff] }
 0x8b8   : > { %13362 = vmatpush1.bf16.msra.mxu0 %v14944_v0  ;;  %13393 = vmatprep.mubr.bf16.mxu0 %v18118_v39  ;;  %v14969_v39 = vcombine.high %v6653_v9, %v6657_v60  ;;  %v15007_v0 = vcombine.high %v6692_v50, %v6696_v32  ;;  %v15008_v5 = vcombine.low %v6693_v43, %v6697_v59  ;;  %v6709_v60 = vld [vmem:[%s16658_s5 + $0x1698] sm:$0xff]  ;;  %v6748_v32 = vld [vmem:[%s16658_s5 + $0x17d0] sm:$0xff] }
 0x8b9   : > { %13363 = vmatprep.subr.bf16.mxu0 %v14953_v24  ;;  %v6704_v24 = vld [vmem:[%s16658_s5 + $0x1670] sm:$0xff] }
 0x8ba   : > { %13036 = vmatpush1.bf16.msra.mxu1 %v14950_v36  ;;  %v15009_v36 = vcombine.high %v6693_v43, %v6697_v59  ;;  %v15014_v9 = vcombine.low %v6700_v22, %v6704_v24  ;;  %v6749_v59 = vld [vmem:[%s16658_s5 + $0x17d8] sm:$0xff] }
 0x8bb   : > { %13037 = vmatprep.subr.bf16.mxu1 %v14959_v30  ;;  %v6705_v30 = vld [vmem:[%s16658_s5 + $0x1678] sm:$0xff] }
 0x8bc   : > { %13364 = vmatpush1.bf16.msra.mxu0 %v14952_v31  ;;  %v15015_v31 = vcombine.high %v6700_v22, %v6704_v24  ;;  %v15016_v41 = vcombine.low %v6701_v13, %v6705_v30  ;;  %v6756_v24 = vld [vmem:[%s16658_s5 + $0x1810] sm:$0xff] }
 0x8bd   : > { %13365 = vmatprep.subr.bf16.mxu0 %v14961_v37  ;;  %v6712_v37 = vld [vmem:[%s16658_s5 + $0x16b0] sm:$0xff] }
 0x8be   : > { %13038 = vmatpush1.bf16.msra.mxu1 %v14958_v53  ;;  %v15017_v53 = vcombine.high %v6701_v13, %v6705_v30  ;;  %v15022_v28 = vcombine.low %v6708_v44, %v6712_v37  ;;  %v6757_v30 = vld [vmem:[%s16658_s5 + $0x1818] sm:$0xff] }
 0x8bf   : > { %13039 = vmatprep.subr.bf16.mxu1 %v14967_v29  ;;  %v6713_v29 = vld [vmem:[%s16658_s5 + $0x16b8] sm:$0xff] }
 0x8c0   : > { %13366 = vmatpush1.bf16.msra.mxu0 %v14960_v14  ;;  %v15023_v14 = vcombine.high %v6708_v44, %v6712_v37  ;;  %v15024_v45 = vcombine.low %v6709_v60, %v6713_v29  ;;  %v6764_v37 = vld [vmem:[%s16658_s5 + $0x1850] sm:$0xff] }
 0x8c1   : > { %13367 = vmatprep.subr.bf16.mxu0 %v14969_v39  ;;  %v6720_v39 = vld [vmem:[%s16658_s5 + $0x16f0] sm:$0xff] }
 0x8c2   : > { %13040 = vmatpush1.bf16.msra.mxu1 %v14966_v4  ;;  %v15025_v4 = vcombine.high %v6709_v60, %v6713_v29  ;;  %v15030_v12 = vcombine.low %v6716_v52, %v6720_v39  ;;  %v6765_v29 = vld [vmem:[%s16658_s5 + $0x1858] sm:$0xff] }
 0x8c3   : > { %13041 = vmatprep.subr.bf16.mxu1 %v14975_v25  ;;  %v6721_v25 = vld [vmem:[%s16658_s5 + $0x16f8] sm:$0xff] }
 0x8c4   : > { %13368 = vmatpush1.bf16.msra.mxu0 %v14968_v51  ;;  %v15031_v51 = vcombine.high %v6716_v52, %v6720_v39  ;;  %v15032_v62 = vcombine.low %v6717_v56, %v6721_v25  ;;  %v6772_v39 = vld [vmem:[%s16658_s5 + $0x1890] sm:$0xff] }
 0x8c5   : > { %13369 = vmatprep.subr.bf16.mxu0 %v14977_v18  ;;  %v6728_v18 = vld [vmem:[%s16658_s5 + $0x1730] sm:$0xff] }
 0x8c6   : > { %13042 = vmatpush1.bf16.msra.mxu1 %v14974_v38  ;;  %v15033_v38 = vcombine.high %v6717_v56, %v6721_v25  ;;  %v15038_v20 = vcombine.low %v6724_v10, %v6728_v18  ;;  %v6773_v25 = vld [vmem:[%s16658_s5 + $0x1898] sm:$0xff] }
 0x8c7   : > { %13043 = vmatprep.subr.bf16.mxu1 %v14983_v34  ;;  %v6729_v34 = vld [vmem:[%s16658_s5 + $0x1738] sm:$0xff] }
 0x8c8   : > { %13370 = vmatpush1.bf16.msra.mxu0 %v14976_v26  ;;  %v15039_v26 = vcombine.high %v6724_v10, %v6728_v18  ;;  %v15040_v1 = vcombine.low %v6725_v61, %v6729_v34  ;;  %v6780_v18 = vld [vmem:[%s16658_s5 + $0x18d0] sm:$0xff] }
 0x8c9   : > { %13371 = vmatprep.subr.bf16.mxu0 %v14985_v47  ;;  %v6736_v47 = vld [vmem:[%s16658_s5 + $0x1770] sm:$0xff] }
 0x8ca   : > { %13044 = vmatpush1.bf16.msra.mxu1 %v14982_v16  ;;  %v15041_v16 = vcombine.high %v6725_v61, %v6729_v34  ;;  %v15046_v57 = vcombine.low %v6732_v11, %v6736_v47  ;;  %v6781_v34 = vld [vmem:[%s16658_s5 + $0x18d8] sm:$0xff] }
 0x8cb   : > { %13045 = vmatprep.subr.bf16.mxu1 %v14991_v23  ;;  %v6737_v23 = vld [vmem:[%s16658_s5 + $0x1778] sm:$0xff] }
 0x8cc   : > { %13372 = vmatpush1.bf16.msra.mxu0 %v14984_v17  ;;  %v15047_v17 = vcombine.high %v6732_v11, %v6736_v47  ;;  %v15048_v50 = vcombine.low %v6733_v54, %v6737_v23  ;;  %v6788_v11 = vld [vmem:[%s16658_s5 + $0x1910] sm:$0xff] }
 0x8cd   : > { %13373 = vmatprep.subr.bf16.mxu0 %v14993_v7  ;;  %v6744_v7 = vld [vmem:[%s16658_s5 + $0x17b0] sm:$0xff] }
 0x8ce   : > { %13046 = vmatpush1.bf16.msra.mxu1 %v14990_v21  ;;  %v15049_v21 = vcombine.high %v6733_v54, %v6737_v23  ;;  %v15054_v43 = vcombine.low %v6740_v33, %v6744_v7  ;;  %v6792_v47 = vld [vmem:[%s16658_s5 + $0x1930] sm:$0xff]  ;;  %v6793_v54 = vld [vmem:[%s16658_s5 + $0x1938] sm:$0xff] }
 0x8cf   : > { %13047 = vmatprep.subr.bf16.mxu1 %v14999_v27  ;;  %v6745_v27 = vld [vmem:[%s16658_s5 + $0x17b8] sm:$0xff]  ;;  %v15103_v23 = vcombine.high %v6788_v11, %v6792_v47 }
 0x8d0   : > { %13374 = vmatpush1.bf16.msra.mxu0 %v14992_v46  ;;  %v15055_v46 = vcombine.high %v6740_v33, %v6744_v7  ;;  %v15056_v22 = vcombine.low %v6741_v6, %v6745_v27  ;;  %v6800_v33 = vld [vmem:[%s16658_s5 + $0x1970] sm:$0xff] }
 0x8d1   : > { %13375 = vmatprep.subr.bf16.mxu0 %v15001_v15  ;;  %v6752_v15 = vld [vmem:[%s16658_s5 + $0x17f0] sm:$0xff] }
 0x8d2   : > { %13048 = vmatpush1.bf16.msra.mxu1 %v14998_v49  ;;  %v15057_v49 = vcombine.high %v6741_v6, %v6745_v27  ;;  %v15062_v13 = vcombine.low %v6748_v32, %v6752_v15  ;;  %v6801_v6 = vld [vmem:[%s16658_s5 + $0x1978] sm:$0xff] }
 0x8d3   : > { %13049 = vmatprep.subr.bf16.mxu1 %v15007_v0  ;;  %v6753_v0 = vld [vmem:[%s16658_s5 + $0x17f8] sm:$0xff] }
 0x8d4   : > { %13376 = vmatpush1.bf16.msra.mxu0 %v15000_v55  ;;  %v15063_v55 = vcombine.high %v6748_v32, %v6752_v15  ;;  %v15064_v44 = vcombine.low %v6749_v59, %v6753_v0  ;;  %v6808_v32 = vld [vmem:[%s16658_s5 + $0x19b0] sm:$0xff] }
 0x8d5   : > { %13377 = vmatprep.subr.bf16.mxu0 %v15009_v36  ;;  %v6760_v36 = vld [vmem:[%s16658_s5 + $0x1830] sm:$0xff] }
 0x8d6   : > { %13050 = vmatpush1.bf16.msra.mxu1 %v15006_v42  ;;  %v15065_v42 = vcombine.high %v6749_v59, %v6753_v0  ;;  %v15070_v60 = vcombine.low %v6756_v24, %v6760_v36  ;;  %v6809_v59 = vld [vmem:[%s16658_s5 + $0x19b8] sm:$0xff] }
 0x8d7   : > { %13051 = vmatprep.subr.bf16.mxu1 %v15015_v31  ;;  %v6761_v31 = vld [vmem:[%s16658_s5 + $0x1838] sm:$0xff] }
 0x8d8   : > { %13378 = vmatpush1.bf16.msra.mxu0 %v15008_v5  ;;  %v15071_v5 = vcombine.high %v6756_v24, %v6760_v36  ;;  %v15072_v52 = vcombine.low %v6757_v30, %v6761_v31  ;;  %v6816_v24 = vld [vmem:[%s16658_s5 + $0x19f0] sm:$0xff] }
 0x8d9   : > { %13379 = vmatprep.subr.bf16.mxu0 %v15017_v53  ;;  %v6768_v53 = vld [vmem:[%s16658_s5 + $0x1870] sm:$0xff] }
 0x8da   : > { %13052 = vmatpush1.bf16.msra.mxu1 %v15014_v9  ;;  %v15073_v9 = vcombine.high %v6757_v30, %v6761_v31  ;;  %v15078_v56 = vcombine.low %v6764_v37, %v6768_v53  ;;  %v6817_v30 = vld [vmem:[%s16658_s5 + $0x19f8] sm:$0xff] }
 0x8db   : > { %13053 = vmatprep.subr.bf16.mxu1 %v15023_v14  ;;  %v6769_v14 = vld [vmem:[%s16658_s5 + $0x1878] sm:$0xff] }
 0x8dc   : > { %13380 = vmatpush1.bf16.msra.mxu0 %v15016_v41  ;;  %v15079_v41 = vcombine.high %v6764_v37, %v6768_v53  ;;  %v15080_v10 = vcombine.low %v6765_v29, %v6769_v14  ;;  %v6824_v37 = vld [vmem:[%s16658_s5 + $0x1a30] sm:$0xff] }
 0x8dd   : > { %13381 = vmatprep.subr.bf16.mxu0 %v15025_v4  ;;  %v6776_v4 = vld [vmem:[%s16658_s5 + $0x18b0] sm:$0xff] }
 0x8de   : > { %13054 = vmatpush1.bf16.msra.mxu1 %v15022_v28  ;;  %v15081_v28 = vcombine.high %v6765_v29, %v6769_v14  ;;  %v15086_v61 = vcombine.low %v6772_v39, %v6776_v4  ;;  %v6825_v29 = vld [vmem:[%s16658_s5 + $0x1a38] sm:$0xff] }
 0x8df   : > { %13055 = vmatprep.subr.bf16.mxu1 %v15031_v51  ;;  %v6777_v51 = vld [vmem:[%s16658_s5 + $0x18b8] sm:$0xff] }
 0x8e0   : > { %13382 = vmatpush1.bf16.msra.mxu0 %v15024_v45  ;;  %v15087_v45 = vcombine.high %v6772_v39, %v6776_v4  ;;  %v6832_v39 = vld [vmem:[%s16658_s5 + $0x1a70] sm:$0xff] }
 0x8e1   : > { %13383 = vmatprep.subr.bf16.mxu0 %v15033_v38  ;;  %v6784_v38 = vld [vmem:[%s16658_s5 + $0x18f0] sm:$0xff] }
 0x8e2   : > { %13056 = vmatpush1.bf16.msra.mxu1 %v15030_v12  ;;  %v15089_v12 = vcombine.high %v6773_v25, %v6777_v51 }
 0x8e3   : > { %13057 = vmatprep.subr.bf16.mxu1 %v15039_v26  ;;  %v6785_v26 = vld [vmem:[%s16658_s5 + $0x18f8] sm:$0xff] }
 0x8e4   : > { %13384 = vmatpush1.bf16.msra.mxu0 %v15032_v62  ;;  %v15088_v62 = vcombine.low %v6773_v25, %v6777_v51  ;;  %v6833_v25 = vld [vmem:[%s16658_s5 + $0x1a78] sm:$0xff] }
 0x8e5   : > { %13385 = vmatprep.subr.bf16.mxu0 %v15041_v16  ;;  %v15094_v16 = vcombine.low %v6780_v18, %v6784_v38 }
 0x8e6   : > { %13058 = vmatpush1.bf16.msra.mxu1 %v15038_v20  ;;  %v6789_v20 = vld [vmem:[%s16658_s5 + $0x1918] sm:$0xff] }
 0x8e7   : > { %13059 = vmatprep.subr.bf16.mxu1 %v15047_v17  ;;  %v15096_v17 = vcombine.low %v6781_v34, %v6785_v26  ;;  %v15105_v7 = vcombine.high %v6789_v20, %v6793_v54 }
 0x8e8   : > { %13386 = vmatpush1.bf16.msra.mxu0 %v15040_v1  ;;  %v6796_v1 = vld [vmem:[%s16658_s5 + $0x1950] sm:$0xff] }
 0x8e9   : > { %13387 = vmatprep.subr.bf16.mxu0 %v15049_v21  ;;  %v15102_v21 = vcombine.low %v6788_v11, %v6792_v47  ;;  %v15111_v27 = vcombine.high %v6796_v1, %v6800_v33  ;;  %v6848_v11 = vld [vmem:[%s16658_s5 + $0x1af0] sm:$0xff] }
 0x8ea   : > { %13060 = vmatpush1.bf16.msra.mxu1 %v15046_v57  ;;  %v6797_v57 = vld [vmem:[%s16658_s5 + $0x1958] sm:$0xff] }
 0x8eb   : > { %13061 = vmatprep.subr.bf16.mxu1 %v15055_v46  ;;  %v15104_v46 = vcombine.low %v6789_v20, %v6793_v54  ;;  %v15113_v15 = vcombine.high %v6797_v57, %v6801_v6  ;;  %v6849_v20 = vld [vmem:[%s16658_s5 + $0x1af8] sm:$0xff] }
 0x8ec   : > { %13388 = vmatpush1.bf16.msra.mxu0 %v15048_v50  ;;  %v6804_v50 = vld [vmem:[%s16658_s5 + $0x1990] sm:$0xff] }
 0x8ed   : > { %13389 = vmatprep.subr.bf16.mxu0 %v15057_v49  ;;  %v15110_v49 = vcombine.low %v6796_v1, %v6800_v33  ;;  %v15119_v0 = vcombine.high %v6804_v50, %v6808_v32  ;;  %v6856_v1 = vld [vmem:[%s16658_s5 + $0x1b30] sm:$0xff] }
 0x8ee   : > { %13062 = vmatpush1.bf16.msra.mxu1 %v15054_v43  ;;  %v6805_v43 = vld [vmem:[%s16658_s5 + $0x1998] sm:$0xff] }
 0x8ef   : > { %13063 = vmatprep.subr.bf16.mxu1 %v15063_v55  ;;  %v15112_v55 = vcombine.low %v6797_v57, %v6801_v6  ;;  %v15121_v36 = vcombine.high %v6805_v43, %v6809_v59  ;;  %v6857_v57 = vld [vmem:[%s16658_s5 + $0x1b38] sm:$0xff] }
 0x8f0   : > { %13390 = vmatpush1.bf16.msra.mxu0 %v15056_v22  ;;  %v6812_v22 = vld [vmem:[%s16658_s5 + $0x19d0] sm:$0xff] }
 0x8f1   : > { %13391 = vmatprep.subr.bf16.mxu0 %v15065_v42  ;;  %v15118_v42 = vcombine.low %v6804_v50, %v6808_v32  ;;  %v15127_v31 = vcombine.high %v6812_v22, %v6816_v24  ;;  %v6864_v50 = vld [vmem:[%s16658_s5 + $0x1b70] sm:$0xff] }
 0x8f2   : > { %13064 = vmatpush1.bf16.msra.mxu1 %v15062_v13  ;;  %v6813_v13 = vld [vmem:[%s16658_s5 + $0x19d8] sm:$0xff] }
 0x8f3   : > { %13074 = vmatprep.subr.bf16.mxu1 %v15071_v5  ;;  %v15120_v5 = vcombine.low %v6805_v43, %v6809_v59  ;;  %v15129_v53 = vcombine.high %v6813_v13, %v6817_v30  ;;  %v6865_v43 = vld [vmem:[%s16658_s5 + $0x1b78] sm:$0xff] }
 0x8f4   : > { %13392 = vmatpush1.bf16.msra.mxu0 %v15064_v44  ;;  %v6820_v44 = vld [vmem:[%s16658_s5 + $0x1a10] sm:$0xff] }
 0x8f5   : > { %13066 = vmatmul.mubr.bf16.vlgmr.msra.gmra.mrb[24].mxu1 %v18190_v8  ;;  %13402 = vmatprep.subr.bf16.mxu0 %v15073_v9  ;;  %v15126_v9 = vcombine.low %v6812_v22, %v6816_v24  ;;  %v15135_v14 = vcombine.high %v6820_v44, %v6824_v37  ;;  %v6872_v22 = vld [vmem:[%s16658_s5 + $0x1bb0] sm:$0xff] }
 0x8f6   : > { %13075 = vmatpush1.bf16.msra.mxu1 %v15070_v60  ;;  %13106 = vmatprep.mubr.bf16.mxu1 %v18192_v63  ;;  %v6821_v60 = vld [vmem:[%s16658_s5 + $0x1a18] sm:$0xff] }
 0x8f7   : > { %13394 = vmatmul.mubr.bf16.vlgmr.msra.gmra.mrb[28].mxu0 %v18190_v8  ;;  %13076 = vmatprep.subr.bf16.mxu1 %v15079_v41  ;;  %v15095_v8 = vcombine.high %v6780_v18, %v6784_v38  ;;  %v15128_v41 = vcombine.low %v6813_v13, %v6817_v30  ;;  %v15137_v4 = vcombine.high %v6821_v60, %v6825_v29  ;;  %v6840_v18 = vld [vmem:[%s16658_s5 + $0x1ab0] sm:$0xff]  ;;  %v6873_v13 = vld [vmem:[%s16658_s5 + $0x1bb8] sm:$0xff] }
 0x8f8   : > { %13403 = vmatpush1.bf16.msra.mxu0 %v15072_v52  ;;  %13434 = vmatprep.mubr.bf16.mxu0 %v18192_v63  ;;  %v15097_v63 = vcombine.high %v6781_v34, %v6785_v26  ;;  %v6828_v52 = vld [vmem:[%s16658_s5 + $0x1a50] sm:$0xff]  ;;  %v6841_v34 = vld [vmem:[%s16658_s5 + $0x1ab8] sm:$0xff] }
 0x8f9   : > { %13404 = vmatprep.subr.bf16.mxu0 %v15081_v28  ;;  %v15134_v28 = vcombine.low %v6820_v44, %v6824_v37  ;;  %v15143_v51 = vcombine.high %v6828_v52, %v6832_v39  ;;  %v6880_v44 = vld [vmem:[%s16658_s5 + $0x1bf0] sm:$0xff] }
 0x8fa   : > { %13077 = vmatpush1.bf16.msra.mxu1 %v15078_v56  ;;  %v6829_v56 = vld [vmem:[%s16658_s5 + $0x1a58] sm:$0xff] }
 0x8fb   : > { %13078 = vmatprep.subr.bf16.mxu1 %v15087_v45  ;;  %v15136_v45 = vcombine.low %v6821_v60, %v6825_v29  ;;  %v15145_v38 = vcombine.high %v6829_v56, %v6833_v25  ;;  %v6881_v60 = vld [vmem:[%s16658_s5 + $0x1bf8] sm:$0xff] }
 0x8fc   : > { %13405 = vmatpush1.bf16.msra.mxu0 %v15080_v10  ;;  %v6836_v10 = vld [vmem:[%s16658_s5 + $0x1a90] sm:$0xff] }
 0x8fd   : > { %13406 = vmatprep.subr.bf16.mxu0 %v15089_v12  ;;  %v15142_v12 = vcombine.low %v6828_v52, %v6832_v39  ;;  %v15151_v26 = vcombine.high %v6836_v10, %v6840_v18  ;;  %v6888_v52 = vld [vmem:[%s16658_s5 + $0x1c30] sm:$0xff] }
 0x8fe   : > { %13079 = vmatpush1.bf16.msra.mxu1 %v15086_v61  ;;  %v6837_v61 = vld [vmem:[%s16658_s5 + $0x1a98] sm:$0xff] }
 0x8ff   : > { %13080 = vmatprep.subr.bf16.mxu1 %v15095_v8  ;;  %v15144_v8 = vcombine.low %v6829_v56, %v6833_v25  ;;  %v15153_v47 = vcombine.high %v6837_v61, %v6841_v34  ;;  %v6889_v56 = vld [vmem:[%s16658_s5 + $0x1c38] sm:$0xff] }
 0x900   : > { %13407 = vmatpush1.bf16.msra.mxu0 %v15088_v62  ;;  %v6844_v62 = vld [vmem:[%s16658_s5 + $0x1ad0] sm:$0xff] }
 0x901   : > { %13408 = vmatprep.subr.bf16.mxu0 %v15097_v63  ;;  %v15150_v63 = vcombine.low %v6836_v10, %v6840_v18  ;;  %v15159_v54 = vcombine.high %v6844_v62, %v6848_v11  ;;  %v6896_v10 = vld [vmem:[%s16658_s5 + $0x1c70] sm:$0xff] }
 0x902   : > { %13081 = vmatpush1.bf16.msra.mxu1 %v15094_v16  ;;  %v6845_v16 = vld [vmem:[%s16658_s5 + $0x1ad8] sm:$0xff] }
 0x903   : > { %13082 = vmatprep.subr.bf16.mxu1 %v15103_v23  ;;  %v15152_v23 = vcombine.low %v6837_v61, %v6841_v34  ;;  %v15161_v33 = vcombine.high %v6845_v16, %v6849_v20  ;;  %v6897_v61 = vld [vmem:[%s16658_s5 + $0x1c78] sm:$0xff] }
 0x904   : > { %13409 = vmatpush1.bf16.msra.mxu0 %v15096_v17  ;;  %v6852_v17 = vld [vmem:[%s16658_s5 + $0x1b10] sm:$0xff] }
 0x905   : > { %13410 = vmatprep.subr.bf16.mxu0 %v15105_v7  ;;  %v15158_v7 = vcombine.low %v6844_v62, %v6848_v11  ;;  %v15167_v6 = vcombine.high %v6852_v17, %v6856_v1  ;;  %v6904_v62 = vld [vmem:[%s16658_s5 + $0x1cb0] sm:$0xff] }
 0x906   : > { %13083 = vmatpush1.bf16.msra.mxu1 %v15102_v21  ;;  %v6853_v21 = vld [vmem:[%s16658_s5 + $0x1b18] sm:$0xff] }
 0x907   : > { %13084 = vmatprep.subr.bf16.mxu1 %v15111_v27  ;;  %v15160_v27 = vcombine.low %v6845_v16, %v6849_v20  ;;  %v15169_v32 = vcombine.high %v6853_v21, %v6857_v57  ;;  %v6905_v16 = vld [vmem:[%s16658_s5 + $0x1cb8] sm:$0xff] }
 0x908   : > { %13411 = vmatpush1.bf16.msra.mxu0 %v15104_v46  ;;  %v6860_v46 = vld [vmem:[%s16658_s5 + $0x1b50] sm:$0xff] }
 0x909   : > { %13412 = vmatprep.subr.bf16.mxu0 %v15113_v15  ;;  %v15166_v15 = vcombine.low %v6852_v17, %v6856_v1  ;;  %v15175_v59 = vcombine.high %v6860_v46, %v6864_v50  ;;  %v6912_v17 = vld [vmem:[%s16658_s5 + $0x1cf0] sm:$0xff] }
 0x90a   : > { %13085 = vmatpush1.bf16.msra.mxu1 %v15110_v49  ;;  %v6861_v49 = vld [vmem:[%s16658_s5 + $0x1b58] sm:$0xff] }
 0x90b   : > { %13086 = vmatprep.subr.bf16.mxu1 %v15119_v0  ;;  %v15168_v0 = vcombine.low %v6853_v21, %v6857_v57  ;;  %v15177_v24 = vcombine.high %v6861_v49, %v6865_v43  ;;  %v6913_v21 = vld [vmem:[%s16658_s5 + $0x1cf8] sm:$0xff] }
 0x90c   : > { %13413 = vmatpush1.bf16.msra.mxu0 %v15112_v55  ;;  %v6868_v55 = vld [vmem:[%s16658_s5 + $0x1b90] sm:$0xff] }
 0x90d   : > { %13414 = vmatprep.subr.bf16.mxu0 %v15121_v36  ;;  %v15174_v36 = vcombine.low %v6860_v46, %v6864_v50  ;;  %v15183_v30 = vcombine.high %v6868_v55, %v6872_v22  ;;  %v6917_v50 = vld [vmem:[%s16658_s5 + $0x1d18] sm:$0xff] }
 0x90e   : > { %13087 = vmatpush1.bf16.msra.mxu1 %v15118_v42  ;;  %v6869_v42 = vld [vmem:[%s16658_s5 + $0x1b98] sm:$0xff] }
 0x90f   : > { %13088 = vmatprep.subr.bf16.mxu1 %v15127_v31  ;;  %v15176_v31 = vcombine.low %v6861_v49, %v6865_v43  ;;  %v15185_v37 = vcombine.high %v6869_v42, %v6873_v13  ;;  %v6924_v43 = vld [vmem:[%s16658_s5 + $0x1d50] sm:$0xff] }
 0x910   : > { %13415 = vmatpush1.bf16.msra.mxu0 %v15120_v5  ;;  %v6876_v5 = vld [vmem:[%s16658_s5 + $0x1bd0] sm:$0xff] }
 0x911   : > { %13416 = vmatprep.subr.bf16.mxu0 %v15129_v53  ;;  %v15182_v53 = vcombine.low %v6868_v55, %v6872_v22  ;;  %v15191_v29 = vcombine.high %v6876_v5, %v6880_v44  ;;  %v6925_v22 = vld [vmem:[%s16658_s5 + $0x1d58] sm:$0xff] }
 0x912   : > { %13089 = vmatpush1.bf16.msra.mxu1 %v15126_v9  ;;  %v6877_v9 = vld [vmem:[%s16658_s5 + $0x1bd8] sm:$0xff] }
 0x913   : > { %13090 = vmatprep.subr.bf16.mxu1 %v15135_v14  ;;  %v15184_v14 = vcombine.low %v6869_v42, %v6873_v13  ;;  %v15193_v39 = vcombine.high %v6877_v9, %v6881_v60  ;;  %v6932_v13 = vld [vmem:[%s16658_s5 + $0x1d90] sm:$0xff] }
 0x914   : > { %13417 = vmatpush1.bf16.msra.mxu0 %v15128_v41  ;;  %v6884_v41 = vld [vmem:[%s16658_s5 + $0x1c10] sm:$0xff] }
 0x915   : > { %13418 = vmatprep.subr.bf16.mxu0 %v15137_v4  ;;  %v15190_v4 = vcombine.low %v6876_v5, %v6880_v44  ;;  %v15199_v25 = vcombine.high %v6884_v41, %v6888_v52  ;;  %v6933_v44 = vld [vmem:[%s16658_s5 + $0x1d98] sm:$0xff] }
 0x916   : > { %13091 = vmatpush1.bf16.msra.mxu1 %v15134_v28  ;;  %v6885_v28 = vld [vmem:[%s16658_s5 + $0x1c18] sm:$0xff] }
 0x917   : > { %13092 = vmatprep.subr.bf16.mxu1 %v15143_v51  ;;  %v15192_v51 = vcombine.low %v6877_v9, %v6881_v60  ;;  %v15201_v18 = vcombine.high %v6885_v28, %v6889_v56  ;;  %v6940_v60 = vld [vmem:[%s16658_s5 + $0x1dd0] sm:$0xff] }
 0x918   : > { %13419 = vmatpush1.bf16.msra.mxu0 %v15136_v45  ;;  %v6892_v45 = vld [vmem:[%s16658_s5 + $0x1c50] sm:$0xff] }
 0x919   : > { %13420 = vmatprep.subr.bf16.mxu0 %v15145_v38  ;;  %v15198_v38 = vcombine.low %v6884_v41, %v6888_v52  ;;  %v15207_v34 = vcombine.high %v6892_v45, %v6896_v10  ;;  %v6941_v52 = vld [vmem:[%s16658_s5 + $0x1dd8] sm:$0xff] }
 0x91a   : > { %13093 = vmatpush1.bf16.msra.mxu1 %v15142_v12  ;;  %v6893_v12 = vld [vmem:[%s16658_s5 + $0x1c58] sm:$0xff] }
 0x91b   : > { %13094 = vmatprep.subr.bf16.mxu1 %v15151_v26  ;;  %v15200_v26 = vcombine.low %v6885_v28, %v6889_v56  ;;  %v15209_v11 = vcombine.high %v6893_v12, %v6897_v61  ;;  %v6948_v56 = vld [vmem:[%s16658_s5 + $0x1e10] sm:$0xff] }
 0x91c   : > { %13421 = vmatpush1.bf16.msra.mxu0 %v15144_v8  ;;  %v6900_v8 = vld [vmem:[%s16658_s5 + $0x1c90] sm:$0xff] }
 0x91d   : > { %13422 = vmatprep.subr.bf16.mxu0 %v15153_v47  ;;  %v15206_v47 = vcombine.low %v6892_v45, %v6896_v10  ;;  %v15215_v20 = vcombine.high %v6900_v8, %v6904_v62  ;;  %v6949_v10 = vld [vmem:[%s16658_s5 + $0x1e18] sm:$0xff] }
 0x91e   : > { %13095 = vmatpush1.bf16.msra.mxu1 %v15150_v63  ;;  %v6901_v63 = vld [vmem:[%s16658_s5 + $0x1c98] sm:$0xff] }
 0x91f   : > { %13096 = vmatprep.subr.bf16.mxu1 %v15159_v54  ;;  %v15208_v54 = vcombine.low %v6893_v12, %v6897_v61  ;;  %v15217_v1 = vcombine.high %v6901_v63, %v6905_v16  ;;  %v15216_v57 = vcombine.low %v6901_v63, %v6905_v16  ;;  %v6956_v61 = vld [vmem:[%s16658_s5 + $0x1e50] sm:$0xff] }
 0x920   : > { %13423 = vmatpush1.bf16.msra.mxu0 %v15152_v23  ;;  %v6908_v23 = vld [vmem:[%s16658_s5 + $0x1cd0] sm:$0xff] }
 0x921   : > { %13424 = vmatprep.subr.bf16.mxu0 %v15161_v33  ;;  %v15214_v33 = vcombine.low %v6900_v8, %v6904_v62  ;;  %v15222_v46 = vcombine.low %v6908_v23, %v6912_v17  ;;  %v6957_v62 = vld [vmem:[%s16658_s5 + $0x1e58] sm:$0xff]  ;;  %v6964_v16 = vld [vmem:[%s16658_s5 + $0x1e90] sm:$0xff] }
 0x922   : > { %13097 = vmatpush1.bf16.msra.mxu1 %v15158_v7  ;;  %v6909_v7 = vld [vmem:[%s16658_s5 + $0x1cd8] sm:$0xff] }
 0x923   : > { %13098 = vmatprep.subr.bf16.mxu1 %v15167_v6  ;;  %v6916_v6 = vld [vmem:[%s16658_s5 + $0x1d10] sm:$0xff]  ;;  %v15224_v49 = vcombine.low %v6909_v7, %v6913_v21 }
 0x924   : > { %13425 = vmatpush1.bf16.msra.mxu0 %v15160_v27  ;;  %v6920_v27 = vld [vmem:[%s16658_s5 + $0x1d30] sm:$0xff] }
 0x925   : > { %13426 = vmatprep.subr.bf16.mxu0 %v15169_v32  ;;  %v6921_v32 = vld [vmem:[%s16658_s5 + $0x1d38] sm:$0xff]  ;;  %v15230_v55 = vcombine.low %v6916_v6, %v6920_v27 }
 0x926   : > { %13099 = vmatpush1.bf16.msra.mxu1 %v15166_v15  ;;  %v15231_v15 = vcombine.high %v6916_v6, %v6920_v27  ;;  %v15232_v42 = vcombine.low %v6917_v50, %v6921_v32  ;;  %v6973_v27 = vld [vmem:[%s16658_s5 + $0x1ed8] sm:$0xff] }
 0x927   : > { %13100 = vmatprep.subr.bf16.mxu1 %v15175_v59  ;;  %v6928_v59 = vld [vmem:[%s16658_s5 + $0x1d70] sm:$0xff] }
 0x928   : > { %13427 = vmatpush1.bf16.msra.mxu0 %v15168_v0  ;;  %v15233_v0 = vcombine.high %v6917_v50, %v6921_v32  ;;  %v15238_v5 = vcombine.low %v6924_v43, %v6928_v59  ;;  %v6980_v32 = vld [vmem:[%s16658_s5 + $0x1f10] sm:$0xff] }
 0x929   : > { %13428 = vmatprep.subr.bf16.mxu0 %v15177_v24  ;;  %v6929_v24 = vld [vmem:[%s16658_s5 + $0x1d78] sm:$0xff] }
 0x92a   : > { %13101 = vmatpush1.bf16.msra.mxu1 %v15174_v36  ;;  %v15239_v36 = vcombine.high %v6924_v43, %v6928_v59  ;;  %v15240_v9 = vcombine.low %v6925_v22, %v6929_v24  ;;  %v6981_v59 = vld [vmem:[%s16658_s5 + $0x1f18] sm:$0xff] }
 0x92b   : > { %13102 = vmatprep.subr.bf16.mxu1 %v15183_v30  ;;  %v6936_v30 = vld [vmem:[%s16658_s5 + $0x1db0] sm:$0xff] }
 0x92c   : > { %13429 = vmatpush1.bf16.msra.mxu0 %v15176_v31  ;;  %v15241_v31 = vcombine.high %v6925_v22, %v6929_v24  ;;  %v15246_v41 = vcombine.low %v6932_v13, %v6936_v30  ;;  %v6988_v24 = vld [vmem:[%s16658_s5 + $0x1f50] sm:$0xff] }
 0x92d   : > { %13430 = vmatprep.subr.bf16.mxu0 %v15185_v37  ;;  %v6937_v37 = vld [vmem:[%s16658_s5 + $0x1db8] sm:$0xff] }
 0x92e   : > { %13103 = vmatpush1.bf16.msra.mxu1 %v15182_v53  ;;  %v15247_v53 = vcombine.high %v6932_v13, %v6936_v30  ;;  %v15248_v28 = vcombine.low %v6933_v44, %v6937_v37  ;;  %v6989_v30 = vld [vmem:[%s16658_s5 + $0x1f58] sm:$0xff] }
 0x92f   : > { %13104 = vmatprep.subr.bf16.mxu1 %v15191_v29  ;;  %v6944_v29 = vld [vmem:[%s16658_s5 + $0x1df0] sm:$0xff] }
 0x930   : > { %13431 = vmatpush1.bf16.msra.mxu0 %v15184_v14  ;;  %v15249_v14 = vcombine.high %v6933_v44, %v6937_v37  ;;  %v15254_v45 = vcombine.low %v6940_v60, %v6944_v29  ;;  %v6996_v37 = vld [vmem:[%s16658_s5 + $0x1f90] sm:$0xff] }
 0x931   : > { %13432 = vmatprep.subr.bf16.mxu0 %v15193_v39  ;;  %v6945_v39 = vld [vmem:[%s16658_s5 + $0x1df8] sm:$0xff] }
 0x932   : > { %13105 = vmatpush1.bf16.msra.mxu1 %v15190_v4  ;;  %v15255_v4 = vcombine.high %v6940_v60, %v6944_v29  ;;  %v15256_v12 = vcombine.low %v6941_v52, %v6945_v39  ;;  %v6997_v29 = vld [vmem:[%s16658_s5 + $0x1f98] sm:$0xff] }
 0x933   : > { %13115 = vmatprep.subr.bf16.mxu1 %v15199_v25  ;;  %v6952_v25 = vld [vmem:[%s16658_s5 + $0x1e30] sm:$0xff] }
 0x934   : > { %13433 = vmatpush1.bf16.msra.mxu0 %v15192_v51  ;;  %v15257_v51 = vcombine.high %v6941_v52, %v6945_v39  ;;  %v15262_v8 = vcombine.low %v6948_v56, %v6952_v25  ;;  %v7004_v39 = vld [vmem:[%s16658_s5 + $0x1fd0] sm:$0xff] }
 0x935   : > { %13107 = vmatmul.mubr.bf16.vlgmr.msra.gmra.mrb[24].mxu1 %v18264_v35  ;;  %13443 = vmatprep.subr.bf16.mxu0 %v15201_v18  ;;  %v6953_v18 = vld [vmem:[%s16658_s5 + $0x1e38] sm:$0xff] }
 0x936   : > { %13116 = vmatpush1.bf16.msra.mxu1 %v15198_v38  ;;  %13147 = vmatprep.mubr.bf16.mxu1 %v18266_v58  ;;  %v15263_v38 = vcombine.high %v6948_v56, %v6952_v25  ;;  %v15264_v63 = vcombine.low %v6949_v10, %v6953_v18  ;;  %v7005_v25 = vld [vmem:[%s16658_s5 + $0x1fd8] sm:$0xff] }
 0x937   : > { %13435 = vmatmul.mubr.bf16.vlgmr.msra.gmra.mrb[28].mxu0 %v18264_v35  ;;  %13117 = vmatprep.subr.bf16.mxu1 %v15207_v34  ;;  %v15223_v35 = vcombine.high %v6908_v23, %v6912_v17  ;;  %v6960_v34 = vld [vmem:[%s16658_s5 + $0x1e70] sm:$0xff]  ;;  %v6965_v17 = vld [vmem:[%s16658_s5 + $0x1e98] sm:$0xff] }
 0x938   : > { %13444 = vmatpush1.bf16.msra.mxu0 %v15200_v26  ;;  %13475 = vmatprep.mubr.bf16.mxu0 %v18266_v58  ;;  %v15225_v58 = vcombine.high %v6909_v7, %v6913_v21  ;;  %v15265_v26 = vcombine.high %v6949_v10, %v6953_v18  ;;  %v15270_v23 = vcombine.low %v6956_v61, %v6960_v34  ;;  %v6972_v21 = vld [vmem:[%s16658_s5 + $0x1ed0] sm:$0xff] }
 0x939   : > { %13445 = vmatprep.subr.bf16.mxu0 %v15209_v11  ;;  %v6961_v11 = vld [vmem:[%s16658_s5 + $0x1e78] sm:$0xff] }
 0x93a   : > { %13118 = vmatpush1.bf16.msra.mxu1 %v15206_v47  ;;  %v15271_v47 = vcombine.high %v6956_v61, %v6960_v34  ;;  %v15272_v7 = vcombine.low %v6957_v62, %v6961_v11  ;;  %v15795_v61 = vld [vmem:[%s547_s17] sm:$0xff] }
 0x93b   : > { %13119 = vmatprep.subr.bf16.mxu1 %v15215_v20  ;;  %v6968_v20 = vld [vmem:[%s16658_s5 + $0x1eb0] sm:$0xff]  ;;  %v7031_v34 = vrot.slane %v15795_v61, %v17191_v19 }
 0x93c   : > { %13446 = vmatpush1.bf16.msra.mxu0 %v15208_v54  ;;  %v15273_v54 = vcombine.high %v6957_v62, %v6961_v11  ;;  %v15278_v6 = vcombine.low %v6964_v16, %v6968_v20  ;;  %v7043_v11 = vrot.slane %v15795_v61, %v17219_v3 }
 0x93d   : > { %13447 = vmatprep.subr.bf16.mxu0 %v15217_v1  ;;  %v6969_v1 = vld [vmem:[%s16658_s5 + $0x1eb8] sm:$0xff] }
 0x93e   : > { %13120 = vmatpush1.bf16.msra.mxu1 %v15214_v33  ;;  %v15279_v33 = vcombine.high %v6964_v16, %v6968_v20  ;;  %v15280_v50 = vcombine.low %v6965_v17, %v6969_v1 }
 0x93f   : > { %13121 = vmatprep.subr.bf16.mxu1 %v15223_v35  ;;  %v6976_v35 = vld [vmem:[%s16658_s5 + $0x1ef0] sm:$0xff] }
 0x940   : > { %13448 = vmatpush1.bf16.msra.mxu0 %v15216_v57  ;;  %v15281_v57 = vcombine.high %v6965_v17, %v6969_v1  ;;  %v15286_v43 = vcombine.low %v6972_v21, %v6976_v35 }
 0x941   : > { %13449 = vmatprep.subr.bf16.mxu0 %v15225_v58  ;;  %v6977_v58 = vld [vmem:[%s16658_s5 + $0x1ef8] sm:$0xff] }
 0x942   : > { %13122 = vmatpush1.bf16.msra.mxu1 %v15222_v46  ;;  %v15287_v46 = vcombine.high %v6972_v21, %v6976_v35  ;;  %v15288_v22 = vcombine.low %v6973_v27, %v6977_v58 }
 0x943   : > { %13123 = vmatprep.subr.bf16.mxu1 %v15231_v15  ;;  %v6984_v15 = vld [vmem:[%s16658_s5 + $0x1f30] sm:$0xff] }
 0x944   : > { %13450 = vmatpush1.bf16.msra.mxu0 %v15224_v49  ;;  %v15289_v49 = vcombine.high %v6973_v27, %v6977_v58  ;;  %v15294_v13 = vcombine.low %v6980_v32, %v6984_v15 }
 0x945   : > { %13451 = vmatprep.subr.bf16.mxu0 %v15233_v0  ;;  %v6985_v0 = vld [vmem:[%s16658_s5 + $0x1f38] sm:$0xff] }
 0x946   : > { %13124 = vmatpush1.bf16.msra.mxu1 %v15230_v55  ;;  %v15295_v55 = vcombine.high %v6980_v32, %v6984_v15  ;;  %v15296_v44 = vcombine.low %v6981_v59, %v6985_v0 }
 0x947   : > { %13125 = vmatprep.subr.bf16.mxu1 %v15239_v36  ;;  %v6992_v36 = vld [vmem:[%s16658_s5 + $0x1f70] sm:$0xff] }
 0x948   : > { %13452 = vmatpush1.bf16.msra.mxu0 %v15232_v42  ;;  %v15297_v42 = vcombine.high %v6981_v59, %v6985_v0  ;;  %v15302_v60 = vcombine.low %v6988_v24, %v6992_v36 }
 0x949   : > { %13453 = vmatprep.subr.bf16.mxu0 %v15241_v31  ;;  %v6993_v31 = vld [vmem:[%s16658_s5 + $0x1f78] sm:$0xff] }
 0x94a   : > { %13126 = vmatpush1.bf16.msra.mxu1 %v15238_v5  ;;  %v15303_v5 = vcombine.high %v6988_v24, %v6992_v36  ;;  %v15304_v52 = vcombine.low %v6989_v30, %v6993_v31 }
 0x94b   : > { %13127 = vmatprep.subr.bf16.mxu1 %v15247_v53  ;;  %v7000_v53 = vld [vmem:[%s16658_s5 + $0x1fb0] sm:$0xff] }
 0x94c   : > { %13454 = vmatpush1.bf16.msra.mxu0 %v15240_v9  ;;  %v15305_v9 = vcombine.high %v6989_v30, %v6993_v31  ;;  %v15310_v56 = vcombine.low %v6996_v37, %v7000_v53 }
 0x94d   : > { %13455 = vmatprep.subr.bf16.mxu0 %v15249_v14  ;;  %v7001_v14 = vld [vmem:[%s16658_s5 + $0x1fb8] sm:$0xff] }
 0x94e   : > { %13128 = vmatpush1.bf16.msra.mxu1 %v15246_v41  ;;  %v15311_v41 = vcombine.high %v6996_v37, %v7000_v53  ;;  %v15312_v10 = vcombine.low %v6997_v29, %v7001_v14 }
 0x94f   : > { %13129 = vmatprep.subr.bf16.mxu1 %v15255_v4  ;;  %v7008_v4 = vld [vmem:[%s16658_s5 + $0x1ff0] sm:$0xff] }
 0x950   : > { %13456 = vmatpush1.bf16.msra.mxu0 %v15248_v28  ;;  %v15313_v28 = vcombine.high %v6997_v29, %v7001_v14 }
 0x951   : > { %13457 = vmatprep.subr.bf16.mxu0 %v15257_v51  ;;  %v7009_v51 = vld [vmem:[%s16658_s5 + $0x1ff8] sm:$0xff] }
 0x952   : > { %13130 = vmatpush1.bf16.msra.mxu1 %v15254_v45  ;;  %v15319_v45 = vcombine.high %v7004_v39, %v7008_v4  ;;  %v15321_v18 = vcombine.high %v7005_v25, %v7009_v51 }
 0x953   : > { %13131 = vmatprep.subr.bf16.mxu1 %v15263_v38  ;;  %v15318_v38 = vcombine.low %v7004_v39, %v7008_v4 }
 0x954   : > { %13458 = vmatpush1.bf16.msra.mxu0 %v15256_v12  ;;  %v15320_v12 = vcombine.low %v7005_v25, %v7009_v51 }
 0x955   : > { %13459 = vmatprep.subr.bf16.mxu0 %v15265_v26  ;;  %v7035_v26 = vrot.slane %v15795_v61, %v17194_v2 }
 0x956   : > { %13132 = vmatpush1.bf16.msra.mxu1 %v15262_v8  ;;  %v7039_v8 = vrot.slane %v15795_v61, %v17206_v40 }
 0x957   : > { %13133 = vmatprep.subr.bf16.mxu1 %v15271_v47 }
 0x958   : > { %13460 = vmatpush1.bf16.msra.mxu0 %v15264_v63 }
 0x959   : > { %13461 = vmatprep.subr.bf16.mxu0 %v15273_v54 }
 0x95a   : > { %13134 = vmatpush1.bf16.msra.mxu1 %v15270_v23 }
 0x95b   : > { %13135 = vmatprep.subr.bf16.mxu1 %v15279_v33 }
 0x95c   : > { %13462 = vmatpush1.bf16.msra.mxu0 %v15272_v7 }
 0x95d   : > { %13463 = vmatprep.subr.bf16.mxu0 %v15281_v57 }
 0x95e   : > { %13136 = vmatpush1.bf16.msra.mxu1 %v15278_v6 }
 0x95f   : > { %13137 = vmatprep.subr.bf16.mxu1 %v15287_v46 }
 0x960   : > { %13464 = vmatpush1.bf16.msra.mxu0 %v15280_v50 }
 0x961   : > { %13465 = vmatprep.subr.bf16.mxu0 %v15289_v49 }
 0x962   : > { %13138 = vmatpush1.bf16.msra.mxu1 %v15286_v43 }
 0x963   : > { %13139 = vmatprep.subr.bf16.mxu1 %v15295_v55 }
 0x964   : > { %13466 = vmatpush1.bf16.msra.mxu0 %v15288_v22 }
 0x965   : > { %13467 = vmatprep.subr.bf16.mxu0 %v15297_v42 }
 0x966   : > { %13140 = vmatpush1.bf16.msra.mxu1 %v15294_v13 }
 0x967   : > { %13141 = vmatprep.subr.bf16.mxu1 %v15303_v5 }
 0x968   : > { %13468 = vmatpush1.bf16.msra.mxu0 %v15296_v44 }
 0x969   : > { %13469 = vmatprep.subr.bf16.mxu0 %v15305_v9 }
 0x96a   : > { %13142 = vmatpush1.bf16.msra.mxu1 %v15302_v60 }
 0x96b   : > { %13143 = vmatprep.subr.bf16.mxu1 %v15311_v41 }
 0x96c   : > { %13470 = vmatpush1.bf16.msra.mxu0 %v15304_v52 }
 0x96d   : > { %13471 = vmatprep.subr.bf16.mxu0 %v15313_v28 }
 0x96e   : > { %13144 = vmatpush1.bf16.msra.mxu1 %v15310_v56 }
 0x96f   : > { %13145 = vmatprep.subr.bf16.mxu1 %v15319_v45 }
 0x970   : > { %13472 = vmatpush1.bf16.msra.mxu0 %v15312_v10 }
 0x971   : > { %13473 = vmatprep.subr.bf16.mxu0 %v15321_v18 }
 0x972   : > { %13146 = vmatpush1.bf16.msra.mxu1 %v15318_v38 }
 0x974   : > { %13474 = vmatpush1.bf16.msra.mxu0 %v15320_v12 }
 0x975   : > { %13148 = vmatmul.mubr.bf16.vlgmr.msra.gmra.mrb[24].mxu1 %v18337_v48 }
 0x977   : > { %13476 = vmatmul.mubr.bf16.vlgmr.msra.gmra.mrb[28].mxu0 %v18337_v48 }
 0xa48   : > { %v13149_v62 = vpop.f32.mrb[24].mxu1 }
 0xa49   : > { %v15330_v47 = vadd.f32 %v13149_v62, %v7031_v34  ;;  %v13151_v63 = vpop.f32.mrb[25].mxu1 }
 0xa4a   : > { %v13477_v16 = vpop.f32.mrb[28].mxu0  ;;  %v15331_v20 = vadd.f32 %v13151_v63, %v7035_v26  ;;  %v13153_v54 = vpop.f32.mrb[26].mxu1 }
 0xa4b   : > { %15787 = vtanh.f32 %v15330_v47  ;;  %v15332_v48 = vadd.f32 %v13477_v16, %v7039_v8  ;;  %v13479_v23 = vpop.f32.mrb[29].mxu0  ;;  %v13154_v19 = vpop.f32.mrb[27].mxu1 }
 0xa4c   : > { %15789 = vtanh.f32 %v15331_v20  ;;  %v15333_v2 = vadd.f32 %v13479_v23, %v7043_v11  ;;  %v13481_v17 = vpop.f32.mrb[30].mxu0 }
 0xa4d   : > { %15791 = vtanh.f32 %v15332_v48  ;;  %v13482_v40 = vpop.f32.mrb[31].mxu0 }
 0xa4e   : > { %15793 = vtanh.f32 %v15333_v2 }
 0xa55   : > { %v15788_v3 = vpop.eup %15787 }
 0xa56   : > { %v15790_v1 = vpop.eup %15789  ;;  %13496 = vst [vmem:[%s18607_s0 + $0x20] sm:$0xff] %v15788_v3 }
 0xa57   : > { %v15792_v33 = vpop.eup %15791  ;;  %13497 = vst [vmem:[%s18607_s0 + $0x28] sm:$0xff] %v15790_v1 }
 0xa58   : > { %v15794_v7 = vpop.eup %15793  ;;  %13498 = vst [vmem:[%s18607_s0 + $0x30] sm:$0xff] %v15792_v33 }
 0xa59   : > { %13499 = vst [vmem:[%s18607_s0 + $0x38] sm:$0xff] %v15794_v7 }
 0xa5a PF: > { %p25_p12 = scmp.ge.s32.totalorder %s16432_s19, 6   ;;  %s19116_s21 = smov %s16186_s22 }
 0xa5b   : > { %s19117_s22 = smov %s16190_s23  ;;  %s19118_s23 = smov %s16443_s14 }
 0xa5c   : > { %s19119_s24 = smov %s16432_s19  ;;  %27 = sbr.rel (!%p25_p12) target bundleno = 15 (0xf), region = 158 }
 0xa63   :  { %13522 = vsyncpa [#allocation3], 1 }
 0xa64   :  { %13524 = vsyncpa [#allocation3 + $0x1], 1 }
 0xa65   :  { %13525 = vsyncpa [#allocation5], 1 }
 0xa66   :  { %13526 = vsyncpa [#allocation8], 1 }
 0xa67   :  { %13527 = vsyncpa [#allocation11], 1 }
 0xa68   :  { %13528 = vsyncpa [#allocation14], 1 }
 0xa69   :  { %13529 = vsyncpa [#allocation17], 1 }

</bundles_post_ra>
